<compile_context>
chip_gen: v7x
topology: tpu7x:2x2x1
jax: 0.10.0
libtpu: 0.0.40
codegen_flags: <defaults>
</compile_context>

<pallas_src>
import functools

import numpy as np

import jax
import jax.numpy as jnp
from jax.experimental import pallas as pl
from jax.experimental.pallas import tpu as pltpu


# ----------------------------------------------------------------------------
# Kernel 1: project_to_2d  (one call for all frames x batches)
#   vertices_cam = vertices @ R^T + T ;  u = fx*x/(z+eps)+cx ; v = fy*y/(z+eps)+cy
# ----------------------------------------------------------------------------
def _project_kernel(cam_ref, v_ref, out_ref):
    # cam_ref : SMEM (FB, 16)  -> [R(9), T(3), fx, fy, cx, cy]
    # v_ref   : VMEM (1, 3, N)
    # out_ref : VMEM (1, 3, N)  rows = (u, v, z_cam)
    i = pl.program_id(0)

    vx = v_ref[0, 0:1, :]
    vy = v_ref[0, 1:2, :]
    vz = v_ref[0, 2:3, :]

    r = [cam_ref[i, k] for k in range(9)]
    t0, t1, t2 = cam_ref[i, 9], cam_ref[i, 10], cam_ref[i, 11]
    fx, fy, cx, cy = cam_ref[i, 12], cam_ref[i, 13], cam_ref[i, 14], cam_ref[i, 15]

    xc = r[0] * vx + r[1] * vy + r[2] * vz + t0
    yc = r[3] * vx + r[4] * vy + r[5] * vz + t1
    zc = r[6] * vx + r[7] * vy + r[8] * vz + t2

    inv_z = 1.0 / (zc + 1e-7)
    out_ref[0, 0:1, :] = fx * (xc * inv_z) + cx
    out_ref[0, 1:2, :] = fy * (yc * inv_z) + cy
    out_ref[0, 2:3, :] = zc


def project_to_2d(vertices_t, camera_params):
    """vertices_t: (FB, 3, N) f32, camera_params: (FB, 16) f32 -> (FB, 3, N)."""
    FB, _, N = vertices_t.shape
    return pl.pallas_call(
        _project_kernel,
        out_shape=jax.ShapeDtypeStruct((FB, 3, N), jnp.float32),
        grid=(FB,),
        in_specs=[
            pl.BlockSpec(memory_space=pltpu.MemorySpace.SMEM),   # camera scalars
            pl.BlockSpec((1, 3, N), lambda i: (i, 0, 0)),
        ],
        out_specs=pl.BlockSpec((1, 3, N), lambda i: (i, 0, 0)),
        compiler_params=pltpu.CompilerParams(dimension_semantics=("parallel",)),
    )(camera_params, vertices_t)


# ----------------------------------------------------------------------------
# Kernel 2: fused encoder
#   3x [3x3 conv (exact Conv3d with D==1, pad=1) + bias + ReLU]  ->  mean pool  ->  Linear(256,512)
#   Layout: activations (C, H*W)  — channels on sublanes, flat spatial on the 128-lane axis.
#   Taps:   pltpu.roll along the lane axis + precomputed boundary masks (zero padding).
# ----------------------------------------------------------------------------
def _encoder_kernel(x_ref, masks_ref, w1_ref, b1_ref, w2_ref, b2_ref,
                    w3_ref, b3_ref, fcw_ref, fcb_ref, out_ref,
                    h1_ref, h2_ref, *, H, W):
    HW = H * W

    def conv3x3_relu(x, w_ref, b_ref):
        # x      : (Cin, HW) f32 value
        # w_ref  : (9, Cout, Cin) bf16   (tap-major: tap = (dh+1)*3 + (dw+1))
        # b_ref  : (Cout, 1) f32
        cout = w_ref.shape[1]
        acc = jnp.zeros((cout, HW), jnp.float32)
        tap = 0
        for dh in (-1, 0, 1):
            for dw in (-1, 0, 1):
                if dh == 0 and dw == 0:
                    xs = x
                else:
                    delta = dh * W + dw
                    # out[p] needs x[p + delta]; roll by (-delta) mod HW, then zero the
                    # positions whose (h+dh, w+dw) falls outside the image (== zero padding).
                    shifted = pltpu.roll(x, shift=(-delta) % HW, axis=1)
                    xs = shifted * masks_ref[tap]          # (1, HW) mask, sublane-broadcast
                acc = acc + jnp.dot(w_ref[tap], xs.astype(jnp.bfloat16),
                                    preferred_element_type=jnp.float32)
                tap += 1
        return jnp.maximum(acc + b_ref[...], 0.0)          # (Cout, HW) f32

    x0 = x_ref[0]                                          # (Cin, HW) f32

    h1_ref[...] = conv3x3_relu(x0, w1_ref, b1_ref)         # (64, HW)  VMEM-resident
    h2_ref[...] = conv3x3_relu(h1_ref[...], w2_ref, b2_ref)  # (128, HW) VMEM-resident
    h3 = conv3x3_relu(h2_ref[...], w3_ref, b3_ref)         # (256, HW) f32, never leaves VMEM

    # AdaptiveAvgPool3d(1) + Flatten: mean over H*W (depth is 1), channels moved to lanes.
    pooled = jnp.mean(jnp.transpose(h3), axis=0, keepdims=True)      # (1, 256)

    # Linear(256, 512)
    code = jnp.dot(pooled.astype(jnp.bfloat16), fcw_ref[...],
                   preferred_element_type=jnp.float32) + fcb_ref[...]  # (1, 512)
    out_ref[0] = code


def _make_tap_masks(H, W):
    """(9, 1, H*W) f32: 1 where the shifted tap reads a real pixel, 0 where it reads padding."""
    r, c = np.meshgrid(np.arange(H), np.arange(W), indexing="ij")
    r = r.reshape(-1)
    c = c.reshape(-1)
    masks = np.zeros((9, 1, H * W), np.float32)
    t = 0
    for dh in (-1, 0, 1):
        for dw in (-1, 0, 1):
            valid = (r + dh >= 0) & (r + dh < H) & (c + dw >= 0) & (c + dw < W)
            masks[t, 0, :] = valid.astype(np.float32)
            t += 1
    return jnp.asarray(masks)


def motion_encoder(feats, masks, params, *, image_size):
    """feats: (FB, Cin, H*W) f32 -> (FB, 512) f32.  One fused pallas_call for all frames/batches."""
    FB, Cin, HW = feats.shape
    H = W = image_size

    w1, b1 = params["conv1_w"], params["conv1_b"]
    w2, b2 = params["conv2_w"], params["conv2_b"]
    w3, b3 = params["conv3_w"], params["conv3_b"]
    fcw, fcb = params["fc_w_t"], params["fc_b"]

    const3 = lambda i: (0, 0, 0)
    const2 = lambda i: (0, 0)

    out = pl.pallas_call(
        functools.partial(_encoder_kernel, H=H, W=W),
        out_shape=jax.ShapeDtypeStruct((FB, 1, 512), jnp.float32),
        grid=(FB,),
        in_specs=[
            pl.BlockSpec((1, Cin, HW), lambda i: (i, 0, 0)),   # per-sample feature map
            pl.BlockSpec(masks.shape, const3),                 # (9, 1, HW)   boundary masks
            pl.BlockSpec(w1.shape, const3),                    # (9, 64, Cin) bf16, VMEM-resident
            pl.BlockSpec(b1.shape, const2),                    # (64, 1)
            pl.BlockSpec(w2.shape, const3),                    # (9, 128, 64)
            pl.BlockSpec(b2.shape, const2),                    # (128, 1)
            pl.BlockSpec(w3.shape, const3),                    # (9, 256, 128)
            pl.BlockSpec(b3.shape, const2),                    # (256, 1)
            pl.BlockSpec(fcw.shape, const2),                   # (256, 512) bf16
            pl.BlockSpec(fcb.shape, const2),                   # (1, 512)
        ],
        out_specs=pl.BlockSpec((1, 1, 512), lambda i: (i, 0, 0)),
        scratch_shapes=[
            pltpu.VMEM((64, HW), jnp.float32),                 # conv1 activation
            pltpu.VMEM((128, HW), jnp.float32),                # conv2 activation
        ],
        compiler_params=pltpu.CompilerParams(dimension_semantics=("parallel",)),
    )(feats, masks, w1, b1, w2, b2, w3, b3, fcw, fcb)
    return out.reshape(FB, 512)


# ----------------------------------------------------------------------------
# Parameter construction (deterministic, matching the PyTorch module's shapes)
# ----------------------------------------------------------------------------
def init_params(key, num_vertices, feature_dim):
    keys = jax.random.split(key, 9)

    def conv3d_tap_weights(k, cin, cout):
        # PyTorch Conv3d weight: (Cout, Cin, 3, 3, 3).  Depth D == 1 with padding 1 means only
        # the middle depth slice ever touches data (exact).  Store tap-major (9, Cout, Cin) bf16.
        w3d = jax.random.normal(k, (cout, cin, 3, 3, 3), jnp.float32)
        w3d = w3d * (1.0 / np.sqrt(cin * 27))
        mid = w3d[:, :, 1, :, :]                                   # (Cout, Cin, 3, 3)
        taps = jnp.transpose(mid, (2, 3, 0, 1)).reshape(9, cout, cin)
        return taps.astype(jnp.bfloat16)

    params = {
        # latent_codes are only consumed by the (untranslatable) rasterizer path.
        "latent_codes": jax.random.normal(keys[0], (num_vertices, feature_dim), jnp.float32),
        "conv1_w": conv3d_tap_weights(keys[1], feature_dim, 64),
        "conv1_b": (jax.random.normal(keys[2], (64,), jnp.float32) * 0.01).reshape(64, 1),
        "conv2_w": conv3d_tap_weights(keys[3], 64, 128),
        "conv2_b": (jax.random.normal(keys[4], (128,), jnp.float32) * 0.01).reshape(128, 1),
        "conv3_w": conv3d_tap_weights(keys[5], 128, 256),
        "conv3_b": (jax.random.normal(keys[6], (256,), jnp.float32) * 0.01).reshape(256, 1),
        # PyTorch Linear(256, 512): weight (512, 256) — stored transposed (256, 512) bf16.
        "fc_w_t": (jax.random.normal(keys[7], (512, 256), jnp.float32)
                   * (1.0 / np.sqrt(256.0))).T.astype(jnp.bfloat16),
        "fc_b": (jax.random.normal(keys[8], (512,), jnp.float32) * 0.01).reshape(1, 512),
    }
    return params


# ----------------------------------------------------------------------------
# Forward pass: frames are folded into the grid (no per-frame Python loop / dispatch).
# Returns (motion_codes (B, 512, F), projected_vertices (F*B, 3, N)).
# ----------------------------------------------------------------------------
def structured_motion_encoder_forward(params, betas, smpl_params, camera_params,
                                      *, num_vertices, feature_dim, image_size):
    del betas  # consumed only by the (untranslatable) SMPLX body model
    if smpl_params.ndim == 2:
        smpl_params = smpl_params[:, None, :]
        camera_params = camera_params[:, None, :]
    B, num_frames, _ = smpl_params.shape
    F = num_frames
    FB = F * B

    # TODO(synk): SMPLX(betas, poses, ...) -> vertices is not translatable; deterministic
    # synthetic vertices stand in for smpl_output.vertices (channels-first (FB, 3, N)).
    vertices_t = jax.random.normal(jax.random.PRNGKey(42),
                                   (F, B, 3, num_vertices), jnp.float32).reshape(FB, 3, num_vertices)

    frame_cams = camera_params.transpose(1, 0, 2).reshape(FB, 16)          # frame-major
    projected = project_to_2d(vertices_t, frame_cams)                      # (FB, 3, N)

    # TODO(synk): DifferentiableRasterizer (nvdiffrast GL rasterize + interpolate + diffuse shading
    # of latent_codes) is not translatable; a deterministic synthetic rasterized feature map in the
    # encoder's (FB, C, H*W) layout is used so the fused encoder kernel runs on realistic shapes.
    feature_maps = jax.random.normal(jax.random.PRNGKey(7),
                                     (FB, feature_dim, image_size * image_size), jnp.float32)

    masks = _make_tap_masks(image_size, image_size)                        # static constants
    codes = motion_encoder(feature_maps, masks, params, image_size=image_size)   # (FB, 512)

    motion_codes = codes.reshape(F, B, 512).transpose(1, 2, 0)             # (B, 512, F)
    return motion_codes, projected


# ----------------------------------------------------------------------------
if __name__ == "__main__":
    B, num_frames = 2, 2
    num_vertices, feature_dim, image_size = 128, 4, 16

    root = jax.random.PRNGKey(0)
    k_param, k_beta, k_smpl = jax.random.split(root, 3)

    params = init_params(k_param, num_vertices, feature_dim)

    betas = jax.random.normal(k_beta, (B, 10), jnp.float32)
    smpl_params = jax.random.normal(k_smpl, (B, num_frames, 168), jnp.float32)

    # Camera: identity rotation, translation (0, 0, 2), fx=fy=100, cx=cy=8
    R_flat = jnp.eye(3, dtype=jnp.float32).reshape(9)
    cam_single = jnp.concatenate(
        [R_flat, jnp.array([0.0, 0.0, 2.0, 100.0, 100.0, 8.0, 8.0], jnp.float32)])
    camera_params = jnp.broadcast_to(cam_single, (B, num_frames, 16))

    fwd = jax.jit(structured_motion_encoder_forward,
                  static_argnames=("num_vertices", "feature_dim", "image_size"))
    motion_codes, projected = fwd(
        params, betas, smpl_params, camera_params,
        num_vertices=num_vertices, feature_dim=feature_dim, image_size=image_size)
    motion_codes, projected = jax.block_until_ready((motion_codes, projected))

    assert motion_codes.shape == (B, 512, num_frames), motion_codes.shape
    assert projected.shape == (num_frames * B, 3, num_vertices), projected.shape
    assert bool(jnp.all(jnp.isfinite(motion_codes)))
    assert bool(jnp.all(jnp.isfinite(projected)))
    print("KERNEL_OK")
</pallas_src>

<mosaic_0001>
module attributes {stable_mosaic.version = 11 : i64} {
  func.func @_encoder_kernel(%arg0: i32, %arg1: memref<1x4x256xf32, #tpu.memory_space<vmem>>, %arg2: memref<9x1x256xf32, #tpu.memory_space<vmem>>, %arg3: memref<9x64x4xbf16, #tpu.memory_space<vmem>>, %arg4: memref<64x1xf32, #tpu.memory_space<vmem>>, %arg5: memref<9x128x64xbf16, #tpu.memory_space<vmem>>, %arg6: memref<128x1xf32, #tpu.memory_space<vmem>>, %arg7: memref<9x256x128xbf16, #tpu.memory_space<vmem>>, %arg8: memref<256x1xf32, #tpu.memory_space<vmem>>, %arg9: memref<256x512xbf16, #tpu.memory_space<vmem>>, %arg10: memref<1x512xf32, #tpu.memory_space<vmem>>, %arg11: memref<1x1x512xf32, #tpu.memory_space<vmem>>, %arg12: memref<64x256xf32, #tpu.memory_space<vmem>>, %arg13: memref<128x256xf32, #tpu.memory_space<vmem>>) attributes {dimension_semantics = [#tpu.dimension_semantics<parallel>], iteration_bounds = array<i64: 4>, scalar_prefetch = 0 : i64, scratch_operands = 2 : i64, tpu.core_type = #tpu.core_type<tc>, window_params = [{transform_indices = @transform_0, window_bounds = array<i64: 1, 4, 256>}, {pipeline_mode = #tpu.pipeline_mode<synchronous>, transform_indices = @transform_1, window_bounds = array<i64: 9, 1, 256>}, {pipeline_mode = #tpu.pipeline_mode<synchronous>, transform_indices = @transform_2, window_bounds = array<i64: 9, 64, 4>}, {pipeline_mode = #tpu.pipeline_mode<synchronous>, transform_indices = @transform_3, window_bounds = array<i64: 64, 1>}, {pipeline_mode = #tpu.pipeline_mode<synchronous>, transform_indices = @transform_4, window_bounds = array<i64: 9, 128, 64>}, {pipeline_mode = #tpu.pipeline_mode<synchronous>, transform_indices = @transform_5, window_bounds = array<i64: 128, 1>}, {pipeline_mode = #tpu.pipeline_mode<synchronous>, transform_indices = @transform_6, window_bounds = array<i64: 9, 256, 128>}, {pipeline_mode = #tpu.pipeline_mode<synchronous>, transform_indices = @transform_7, window_bounds = array<i64: 256, 1>}, {pipeline_mode = #tpu.pipeline_mode<synchronous>, transform_indices = @transform_8, window_bounds = array<i64: 256, 512>}, {pipeline_mode = #tpu.pipeline_mode<synchronous>, transform_indices = @transform_9, window_bounds = array<i64: 1, 512>}, {transform_indices = @transform_10, window_bounds = array<i64: 1, 1, 512>}]} {
    %c0 = arith.constant 0 : index
    %c0_0 = arith.constant 0 : index
    %c0_1 = arith.constant 0 : index
    %0 = vector.load %arg1[%c0, %c0_0, %c0_1] : memref<1x4x256xf32, #tpu.memory_space<vmem>>, vector<1x4x256xf32>
    %1 = vector.shape_cast %0 : vector<1x4x256xf32> to vector<4x256xf32>
    %cst = arith.constant 0.000000e+00 : f32
    %2 = vector.broadcast %cst : f32 to vector<64x256xf32>
    %c17_i32 = arith.constant 17 : i32
    %3 = tpu.dynamic_rotate %1 by %c17_i32 dim 1 : vector<4x256xf32>, i32 -> vector<4x256xf32>
    %c0_2 = arith.constant 0 : index
    %c0_3 = arith.constant 0 : index
    %c0_4 = arith.constant 0 : index
    %4 = vector.load %arg2[%c0_2, %c0_3, %c0_4] : memref<9x1x256xf32, #tpu.memory_space<vmem>>, vector<1x1x256xf32>
    %5 = vector.shape_cast %4 : vector<1x1x256xf32> to vector<1x256xf32>
    %6 = vector.broadcast %5 : vector<1x256xf32> to vector<4x256xf32>
    %7 = arith.mulf %3, %6 : vector<4x256xf32>
    %c0_5 = arith.constant 0 : index
    %c0_6 = arith.constant 0 : index
    %c0_7 = arith.constant 0 : index
    %8 = vector.load %arg3[%c0_5, %c0_6, %c0_7] : memref<9x64x4xbf16, #tpu.memory_space<vmem>>, vector<1x64x4xbf16>
    %9 = vector.shape_cast %8 : vector<1x64x4xbf16> to vector<64x4xbf16>
    %10 = arith.truncf %7 : vector<4x256xf32> to vector<4x256xbf16>
    %cst_8 = arith.constant dense<0.000000e+00> : vector<64x256xf32>
    %11 = tpu.matmul %9, %10, %cst_8 {dimension_numbers = #tpu.dot_dimension_numbers<[1], [0], [0], [1], [0, 0, 1, 1], [], []>} : vector<64x4xbf16>, vector<4x256xbf16>, vector<64x256xf32> -> vector<64x256xf32>
    %12 = arith.addf %2, %11 : vector<64x256xf32>
    %c16_i32 = arith.constant 16 : i32
    %13 = tpu.dynamic_rotate %1 by %c16_i32 dim 1 : vector<4x256xf32>, i32 -> vector<4x256xf32>
    %c1 = arith.constant 1 : index
    %c0_9 = arith.constant 0 : index
    %c0_10 = arith.constant 0 : index
    %14 = vector.load %arg2[%c1, %c0_9, %c0_10] : memref<9x1x256xf32, #tpu.memory_space<vmem>>, vector<1x1x256xf32>
    %15 = vector.shape_cast %14 : vector<1x1x256xf32> to vector<1x256xf32>
    %16 = vector.broadcast %15 : vector<1x256xf32> to vector<4x256xf32>
    %17 = arith.mulf %13, %16 : vector<4x256xf32>
    %c1_11 = arith.constant 1 : index
    %c0_12 = arith.constant 0 : index
    %c0_13 = arith.constant 0 : index
    %18 = vector.load %arg3[%c1_11, %c0_12, %c0_13] : memref<9x64x4xbf16, #tpu.memory_space<vmem>>, vector<1x64x4xbf16>
    %19 = vector.shape_cast %18 : vector<1x64x4xbf16> to vector<64x4xbf16>
    %20 = arith.truncf %17 : vector<4x256xf32> to vector<4x256xbf16>
    %cst_14 = arith.constant dense<0.000000e+00> : vector<64x256xf32>
    %21 = tpu.matmul %19, %20, %cst_14 {dimension_numbers = #tpu.dot_dimension_numbers<[1], [0], [0], [1], [0, 0, 1, 1], [], []>} : vector<64x4xbf16>, vector<4x256xbf16>, vector<64x256xf32> -> vector<64x256xf32>
    %22 = arith.addf %12, %21 : vector<64x256xf32>
    %c15_i32 = arith.constant 15 : i32
    %23 = tpu.dynamic_rotate %1 by %c15_i32 dim 1 : vector<4x256xf32>, i32 -> vector<4x256xf32>
    %c2 = arith.constant 2 : index
    %c0_15 = arith.constant 0 : index
    %c0_16 = arith.constant 0 : index
    %24 = vector.load %arg2[%c2, %c0_15, %c0_16] : memref<9x1x256xf32, #tpu.memory_space<vmem>>, vector<1x1x256xf32>
    %25 = vector.shape_cast %24 : vector<1x1x256xf32> to vector<1x256xf32>
    %26 = vector.broadcast %25 : vector<1x256xf32> to vector<4x256xf32>
    %27 = arith.mulf %23, %26 : vector<4x256xf32>
    %c2_17 = arith.constant 2 : index
    %c0_18 = arith.constant 0 : index
    %c0_19 = arith.constant 0 : index
    %28 = vector.load %arg3[%c2_17, %c0_18, %c0_19] : memref<9x64x4xbf16, #tpu.memory_space<vmem>>, vector<1x64x4xbf16>
    %29 = vector.shape_cast %28 : vector<1x64x4xbf16> to vector<64x4xbf16>
    %30 = arith.truncf %27 : vector<4x256xf32> to vector<4x256xbf16>
    %cst_20 = arith.constant dense<0.000000e+00> : vector<64x256xf32>
    %31 = tpu.matmul %29, %30, %cst_20 {dimension_numbers = #tpu.dot_dimension_numbers<[1], [0], [0], [1], [0, 0, 1, 1], [], []>} : vector<64x4xbf16>, vector<4x256xbf16>, vector<64x256xf32> -> vector<64x256xf32>
    %32 = arith.addf %22, %31 : vector<64x256xf32>
    %c1_i32 = arith.constant 1 : i32
    %33 = tpu.dynamic_rotate %1 by %c1_i32 dim 1 : vector<4x256xf32>, i32 -> vector<4x256xf32>
    %c3 = arith.constant 3 : index
    %c0_21 = arith.constant 0 : index
    %c0_22 = arith.constant 0 : index
    %34 = vector.load %arg2[%c3, %c0_21, %c0_22] : memref<9x1x256xf32, #tpu.memory_space<vmem>>, vector<1x1x256xf32>
    %35 = vector.shape_cast %34 : vector<1x1x256xf32> to vector<1x256xf32>
    %36 = vector.broadcast %35 : vector<1x256xf32> to vector<4x256xf32>
    %37 = arith.mulf %33, %36 : vector<4x256xf32>
    %c3_23 = arith.constant 3 : index
    %c0_24 = arith.constant 0 : index
    %c0_25 = arith.constant 0 : index
    %38 = vector.load %arg3[%c3_23, %c0_24, %c0_25] : memref<9x64x4xbf16, #tpu.memory_space<vmem>>, vector<1x64x4xbf16>
    %39 = vector.shape_cast %38 : vector<1x64x4xbf16> to vector<64x4xbf16>
    %40 = arith.truncf %37 : vector<4x256xf32> to vector<4x256xbf16>
    %cst_26 = arith.constant dense<0.000000e+00> : vector<64x256xf32>
    %41 = tpu.matmul %39, %40, %cst_26 {dimension_numbers = #tpu.dot_dimension_numbers<[1], [0], [0], [1], [0, 0, 1, 1], [], []>} : vector<64x4xbf16>, vector<4x256xbf16>, vector<64x256xf32> -> vector<64x256xf32>
    %42 = arith.addf %32, %41 : vector<64x256xf32>
    %c4 = arith.constant 4 : index
    %c0_27 = arith.constant 0 : index
    %c0_28 = arith.constant 0 : index
    %43 = vector.load %arg3[%c4, %c0_27, %c0_28] : memref<9x64x4xbf16, #tpu.memory_space<vmem>>, vector<1x64x4xbf16>
    %44 = vector.shape_cast %43 : vector<1x64x4xbf16> to vector<64x4xbf16>
    %45 = arith.truncf %1 : vector<4x256xf32> to vector<4x256xbf16>
    %cst_29 = arith.constant dense<0.000000e+00> : vector<64x256xf32>
    %46 = tpu.matmul %44, %45, %cst_29 {dimension_numbers = #tpu.dot_dimension_numbers<[1], [0], [0], [1], [0, 0, 1, 1], [], []>} : vector<64x4xbf16>, vector<4x256xbf16>, vector<64x256xf32> -> vector<64x256xf32>
    %47 = arith.addf %42, %46 : vector<64x256xf32>
    %c255_i32 = arith.constant 255 : i32
    %48 = tpu.dynamic_rotate %1 by %c255_i32 dim 1 : vector<4x256xf32>, i32 -> vector<4x256xf32>
    %c5 = arith.constant 5 : index
    %c0_30 = arith.constant 0 : index
    %c0_31 = arith.constant 0 : index
    %49 = vector.load %arg2[%c5, %c0_30, %c0_31] : memref<9x1x256xf32, #tpu.memory_space<vmem>>, vector<1x1x256xf32>
    %50 = vector.shape_cast %49 : vector<1x1x256xf32> to vector<1x256xf32>
    %51 = vector.broadcast %50 : vector<1x256xf32> to vector<4x256xf32>
    %52 = arith.mulf %48, %51 : vector<4x256xf32>
    %c5_32 = arith.constant 5 : index
    %c0_33 = arith.constant 0 : index
    %c0_34 = arith.constant 0 : index
    %53 = vector.load %arg3[%c5_32, %c0_33, %c0_34] : memref<9x64x4xbf16, #tpu.memory_space<vmem>>, vector<1x64x4xbf16>
    %54 = vector.shape_cast %53 : vector<1x64x4xbf16> to vector<64x4xbf16>
    %55 = arith.truncf %52 : vector<4x256xf32> to vector<4x256xbf16>
    %cst_35 = arith.constant dense<0.000000e+00> : vector<64x256xf32>
    %56 = tpu.matmul %54, %55, %cst_35 {dimension_numbers = #tpu.dot_dimension_numbers<[1], [0], [0], [1], [0, 0, 1, 1], [], []>} : vector<64x4xbf16>, vector<4x256xbf16>, vector<64x256xf32> -> vector<64x256xf32>
    %57 = arith.addf %47, %56 : vector<64x256xf32>
    %c241_i32 = arith.constant 241 : i32
    %58 = tpu.dynamic_rotate %1 by %c241_i32 dim 1 : vector<4x256xf32>, i32 -> vector<4x256xf32>
    %c6 = arith.constant 6 : index
    %c0_36 = arith.constant 0 : index
    %c0_37 = arith.constant 0 : index
    %59 = vector.load %arg2[%c6, %c0_36, %c0_37] : memref<9x1x256xf32, #tpu.memory_space<vmem>>, vector<1x1x256xf32>
    %60 = vector.shape_cast %59 : vector<1x1x256xf32> to vector<1x256xf32>
    %61 = vector.broadcast %60 : vector<1x256xf32> to vector<4x256xf32>
    %62 = arith.mulf %58, %61 : vector<4x256xf32>
    %c6_38 = arith.constant 6 : index
    %c0_39 = arith.constant 0 : index
    %c0_40 = arith.constant 0 : index
    %63 = vector.load %arg3[%c6_38, %c0_39, %c0_40] : memref<9x64x4xbf16, #tpu.memory_space<vmem>>, vector<1x64x4xbf16>
    %64 = vector.shape_cast %63 : vector<1x64x4xbf16> to vector<64x4xbf16>
    %65 = arith.truncf %62 : vector<4x256xf32> to vector<4x256xbf16>
    %cst_41 = arith.constant dense<0.000000e+00> : vector<64x256xf32>
    %66 = tpu.matmul %64, %65, %cst_41 {dimension_numbers = #tpu.dot_dimension_numbers<[1], [0], [0], [1], [0, 0, 1, 1], [], []>} : vector<64x4xbf16>, vector<4x256xbf16>, vector<64x256xf32> -> vector<64x256xf32>
    %67 = arith.addf %57, %66 : vector<64x256xf32>
    %c240_i32 = arith.constant 240 : i32
    %68 = tpu.dynamic_rotate %1 by %c240_i32 dim 1 : vector<4x256xf32>, i32 -> vector<4x256xf32>
    %c7 = arith.constant 7 : index
    %c0_42 = arith.constant 0 : index
    %c0_43 = arith.constant 0 : index
    %69 = vector.load %arg2[%c7, %c0_42, %c0_43] : memref<9x1x256xf32, #tpu.memory_space<vmem>>, vector<1x1x256xf32>
    %70 = vector.shape_cast %69 : vector<1x1x256xf32> to vector<1x256xf32>
    %71 = vector.broadcast %70 : vector<1x256xf32> to vector<4x256xf32>
    %72 = arith.mulf %68, %71 : vector<4x256xf32>
    %c7_44 = arith.constant 7 : index
    %c0_45 = arith.constant 0 : index
    %c0_46 = arith.constant 0 : index
    %73 = vector.load %arg3[%c7_44, %c0_45, %c0_46] : memref<9x64x4xbf16, #tpu.memory_space<vmem>>, vector<1x64x4xbf16>
    %74 = vector.shape_cast %73 : vector<1x64x4xbf16> to vector<64x4xbf16>
    %75 = arith.truncf %72 : vector<4x256xf32> to vector<4x256xbf16>
    %cst_47 = arith.constant dense<0.000000e+00> : vector<64x256xf32>
    %76 = tpu.matmul %74, %75, %cst_47 {dimension_numbers = #tpu.dot_dimension_numbers<[1], [0], [0], [1], [0, 0, 1, 1], [], []>} : vector<64x4xbf16>, vector<4x256xbf16>, vector<64x256xf32> -> vector<64x256xf32>
    %77 = arith.addf %67, %76 : vector<64x256xf32>
    %c239_i32 = arith.constant 239 : i32
    %78 = tpu.dynamic_rotate %1 by %c239_i32 dim 1 : vector<4x256xf32>, i32 -> vector<4x256xf32>
    %c8 = arith.constant 8 : index
    %c0_48 = arith.constant 0 : index
    %c0_49 = arith.constant 0 : index
    %79 = vector.load %arg2[%c8, %c0_48, %c0_49] : memref<9x1x256xf32, #tpu.memory_space<vmem>>, vector<1x1x256xf32>
    %80 = vector.shape_cast %79 : vector<1x1x256xf32> to vector<1x256xf32>
    %81 = vector.broadcast %80 : vector<1x256xf32> to vector<4x256xf32>
    %82 = arith.mulf %78, %81 : vector<4x256xf32>
    %c8_50 = arith.constant 8 : index
    %c0_51 = arith.constant 0 : index
    %c0_52 = arith.constant 0 : index
    %83 = vector.load %arg3[%c8_50, %c0_51, %c0_52] : memref<9x64x4xbf16, #tpu.memory_space<vmem>>, vector<1x64x4xbf16>
    %84 = vector.shape_cast %83 : vector<1x64x4xbf16> to vector<64x4xbf16>
    %85 = arith.truncf %82 : vector<4x256xf32> to vector<4x256xbf16>
    %cst_53 = arith.constant dense<0.000000e+00> : vector<64x256xf32>
    %86 = tpu.matmul %84, %85, %cst_53 {dimension_numbers = #tpu.dot_dimension_numbers<[1], [0], [0], [1], [0, 0, 1, 1], [], []>} : vector<64x4xbf16>, vector<4x256xbf16>, vector<64x256xf32> -> vector<64x256xf32>
    %87 = arith.addf %77, %86 : vector<64x256xf32>
    %c0_54 = arith.constant 0 : index
    %c0_55 = arith.constant 0 : index
    %88 = vector.load %arg4[%c0_54, %c0_55] : memref<64x1xf32, #tpu.memory_space<vmem>>, vector<64x1xf32>
    %89 = vector.broadcast %88 : vector<64x1xf32> to vector<64x256xf32>
    %90 = arith.addf %87, %89 : vector<64x256xf32>
    %cst_56 = arith.constant 0.000000e+00 : f32
    %91 = vector.broadcast %cst_56 : f32 to vector<64x256xf32>
    %92 = arith.maximumf %90, %91 : vector<64x256xf32>
    %c0_57 = arith.constant 0 : index
    %c0_58 = arith.constant 0 : index
    %93 = vector.load %arg12[%c0_57, %c0_58] : memref<64x256xf32, #tpu.memory_space<vmem>>, vector<64x256xf32>
    tpu.vector_store %arg12[%c0_57, %c0_58], %92 {strides = array<i32>} : memref<64x256xf32, #tpu.memory_space<vmem>>, vector<64x256xf32>,
    %c0_59 = arith.constant 0 : index
    %c0_60 = arith.constant 0 : index
    %94 = vector.load %arg12[%c0_59, %c0_60] : memref<64x256xf32, #tpu.memory_space<vmem>>, vector<64x256xf32>
    %cst_61 = arith.constant 0.000000e+00 : f32
    %95 = vector.broadcast %cst_61 : f32 to vector<128x256xf32>
    %c17_i32_62 = arith.constant 17 : i32
    %96 = tpu.dynamic_rotate %94 by %c17_i32_62 dim 1 : vector<64x256xf32>, i32 -> vector<64x256xf32>
    %c0_63 = arith.constant 0 : index
    %c0_64 = arith.constant 0 : index
    %c0_65 = arith.constant 0 : index
    %97 = vector.load %arg2[%c0_63, %c0_64, %c0_65] : memref<9x1x256xf32, #tpu.memory_space<vmem>>, vector<1x1x256xf32>
    %98 = vector.shape_cast %97 : vector<1x1x256xf32> to vector<1x256xf32>
    %99 = vector.broadcast %98 : vector<1x256xf32> to vector<64x256xf32>
    %100 = arith.mulf %96, %99 : vector<64x256xf32>
    %c0_66 = arith.constant 0 : index
    %c0_67 = arith.constant 0 : index
    %c0_68 = arith.constant 0 : index
    %101 = vector.load %arg5[%c0_66, %c0_67, %c0_68] : memref<9x128x64xbf16, #tpu.memory_space<vmem>>, vector<1x128x64xbf16>
    %102 = vector.shape_cast %101 : vector<1x128x64xbf16> to vector<128x64xbf16>
    %103 = arith.truncf %100 : vector<64x256xf32> to vector<64x256xbf16>
    %cst_69 = arith.constant dense<0.000000e+00> : vector<128x256xf32>
    %104 = tpu.matmul %102, %103, %cst_69 {dimension_numbers = #tpu.dot_dimension_numbers<[1], [0], [0], [1], [0, 0, 1, 1], [], []>} : vector<128x64xbf16>, vector<64x256xbf16>, vector<128x256xf32> -> vector<128x256xf32>
    %105 = arith.addf %95, %104 : vector<128x256xf32>
    %c16_i32_70 = arith.constant 16 : i32
    %106 = tpu.dynamic_rotate %94 by %c16_i32_70 dim 1 : vector<64x256xf32>, i32 -> vector<64x256xf32>
    %c1_71 = arith.constant 1 : index
    %c0_72 = arith.constant 0 : index
    %c0_73 = arith.constant 0 : index
    %107 = vector.load %arg2[%c1_71, %c0_72, %c0_73] : memref<9x1x256xf32, #tpu.memory_space<vmem>>, vector<1x1x256xf32>
    %108 = vector.shape_cast %107 : vector<1x1x256xf32> to vector<1x256xf32>
    %109 = vector.broadcast %108 : vector<1x256xf32> to vector<64x256xf32>
    %110 = arith.mulf %106, %109 : vector<64x256xf32>
    %c1_74 = arith.constant 1 : index
    %c0_75 = arith.constant 0 : index
    %c0_76 = arith.constant 0 : index
    %111 = vector.load %arg5[%c1_74, %c0_75, %c0_76] : memref<9x128x64xbf16, #tpu.memory_space<vmem>>, vector<1x128x64xbf16>
    %112 = vector.shape_cast %111 : vector<1x128x64xbf16> to vector<128x64xbf16>
    %113 = arith.truncf %110 : vector<64x256xf32> to vector<64x256xbf16>
    %cst_77 = arith.constant dense<0.000000e+00> : vector<128x256xf32>
    %114 = tpu.matmul %112, %113, %cst_77 {dimension_numbers = #tpu.dot_dimension_numbers<[1], [0], [0], [1], [0, 0, 1, 1], [], []>} : vector<128x64xbf16>, vector<64x256xbf16>, vector<128x256xf32> -> vector<128x256xf32>
    %115 = arith.addf %105, %114 : vector<128x256xf32>
    %c15_i32_78 = arith.constant 15 : i32
    %116 = tpu.dynamic_rotate %94 by %c15_i32_78 dim 1 : vector<64x256xf32>, i32 -> vector<64x256xf32>
    %c2_79 = arith.constant 2 : index
    %c0_80 = arith.constant 0 : index
    %c0_81 = arith.constant 0 : index
    %117 = vector.load %arg2[%c2_79, %c0_80, %c0_81] : memref<9x1x256xf32, #tpu.memory_space<vmem>>, vector<1x1x256xf32>
    %118 = vector.shape_cast %117 : vector<1x1x256xf32> to vector<1x256xf32>
    %119 = vector.broadcast %118 : vector<1x256xf32> to vector<64x256xf32>
    %120 = arith.mulf %116, %119 : vector<64x256xf32>
    %c2_82 = arith.constant 2 : index
    %c0_83 = arith.constant 0 : index
    %c0_84 = arith.constant 0 : index
    %121 = vector.load %arg5[%c2_82, %c0_83, %c0_84] : memref<9x128x64xbf16, #tpu.memory_space<vmem>>, vector<1x128x64xbf16>
    %122 = vector.shape_cast %121 : vector<1x128x64xbf16> to vector<128x64xbf16>
    %123 = arith.truncf %120 : vector<64x256xf32> to vector<64x256xbf16>
    %cst_85 = arith.constant dense<0.000000e+00> : vector<128x256xf32>
    %124 = tpu.matmul %122, %123, %cst_85 {dimension_numbers = #tpu.dot_dimension_numbers<[1], [0], [0], [1], [0, 0, 1, 1], [], []>} : vector<128x64xbf16>, vector<64x256xbf16>, vector<128x256xf32> -> vector<128x256xf32>
    %125 = arith.addf %115, %124 : vector<128x256xf32>
    %c1_i32_86 = arith.constant 1 : i32
    %126 = tpu.dynamic_rotate %94 by %c1_i32_86 dim 1 : vector<64x256xf32>, i32 -> vector<64x256xf32>
    %c3_87 = arith.constant 3 : index
    %c0_88 = arith.constant 0 : index
    %c0_89 = arith.constant 0 : index
    %127 = vector.load %arg2[%c3_87, %c0_88, %c0_89] : memref<9x1x256xf32, #tpu.memory_space<vmem>>, vector<1x1x256xf32>
    %128 = vector.shape_cast %127 : vector<1x1x256xf32> to vector<1x256xf32>
    %129 = vector.broadcast %128 : vector<1x256xf32> to vector<64x256xf32>
    %130 = arith.mulf %126, %129 : vector<64x256xf32>
    %c3_90 = arith.constant 3 : index
    %c0_91 = arith.constant 0 : index
    %c0_92 = arith.constant 0 : index
    %131 = vector.load %arg5[%c3_90, %c0_91, %c0_92] : memref<9x128x64xbf16, #tpu.memory_space<vmem>>, vector<1x128x64xbf16>
    %132 = vector.shape_cast %131 : vector<1x128x64xbf16> to vector<128x64xbf16>
    %133 = arith.truncf %130 : vector<64x256xf32> to vector<64x256xbf16>
    %cst_93 = arith.constant dense<0.000000e+00> : vector<128x256xf32>
    %134 = tpu.matmul %132, %133, %cst_93 {dimension_numbers = #tpu.dot_dimension_numbers<[1], [0], [0], [1], [0, 0, 1, 1], [], []>} : vector<128x64xbf16>, vector<64x256xbf16>, vector<128x256xf32> -> vector<128x256xf32>
    %135 = arith.addf %125, %134 : vector<128x256xf32>
    %c4_94 = arith.constant 4 : index
    %c0_95 = arith.constant 0 : index
    %c0_96 = arith.constant 0 : index
    %136 = vector.load %arg5[%c4_94, %c0_95, %c0_96] : memref<9x128x64xbf16, #tpu.memory_space<vmem>>, vector<1x128x64xbf16>
    %137 = vector.shape_cast %136 : vector<1x128x64xbf16> to vector<128x64xbf16>
    %138 = arith.truncf %94 : vector<64x256xf32> to vector<64x256xbf16>
    %cst_97 = arith.constant dense<0.000000e+00> : vector<128x256xf32>
    %139 = tpu.matmul %137, %138, %cst_97 {dimension_numbers = #tpu.dot_dimension_numbers<[1], [0], [0], [1], [0, 0, 1, 1], [], []>} : vector<128x64xbf16>, vector<64x256xbf16>, vector<128x256xf32> -> vector<128x256xf32>
    %140 = arith.addf %135, %139 : vector<128x256xf32>
    %c255_i32_98 = arith.constant 255 : i32
    %141 = tpu.dynamic_rotate %94 by %c255_i32_98 dim 1 : vector<64x256xf32>, i32 -> vector<64x256xf32>
    %c5_99 = arith.constant 5 : index
    %c0_100 = arith.constant 0 : index
    %c0_101 = arith.constant 0 : index
    %142 = vector.load %arg2[%c5_99, %c0_100, %c0_101] : memref<9x1x256xf32, #tpu.memory_space<vmem>>, vector<1x1x256xf32>
    %143 = vector.shape_cast %142 : vector<1x1x256xf32> to vector<1x256xf32>
    %144 = vector.broadcast %143 : vector<1x256xf32> to vector<64x256xf32>
    %145 = arith.mulf %141, %144 : vector<64x256xf32>
    %c5_102 = arith.constant 5 : index
    %c0_103 = arith.constant 0 : index
    %c0_104 = arith.constant 0 : index
    %146 = vector.load %arg5[%c5_102, %c0_103, %c0_104] : memref<9x128x64xbf16, #tpu.memory_space<vmem>>, vector<1x128x64xbf16>
    %147 = vector.shape_cast %146 : vector<1x128x64xbf16> to vector<128x64xbf16>
    %148 = arith.truncf %145 : vector<64x256xf32> to vector<64x256xbf16>
    %cst_105 = arith.constant dense<0.000000e+00> : vector<128x256xf32>
    %149 = tpu.matmul %147, %148, %cst_105 {dimension_numbers = #tpu.dot_dimension_numbers<[1], [0], [0], [1], [0, 0, 1, 1], [], []>} : vector<128x64xbf16>, vector<64x256xbf16>, vector<128x256xf32> -> vector<128x256xf32>
    %150 = arith.addf %140, %149 : vector<128x256xf32>
    %c241_i32_106 = arith.constant 241 : i32
    %151 = tpu.dynamic_rotate %94 by %c241_i32_106 dim 1 : vector<64x256xf32>, i32 -> vector<64x256xf32>
    %c6_107 = arith.constant 6 : index
    %c0_108 = arith.constant 0 : index
    %c0_109 = arith.constant 0 : index
    %152 = vector.load %arg2[%c6_107, %c0_108, %c0_109] : memref<9x1x256xf32, #tpu.memory_space<vmem>>, vector<1x1x256xf32>
    %153 = vector.shape_cast %152 : vector<1x1x256xf32> to vector<1x256xf32>
    %154 = vector.broadcast %153 : vector<1x256xf32> to vector<64x256xf32>
    %155 = arith.mulf %151, %154 : vector<64x256xf32>
    %c6_110 = arith.constant 6 : index
    %c0_111 = arith.constant 0 : index
    %c0_112 = arith.constant 0 : index
    %156 = vector.load %arg5[%c6_110, %c0_111, %c0_112] : memref<9x128x64xbf16, #tpu.memory_space<vmem>>, vector<1x128x64xbf16>
    %157 = vector.shape_cast %156 : vector<1x128x64xbf16> to vector<128x64xbf16>
    %158 = arith.truncf %155 : vector<64x256xf32> to vector<64x256xbf16>
    %cst_113 = arith.constant dense<0.000000e+00> : vector<128x256xf32>
    %159 = tpu.matmul %157, %158, %cst_113 {dimension_numbers = #tpu.dot_dimension_numbers<[1], [0], [0], [1], [0, 0, 1, 1], [], []>} : vector<128x64xbf16>, vector<64x256xbf16>, vector<128x256xf32> -> vector<128x256xf32>
    %160 = arith.addf %150, %159 : vector<128x256xf32>
    %c240_i32_114 = arith.constant 240 : i32
    %161 = tpu.dynamic_rotate %94 by %c240_i32_114 dim 1 : vector<64x256xf32>, i32 -> vector<64x256xf32>
    %c7_115 = arith.constant 7 : index
    %c0_116 = arith.constant 0 : index
    %c0_117 = arith.constant 0 : index
    %162 = vector.load %arg2[%c7_115, %c0_116, %c0_117] : memref<9x1x256xf32, #tpu.memory_space<vmem>>, vector<1x1x256xf32>
    %163 = vector.shape_cast %162 : vector<1x1x256xf32> to vector<1x256xf32>
    %164 = vector.broadcast %163 : vector<1x256xf32> to vector<64x256xf32>
    %165 = arith.mulf %161, %164 : vector<64x256xf32>
    %c7_118 = arith.constant 7 : index
    %c0_119 = arith.constant 0 : index
    %c0_120 = arith.constant 0 : index
    %166 = vector.load %arg5[%c7_118, %c0_119, %c0_120] : memref<9x128x64xbf16, #tpu.memory_space<vmem>>, vector<1x128x64xbf16>
    %167 = vector.shape_cast %166 : vector<1x128x64xbf16> to vector<128x64xbf16>
    %168 = arith.truncf %165 : vector<64x256xf32> to vector<64x256xbf16>
    %cst_121 = arith.constant dense<0.000000e+00> : vector<128x256xf32>
    %169 = tpu.matmul %167, %168, %cst_121 {dimension_numbers = #tpu.dot_dimension_numbers<[1], [0], [0], [1], [0, 0, 1, 1], [], []>} : vector<128x64xbf16>, vector<64x256xbf16>, vector<128x256xf32> -> vector<128x256xf32>
    %170 = arith.addf %160, %169 : vector<128x256xf32>
    %c239_i32_122 = arith.constant 239 : i32
    %171 = tpu.dynamic_rotate %94 by %c239_i32_122 dim 1 : vector<64x256xf32>, i32 -> vector<64x256xf32>
    %c8_123 = arith.constant 8 : index
    %c0_124 = arith.constant 0 : index
    %c0_125 = arith.constant 0 : index
    %172 = vector.load %arg2[%c8_123, %c0_124, %c0_125] : memref<9x1x256xf32, #tpu.memory_space<vmem>>, vector<1x1x256xf32>
    %173 = vector.shape_cast %172 : vector<1x1x256xf32> to vector<1x256xf32>
    %174 = vector.broadcast %173 : vector<1x256xf32> to vector<64x256xf32>
    %175 = arith.mulf %171, %174 : vector<64x256xf32>
    %c8_126 = arith.constant 8 : index
    %c0_127 = arith.constant 0 : index
    %c0_128 = arith.constant 0 : index
    %176 = vector.load %arg5[%c8_126, %c0_127, %c0_128] : memref<9x128x64xbf16, #tpu.memory_space<vmem>>, vector<1x128x64xbf16>
    %177 = vector.shape_cast %176 : vector<1x128x64xbf16> to vector<128x64xbf16>
    %178 = arith.truncf %175 : vector<64x256xf32> to vector<64x256xbf16>
    %cst_129 = arith.constant dense<0.000000e+00> : vector<128x256xf32>
    %179 = tpu.matmul %177, %178, %cst_129 {dimension_numbers = #tpu.dot_dimension_numbers<[1], [0], [0], [1], [0, 0, 1, 1], [], []>} : vector<128x64xbf16>, vector<64x256xbf16>, vector<128x256xf32> -> vector<128x256xf32>
    %180 = arith.addf %170, %179 : vector<128x256xf32>
    %c0_130 = arith.constant 0 : index
    %c0_131 = arith.constant 0 : index
    %181 = vector.load %arg6[%c0_130, %c0_131] : memref<128x1xf32, #tpu.memory_space<vmem>>, vector<128x1xf32>
    %182 = vector.broadcast %181 : vector<128x1xf32> to vector<128x256xf32>
    %183 = arith.addf %180, %182 : vector<128x256xf32>
    %cst_132 = arith.constant 0.000000e+00 : f32
    %184 = vector.broadcast %cst_132 : f32 to vector<128x256xf32>
    %185 = arith.maximumf %183, %184 : vector<128x256xf32>
    %c0_133 = arith.constant 0 : index
    %c0_134 = arith.constant 0 : index
    %186 = vector.load %arg13[%c0_133, %c0_134] : memref<128x256xf32, #tpu.memory_space<vmem>>, vector<128x256xf32>
    tpu.vector_store %arg13[%c0_133, %c0_134], %185 {strides = array<i32>} : memref<128x256xf32, #tpu.memory_space<vmem>>, vector<128x256xf32>,
    %c0_135 = arith.constant 0 : index
    %c0_136 = arith.constant 0 : index
    %187 = vector.load %arg13[%c0_135, %c0_136] : memref<128x256xf32, #tpu.memory_space<vmem>>, vector<128x256xf32>
    %cst_137 = arith.constant 0.000000e+00 : f32
    %188 = vector.broadcast %cst_137 : f32 to vector<256x256xf32>
    %c17_i32_138 = arith.constant 17 : i32
    %189 = tpu.dynamic_rotate %187 by %c17_i32_138 dim 1 : vector<128x256xf32>, i32 -> vector<128x256xf32>
    %c0_139 = arith.constant 0 : index
    %c0_140 = arith.constant 0 : index
    %c0_141 = arith.constant 0 : index
    %190 = vector.load %arg2[%c0_139, %c0_140, %c0_141] : memref<9x1x256xf32, #tpu.memory_space<vmem>>, vector<1x1x256xf32>
    %191 = vector.shape_cast %190 : vector<1x1x256xf32> to vector<1x256xf32>
    %192 = vector.broadcast %191 : vector<1x256xf32> to vector<128x256xf32>
    %193 = arith.mulf %189, %192 : vector<128x256xf32>
    %c0_142 = arith.constant 0 : index
    %c0_143 = arith.constant 0 : index
    %c0_144 = arith.constant 0 : index
    %194 = vector.load %arg7[%c0_142, %c0_143, %c0_144] : memref<9x256x128xbf16, #tpu.memory_space<vmem>>, vector<1x256x128xbf16>
    %195 = vector.shape_cast %194 : vector<1x256x128xbf16> to vector<256x128xbf16>
    %196 = arith.truncf %193 : vector<128x256xf32> to vector<128x256xbf16>
    %cst_145 = arith.constant dense<0.000000e+00> : vector<256x256xf32>
    %197 = tpu.matmul %195, %196, %cst_145 {dimension_numbers = #tpu.dot_dimension_numbers<[1], [0], [0], [1], [0, 0, 1, 1], [], []>} : vector<256x128xbf16>, vector<128x256xbf16>, vector<256x256xf32> -> vector<256x256xf32>
    %198 = arith.addf %188, %197 : vector<256x256xf32>
    %c16_i32_146 = arith.constant 16 : i32
    %199 = tpu.dynamic_rotate %187 by %c16_i32_146 dim 1 : vector<128x256xf32>, i32 -> vector<128x256xf32>
    %c1_147 = arith.constant 1 : index
    %c0_148 = arith.constant 0 : index
    %c0_149 = arith.constant 0 : index
    %200 = vector.load %arg2[%c1_147, %c0_148, %c0_149] : memref<9x1x256xf32, #tpu.memory_space<vmem>>, vector<1x1x256xf32>
    %201 = vector.shape_cast %200 : vector<1x1x256xf32> to vector<1x256xf32>
    %202 = vector.broadcast %201 : vector<1x256xf32> to vector<128x256xf32>
    %203 = arith.mulf %199, %202 : vector<128x256xf32>
    %c1_150 = arith.constant 1 : index
    %c0_151 = arith.constant 0 : index
    %c0_152 = arith.constant 0 : index
    %204 = vector.load %arg7[%c1_150, %c0_151, %c0_152] : memref<9x256x128xbf16, #tpu.memory_space<vmem>>, vector<1x256x128xbf16>
    %205 = vector.shape_cast %204 : vector<1x256x128xbf16> to vector<256x128xbf16>
    %206 = arith.truncf %203 : vector<128x256xf32> to vector<128x256xbf16>
    %cst_153 = arith.constant dense<0.000000e+00> : vector<256x256xf32>
    %207 = tpu.matmul %205, %206, %cst_153 {dimension_numbers = #tpu.dot_dimension_numbers<[1], [0], [0], [1], [0, 0, 1, 1], [], []>} : vector<256x128xbf16>, vector<128x256xbf16>, vector<256x256xf32> -> vector<256x256xf32>
    %208 = arith.addf %198, %207 : vector<256x256xf32>
    %c15_i32_154 = arith.constant 15 : i32
    %209 = tpu.dynamic_rotate %187 by %c15_i32_154 dim 1 : vector<128x256xf32>, i32 -> vector<128x256xf32>
    %c2_155 = arith.constant 2 : index
    %c0_156 = arith.constant 0 : index
    %c0_157 = arith.constant 0 : index
    %210 = vector.load %arg2[%c2_155, %c0_156, %c0_157] : memref<9x1x256xf32, #tpu.memory_space<vmem>>, vector<1x1x256xf32>
    %211 = vector.shape_cast %210 : vector<1x1x256xf32> to vector<1x256xf32>
    %212 = vector.broadcast %211 : vector<1x256xf32> to vector<128x256xf32>
    %213 = arith.mulf %209, %212 : vector<128x256xf32>
    %c2_158 = arith.constant 2 : index
    %c0_159 = arith.constant 0 : index
    %c0_160 = arith.constant 0 : index
    %214 = vector.load %arg7[%c2_158, %c0_159, %c0_160] : memref<9x256x128xbf16, #tpu.memory_space<vmem>>, vector<1x256x128xbf16>
    %215 = vector.shape_cast %214 : vector<1x256x128xbf16> to vector<256x128xbf16>
    %216 = arith.truncf %213 : vector<128x256xf32> to vector<128x256xbf16>
    %cst_161 = arith.constant dense<0.000000e+00> : vector<256x256xf32>
    %217 = tpu.matmul %215, %216, %cst_161 {dimension_numbers = #tpu.dot_dimension_numbers<[1], [0], [0], [1], [0, 0, 1, 1], [], []>} : vector<256x128xbf16>, vector<128x256xbf16>, vector<256x256xf32> -> vector<256x256xf32>
    %218 = arith.addf %208, %217 : vector<256x256xf32>
    %c1_i32_162 = arith.constant 1 : i32
    %219 = tpu.dynamic_rotate %187 by %c1_i32_162 dim 1 : vector<128x256xf32>, i32 -> vector<128x256xf32>
    %c3_163 = arith.constant 3 : index
    %c0_164 = arith.constant 0 : index
    %c0_165 = arith.constant 0 : index
    %220 = vector.load %arg2[%c3_163, %c0_164, %c0_165] : memref<9x1x256xf32, #tpu.memory_space<vmem>>, vector<1x1x256xf32>
    %221 = vector.shape_cast %220 : vector<1x1x256xf32> to vector<1x256xf32>
    %222 = vector.broadcast %221 : vector<1x256xf32> to vector<128x256xf32>
    %223 = arith.mulf %219, %222 : vector<128x256xf32>
    %c3_166 = arith.constant 3 : index
    %c0_167 = arith.constant 0 : index
    %c0_168 = arith.constant 0 : index
    %224 = vector.load %arg7[%c3_166, %c0_167, %c0_168] : memref<9x256x128xbf16, #tpu.memory_space<vmem>>, vector<1x256x128xbf16>
    %225 = vector.shape_cast %224 : vector<1x256x128xbf16> to vector<256x128xbf16>
    %226 = arith.truncf %223 : vector<128x256xf32> to vector<128x256xbf16>
    %cst_169 = arith.constant dense<0.000000e+00> : vector<256x256xf32>
    %227 = tpu.matmul %225, %226, %cst_169 {dimension_numbers = #tpu.dot_dimension_numbers<[1], [0], [0], [1], [0, 0, 1, 1], [], []>} : vector<256x128xbf16>, vector<128x256xbf16>, vector<256x256xf32> -> vector<256x256xf32>
    %228 = arith.addf %218, %227 : vector<256x256xf32>
    %c4_170 = arith.constant 4 : index
    %c0_171 = arith.constant 0 : index
    %c0_172 = arith.constant 0 : index
    %229 = vector.load %arg7[%c4_170, %c0_171, %c0_172] : memref<9x256x128xbf16, #tpu.memory_space<vmem>>, vector<1x256x128xbf16>
    %230 = vector.shape_cast %229 : vector<1x256x128xbf16> to vector<256x128xbf16>
    %231 = arith.truncf %187 : vector<128x256xf32> to vector<128x256xbf16>
    %cst_173 = arith.constant dense<0.000000e+00> : vector<256x256xf32>
    %232 = tpu.matmul %230, %231, %cst_173 {dimension_numbers = #tpu.dot_dimension_numbers<[1], [0], [0], [1], [0, 0, 1, 1], [], []>} : vector<256x128xbf16>, vector<128x256xbf16>, vector<256x256xf32> -> vector<256x256xf32>
    %233 = arith.addf %228, %232 : vector<256x256xf32>
    %c255_i32_174 = arith.constant 255 : i32
    %234 = tpu.dynamic_rotate %187 by %c255_i32_174 dim 1 : vector<128x256xf32>, i32 -> vector<128x256xf32>
    %c5_175 = arith.constant 5 : index
    %c0_176 = arith.constant 0 : index
    %c0_177 = arith.constant 0 : index
    %235 = vector.load %arg2[%c5_175, %c0_176, %c0_177] : memref<9x1x256xf32, #tpu.memory_space<vmem>>, vector<1x1x256xf32>
    %236 = vector.shape_cast %235 : vector<1x1x256xf32> to vector<1x256xf32>
    %237 = vector.broadcast %236 : vector<1x256xf32> to vector<128x256xf32>
    %238 = arith.mulf %234, %237 : vector<128x256xf32>
    %c5_178 = arith.constant 5 : index
    %c0_179 = arith.constant 0 : index
    %c0_180 = arith.constant 0 : index
    %239 = vector.load %arg7[%c5_178, %c0_179, %c0_180] : memref<9x256x128xbf16, #tpu.memory_space<vmem>>, vector<1x256x128xbf16>
    %240 = vector.shape_cast %239 : vector<1x256x128xbf16> to vector<256x128xbf16>
    %241 = arith.truncf %238 : vector<128x256xf32> to vector<128x256xbf16>
    %cst_181 = arith.constant dense<0.000000e+00> : vector<256x256xf32>
    %242 = tpu.matmul %240, %241, %cst_181 {dimension_numbers = #tpu.dot_dimension_numbers<[1], [0], [0], [1], [0, 0, 1, 1], [], []>} : vector<256x128xbf16>, vector<128x256xbf16>, vector<256x256xf32> -> vector<256x256xf32>
    %243 = arith.addf %233, %242 : vector<256x256xf32>
    %c241_i32_182 = arith.constant 241 : i32
    %244 = tpu.dynamic_rotate %187 by %c241_i32_182 dim 1 : vector<128x256xf32>, i32 -> vector<128x256xf32>
    %c6_183 = arith.constant 6 : index
    %c0_184 = arith.constant 0 : index
    %c0_185 = arith.constant 0 : index
    %245 = vector.load %arg2[%c6_183, %c0_184, %c0_185] : memref<9x1x256xf32, #tpu.memory_space<vmem>>, vector<1x1x256xf32>
    %246 = vector.shape_cast %245 : vector<1x1x256xf32> to vector<1x256xf32>
    %247 = vector.broadcast %246 : vector<1x256xf32> to vector<128x256xf32>
    %248 = arith.mulf %244, %247 : vector<128x256xf32>
    %c6_186 = arith.constant 6 : index
    %c0_187 = arith.constant 0 : index
    %c0_188 = arith.constant 0 : index
    %249 = vector.load %arg7[%c6_186, %c0_187, %c0_188] : memref<9x256x128xbf16, #tpu.memory_space<vmem>>, vector<1x256x128xbf16>
    %250 = vector.shape_cast %249 : vector<1x256x128xbf16> to vector<256x128xbf16>
    %251 = arith.truncf %248 : vector<128x256xf32> to vector<128x256xbf16>
    %cst_189 = arith.constant dense<0.000000e+00> : vector<256x256xf32>
    %252 = tpu.matmul %250, %251, %cst_189 {dimension_numbers = #tpu.dot_dimension_numbers<[1], [0], [0], [1], [0, 0, 1, 1], [], []>} : vector<256x128xbf16>, vector<128x256xbf16>, vector<256x256xf32> -> vector<256x256xf32>
    %253 = arith.addf %243, %252 : vector<256x256xf32>
    %c240_i32_190 = arith.constant 240 : i32
    %254 = tpu.dynamic_rotate %187 by %c240_i32_190 dim 1 : vector<128x256xf32>, i32 -> vector<128x256xf32>
    %c7_191 = arith.constant 7 : index
    %c0_192 = arith.constant 0 : index
    %c0_193 = arith.constant 0 : index
    %255 = vector.load %arg2[%c7_191, %c0_192, %c0_193] : memref<9x1x256xf32, #tpu.memory_space<vmem>>, vector<1x1x256xf32>
    %256 = vector.shape_cast %255 : vector<1x1x256xf32> to vector<1x256xf32>
    %257 = vector.broadcast %256 : vector<1x256xf32> to vector<128x256xf32>
    %258 = arith.mulf %254, %257 : vector<128x256xf32>
    %c7_194 = arith.constant 7 : index
    %c0_195 = arith.constant 0 : index
    %c0_196 = arith.constant 0 : index
    %259 = vector.load %arg7[%c7_194, %c0_195, %c0_196] : memref<9x256x128xbf16, #tpu.memory_space<vmem>>, vector<1x256x128xbf16>
    %260 = vector.shape_cast %259 : vector<1x256x128xbf16> to vector<256x128xbf16>
    %261 = arith.truncf %258 : vector<128x256xf32> to vector<128x256xbf16>
    %cst_197 = arith.constant dense<0.000000e+00> : vector<256x256xf32>
    %262 = tpu.matmul %260, %261, %cst_197 {dimension_numbers = #tpu.dot_dimension_numbers<[1], [0], [0], [1], [0, 0, 1, 1], [], []>} : vector<256x128xbf16>, vector<128x256xbf16>, vector<256x256xf32> -> vector<256x256xf32>
    %263 = arith.addf %253, %262 : vector<256x256xf32>
    %c239_i32_198 = arith.constant 239 : i32
    %264 = tpu.dynamic_rotate %187 by %c239_i32_198 dim 1 : vector<128x256xf32>, i32 -> vector<128x256xf32>
    %c8_199 = arith.constant 8 : index
    %c0_200 = arith.constant 0 : index
    %c0_201 = arith.constant 0 : index
    %265 = vector.load %arg2[%c8_199, %c0_200, %c0_201] : memref<9x1x256xf32, #tpu.memory_space<vmem>>, vector<1x1x256xf32>
    %266 = vector.shape_cast %265 : vector<1x1x256xf32> to vector<1x256xf32>
    %267 = vector.broadcast %266 : vector<1x256xf32> to vector<128x256xf32>
    %268 = arith.mulf %264, %267 : vector<128x256xf32>
    %c8_202 = arith.constant 8 : index
    %c0_203 = arith.constant 0 : index
    %c0_204 = arith.constant 0 : index
    %269 = vector.load %arg7[%c8_202, %c0_203, %c0_204] : memref<9x256x128xbf16, #tpu.memory_space<vmem>>, vector<1x256x128xbf16>
    %270 = vector.shape_cast %269 : vector<1x256x128xbf16> to vector<256x128xbf16>
    %271 = arith.truncf %268 : vector<128x256xf32> to vector<128x256xbf16>
    %cst_205 = arith.constant dense<0.000000e+00> : vector<256x256xf32>
    %272 = tpu.matmul %270, %271, %cst_205 {dimension_numbers = #tpu.dot_dimension_numbers<[1], [0], [0], [1], [0, 0, 1, 1], [], []>} : vector<256x128xbf16>, vector<128x256xbf16>, vector<256x256xf32> -> vector<256x256xf32>
    %273 = arith.addf %263, %272 : vector<256x256xf32>
    %c0_206 = arith.constant 0 : index
    %c0_207 = arith.constant 0 : index
    %274 = vector.load %arg8[%c0_206, %c0_207] : memref<256x1xf32, #tpu.memory_space<vmem>>, vector<256x1xf32>
    %275 = vector.broadcast %274 : vector<256x1xf32> to vector<256x256xf32>
    %276 = arith.addf %273, %275 : vector<256x256xf32>
    %cst_208 = arith.constant 0.000000e+00 : f32
    %277 = vector.broadcast %cst_208 : f32 to vector<256x256xf32>
    %278 = arith.maximumf %276, %277 : vector<256x256xf32>
    %279 = tpu.transpose %278, [1, 0] : vector<256x256xf32> -> vector<256x256xf32>
    %cst_209 = arith.constant dense<0.000000e+00> : vector<256xf32>
    %280 = vector.multi_reduction <add>, %279, %cst_209 [0] : vector<256x256xf32> to vector<256xf32>
    %281 = vector.shape_cast %280 : vector<256xf32> to vector<1x256xf32>
    %cst_210 = arith.constant 2.560000e+02 : f32
    %282 = vector.broadcast %cst_210 : f32 to vector<1x256xf32>
    %283 = arith.divf %281, %282 : vector<1x256xf32>
    %284 = arith.truncf %283 : vector<1x256xf32> to vector<1x256xbf16>
    %c0_211 = arith.constant 0 : index
    %c0_212 = arith.constant 0 : index
    %285 = vector.load %arg9[%c0_211, %c0_212] : memref<256x512xbf16, #tpu.memory_space<vmem>>, vector<256x512xbf16>
    %cst_213 = arith.constant dense<0.000000e+00> : vector<1x512xf32>
    %286 = tpu.matmul %284, %285, %cst_213 {dimension_numbers = #tpu.dot_dimension_numbers<[1], [0], [0], [1], [0, 0, 1, 1], [], []>} : vector<1x256xbf16>, vector<256x512xbf16>, vector<1x512xf32> -> vector<1x512xf32>
    %c0_214 = arith.constant 0 : index
    %c0_215 = arith.constant 0 : index
    %287 = vector.load %arg10[%c0_214, %c0_215] : memref<1x512xf32, #tpu.memory_space<vmem>>, vector<1x512xf32>
    %288 = arith.addf %286, %287 : vector<1x512xf32>
    %c0_216 = arith.constant 0 : index
    %c0_217 = arith.constant 0 : index
    %c0_218 = arith.constant 0 : index
    %289 = vector.load %arg11[%c0_216, %c0_217, %c0_218] : memref<1x1x512xf32, #tpu.memory_space<vmem>>, vector<1x1x512xf32>
    %290 = vector.shape_cast %289 : vector<1x1x512xf32> to vector<1x512xf32>
    %291 = vector.shape_cast %288 : vector<1x512xf32> to vector<1x1x512xf32>
    tpu.vector_store %arg11[%c0_216, %c0_217, %c0_218], %291 {strides = array<i32>} : memref<1x1x512xf32, #tpu.memory_space<vmem>>, vector<1x1x512xf32>,
    return
  }
  func.func @transform_0(%arg0: i32) -> (i32, i32, i32) {
    %c0_i32 = arith.constant 0 : i32
    %c0_i32_0 = arith.constant 0 : i32
    %c0_i32_1 = arith.constant 0 : i32
    return %arg0, %c0_i32, %c0_i32_0 : i32, i32, i32
  }
  func.func @transform_1(%arg0: i32) -> (i32, i32, i32) {
    %c0_i32 = arith.constant 0 : i32
    %c0_i32_0 = arith.constant 0 : i32
    %c0_i32_1 = arith.constant 0 : i32
    %c0_i32_2 = arith.constant 0 : i32
    return %c0_i32, %c0_i32_0, %c0_i32_1 : i32, i32, i32
  }
  func.func @transform_2(%arg0: i32) -> (i32, i32, i32) {
    %c0_i32 = arith.constant 0 : i32
    %c0_i32_0 = arith.constant 0 : i32
    %c0_i32_1 = arith.constant 0 : i32
    %c0_i32_2 = arith.constant 0 : i32
    return %c0_i32, %c0_i32_0, %c0_i32_1 : i32, i32, i32
  }
  func.func @transform_3(%arg0: i32) -> (i32, i32) {
    %c0_i32 = arith.constant 0 : i32
    %c0_i32_0 = arith.constant 0 : i32
    %c0_i32_1 = arith.constant 0 : i32
    return %c0_i32, %c0_i32_0 : i32, i32
  }
  func.func @transform_4(%arg0: i32) -> (i32, i32, i32) {
    %c0_i32 = arith.constant 0 : i32
    %c0_i32_0 = arith.constant 0 : i32
    %c0_i32_1 = arith.constant 0 : i32
    %c0_i32_2 = arith.constant 0 : i32
    return %c0_i32, %c0_i32_0, %c0_i32_1 : i32, i32, i32
  }
  func.func @transform_5(%arg0: i32) -> (i32, i32) {
    %c0_i32 = arith.constant 0 : i32
    %c0_i32_0 = arith.constant 0 : i32
    %c0_i32_1 = arith.constant 0 : i32
    return %c0_i32, %c0_i32_0 : i32, i32
  }
  func.func @transform_6(%arg0: i32) -> (i32, i32, i32) {
    %c0_i32 = arith.constant 0 : i32
    %c0_i32_0 = arith.constant 0 : i32
    %c0_i32_1 = arith.constant 0 : i32
    %c0_i32_2 = arith.constant 0 : i32
    return %c0_i32, %c0_i32_0, %c0_i32_1 : i32, i32, i32
  }
  func.func @transform_7(%arg0: i32) -> (i32, i32) {
    %c0_i32 = arith.constant 0 : i32
    %c0_i32_0 = arith.constant 0 : i32
    %c0_i32_1 = arith.constant 0 : i32
    return %c0_i32, %c0_i32_0 : i32, i32
  }
  func.func @transform_8(%arg0: i32) -> (i32, i32) {
    %c0_i32 = arith.constant 0 : i32
    %c0_i32_0 = arith.constant 0 : i32
    %c0_i32_1 = arith.constant 0 : i32
    return %c0_i32, %c0_i32_0 : i32, i32
  }
  func.func @transform_9(%arg0: i32) -> (i32, i32) {
    %c0_i32 = arith.constant 0 : i32
    %c0_i32_0 = arith.constant 0 : i32
    %c0_i32_1 = arith.constant 0 : i32
    return %c0_i32, %c0_i32_0 : i32, i32
  }
  func.func @transform_10(%arg0: i32) -> (i32, i32, i32) {
    %c0_i32 = arith.constant 0 : i32
    %c0_i32_0 = arith.constant 0 : i32
    %c0_i32_1 = arith.constant 0 : i32
    return %arg0, %c0_i32, %c0_i32_0 : i32, i32, i32
  }
}

module attributes {stable_mosaic.version = 11 : i64} {
  func.func @_project_kernel(%arg0: i32, %arg1: memref<4x16xf32, #tpu.memory_space<smem>>, %arg2: memref<1x3x128xf32, #tpu.memory_space<vmem>>, %arg3: memref<1x3x128xf32, #tpu.memory_space<vmem>>) attributes {dimension_semantics = [#tpu.dimension_semantics<parallel>], iteration_bounds = array<i64: 4>, scalar_prefetch = 0 : i64, scratch_operands = 0 : i64, tpu.core_type = #tpu.core_type<tc>, window_params = [{transform_indices = @transform_0, window_bounds = array<i64: 4, 16>}, {transform_indices = @transform_1, window_bounds = array<i64: 1, 3, 128>}, {transform_indices = @transform_2, window_bounds = array<i64: 1, 3, 128>}]} {
    %c0 = arith.constant 0 : index
    %c0_0 = arith.constant 0 : index
    %c0_1 = arith.constant 0 : index
    %0 = vector.load %arg2[%c0, %c0_0, %c0_1] : memref<1x3x128xf32, #tpu.memory_space<vmem>>, vector<1x1x128xf32>
    %1 = vector.shape_cast %0 : vector<1x1x128xf32> to vector<1x128xf32>
    %c0_2 = arith.constant 0 : index
    %c1 = arith.constant 1 : index
    %c0_3 = arith.constant 0 : index
    %2 = vector.load %arg2[%c0_2, %c1, %c0_3] : memref<1x3x128xf32, #tpu.memory_space<vmem>>, vector<1x1x128xf32>
    %3 = vector.shape_cast %2 : vector<1x1x128xf32> to vector<1x128xf32>
    %c0_4 = arith.constant 0 : index
    %c2 = arith.constant 2 : index
    %c0_5 = arith.constant 0 : index
    %4 = vector.load %arg2[%c0_4, %c2, %c0_5] : memref<1x3x128xf32, #tpu.memory_space<vmem>>, vector<1x1x128xf32>
    %5 = vector.shape_cast %4 : vector<1x1x128xf32> to vector<1x128xf32>
    %6 = arith.index_cast %arg0 : i32 to index
    %c0_6 = arith.constant 0 : index
    %7 = memref.load %arg1[%6, %c0_6] : memref<4x16xf32, #tpu.memory_space<smem>>
    %8 = arith.index_cast %arg0 : i32 to index
    %c1_7 = arith.constant 1 : index
    %9 = memref.load %arg1[%8, %c1_7] : memref<4x16xf32, #tpu.memory_space<smem>>
    %10 = arith.index_cast %arg0 : i32 to index
    %c2_8 = arith.constant 2 : index
    %11 = memref.load %arg1[%10, %c2_8] : memref<4x16xf32, #tpu.memory_space<smem>>
    %12 = arith.index_cast %arg0 : i32 to index
    %c3 = arith.constant 3 : index
    %13 = memref.load %arg1[%12, %c3] : memref<4x16xf32, #tpu.memory_space<smem>>
    %14 = arith.index_cast %arg0 : i32 to index
    %c4 = arith.constant 4 : index
    %15 = memref.load %arg1[%14, %c4] : memref<4x16xf32, #tpu.memory_space<smem>>
    %16 = arith.index_cast %arg0 : i32 to index
    %c5 = arith.constant 5 : index
    %17 = memref.load %arg1[%16, %c5] : memref<4x16xf32, #tpu.memory_space<smem>>
    %18 = arith.index_cast %arg0 : i32 to index
    %c6 = arith.constant 6 : index
    %19 = memref.load %arg1[%18, %c6] : memref<4x16xf32, #tpu.memory_space<smem>>
    %20 = arith.index_cast %arg0 : i32 to index
    %c7 = arith.constant 7 : index
    %21 = memref.load %arg1[%20, %c7] : memref<4x16xf32, #tpu.memory_space<smem>>
    %22 = arith.index_cast %arg0 : i32 to index
    %c8 = arith.constant 8 : index
    %23 = memref.load %arg1[%22, %c8] : memref<4x16xf32, #tpu.memory_space<smem>>
    %24 = arith.index_cast %arg0 : i32 to index
    %c9 = arith.constant 9 : index
    %25 = memref.load %arg1[%24, %c9] : memref<4x16xf32, #tpu.memory_space<smem>>
    %26 = arith.index_cast %arg0 : i32 to index
    %c10 = arith.constant 10 : index
    %27 = memref.load %arg1[%26, %c10] : memref<4x16xf32, #tpu.memory_space<smem>>
    %28 = arith.index_cast %arg0 : i32 to index
    %c11 = arith.constant 11 : index
    %29 = memref.load %arg1[%28, %c11] : memref<4x16xf32, #tpu.memory_space<smem>>
    %30 = arith.index_cast %arg0 : i32 to index
    %c12 = arith.constant 12 : index
    %31 = memref.load %arg1[%30, %c12] : memref<4x16xf32, #tpu.memory_space<smem>>
    %32 = arith.index_cast %arg0 : i32 to index
    %c13 = arith.constant 13 : index
    %33 = memref.load %arg1[%32, %c13] : memref<4x16xf32, #tpu.memory_space<smem>>
    %34 = arith.index_cast %arg0 : i32 to index
    %c14 = arith.constant 14 : index
    %35 = memref.load %arg1[%34, %c14] : memref<4x16xf32, #tpu.memory_space<smem>>
    %36 = arith.index_cast %arg0 : i32 to index
    %c15 = arith.constant 15 : index
    %37 = memref.load %arg1[%36, %c15] : memref<4x16xf32, #tpu.memory_space<smem>>
    %38 = vector.broadcast %7 : f32 to vector<1x128xf32>
    %39 = arith.mulf %38, %1 : vector<1x128xf32>
    %40 = vector.broadcast %9 : f32 to vector<1x128xf32>
    %41 = arith.mulf %40, %3 : vector<1x128xf32>
    %42 = arith.addf %39, %41 : vector<1x128xf32>
    %43 = vector.broadcast %11 : f32 to vector<1x128xf32>
    %44 = arith.mulf %43, %5 : vector<1x128xf32>
    %45 = arith.addf %42, %44 : vector<1x128xf32>
    %46 = vector.broadcast %25 : f32 to vector<1x128xf32>
    %47 = arith.addf %45, %46 : vector<1x128xf32>
    %48 = vector.broadcast %13 : f32 to vector<1x128xf32>
    %49 = arith.mulf %48, %1 : vector<1x128xf32>
    %50 = vector.broadcast %15 : f32 to vector<1x128xf32>
    %51 = arith.mulf %50, %3 : vector<1x128xf32>
    %52 = arith.addf %49, %51 : vector<1x128xf32>
    %53 = vector.broadcast %17 : f32 to vector<1x128xf32>
    %54 = arith.mulf %53, %5 : vector<1x128xf32>
    %55 = arith.addf %52, %54 : vector<1x128xf32>
    %56 = vector.broadcast %27 : f32 to vector<1x128xf32>
    %57 = arith.addf %55, %56 : vector<1x128xf32>
    %58 = vector.broadcast %19 : f32 to vector<1x128xf32>
    %59 = arith.mulf %58, %1 : vector<1x128xf32>
    %60 = vector.broadcast %21 : f32 to vector<1x128xf32>
    %61 = arith.mulf %60, %3 : vector<1x128xf32>
    %62 = arith.addf %59, %61 : vector<1x128xf32>
    %63 = vector.broadcast %23 : f32 to vector<1x128xf32>
    %64 = arith.mulf %63, %5 : vector<1x128xf32>
    %65 = arith.addf %62, %64 : vector<1x128xf32>
    %66 = vector.broadcast %29 : f32 to vector<1x128xf32>
    %67 = arith.addf %65, %66 : vector<1x128xf32>
    %cst = arith.constant 1.000000e-07 : f32
    %68 = vector.broadcast %cst : f32 to vector<1x128xf32>
    %69 = arith.addf %67, %68 : vector<1x128xf32>
    %cst_9 = arith.constant 1.000000e+00 : f32
    %70 = vector.broadcast %cst_9 : f32 to vector<1x128xf32>
    %71 = arith.divf %70, %69 : vector<1x128xf32>
    %72 = arith.mulf %47, %71 : vector<1x128xf32>
    %73 = vector.broadcast %31 : f32 to vector<1x128xf32>
    %74 = arith.mulf %73, %72 : vector<1x128xf32>
    %75 = vector.broadcast %35 : f32 to vector<1x128xf32>
    %76 = arith.addf %74, %75 : vector<1x128xf32>
    %c0_10 = arith.constant 0 : index
    %c0_11 = arith.constant 0 : index
    %c0_12 = arith.constant 0 : index
    %77 = vector.load %arg3[%c0_10, %c0_11, %c0_12] : memref<1x3x128xf32, #tpu.memory_space<vmem>>, vector<1x1x128xf32>
    %78 = vector.shape_cast %77 : vector<1x1x128xf32> to vector<1x128xf32>
    %79 = vector.shape_cast %76 : vector<1x128xf32> to vector<1x1x128xf32>
    tpu.vector_store %arg3[%c0_10, %c0_11, %c0_12], %79 {strides = array<i32>} : memref<1x3x128xf32, #tpu.memory_space<vmem>>, vector<1x1x128xf32>,
    %80 = arith.mulf %57, %71 : vector<1x128xf32>
    %81 = vector.broadcast %33 : f32 to vector<1x128xf32>
    %82 = arith.mulf %81, %80 : vector<1x128xf32>
    %83 = vector.broadcast %37 : f32 to vector<1x128xf32>
    %84 = arith.addf %82, %83 : vector<1x128xf32>
    %c0_13 = arith.constant 0 : index
    %c1_14 = arith.constant 1 : index
    %c0_15 = arith.constant 0 : index
    %85 = vector.load %arg3[%c0_13, %c1_14, %c0_15] : memref<1x3x128xf32, #tpu.memory_space<vmem>>, vector<1x1x128xf32>
    %86 = vector.shape_cast %85 : vector<1x1x128xf32> to vector<1x128xf32>
    %87 = vector.shape_cast %84 : vector<1x128xf32> to vector<1x1x128xf32>
    tpu.vector_store %arg3[%c0_13, %c1_14, %c0_15], %87 {strides = array<i32>} : memref<1x3x128xf32, #tpu.memory_space<vmem>>, vector<1x1x128xf32>,
    %c0_16 = arith.constant 0 : index
    %c2_17 = arith.constant 2 : index
    %c0_18 = arith.constant 0 : index
    %88 = vector.load %arg3[%c0_16, %c2_17, %c0_18] : memref<1x3x128xf32, #tpu.memory_space<vmem>>, vector<1x1x128xf32>
    %89 = vector.shape_cast %88 : vector<1x1x128xf32> to vector<1x128xf32>
    %90 = vector.shape_cast %67 : vector<1x128xf32> to vector<1x1x128xf32>
    tpu.vector_store %arg3[%c0_16, %c2_17, %c0_18], %90 {strides = array<i32>} : memref<1x3x128xf32, #tpu.memory_space<vmem>>, vector<1x1x128xf32>,
    return
  }
  func.func @transform_0(%arg0: i32) -> (i32, i32) {
    %c0_i32 = arith.constant 0 : i32
    %c0_i32_0 = arith.constant 0 : i32
    %c0_i32_1 = arith.constant 0 : i32
    return %c0_i32, %c0_i32_0 : i32, i32
  }
  func.func @transform_1(%arg0: i32) -> (i32, i32, i32) {
    %c0_i32 = arith.constant 0 : i32
    %c0_i32_0 = arith.constant 0 : i32
    %c0_i32_1 = arith.constant 0 : i32
    return %arg0, %c0_i32, %c0_i32_0 : i32, i32, i32
  }
  func.func @transform_2(%arg0: i32) -> (i32, i32, i32) {
    %c0_i32 = arith.constant 0 : i32
    %c0_i32_0 = arith.constant 0 : i32
    %c0_i32_1 = arith.constant 0 : i32
    return %arg0, %c0_i32, %c0_i32_0 : i32, i32, i32
  }
}

</mosaic_0001>

<bundles_post_ra>
// kernel: structured_motion_encoder_forward.3
= control target key start
LH: loop header
LB: loop body
LE: loop exit
PB: predicated region body
PF: predicated region fallthrough
CT: control target
= control target key end

     0   :  { %7 = vsyncpa [#allocation3], 0  ;;  %s375_s9 = smov 0   ;;  %s448_s0 = inlined_call_operand.vmem [shape: f32[4,16], index: 0, kind: input, shape index: {}]   ;;  %s449_s1 = inlined_call_operand.vmem [shape: f32[4,3,128], index: 1, kind: input, shape index: {}]   ;;  %s450_s2 = inlined_call_operand.vmem [shape: f32[4,3,128], index: 2, kind: output, shape index: {}]  }
   0x1 LB: > { %s299_s10 = sadd.s32 4294967295, %s357_s9   ;;  %p301_p0 = scmp.ge.s32.totalorder %s357_s9, 1  ;;  %s357_s9 = sphi %s375_s9, %s13_s9  }
   0x2   : > { %p91_p1 = scmp.lt.s32.totalorder %s357_s9, 5  ;;  %s104_s13 = sshll.u32 %s448_s0, 4  ;;  %s105_s13 = int_to_ptr.vmem [resolvable:$true] %s104_s13 }
   0x3   : > { %p319_p3 = scmp.eq.s32.totalorder %s299_s10, 0  ;;  %s332_s15 = scalar_lea.vmem %s105_s13, 64 }
   0x4   : > { %p386_p2 = pnand %p301_p0, %p91_p1  ;;  %p333_p6 = scmp.ne.s32.totalorder %s105_s13, %s332_s15 }
   0x5   : > { %p340_p10 = scmp.lt.s32.totalorder %s105_s13, %s105_s13  ;;  %p341_p11 = scmp.lt.s32.totalorder %s332_s15, %s332_s15 }
   0x6   : > { %p315_p4 = pneg %p386_p2 }
   0x7   : > { %p342_p12 = por %p341_p11, %p340_p10 }
   0x8   : > { %p316_p5 = pnand %p319_p3, %p315_p4 }
   0xa   : > { %p334_p7 = pneg %p316_p5 }
   0xc   : > { %p335_p8 = pnand %p334_p7, %p333_p6 }
   0xe   : > { %p336_p9 = pneg %p335_p8 }
  0x10   : > { %p343_p13 = pnand %p342_p12, %p336_p9 }
  0x12   : > { %346 = shalt.err (!%p343_p13)
}
  0x13   : > { %s359_s16 = smov [#allocation2]   ;;  %124 = sbr.rel (%p386_p2) target bundleno = 72 (0x48), region = 28 }
  0x14   : > { %318 = dma.vmem_to_smem (!%p316_p5), %s105_s13, 64, %s359_s16, [#allocation3]  }
  0x1a   : > { %352 = dma.done.wait (%p319_p3), [#allocation3], 64  }
  0x1b   : > { %354 = vsyncadd (%p319_p3), [#allocation3], 4294967232 }
  0x1c   : > { %130 = sfence }
  0x1d   : > { %p145_p0 = scmp.lt.s32.totalorder %s299_s10, 3  ;;  %s399_s18 = sshll.u32 %s299_s10, 7 }
  0x1e   : > { %s158_s19 = sadd.s32 1, %s399_s18  ;;  %s404_s21 = sld [smem:[#allocation2 + %s399_s18]] }
  0x1f   : > { %s397_s17 = scalar_select %p145_p0, %s299_s10, 3 }
  0x20   : > { %s406_s22 = sld [smem:[#allocation2 + %s158_s19]]  ;;  %s162_s23 = sadd.s32 3, %s399_s18 }
  0x21   : > { %s306_s20 = sshll.u32 %s397_s17, 2  ;;  %s160_s27 = sadd.s32 2, %s399_s18 }
  0x22   : > { %s148_s26 = scalar_lea.vmem %s449_s1, %s306_s20  ;;  %s164_s28 = sadd.s32 4, %s399_s18 }
  0x23   : > { %s168_s29 = sadd.s32 6, %s399_s18  ;;  %s417_s30 = sld [smem:[#allocation2 + %s162_s23]]  ;;  %v153_v0 = vld [vmem:[%s148_s26] sm:$0x1]  ;;  %v154_v1 = vld [vmem:[%s148_s26 + $0x1] sm:$0x1] }
  0x24   : > { %s169_s3 = sld [smem:[#allocation2 + %s168_s29]]  ;;  %s170_s4 = sadd.s32 7, %s399_s18  ;;  %v155_v2 = vld [vmem:[%s148_s26 + $0x2] sm:$0x1]  ;;  %v188_v9 = vstv %s404_s21 }
  0x25   : > { %s172_s5 = sadd.s32 8, %s399_s18  ;;  %s171_s6 = sld [smem:[#allocation2 + %s170_s4]]  ;;  %v189_v16 = vmul.f32 %v188_v9, %v153_v0 }
  0x26   : > { %s173_s7 = sld [smem:[#allocation2 + %s172_s5]]  ;;  %s178_s10 = sadd.s32 11, %s399_s18  ;;  %v190_v10 = vstv %s406_s22 }
  0x27   : > { %s165_s8 = sld [smem:[#allocation2 + %s164_s28]]  ;;  %s166_s11 = sadd.s32 5, %s399_s18  ;;  %v191_v17 = vmul.f32 %v190_v10, %v154_v1 }
  0x28   : > { %s179_s12 = sld [smem:[#allocation2 + %s178_s10]]  ;;  %s174_s15 = sadd.s32 9, %s399_s18 }
  0x29   : > { %s161_s13 = sld [smem:[#allocation2 + %s160_s27]]  ;;  %v198_v11 = vstv %s417_s30  ;;  %s176_s16 = sadd.s32 10, %s399_s18  ;;  %v192_v24 = vadd.f32 %v191_v17, %v189_v16 }
  0x2a   : > { %v208_v3 = vstv %s169_s3  ;;  %s423_s14 = sld [smem:[#allocation2 + %s166_s11]]  ;;  %s435_s24 = scalar_lea.vmem %s450_s2, %s306_s20  ;;  %v199_v18 = vmul.f32 %v198_v11, %v153_v0 }
  0x2b   : > { %v209_v4 = vmul.f32 %v208_v3, %v153_v0  ;;  %v210_v5 = vstv %s171_s6  ;;  %s175_s21 = sld [smem:[#allocation2 + %s174_s15]]  ;;  %s180_s17 = sadd.s32 12, %s399_s18 }
  0x2c   : > { %v213_v6 = vstv %s173_s7  ;;  %v211_v7 = vmul.f32 %v210_v5, %v154_v1  ;;  %s177_s22 = sld [smem:[#allocation2 + %s176_s16]]  ;;  %s182_s20 = sadd.s32 13, %s399_s18 }
  0x2d   : > { %v214_v8 = vmul.f32 %v213_v6, %v155_v2  ;;  %v200_v12 = vstv %s165_s8  ;;  %s184_s25 = sadd.s32 14, %s399_s18  ;;  %s186_s26 = sadd.s32 15, %s399_s18 }
  0x2e   : > { %v212_v13 = vadd.f32 %v211_v7, %v209_v4  ;;  %v216_v14 = vstv %s179_s12  ;;  %v201_v19 = vmul.f32 %v200_v12, %v154_v1  ;;  %s181_s27 = sld [smem:[#allocation2 + %s180_s17]] }
  0x2f   : > { %v193_v20 = vstv %s161_s13  ;;  %s183_s28 = sld [smem:[#allocation2 + %s182_s20]] }
  0x30   : > { %v215_v15 = vadd.f32 %v214_v8, %v212_v13  ;;  %v203_v21 = vstv %s423_s14  ;;  %v194_v25 = vmul.f32 %v193_v20, %v155_v2  ;;  %v202_v26 = vadd.f32 %v201_v19, %v199_v18  ;;  %s185_s29 = sld [smem:[#allocation2 + %s184_s25]] }
  0x31   : > { %v204_v27 = vmul.f32 %v203_v21, %v155_v2  ;;  %v196_v30 = vstv %s175_s21  ;;  %s187_s30 = sld [smem:[#allocation2 + %s186_s26]] }
  0x32   : > { %v217_v22 = vadd.f32 %v216_v14, %v215_v15  ;;  %v195_v28 = vadd.f32 %v194_v25, %v192_v24  ;;  %v206_v31 = vstv %s177_s22 }
  0x33   : > { %v205_v29 = vadd.f32 %v204_v27, %v202_v26 }
  0x34   : > { %v218_v23 = vadd.f32 1e-07, %v217_v22  ;;  %233 = vst [vmem:[%s435_s24 + $0x2] sm:$0x1] %v217_v22  ;;  %v197_v32 = vadd.f32 %v196_v30, %v195_v28  ;;  %v222_v35 = vstv %s181_s27 }
  0x35   : > { %v207_v33 = vadd.f32 %v206_v31, %v205_v29  ;;  %v228_v36 = vstv %s183_s28 }
  0x36   : > { %330 = vrcp.f32 %v218_v23  ;;  %v224_v39 = vstv %s185_s29 }
  0x37   : > { %v230_v40 = vstv %s187_s30 }
  0x40   : > { %v331_v34 = vpop.eup %330 }
  0x41   : > { %v221_v37 = vmul.f32 %v331_v34, %v197_v32  ;;  %v227_v38 = vmul.f32 %v331_v34, %v207_v33 }
  0x43   : > { %v223_v41 = vmul.f32 %v222_v35, %v221_v37  ;;  %v229_v42 = vmul.f32 %v228_v36, %v227_v38 }
  0x45   : > { %v225_v43 = vadd.f32 %v224_v39, %v223_v41  ;;  %v231_v44 = vadd.f32 %v230_v40, %v229_v42 }
  0x47   : > { %226 = vst [vmem:[%s435_s24] sm:$0x1] %v225_v43  ;;  %232 = vst [vmem:[%s435_s24 + $0x1] sm:$0x1] %v231_v44 }
  0x48 PF: > { %s13_s9 = sadd.s32 1, %s357_s9  }
  0x49   : > { %p10_p1 = scmp.ge.s32.totalorder %s13_s9, 6  }
  0x4b   :  { %12 = sbr.rel (!%p10_p1) target bundleno = 1 (0x1), region = 63 }
  0x52   :  { %253 = vsyncpa [#allocation3], 1 }
  0x53   :  { %255 = vsyncpa [#allocation3 + $0x1], 1 }

// kernel: structured_motion_encoder_forward.2
= control target key start
LH: loop header
LB: loop body
LE: loop exit
PB: predicated region body
PF: predicated region fallthrough
CT: control target
= control target key end

     0   :  { %s12700_s13 = smov 0   ;;  %s17433_s0 = inlined_call_operand.vmem [shape: f32[4,4,256], index: 0, kind: input, shape index: {}]   ;;  %s17434_s1 = inlined_call_operand.vmem [shape: f32[9,1,256], index: 1, kind: input, shape index: {}]   ;;  %s17435_s2 = inlined_call_operand.vmem [shape: bf16[9,64,4], index: 2, kind: input, shape index: {}]   ;;  %s17436_s3 = inlined_call_operand.vmem [shape: f32[64,1], index: 3, kind: input, shape index: {}]   ;;  %s17437_s4 = inlined_call_operand.vmem [shape: bf16[9,128,64], index: 4, kind: input, shape index: {}]   ;;  %s17438_s5 = inlined_call_operand.vmem [shape: f32[128,1], index: 5, kind: input, shape index: {}]   ;;  %s17439_s6 = inlined_call_operand.vmem [shape: bf16[9,256,128], index: 6, kind: input, shape index: {}]   ;;  %s17440_s7 = inlined_call_operand.vmem [shape: f32[256,1], index: 7, kind: input, shape index: {}]   ;;  %s17441_s8 = inlined_call_operand.vmem [shape: bf16[256,512], index: 8, kind: input, shape index: {}]   ;;  %s17442_s9 = inlined_call_operand.vmem [shape: f32[1,512], index: 9, kind: input, shape index: {}]   ;;  %s17443_s10 = inlined_call_operand.vmem [shape: f32[4,1,512], index: 10, kind: output, shape index: {}]  }
   0x1 LB: > { %s10448_s14 = sadd.s32 4294967295, %s12633_s13   ;;  %p10452_p0 = scmp.ge.s32.totalorder %s12633_s13, 1  ;;  %s12633_s13 = sphi %s12700_s13, %s20_s13  }
   0x2   : > { %p312_p1 = scmp.lt.s32.totalorder %s12633_s13, 5 }
   0x4   : > { %p313_p2 = pnand %p10452_p0, %p312_p1 }
   0x6   : > { %316 = sbr.rel (%p313_p2) target bundleno = 3169 (0xc61), region = 60 }
   0xd   : > { %p349_p3 = scmp.lt.s32.totalorder %s10448_s14, 3  ;;  %s12635_s19 = smov 16   ;;  %v17453_v2 = vmov 0   ;;  %v17444_v3 = vlaneseq  ;;  %v372_v8 = vld [vmem:[%s17434_s1] sm:$0x3]  ;;  %vm462_vm3 = vcmask 1041408  }
   0xe   : > { %s12636_s20 = smov 17   ;;  %501 = vmatprep.mubr.bf16.mxu0 %v17453_v2  ;;  %12276 = vset.pattern.permute.xlu1 %v17453_v2  ;;  %s12638_s21 = smov 15   ;;  %v10456_v9 = vld [vmem:[%s17434_s1 + $0x2] sm:$0x3]  ;;  %v10483_v10 = vld [vmem:[%s17434_s1 + $0x4] sm:$0x3] }
   0xf   : > { %s17703_s14 = smov (!%p349_p3, %s10448_s14), 3  ;;  %12275 = vset.pattern.permute.xlu0 %v17453_v2  ;;  %2161 = vmatprep.mubr.bf16.mxu1 %v17453_v2  ;;  %s12639_s22 = smov 1   ;;  %v12745_v4 = vand.u32 127, %v17444_v3  ;;  %v12748_v5 = vshrl.u32 %v17444_v3, 7  ;;  %vm449_vm4 = vcmask 31744   ;;  %v12278_v32 = vld [vmem:[%s17435_s2 + $0x20] sm:$0xff]  }
  0x10   : > { %s11360_s15 = sshll.u32 %s17703_s14, 3  ;;  %s12640_s23 = smov 127   ;;  %v12279_v40 = vld [vmem:[%s17435_s2 + $0x28] sm:$0xff]   ;;  %v12280_v41 = vld [vmem:[%s17435_s2 + $0x30] sm:$0xff]   ;;  %v10501_v45 = vld [vmem:[%s17434_s1 + $0x6] sm:$0x3] }
  0x11   : > { %s12714_s18 = scalar_lea.vmem %s17433_s0, %s11360_s15  ;;  %s12641_s24 = smov 113   ;;  %17530 = vst [vmem:[#allocation4_spill] sm:$0xff] %v12748_v5  ;;  %v12751_v6 = vsub.s32 0, %v12748_v5  ;;  %v12754_v7 = vsub.s32 1, %v12748_v5  ;;  %vm400_vm0 = vcmp.lt.s32.totalorder %v12745_v4, 16  ;;  %vm369_vm1 = vcmp.lt.s32.totalorder %v12745_v4, 17 }
  0x12   : > { %v359_v0 = vld [vmem:[%s12714_s18] sm:$0xff]  ;;  %s12642_s25 = smov 112   ;;  %s12643_s26 = smov 111   ;;  %vm657_vm2 = vcmp.lt.s32.totalorder %v12745_v4, 15  ;;  %vm817_vm5 = vcmp.lt.s32.totalorder %v12745_v4, 1  ;;  %v12281_v46 = vld [vmem:[%s17435_s2 + $0x38] sm:$0xff]  }
  0x13   : > { %396 = vrot.lane.b32.xlu0 %v359_v0, %s12635_s19  ;;  %363 = vrot.lane.b32.xlu1 %v359_v0, %s12636_s20  ;;  %v12719_v1 = vcombine.high %v359_v0, %v359_v0  ;;  %17531 = vst [vmem:[#allocation5_spill] sm:$0xff] %v12751_v6  ;;  %17532 = vst [vmem:[#allocation6_spill] sm:$0xff] %v12754_v7  ;;  %v377_v13 = vrot.slane %v372_v8, %v12751_v6  ;;  %v12282_v53 = vld [vmem:[%s17435_s2] sm:$0xff]   ;;  %v12283_v56 = vld [vmem:[%s17435_s2 + $0x8] sm:$0xff]   ;;  %vm1115_vm6 = vcmp.lt.s32.totalorder %v12745_v4, 127  ;;  %vm2104_vm10 = vcmask 523264  }
  0x14   : > { %v381_v14 = vrot.slane %v372_v8, %v12754_v7  ;;  %v413_v15 = vrot.slane %v10456_v9, %v12754_v7  ;;  %v409_v16 = vrot.slane %v10456_v9, %v12751_v6  ;;  %v670_v19 = vrot.slane %v10483_v10, %v12754_v7  ;;  %v12284_v57 = vld [vmem:[%s17435_s2 + $0x10] sm:$0xff]   ;;  %v12285_v58 = vld [vmem:[%s17435_s2 + $0x18] sm:$0xff]   ;;  %v12286_v63 = vld [vmem:[%s17435_s2 + $0x40] sm:$0xff]   ;;  %s10455_s28 = sshll.u32 %s17703_s14, 2 }
  0x15   : > { %v666_v42 = vrot.slane %v10483_v10, %v12751_v6  ;;  %v830_v50 = vrot.slane %v10501_v45, %v12754_v7  ;;  %v826_v59 = vrot.slane %v10501_v45, %v12751_v6  ;;  %v983_v8 = vpack.c.bf16 %v12719_v1, %v12719_v1  ;;  %v12287_v9 = vld [vmem:[%s17435_s2 + $0x48] sm:$0xff]   ;;  %s357_s29 = scalar_lea.vmem %s17443_s10, %s10455_s28 }
  0x16   : > { %v10536_v10 = vld [vmem:[%s17434_s1 + $0xa] sm:$0x3]  ;;  %vm1275_vm7 = vcmp.lt.s32.totalorder %v12745_v4, 113  ;;  %vm1435_vm8 = vcmp.lt.s32.totalorder %v12745_v4, 112  ;;  %vm1595_vm9 = vcmp.lt.s32.totalorder %v12745_v4, 111  ;;  %v12498_v4 = vld [vmem:[%s17439_s6 + $0x160] sm:$0xff]  }
  0x17   : > { %398 = vrot.lane.b32.xlu0 %v12719_v1, %s12635_s19  ;;  %365 = vrot.lane.b32.xlu1 %v12719_v1, %s12636_s20 }
  0x1b   : > { %655 = vrot.lane.b32.xlu1 %v12719_v1, %s12638_s21  ;;  %653 = vrot.lane.b32.xlu0 %v359_v0, %s12638_s21 }
  0x1f   : > { %815 = vrot.lane.b32.xlu1 %v12719_v1, %s12639_s22  ;;  %813 = vrot.lane.b32.xlu0 %v359_v0, %s12639_s22 }
  0x23   : > { %1113 = vrot.lane.b32.xlu1 %v12719_v1, %s12640_s23  ;;  %1111 = vrot.lane.b32.xlu0 %v359_v0, %s12640_s23 }
  0x27   : > { %1273 = vrot.lane.b32.xlu1 %v12719_v1, %s12641_s24  ;;  %1271 = vrot.lane.b32.xlu0 %v359_v0, %s12641_s24 }
  0x2b   : > { %1433 = vrot.lane.b32.xlu1 %v12719_v1, %s12642_s25  ;;  %1431 = vrot.lane.b32.xlu0 %v359_v0, %s12642_s25 }
  0x2f   : > { %1593 = vrot.lane.b32.xlu1 %v12719_v1, %s12643_s26  ;;  %1591 = vrot.lane.b32.xlu0 %v359_v0, %s12643_s26  ;;  %v12288_v1 = vld [vmem:[%s17435_s2 + $0x50] sm:$0xff]  }
  0x85   : > { %v397_v11 = vpop.permute.xlu0 %396  ;;  %v364_v12 = vpop.permute.xlu1 %363 }
  0x89   : > { %v399_v17 = vpop.permute.xlu0 %398  ;;  %v366_v18 = vpop.permute.xlu1 %365 }
  0x8a   : > { %v402_v20 = vsel %vm400_vm0, %v399_v17, %v397_v11  ;;  %v370_v21 = vsel %vm369_vm1, %v364_v12, %v366_v18  ;;  %v371_v22 = vsel %vm369_vm1, %v366_v18, %v364_v12  ;;  %v401_v23 = vsel %vm400_vm0, %v397_v11, %v399_v17  ;;  %v12289_v11 = vld [vmem:[%s17435_s2 + $0x58] sm:$0xff]  }
  0x8b   : > { %v384_v24 = vmul.f32 %v377_v13, %v371_v22  ;;  %v385_v25 = vmul.f32 %v381_v14, %v370_v21  ;;  %v417_v26 = vmul.f32 %v413_v15, %v401_v23  ;;  %v416_v27 = vmul.f32 %v409_v16, %v402_v20  ;;  %v12626_v16 = vld [vmem:[%s12714_s18] sm:$0xff]  ;;  %v12291_v22 = vld [vmem:[%s17435_s2 + $0x68] sm:$0xff]   ;;  %v12292_v23 = vld [vmem:[%s17435_s2 + $0x70] sm:$0xff]  }
  0x8c   : > { %v1128_v14 = vrot.slane %v10536_v10, %v12754_v7  ;;  %v982_v17 = vpack.c.bf16 %v12626_v16, %v12626_v16 }
  0x8d   : > { %v394_v28 = vpack.c.bf16 %v384_v24, %v384_v24  ;;  %v395_v29 = vpack.c.bf16 %v385_v25, %v385_v25  ;;  %v428_v30 = vpack.c.bf16 %v417_v26, %v417_v26  ;;  %v427_v31 = vpack.c.bf16 %v416_v27, %v416_v27  ;;  %v656_v33 = vpop.permute.xlu1 %655  ;;  %v654_v34 = vpop.permute.xlu0 %653  ;;  %v10554_v26 = vld [vmem:[%s17434_s1 + $0xc] sm:$0x3]  ;;  %v12293_v27 = vld [vmem:[%s17435_s2 + $0x78] sm:$0xff]  }
  0x8e   : > { %v658_v35 = vsel %vm657_vm2, %v654_v34, %v656_v33  ;;  %v659_v43 = vsel %vm657_vm2, %v656_v33, %v654_v34  ;;  %v1017_v20 = vsel %vm462_vm3, %v982_v17, 0  ;;  %v1124_v24 = vrot.slane %v10536_v10, %v12751_v6  ;;  %v12302_v17 = vld [vmem:[%s17435_s2 + $0xc0] sm:$0xff]  }
  0x8f   : > { %10469 = vmatprep.subr.msk.bf16.mxu0 %vm462_vm3, %v428_v30  ;;  %v464_v36 = vsel %vm462_vm3, %v427_v31, 0  ;;  %v575_v37 = vsel %vm462_vm3, %v394_v28, 0  ;;  %v674_v38 = vmul.f32 %v670_v19, %v658_v35  ;;  %v673_v44 = vmul.f32 %v666_v42, %v659_v43  ;;  %v12290_v19 = vld [vmem:[%s17435_s2 + $0x60] sm:$0xff]   ;;  %v10572_v42 = vld [vmem:[%s17434_s1 + $0xe] sm:$0x3]  ;;  %v12297_v43 = vld [vmem:[%s17435_s2 + $0x98] sm:$0xff]  }
  0x90   : > { %470 = vmatpush1.bf16.msra.mxu0 %v464_v36  ;;  %v1288_v31 = vrot.slane %v10554_v26, %v12754_v7  ;;  %v12294_v35 = vld [vmem:[%s17435_s2 + $0x80] sm:$0xff]  }
  0x91   : > { %10478 = vmatprep.subr.msk.bf16.mxu0 %vm462_vm3, %v395_v29  ;;  %v685_v39 = vpack.c.bf16 %v674_v38, %v674_v38  ;;  %v816_v47 = vpop.permute.xlu1 %815  ;;  %v814_v48 = vpop.permute.xlu0 %813  ;;  %v684_v49 = vpack.c.bf16 %v673_v44, %v673_v44  ;;  %v12295_v38 = vld [vmem:[%s17435_s2 + $0x88] sm:$0xff]  }
  0x92   : > { %v818_v51 = vsel %vm817_vm5, %v814_v48, %v816_v47  ;;  %v819_v60 = vsel %vm817_vm5, %v816_v47, %v814_v48  ;;  %v1448_v47 = vrot.slane %v10572_v42, %v12754_v7 }
  0x93   : > { %10470 = vmatmul.mubr.msk.bf16.vlgmr.msra.gmra.mrb[0].mxu0 %vm449_vm4, %v12278_v32  ;;  %v719_v52 = vsel %vm462_vm3, %v684_v49, 0  ;;  %v834_v54 = vmul.f32 %v830_v50, %v818_v51  ;;  %v833_v61 = vmul.f32 %v826_v59, %v819_v60  ;;  %v1752_v49 = vld [vmem:[%s17436_s3 + $0x8] sm:$0xff]  ;;  %v1751_v50 = vld [vmem:[%s17436_s3] sm:$0xff]  ;;  %v1757_v60 = vld [vmem:[%s17436_s3 + $0x30] sm:$0xff] }
  0x94   : > { %581 = vmatpush1.bf16.msra.mxu0 %v575_v37  ;;  %511 = vmatprep.mubr.bf16.mxu0 %v17453_v2  ;;  %v1756_v59 = vld [vmem:[%s17436_s3 + $0x28] sm:$0xff] }
  0x95   : > { %10496 = vmatprep.subr.msk.bf16.mxu0 %vm462_vm3, %v685_v39  ;;  %v845_v55 = vpack.c.bf16 %v834_v54, %v834_v54  ;;  %v844_v62 = vpack.c.bf16 %v833_v61, %v833_v61  ;;  %v1114_v12 = vpop.permute.xlu1 %1113  ;;  %v1112_v13 = vpop.permute.xlu0 %1111  ;;  %v12296_v39 = vld [vmem:[%s17435_s2 + $0x90] sm:$0xff]   ;;  %1766 = vperm.xlu1 %12276, %v1752_v49   ;;  %v1754_v54 = vld [vmem:[%s17436_s3 + $0x18] sm:$0xff]  ;;  %v12299_v61 = vld [vmem:[%s17435_s2 + $0xa8] sm:$0xff]  }
  0x96   : > { %v1117_v15 = vsel %vm1115_vm6, %v1114_v12, %v1112_v13  ;;  %v1116_v25 = vsel %vm1115_vm6, %v1112_v13, %v1114_v12  ;;  %1761 = vperm.xlu0 %12275, %v1751_v50  }
  0x97   : > { %v879_v0 = vsel %vm462_vm3, %v844_v62, 0  ;;  %v1132_v18 = vmul.f32 %v1128_v14, %v1117_v15  ;;  %v1131_v30 = vmul.f32 %v1124_v24, %v1116_v25  ;;  %v1758_v62 = vld [vmem:[%s17436_s3 + $0x38] sm:$0xff] }
  0x98   : > { %v12305_v24 = vld [vmem:[%s17435_s2 + $0xd8] sm:$0xff]  }
  0x99   : > { %v1143_v21 = vpack.c.bf16 %v1132_v18, %v1132_v18  ;;  %v1274_v28 = vpop.permute.xlu1 %1273  ;;  %v1272_v29 = vpop.permute.xlu0 %1271  ;;  %v1142_v33 = vpack.c.bf16 %v1131_v30, %v1131_v30  ;;  %v12308_v30 = vld [vmem:[%s17435_s2 + $0xf0] sm:$0xff]  }
  0x9a   : > { %v1277_v32 = vsel %vm1275_vm7, %v1274_v28, %v1272_v29  ;;  %1776 = vperm.xlu0 %12275, %v1754_v54  }
  0x9b   : > { %10471 = vmatmul.mubr.msk.bf16.gmra.mrb[4].mxu0 %vm449_vm4, %v12279_v40  ;;  %v1292_v34 = vmul.f32 %v1288_v31, %v1277_v32  ;;  %v1177_v36 = vsel %vm462_vm3, %v1142_v33, 0  ;;  %v1284_v40 = vrot.slane %v10554_v26, %v12751_v6  ;;  %v12309_v31 = vld [vmem:[%s17435_s2 + $0xf8] sm:$0xff]   ;;  %v12310_v32 = vld [vmem:[%s17435_s2 + $0x100] sm:$0xff]   ;;  %v12311_v33 = vld [vmem:[%s17435_s2 + $0x108] sm:$0xff]  }
  0x9c   : > { %521 = vmatprep.mubr.bf16.mxu0 %v17453_v2 }
  0x9d   : > { %v1303_v37 = vpack.c.bf16 %v1292_v34, %v1292_v34  ;;  %v1434_v44 = vpop.permute.xlu1 %1433  ;;  %v1432_v45 = vpop.permute.xlu0 %1431  ;;  %v12312_v34 = vld [vmem:[%s17435_s2 + $0x110] sm:$0xff]  }
  0x9e   : > { %v1437_v48 = vsel %vm1435_vm8, %v1434_v44, %v1432_v45  ;;  %1786 = vperm.xlu0 %12275, %v1756_v59  }
  0xa1   : > { %v1594_v10 = vpop.permute.xlu1 %1593 }
  0xa2   : > { %1796 = vperm.xlu0 %12275, %v1758_v62  }
  0xa3   : > { %10472 = vmatmul.mubr.msk.bf16.gmra.mrb[8].mxu0 %vm449_vm4, %v12280_v41  ;;  %v1276_v41 = vsel %vm1275_vm7, %v1272_v29, %v1274_v28  ;;  %v12307_v29 = vld [vmem:[%s17435_s2 + $0xe8] sm:$0xff]  }
  0xa4   : > { %531 = vmatprep.mubr.bf16.mxu0 %v17453_v2 }
  0xab   : > { %10473 = vmatmul.mubr.msk.bf16.gmra.mrb[12].mxu0 %vm449_vm4, %v12281_v46  ;;  %v1291_v46 = vmul.f32 %v1284_v40, %v1276_v41 }
  0xac   : > { %612 = vmatprep.mubr.bf16.mxu0 %v17453_v2 }
  0xad   : > { %v1302_v51 = vpack.c.bf16 %v1291_v46, %v1291_v46 }
  0xb3   : > { %10479 = vmatmul.mubr.msk.bf16.vlgmr.msra.gmra.mrb[0].mxu0 %vm449_vm4, %v12282_v53  ;;  %v1753_v53 = vld [vmem:[%s17436_s3 + $0x10] sm:$0xff] }
  0xb4   : > { %725 = vmatpush1.bf16.msra.mxu0 %v719_v52  ;;  %622 = vmatprep.mubr.bf16.mxu0 %v17453_v2  ;;  %v1452_v52 = vmul.f32 %v1448_v47, %v1437_v48 }
  0xb5   : > { %10514 = vmatprep.subr.msk.bf16.mxu0 %vm462_vm3, %v845_v55  ;;  %v12298_v55 = vld [vmem:[%s17435_s2 + $0xa0] sm:$0xff]   ;;  %1771 = vperm.xlu1 %12276, %v1753_v53  }
  0xbb   : > { %10480 = vmatmul.mubr.msk.bf16.gmra.mrb[4].mxu0 %vm449_vm4, %v12283_v56  ;;  %v1337_v56 = vsel %vm462_vm3, %v1302_v51, 0 }
  0xbc   : > { %632 = vmatprep.mubr.bf16.mxu0 %v17453_v2 }
  0xc3   : > { %10481 = vmatmul.mubr.msk.bf16.gmra.mrb[8].mxu0 %vm449_vm4, %v12284_v57  ;;  %v1463_v57 = vpack.c.bf16 %v1452_v52, %v1452_v52 }
  0xc4   : > { %642 = vmatprep.mubr.bf16.mxu0 %v17453_v2 }
  0xcb   : > { %10482 = vmatmul.mubr.msk.bf16.gmra.mrb[12].mxu0 %vm449_vm4, %v12285_v58  ;;  %v1755_v58 = vld [vmem:[%s17436_s3 + $0x20] sm:$0xff] }
  0xcc   : > { %756 = vmatprep.mubr.bf16.mxu0 %v17453_v2  ;;  %1781 = vperm.xlu1 %12276, %v1755_v58  }
  0xd0   : > { %1791 = vperm.xlu1 %12276, %v1757_v60  }
  0xd3   : > { %10497 = vmatmul.mubr.msk.bf16.vlgmr.msra.gmra.mrb[0].mxu0 %vm449_vm4, %v12286_v63  ;;  %v12300_v63 = vld [vmem:[%s17435_s2 + $0xb0] sm:$0xff]  }
  0xd4   : > { %885 = vmatpush1.bf16.msra.mxu0 %v879_v0  ;;  %766 = vmatprep.mubr.bf16.mxu0 %v17453_v2  ;;  %v1444_v0 = vrot.slane %v10572_v42, %v12751_v6 }
  0xd5   : > { %10531 = vmatprep.subr.msk.bf16.mxu0 %vm462_vm3, %v983_v8  ;;  %v1436_v8 = vsel %vm1435_vm8, %v1432_v45, %v1434_v44 }
  0xd6   : > { %v1451_v12 = vmul.f32 %v1444_v0, %v1436_v8 }
  0xd8   : > { %v1462_v15 = vpack.c.bf16 %v1451_v12, %v1451_v12 }
  0xda   : > { %v1497_v18 = vsel %vm462_vm3, %v1462_v15, 0 }
  0xdb   : > { %10498 = vmatmul.mubr.msk.bf16.gmra.mrb[4].mxu0 %vm449_vm4, %v12287_v9  ;;  %v10590_v9 = vld [vmem:[%s17434_s1 + $0x10] sm:$0x3] }
  0xdc   : > { %776 = vmatprep.mubr.bf16.mxu0 %v17453_v2  ;;  %v1608_v13 = vrot.slane %v10590_v9, %v12754_v7 }
  0xe3   : > { %10499 = vmatmul.mubr.msk.bf16.gmra.mrb[8].mxu0 %vm449_vm4, %v12288_v1  ;;  %v12301_v1 = vld [vmem:[%s17435_s2 + $0xb8] sm:$0xff]  }
  0xe4   : > { %786 = vmatprep.mubr.bf16.mxu0 %v17453_v2 }
  0xeb   : > { %10500 = vmatmul.mubr.msk.bf16.gmra.mrb[12].mxu0 %vm449_vm4, %v12289_v11  ;;  %v1592_v11 = vpop.permute.xlu0 %1591 }
  0xec   : > { %916 = vmatprep.mubr.bf16.mxu0 %v17453_v2  ;;  %v1597_v14 = vsel %vm1595_vm9, %v1594_v10, %v1592_v11 }
  0xed   : > { %v1612_v16 = vmul.f32 %v1608_v13, %v1597_v14 }
  0xf3   : > { %10515 = vmatmul.mubr.msk.bf16.vlgmr.msra.gmra.mrb[0].mxu0 %vm449_vm4, %v12290_v19  ;;  %v1623_v19 = vpack.c.bf16 %v1612_v16, %v1612_v16 }
  0xf4   : > { %1023 = vmatpush1.bf16.msra.mxu0 %v1017_v20  ;;  %926 = vmatprep.mubr.bf16.mxu0 %v17453_v2  ;;  %v12303_v20 = vld [vmem:[%s17435_s2 + $0xc8] sm:$0xff]  }
  0xf5   : > { %10549 = vmatprep.subr.msk.bf16.mxu0 %vm462_vm3, %v1143_v21  ;;  %v12304_v21 = vld [vmem:[%s17435_s2 + $0xd0] sm:$0xff]  }
  0xfb   : > { %10516 = vmatmul.mubr.msk.bf16.gmra.mrb[4].mxu0 %vm449_vm4, %v12291_v22  ;;  %v1604_v22 = vrot.slane %v10590_v9, %v12751_v6 }
  0xfc   : > { %936 = vmatprep.mubr.bf16.mxu0 %v17453_v2 }
 0x103   : > { %10517 = vmatmul.mubr.msk.bf16.gmra.mrb[8].mxu0 %vm449_vm4, %v12292_v23  ;;  %v1596_v23 = vsel %vm1595_vm9, %v1592_v11, %v1594_v10 }
 0x104   : > { %946 = vmatprep.mubr.bf16.mxu0 %v17453_v2  ;;  %v1611_v25 = vmul.f32 %v1604_v22, %v1596_v23 }
 0x106   : > { %v1622_v26 = vpack.c.bf16 %v1611_v25, %v1611_v25 }
 0x108   : > { %v1657_v28 = vsel %vm462_vm3, %v1622_v26, 0 }
 0x10b   : > { %10518 = vmatmul.mubr.msk.bf16.gmra.mrb[12].mxu0 %vm449_vm4, %v12293_v27  ;;  %v12306_v27 = vld [vmem:[%s17435_s2 + $0xe0] sm:$0xff]  }
 0x10c   : > { %1054 = vmatprep.mubr.bf16.mxu0 %v17453_v2 }
 0x113   : > { %10532 = vmatmul.mubr.msk.bf16.vlgmr.msra.gmra.mrb[0].mxu0 %vm449_vm4, %v12294_v35  ;;  %v12313_v35 = vld [vmem:[%s17435_s2 + $0x118] sm:$0xff]  }
 0x114   : > { %1183 = vmatpush1.bf16.msra.mxu0 %v1177_v36  ;;  %1064 = vmatprep.mubr.bf16.mxu0 %v17453_v2  ;;  %v1767_v40 = vpop.permute.xlu1 %1766 }
 0x115   : > { %10567 = vmatprep.subr.msk.bf16.mxu0 %vm462_vm3, %v1303_v37  ;;  %v1762_v36 = vpop.permute.xlu0 %1761 }
 0x119   : > { %v1777_v54 = vpop.permute.xlu0 %1776 }
 0x11b   : > { %10533 = vmatmul.mubr.msk.bf16.gmra.mrb[4].mxu0 %vm449_vm4, %v12295_v38 }
 0x11c   : > { %1074 = vmatprep.mubr.bf16.mxu0 %v17453_v2 }
 0x11d   : > { %v1787_v10 = vpop.permute.xlu0 %1786 }
 0x123   : > { %10534 = vmatmul.mubr.msk.bf16.gmra.mrb[8].mxu0 %vm449_vm4, %v12296_v39 }
 0x124   : > { %1084 = vmatprep.mubr.bf16.mxu0 %v17453_v2 }
 0x12b   : > { %10535 = vmatmul.mubr.msk.bf16.gmra.mrb[12].mxu0 %vm449_vm4, %v12297_v43 }
 0x12c   : > { %1214 = vmatprep.mubr.bf16.mxu0 %v17453_v2 }
 0x133   : > { %10550 = vmatmul.mubr.msk.bf16.vlgmr.msra.gmra.mrb[0].mxu0 %vm449_vm4, %v12298_v55 }
 0x134   : > { %1343 = vmatpush1.bf16.msra.mxu0 %v1337_v56  ;;  %1224 = vmatprep.mubr.bf16.mxu0 %v17453_v2  ;;  %v1772_v49 = vpop.permute.xlu1 %1771 }
 0x135   : > { %10585 = vmatprep.subr.msk.bf16.mxu0 %vm462_vm3, %v1463_v57 }
 0x13b   : > { %10551 = vmatmul.mubr.msk.bf16.gmra.mrb[4].mxu0 %vm449_vm4, %v12299_v61 }
 0x13c   : > { %1234 = vmatprep.mubr.bf16.mxu0 %v17453_v2 }
 0x143   : > { %10552 = vmatmul.mubr.msk.bf16.gmra.mrb[8].mxu0 %vm449_vm4, %v12300_v63 }
 0x144   : > { %1244 = vmatprep.mubr.bf16.mxu0 %v17453_v2 }
 0x14b   : > { %10553 = vmatmul.mubr.msk.bf16.gmra.mrb[12].mxu0 %vm449_vm4, %v12301_v1  ;;  %v1782_v63 = vpop.permute.xlu1 %1781 }
 0x14c   : > { %1374 = vmatprep.mubr.bf16.mxu0 %v17453_v2 }
 0x153   : > { %10568 = vmatmul.mubr.msk.bf16.vlgmr.msra.gmra.mrb[0].mxu0 %vm449_vm4, %v12302_v17 }
 0x154   : > { %1503 = vmatpush1.bf16.msra.mxu0 %v1497_v18  ;;  %1384 = vmatprep.mubr.bf16.mxu0 %v17453_v2 }
 0x155   : > { %10603 = vmatprep.subr.msk.bf16.mxu0 %vm462_vm3, %v1623_v19  ;;  %v1792_v19 = vpop.permute.xlu1 %1791 }
 0x15b   : > { %10569 = vmatmul.mubr.msk.bf16.gmra.mrb[4].mxu0 %vm449_vm4, %v12303_v20 }
 0x15c   : > { %1394 = vmatprep.mubr.bf16.mxu0 %v17453_v2 }
 0x163   : > { %10570 = vmatmul.mubr.msk.bf16.gmra.mrb[8].mxu0 %vm449_vm4, %v12304_v21 }
 0x164   : > { %1404 = vmatprep.mubr.bf16.mxu0 %v17453_v2 }
 0x16b   : > { %10571 = vmatmul.mubr.msk.bf16.gmra.mrb[12].mxu0 %vm449_vm4, %v12305_v24  ;;  %v1797_v24 = vpop.permute.xlu0 %1796 }
 0x16c   : > { %1534 = vmatprep.mubr.bf16.mxu0 %v17453_v2 }
 0x173   : > { %10586 = vmatmul.mubr.msk.bf16.vlgmr.msra.gmra.mrb[0].mxu0 %vm449_vm4, %v12306_v27 }
 0x174   : > { %1663 = vmatpush1.bf16.msra.mxu0 %v1657_v28  ;;  %1544 = vmatprep.mubr.bf16.mxu0 %v17453_v2 }
 0x17b   : > { %10587 = vmatmul.mubr.msk.bf16.gmra.mrb[4].mxu0 %vm449_vm4, %v12307_v29 }
 0x17c   : > { %1554 = vmatprep.mubr.bf16.mxu0 %v17453_v2 }
 0x183   : > { %10588 = vmatmul.mubr.msk.bf16.gmra.mrb[8].mxu0 %vm449_vm4, %v12308_v30 }
 0x184   : > { %1564 = vmatprep.mubr.bf16.mxu0 %v17453_v2 }
 0x18b   : > { %10589 = vmatmul.mubr.msk.bf16.gmra.mrb[12].mxu0 %vm449_vm4, %v12309_v31 }
 0x18c   : > { %1694 = vmatprep.mubr.bf16.mxu0 %v17453_v2 }
 0x193   : > { %10604 = vmatmul.mubr.msk.bf16.vlgmr.msra.gmra.mrb[0].mxu0 %vm449_vm4, %v12310_v32 }
 0x194   : > { %1704 = vmatprep.mubr.bf16.mxu0 %v17453_v2 }
 0x19b   : > { %10605 = vmatmul.mubr.msk.bf16.gmra.mrb[4].mxu0 %vm449_vm4, %v12311_v33 }
 0x19c   : > { %1714 = vmatprep.mubr.bf16.mxu0 %v17453_v2 }
 0x1a3   : > { %10606 = vmatmul.mubr.msk.bf16.gmra.mrb[8].mxu0 %vm449_vm4, %v12312_v34 }
 0x1a4   : > { %1724 = vmatprep.mubr.bf16.mxu0 %v17453_v2 }
 0x1ab   : > { %10607 = vmatmul.mubr.msk.bf16.gmra.mrb[12].mxu0 %vm449_vm4, %v12313_v35  ;;  %v10608_v35 = vld [vmem:[%s17434_s1 + $0x2] sm:$0x3] }
 0x1ac   : > { %6551 = vmatprep.mubr.bf16.mxu0 %v17453_v2 }
 0x266   : > { %v1696_v37 = vpop.f32.mrb[0].mxu0 }
 0x267   : > { %v1799_v38 = vadd.f32 %v1762_v36, %v1696_v37  ;;  %v1698_v39 = vpop.f32.mrb[1].mxu0 }
 0x268   : > { %v1700_v41 = vpop.f32.mrb[2].mxu0  ;;  %v1800_v43 = vadd.f32 %v1762_v36, %v1698_v39  ;;  %v13223_v39 = vrot.slane %v10608_v35, %v12754_v7 }
 0x269   : > { %v13064_v42 = vmax.f32 %v1799_v38, 0.0  ;;  %v1801_v44 = vadd.f32 %v1767_v40, %v1700_v41  ;;  %v1702_v45 = vpop.f32.mrb[3].mxu0  ;;  %v13220_v38 = vrot.slane %v10608_v35, %v12751_v6 }
 0x26a   : > { %v1802_v47 = vadd.f32 %v1767_v40, %v1702_v45  ;;  %v13070_v48 = vmax.f32 %v1800_v43, 0.0 }
 0x26b   : > { %v13066_v46 = vmax.f32 %v1801_v44, 0.0  ;;  %1963 = vrot.lane.b32.xlu1 %v13064_v42, %s12635_s19 }
 0x26c   : > { %v13074_v51 = vmax.f32 %v1802_v47, 0.0 }
 0x26d   : > { %1965 = vrot.lane.b32.xlu0 %v13066_v46, %s12635_s19 }
 0x26e   : > { %v1706_v50 = vpop.f32.mrb[4].mxu0 }
 0x26f   : > { %v1803_v52 = vadd.f32 %v1772_v49, %v1706_v50  ;;  %1979 = vrot.lane.b32.xlu1 %v13070_v48, %s12635_s19  ;;  %v1708_v53 = vpop.f32.mrb[5].mxu0 }
 0x270   : > { %v1710_v55 = vpop.f32.mrb[6].mxu0  ;;  %v1804_v57 = vadd.f32 %v1772_v49, %v1708_v53 }
 0x271   : > { %v13078_v56 = vmax.f32 %v1803_v52, 0.0  ;;  %v1805_v58 = vadd.f32 %v1777_v54, %v1710_v55  ;;  %1981 = vrot.lane.b32.xlu0 %v13074_v51, %s12635_s19  ;;  %v1712_v59 = vpop.f32.mrb[7].mxu0 }
 0x272   : > { %v1806_v61 = vadd.f32 %v1777_v54, %v1712_v59  ;;  %v13086_v62 = vmax.f32 %v1804_v57, 0.0 }
 0x273   : > { %v13082_v60 = vmax.f32 %v1805_v58, 0.0  ;;  %1967 = vrot.lane.b32.xlu1 %v13078_v56, %s12635_s19 }
 0x274   : > { %v13090_v8 = vmax.f32 %v1806_v61, 0.0 }
 0x275   : > { %1969 = vrot.lane.b32.xlu0 %v13082_v60, %s12635_s19 }
 0x276   : > { %v1716_v0 = vpop.f32.mrb[8].mxu0 }
 0x277   : > { %v1807_v9 = vadd.f32 %v1782_v63, %v1716_v0  ;;  %1983 = vrot.lane.b32.xlu1 %v13086_v62, %s12635_s19  ;;  %v1718_v1 = vpop.f32.mrb[9].mxu0 }
 0x278   : > { %v1720_v11 = vpop.f32.mrb[10].mxu0  ;;  %v1808_v13 = vadd.f32 %v1782_v63, %v1718_v1 }
 0x279   : > { %v13094_v12 = vmax.f32 %v1807_v9, 0.0  ;;  %v1809_v14 = vadd.f32 %v1787_v10, %v1720_v11  ;;  %1985 = vrot.lane.b32.xlu0 %v13090_v8, %s12635_s19  ;;  %v1722_v15 = vpop.f32.mrb[11].mxu0 }
 0x27a   : > { %v1810_v17 = vadd.f32 %v1787_v10, %v1722_v15  ;;  %v13102_v18 = vmax.f32 %v1808_v13, 0.0 }
 0x27b   : > { %v13098_v16 = vmax.f32 %v1809_v14, 0.0  ;;  %1971 = vrot.lane.b32.xlu1 %v13094_v12, %s12635_s19 }
 0x27c   : > { %v13106_v21 = vmax.f32 %v1810_v17, 0.0 }
 0x27d   : > { %1973 = vrot.lane.b32.xlu0 %v13098_v16, %s12635_s19 }
 0x27e   : > { %v1726_v20 = vpop.f32.mrb[12].mxu0 }
 0x27f   : > { %v1811_v22 = vadd.f32 %v1792_v19, %v1726_v20  ;;  %1987 = vrot.lane.b32.xlu1 %v13102_v18, %s12635_s19  ;;  %v1728_v23 = vpop.f32.mrb[13].mxu0 }
 0x280   : > { %v1730_v25 = vpop.f32.mrb[14].mxu0  ;;  %v1812_v27 = vadd.f32 %v1792_v19, %v1728_v23 }
 0x281   : > { %v13110_v26 = vmax.f32 %v1811_v22, 0.0  ;;  %v1813_v28 = vadd.f32 %v1797_v24, %v1730_v25  ;;  %1989 = vrot.lane.b32.xlu0 %v13106_v21, %s12635_s19  ;;  %v1732_v29 = vpop.f32.mrb[15].mxu0 }
 0x282   : > { %v1814_v31 = vadd.f32 %v1797_v24, %v1732_v29  ;;  %v13118_v32 = vmax.f32 %v1812_v27, 0.0 }
 0x283   : > { %v13114_v30 = vmax.f32 %v1813_v28, 0.0  ;;  %1975 = vrot.lane.b32.xlu1 %v13110_v26, %s12635_s19 }
 0x284   : > { %v13122_v33 = vmax.f32 %v1814_v31, 0.0 }
 0x285   : > { %1977 = vrot.lane.b32.xlu0 %v13114_v30, %s12635_s19 }
 0x287   : > { %1991 = vrot.lane.b32.xlu1 %v13118_v32, %s12635_s19 }
 0x289   : > { %1993 = vrot.lane.b32.xlu0 %v13122_v33, %s12635_s19 }
 0x28b   : > { %1863 = vrot.lane.b32.xlu1 %v13064_v42, %s12636_s20 }
 0x28d   : > { %1865 = vrot.lane.b32.xlu0 %v13066_v46, %s12636_s20 }
 0x28f   : > { %1879 = vrot.lane.b32.xlu1 %v13070_v48, %s12636_s20 }
 0x291   : > { %1881 = vrot.lane.b32.xlu0 %v13074_v51, %s12636_s20 }
 0x293   : > { %1867 = vrot.lane.b32.xlu1 %v13078_v56, %s12636_s20 }
 0x295   : > { %1869 = vrot.lane.b32.xlu0 %v13082_v60, %s12636_s20 }
 0x297   : > { %1883 = vrot.lane.b32.xlu1 %v13086_v62, %s12636_s20 }
 0x299   : > { %1885 = vrot.lane.b32.xlu0 %v13090_v8, %s12636_s20 }
 0x29b   : > { %1871 = vrot.lane.b32.xlu1 %v13094_v12, %s12636_s20 }
 0x29d   : > { %1873 = vrot.lane.b32.xlu0 %v13098_v16, %s12636_s20 }
 0x29f   : > { %1887 = vrot.lane.b32.xlu1 %v13102_v18, %s12636_s20 }
 0x2a1   : > { %1889 = vrot.lane.b32.xlu0 %v13106_v21, %s12636_s20 }
 0x2a3   : > { %1875 = vrot.lane.b32.xlu1 %v13110_v26, %s12636_s20 }
 0x2a5   : > { %1877 = vrot.lane.b32.xlu0 %v13114_v30, %s12636_s20 }
 0x2a7   : > { %1891 = vrot.lane.b32.xlu1 %v13118_v32, %s12636_s20 }
 0x2a9   : > { %1893 = vrot.lane.b32.xlu0 %v13122_v33, %s12636_s20 }
 0x2ab   : > { %2419 = vrot.lane.b32.xlu1 %v13064_v42, %s12638_s21 }
 0x2ad   : > { %2421 = vrot.lane.b32.xlu0 %v13066_v46, %s12638_s21 }
 0x2af   : > { %2435 = vrot.lane.b32.xlu1 %v13070_v48, %s12638_s21 }
 0x2b1   : > { %2437 = vrot.lane.b32.xlu0 %v13074_v51, %s12638_s21 }
 0x2b3   : > { %2423 = vrot.lane.b32.xlu1 %v13078_v56, %s12638_s21 }
 0x2b5   : > { %2425 = vrot.lane.b32.xlu0 %v13082_v60, %s12638_s21 }
 0x2b7   : > { %2439 = vrot.lane.b32.xlu1 %v13086_v62, %s12638_s21 }
 0x2b9   : > { %2441 = vrot.lane.b32.xlu0 %v13090_v8, %s12638_s21 }
 0x2bb   : > { %2427 = vrot.lane.b32.xlu1 %v13094_v12, %s12638_s21 }
 0x2bd   : > { %2429 = vrot.lane.b32.xlu0 %v13098_v16, %s12638_s21 }
 0x2bf   : > { %2443 = vrot.lane.b32.xlu1 %v13102_v18, %s12638_s21 }
 0x2c1   : > { %2445 = vrot.lane.b32.xlu0 %v13106_v21, %s12638_s21 }
 0x2c3   : > { %2431 = vrot.lane.b32.xlu1 %v13110_v26, %s12638_s21 }
 0x2c5   : > { %2433 = vrot.lane.b32.xlu0 %v13114_v30, %s12638_s21 }
 0x2c7   : > { %2447 = vrot.lane.b32.xlu1 %v13118_v32, %s12638_s21 }
 0x2c9   : > { %2449 = vrot.lane.b32.xlu0 %v13122_v33, %s12638_s21 }
 0x2cb   : > { %2729 = vrot.lane.b32.xlu1 %v13064_v42, %s12639_s22 }
 0x2cd   : > { %2731 = vrot.lane.b32.xlu0 %v13066_v46, %s12639_s22 }
 0x2cf   : > { %2745 = vrot.lane.b32.xlu1 %v13070_v48, %s12639_s22 }
 0x2d1   : > { %2747 = vrot.lane.b32.xlu0 %v13074_v51, %s12639_s22 }
 0x2d3   : > { %2733 = vrot.lane.b32.xlu1 %v13078_v56, %s12639_s22 }
 0x2d5   : > { %2735 = vrot.lane.b32.xlu0 %v13082_v60, %s12639_s22 }
 0x2d7   : > { %2749 = vrot.lane.b32.xlu1 %v13086_v62, %s12639_s22 }
 0x2d9   : > { %2751 = vrot.lane.b32.xlu0 %v13090_v8, %s12639_s22 }
 0x2db   : > { %2737 = vrot.lane.b32.xlu1 %v13094_v12, %s12639_s22 }
 0x2dd   : > { %v1964_v34 = vpop.permute.xlu1 %1963  ;;  %2739 = vrot.lane.b32.xlu0 %v13098_v16, %s12639_s22 }
 0x2df   : > { %v1966_v36 = vpop.permute.xlu0 %1965  ;;  %2753 = vrot.lane.b32.xlu1 %v13102_v18, %s12639_s22 }
 0x2e1   : > { %v1980_v37 = vpop.permute.xlu1 %1979  ;;  %2755 = vrot.lane.b32.xlu0 %v13106_v21, %s12639_s22 }
 0x2e2   : > { %v2003_v40 = vsel %vm400_vm0, %v1980_v37, %v1964_v34  ;;  %v1995_v41 = vsel %vm400_vm0, %v1964_v34, %v1980_v37 }
 0x2e3   : > { %v1982_v43 = vpop.permute.xlu0 %1981  ;;  %2741 = vrot.lane.b32.xlu1 %v13110_v26, %s12639_s22  ;;  %v2024_v49 = vmul.f32 %v13223_v39, %v1995_v41  ;;  %v2023_v52 = vmul.f32 %v13220_v38, %v2003_v40 }
 0x2e4   : > { %v2004_v44 = vsel %vm400_vm0, %v1982_v43, %v1966_v36  ;;  %v1996_v45 = vsel %vm400_vm0, %v1966_v36, %v1982_v43 }
 0x2e5   : > { %v1968_v47 = vpop.permute.xlu1 %1967  ;;  %2743 = vrot.lane.b32.xlu0 %v13114_v30, %s12639_s22  ;;  %v2026_v50 = vmul.f32 %v13223_v39, %v1996_v45  ;;  %v2025_v53 = vmul.f32 %v13220_v38, %v2004_v44 }
 0x2e7   : > { %v1970_v54 = vpop.permute.xlu0 %1969  ;;  %2757 = vrot.lane.b32.xlu1 %v13118_v32, %s12639_s22  ;;  %v2057_v55 = vpack.c.bf16 %v2026_v50, %v2024_v49  ;;  %v2056_v57 = vpack.c.bf16 %v2025_v53, %v2023_v52 }
 0x2e9   : > { %2129 = vmatprep.subr.bf16.mxu1 %v2057_v55  ;;  %v1984_v58 = vpop.permute.xlu1 %1983  ;;  %2759 = vrot.lane.b32.xlu0 %v13122_v33, %s12639_s22 }
 0x2ea   : > { %v1997_v59 = vsel %vm400_vm0, %v1968_v47, %v1984_v58  ;;  %v2005_v61 = vsel %vm400_vm0, %v1984_v58, %v1968_v47  ;;  %2130 = vmatpush1.bf16.msra.mxu1 %v2056_v57  ;;  %v1911_v57 = vld [vmem:[%s17434_s1] sm:$0x3] }
 0x2eb   : > { %v1986_v63 = vpop.permute.xlu0 %1985  ;;  %3273 = vrot.lane.b32.xlu1 %v13064_v42, %s12640_s23  ;;  %v2027_v1 = vmul.f32 %v13220_v38, %v2005_v61  ;;  %v2028_v10 = vmul.f32 %v13223_v39, %v1997_v59 }
 0x2ec   : > { %v1998_v0 = vsel %vm400_vm0, %v1970_v54, %v1986_v63  ;;  %v2006_v9 = vsel %vm400_vm0, %v1986_v63, %v1970_v54  ;;  %v13307_v63 = vrot.slane %v1911_v57, %v12751_v6 }
 0x2ed   : > { %v2029_v11 = vmul.f32 %v13220_v38, %v2006_v9  ;;  %v2030_v13 = vmul.f32 %v13223_v39, %v1998_v0  ;;  %v1972_v14 = vpop.permute.xlu1 %1971  ;;  %3275 = vrot.lane.b32.xlu0 %v13066_v46, %s12640_s23  ;;  %v12314_v0 = vld [vmem:[%s17437_s4 + $0x40] sm:$0xff]  }
 0x2ef   : > { %v1974_v15 = vpop.permute.xlu0 %1973  ;;  %3289 = vrot.lane.b32.xlu1 %v13070_v48, %s12640_s23  ;;  %v2059_v17 = vpack.c.bf16 %v2030_v13, %v2028_v10  ;;  %v2058_v19 = vpack.c.bf16 %v2029_v11, %v2027_v1 }
 0x2f1   : > { %2131 = vmatprep.subr.bf16.mxu1 %v2059_v17  ;;  %v1988_v20 = vpop.permute.xlu1 %1987  ;;  %3291 = vrot.lane.b32.xlu0 %v13074_v51, %s12640_s23 }
 0x2f2   : > { %v1999_v22 = vsel %vm400_vm0, %v1972_v14, %v1988_v20  ;;  %v2007_v23 = vsel %vm400_vm0, %v1988_v20, %v1972_v14  ;;  %2132 = vmatpush1.bf16.msra.mxu1 %v2058_v19 }
 0x2f3   : > { %v1990_v24 = vpop.permute.xlu0 %1989  ;;  %3277 = vrot.lane.b32.xlu1 %v13078_v56, %s12640_s23  ;;  %v2031_v28 = vmul.f32 %v13220_v38, %v2007_v23  ;;  %v2032_v29 = vmul.f32 %v13223_v39, %v1999_v22 }
 0x2f4   : > { %v2000_v25 = vsel %vm400_vm0, %v1974_v15, %v1990_v24  ;;  %v2008_v27 = vsel %vm400_vm0, %v1990_v24, %v1974_v15 }
 0x2f5   : > { %v2033_v31 = vmul.f32 %v13220_v38, %v2008_v27  ;;  %v2034_v34 = vmul.f32 %v13223_v39, %v2000_v25  ;;  %v1976_v35 = vpop.permute.xlu1 %1975  ;;  %3279 = vrot.lane.b32.xlu0 %v13082_v60, %s12640_s23  ;;  %v12315_v27 = vld [vmem:[%s17437_s4 + $0x48] sm:$0xff]  }
 0x2f7   : > { %3293 = vrot.lane.b32.xlu1 %v13086_v62, %s12640_s23  ;;  %v1978_v36 = vpop.permute.xlu0 %1977  ;;  %v2061_v37 = vpack.c.bf16 %v2034_v34, %v2032_v29  ;;  %v2060_v40 = vpack.c.bf16 %v2033_v31, %v2031_v28 }
 0x2f9   : > { %2133 = vmatprep.subr.bf16.mxu1 %v2061_v37  ;;  %v1992_v41 = vpop.permute.xlu1 %1991  ;;  %3295 = vrot.lane.b32.xlu0 %v13090_v8, %s12640_s23 }
 0x2fa   : > { %v2001_v43 = vsel %vm400_vm0, %v1976_v35, %v1992_v41  ;;  %v2009_v44 = vsel %vm400_vm0, %v1992_v41, %v1976_v35  ;;  %2134 = vmatpush1.bf16.msra.mxu1 %v2060_v40 }
 0x2fb   : > { %3281 = vrot.lane.b32.xlu1 %v13094_v12, %s12640_s23  ;;  %v1994_v45 = vpop.permute.xlu0 %1993  ;;  %v2035_v50 = vmul.f32 %v13220_v38, %v2009_v44  ;;  %v2036_v52 = vmul.f32 %v13223_v39, %v2001_v43 }
 0x2fc   : > { %v2002_v47 = vsel %vm400_vm0, %v1978_v36, %v1994_v45  ;;  %v2010_v49 = vsel %vm400_vm0, %v1994_v45, %v1978_v36 }
 0x2fd   : > { %v2037_v53 = vmul.f32 %v13220_v38, %v2010_v49  ;;  %v2038_v54 = vmul.f32 %v13223_v39, %v2002_v47  ;;  %v1864_v55 = vpop.permute.xlu1 %1863  ;;  %3283 = vrot.lane.b32.xlu0 %v13098_v16, %s12640_s23  ;;  %v13310_v38 = vrot.slane %v1911_v57, %v12754_v7 }
 0x2ff   : > { %3297 = vrot.lane.b32.xlu1 %v13102_v18, %s12640_s23  ;;  %v1866_v58 = vpop.permute.xlu0 %1865  ;;  %v2063_v59 = vpack.c.bf16 %v2038_v54, %v2036_v52  ;;  %v2062_v61 = vpack.c.bf16 %v2037_v53, %v2035_v50  ;;  %v12316_v50 = vld [vmem:[%s17437_s4 + $0x50] sm:$0xff]  }
 0x301   : > { %v1880_v39 = vpop.permute.xlu1 %1879  ;;  %3299 = vrot.lane.b32.xlu0 %v13106_v21, %s12640_s23  ;;  %2135 = vmatprep.subr.bf16.mxu1 %v2063_v59 }
 0x302   : > { %v1895_v9 = vsel %vm369_vm1, %v1864_v55, %v1880_v39  ;;  %v1903_v1 = vsel %vm369_vm1, %v1880_v39, %v1864_v55  ;;  %2136 = vmatpush1.bf16.msra.mxu1 %v2062_v61 }
 0x303   : > { %3285 = vrot.lane.b32.xlu1 %v13110_v26, %s12640_s23  ;;  %v1882_v10 = vpop.permute.xlu0 %1881  ;;  %v1923_v11 = vmul.f32 %v13307_v63, %v1903_v1  ;;  %v1924_v15 = vmul.f32 %v13310_v38, %v1895_v9 }
 0x304   : > { %v1896_v13 = vsel %vm369_vm1, %v1866_v58, %v1882_v10  ;;  %v1904_v14 = vsel %vm369_vm1, %v1882_v10, %v1866_v58 }
 0x305   : > { %v1925_v17 = vmul.f32 %v13307_v63, %v1904_v14  ;;  %v1926_v19 = vmul.f32 %v13310_v38, %v1896_v13  ;;  %v1868_v20 = vpop.permute.xlu1 %1867  ;;  %3287 = vrot.lane.b32.xlu0 %v13114_v30, %s12640_s23  ;;  %10633 = vmatmul.mubr.msk.bf16.vlgmr.msra.gmra.mrb[0].mxu1 %vm2104_vm10, %v12314_v0  ;;  %v12317_v13 = vld [vmem:[%s17437_s4 + $0x58] sm:$0xff]  }
 0x306   : > { %2171 = vmatprep.mubr.bf16.mxu1 %v17453_v2 }
 0x307   : > { %v1955_v22 = vpack.c.bf16 %v1925_v17, %v1923_v11  ;;  %3301 = vrot.lane.b32.xlu1 %v13118_v32, %s12640_s23  ;;  %v1870_v23 = vpop.permute.xlu0 %1869  ;;  %v1956_v24 = vpack.c.bf16 %v1926_v19, %v1924_v15 }
 0x309   : > { %v1884_v25 = vpop.permute.xlu1 %1883  ;;  %3303 = vrot.lane.b32.xlu0 %v13122_v33, %s12640_s23  ;;  %2306 = vmatprep.subr.bf16.mxu1 %v1956_v24 }
 0x30a   : > { %v1897_v28 = vsel %vm369_vm1, %v1868_v20, %v1884_v25  ;;  %v1905_v29 = vsel %vm369_vm1, %v1884_v25, %v1868_v20  ;;  %2307 = vmatpush1.bf16.msra.mxu1 %v1955_v22 }
 0x30b   : > { %3583 = vrot.lane.b32.xlu1 %v13064_v42, %s12641_s24  ;;  %v1886_v31 = vpop.permute.xlu0 %1885  ;;  %v1927_v34 = vmul.f32 %v13307_v63, %v1905_v29  ;;  %v1928_v37 = vmul.f32 %v13310_v38, %v1897_v28  ;;  %v10657_v28 = vld [vmem:[%s17434_s1 + $0x4] sm:$0x3] }
 0x30c   : > { %v1898_v35 = vsel %vm369_vm1, %v1870_v23, %v1886_v31  ;;  %v1906_v36 = vsel %vm369_vm1, %v1886_v31, %v1870_v23 }
 0x30d   : > { %v1929_v40 = vmul.f32 %v13307_v63, %v1906_v36  ;;  %v1930_v41 = vmul.f32 %v13310_v38, %v1898_v35  ;;  %v1872_v43 = vpop.permute.xlu1 %1871  ;;  %3585 = vrot.lane.b32.xlu0 %v13066_v46, %s12641_s24  ;;  %10634 = vmatmul.mubr.msk.bf16.gmra.mrb[4].mxu1 %vm2104_vm10, %v12315_v27  ;;  %v12318_v35 = vld [vmem:[%s17437_s4 + $0x60] sm:$0xff]  }
 0x30e   : > { %2181 = vmatprep.mubr.bf16.mxu1 %v17453_v2 }
 0x30f   : > { %v1957_v44 = vpack.c.bf16 %v1929_v40, %v1927_v34  ;;  %3599 = vrot.lane.b32.xlu1 %v13070_v48, %s12641_s24  ;;  %v1874_v45 = vpop.permute.xlu0 %1873  ;;  %v1958_v47 = vpack.c.bf16 %v1930_v41, %v1928_v37 }
 0x311   : > { %v1888_v49 = vpop.permute.xlu1 %1887  ;;  %3601 = vrot.lane.b32.xlu0 %v13074_v51, %s12641_s24  ;;  %2308 = vmatprep.subr.bf16.mxu1 %v1958_v47 }
 0x312   : > { %v1899_v52 = vsel %vm369_vm1, %v1872_v43, %v1888_v49  ;;  %v1907_v53 = vsel %vm369_vm1, %v1888_v49, %v1872_v43  ;;  %2309 = vmatpush1.bf16.msra.mxu1 %v1957_v44 }
 0x313   : > { %3587 = vrot.lane.b32.xlu1 %v13078_v56, %s12641_s24  ;;  %v1890_v54 = vpop.permute.xlu0 %1889  ;;  %v1931_v55 = vmul.f32 %v13307_v63, %v1907_v53  ;;  %v1932_v59 = vmul.f32 %v13310_v38, %v1899_v52 }
 0x314   : > { %v1900_v57 = vsel %vm369_vm1, %v1874_v45, %v1890_v54  ;;  %v1908_v58 = vsel %vm369_vm1, %v1890_v54, %v1874_v45 }
 0x315   : > { %v1933_v61 = vmul.f32 %v13307_v63, %v1908_v58  ;;  %v1934_v39 = vmul.f32 %v13310_v38, %v1900_v57  ;;  %v1876_v0 = vpop.permute.xlu1 %1875  ;;  %3589 = vrot.lane.b32.xlu0 %v13082_v60, %s12641_s24  ;;  %10635 = vmatmul.mubr.msk.bf16.gmra.mrb[8].mxu1 %vm2104_vm10, %v12316_v50  ;;  %v12319_v50 = vld [vmem:[%s17437_s4 + $0x68] sm:$0xff]   ;;  %v12320_v57 = vld [vmem:[%s17437_s4 + $0x70] sm:$0xff]  }
 0x316   : > { %2191 = vmatprep.mubr.bf16.mxu1 %v17453_v2 }
 0x317   : > { %v1959_v9 = vpack.c.bf16 %v1933_v61, %v1931_v55  ;;  %3603 = vrot.lane.b32.xlu1 %v13086_v62, %s12641_s24  ;;  %v1878_v1 = vpop.permute.xlu0 %1877  ;;  %v1960_v10 = vpack.c.bf16 %v1934_v39, %v1932_v59  ;;  %v12321_v39 = vld [vmem:[%s17437_s4 + $0x78] sm:$0xff]  }
 0x319   : > { %v1892_v11 = vpop.permute.xlu1 %1891  ;;  %3605 = vrot.lane.b32.xlu0 %v13090_v8, %s12641_s24  ;;  %2310 = vmatprep.subr.bf16.mxu1 %v1960_v10  ;;  %v2472_v10 = vrot.slane %v10657_v28, %v12751_v6 }
 0x31a   : > { %v1901_v14 = vsel %vm369_vm1, %v1876_v0, %v1892_v11  ;;  %v1909_v15 = vsel %vm369_vm1, %v1892_v11, %v1876_v0  ;;  %2311 = vmatpush1.bf16.msra.mxu1 %v1959_v9 }
 0x31b   : > { %3591 = vrot.lane.b32.xlu1 %v13094_v12, %s12641_s24  ;;  %v1894_v17 = vpop.permute.xlu0 %1893  ;;  %v1935_v19 = vmul.f32 %v13307_v63, %v1909_v15  ;;  %v1936_v23 = vmul.f32 %v13310_v38, %v1901_v14 }
 0x31c   : > { %v1902_v20 = vsel %vm369_vm1, %v1878_v1, %v1894_v17  ;;  %v1910_v22 = vsel %vm369_vm1, %v1894_v17, %v1878_v1 }
 0x31d   : > { %v1937_v24 = vmul.f32 %v13307_v63, %v1910_v22  ;;  %v1938_v25 = vmul.f32 %v13310_v38, %v1902_v20  ;;  %v13406_v27 = vpop.permute.xlu1 %2419  ;;  %3593 = vrot.lane.b32.xlu0 %v13098_v16, %s12641_s24  ;;  %10636 = vmatmul.mubr.msk.bf16.gmra.mrb[12].mxu1 %vm2104_vm10, %v12317_v13  ;;  %v13418_v38 = vrot.slane %v10657_v28, %v12754_v7  ;;  %v12322_v22 = vld [vmem:[%s17437_s4] sm:$0xff]  }
 0x31e   : > { %2201 = vmatprep.mubr.bf16.mxu1 %v17453_v2 }
 0x31f   : > { %v1961_v29 = vpack.c.bf16 %v1937_v24, %v1935_v19  ;;  %3607 = vrot.lane.b32.xlu1 %v13102_v18, %s12641_s24  ;;  %v2422_v63 = vpop.permute.xlu0 %2421  ;;  %v1962_v31 = vpack.c.bf16 %v1938_v25, %v1936_v23 }
 0x321   : > { %v2436_v34 = vpop.permute.xlu1 %2435  ;;  %3609 = vrot.lane.b32.xlu0 %v13106_v21, %s12641_s24  ;;  %2312 = vmatprep.subr.bf16.mxu1 %v1962_v31 }
 0x322   : > { %v2451_v36 = vsel %vm657_vm2, %v13406_v27, %v2436_v34  ;;  %2313 = vmatpush1.bf16.msra.mxu1 %v1961_v29  ;;  %v2459_v13 = vsel %vm657_vm2, %v2436_v34, %v13406_v27 }
 0x323   : > { %3595 = vrot.lane.b32.xlu1 %v13110_v26, %s12641_s24  ;;  %v2438_v37 = vpop.permute.xlu0 %2437  ;;  %v2480_v41 = vmul.f32 %v13418_v38, %v2451_v36  ;;  %v2479_v23 = vmul.f32 %v2472_v10, %v2459_v13 }
 0x324   : > { %v2452_v40 = vsel %vm657_vm2, %v2422_v63, %v2438_v37  ;;  %v2460_v9 = vsel %vm657_vm2, %v2438_v37, %v2422_v63 }
 0x325   : > { %v2482_v43 = vmul.f32 %v13418_v38, %v2452_v40  ;;  %v2424_v44 = vpop.permute.xlu1 %2423  ;;  %3597 = vrot.lane.b32.xlu0 %v13114_v30, %s12641_s24  ;;  %10637 = vmatmul.mubr.msk.bf16.gmra.mrb[16].mxu1 %vm2104_vm10, %v12318_v35  ;;  %v2481_v14 = vmul.f32 %v2472_v10, %v2460_v9 }
 0x326   : > { %2211 = vmatprep.mubr.bf16.mxu1 %v17453_v2 }
 0x327   : > { %3611 = vrot.lane.b32.xlu1 %v13118_v32, %s12641_s24  ;;  %v2426_v45 = vpop.permute.xlu0 %2425  ;;  %v2513_v47 = vpack.c.bf16 %v2482_v43, %v2480_v41  ;;  %v2512_v29 = vpack.c.bf16 %v2481_v14, %v2479_v23  ;;  %v12326_v23 = vld [vmem:[%s17437_s4 + $0x20] sm:$0xff]  }
 0x329   : > { %v2440_v49 = vpop.permute.xlu1 %2439  ;;  %3613 = vrot.lane.b32.xlu0 %v13122_v33, %s12641_s24  ;;  %2584 = vmatprep.subr.bf16.mxu1 %v2513_v47 }
 0x32a   : > { %v2453_v15 = vsel %vm657_vm2, %v2424_v44, %v2440_v49  ;;  %v2461_v25 = vsel %vm657_vm2, %v2440_v49, %v2424_v44 }
 0x32b   : > { %3893 = vrot.lane.b32.xlu1 %v13064_v42, %s12642_s25  ;;  %v2442_v52 = vpop.permute.xlu0 %2441  ;;  %v2484_v27 = vmul.f32 %v13418_v38, %v2453_v15  ;;  %v2483_v37 = vmul.f32 %v2472_v10, %v2461_v25 }
 0x32c   : > { %v2454_v11 = vsel %vm657_vm2, %v2426_v45, %v2442_v52  ;;  %v2462_v17 = vsel %vm657_vm2, %v2442_v52, %v2426_v45 }
 0x32d   : > { %v2428_v53 = vpop.permute.xlu1 %2427  ;;  %3895 = vrot.lane.b32.xlu0 %v13066_v46, %s12642_s25  ;;  %10638 = vmatmul.mubr.msk.bf16.gmra.mrb[20].mxu1 %vm2104_vm10, %v12319_v50  ;;  %v2486_v19 = vmul.f32 %v13418_v38, %v2454_v11  ;;  %v2485_v63 = vmul.f32 %v2472_v10, %v2462_v17  ;;  %v13531_v50 = vld [vmem:[%s17434_s1 + $0x6] sm:$0x3] }
 0x32e   : > { %2221 = vmatprep.mubr.bf16.mxu1 %v17453_v2  ;;  %v13552_v9 = vrot.slane %v13531_v50, %v12754_v7 }
 0x32f   : > { %3909 = vrot.lane.b32.xlu1 %v13070_v48, %s12642_s25  ;;  %v2430_v54 = vpop.permute.xlu0 %2429  ;;  %v2515_v36 = vpack.c.bf16 %v2486_v19, %v2484_v27  ;;  %v2514_v45 = vpack.c.bf16 %v2485_v63, %v2483_v37  ;;  %v4513_v27 = vld [vmem:[%s17438_s5] sm:$0xff]  ;;  %v4514_v63 = vld [vmem:[%s17438_s5 + $0x8] sm:$0xff] }
 0x330   : > { %v4517_v37 = vld [vmem:[%s17438_s5 + $0x20] sm:$0xff] }
 0x331   : > { %v2444_v55 = vpop.permute.xlu1 %2443  ;;  %3911 = vrot.lane.b32.xlu0 %v13074_v51, %s12642_s25 }
 0x332   : > { %v2455_v31 = vsel %vm657_vm2, %v2428_v53, %v2444_v55  ;;  %v2463_v41 = vsel %vm657_vm2, %v2444_v55, %v2428_v53 }
 0x333   : > { %3897 = vrot.lane.b32.xlu1 %v13078_v56, %s12642_s25  ;;  %v2446_v58 = vpop.permute.xlu0 %2445  ;;  %v2488_v43 = vmul.f32 %v13418_v38, %v2455_v31 }
 0x334   : > { %v2456_v24 = vsel %vm657_vm2, %v2430_v54, %v2446_v58  ;;  %v2464_v34 = vsel %vm657_vm2, %v2446_v58, %v2430_v54  ;;  %v2487_v58 = vmul.f32 %v2472_v10, %v2463_v41  ;;  %v12328_v41 = vld [vmem:[%s17437_s4 + $0x30] sm:$0xff]  }
 0x335   : > { %3899 = vrot.lane.b32.xlu0 %v13082_v60, %s12642_s25  ;;  %10639 = vmatmul.mubr.msk.bf16.gmra.mrb[24].mxu1 %vm2104_vm10, %v12320_v57  ;;  %v2432_v59 = vpop.permute.xlu1 %2431  ;;  %v2490_v35 = vmul.f32 %v13418_v38, %v2456_v24  ;;  %v2489_v47 = vmul.f32 %v2472_v10, %v2464_v34  ;;  %v12323_v57 = vld [vmem:[%s17437_s4 + $0x8] sm:$0xff]   ;;  %v4515_v34 = vld [vmem:[%s17438_s5 + $0x10] sm:$0xff] }
 0x336   : > { %2231 = vmatprep.mubr.bf16.mxu1 %v17453_v2 }
 0x337   : > { %3913 = vrot.lane.b32.xlu1 %v13086_v62, %s12642_s25  ;;  %v2434_v61 = vpop.permute.xlu0 %2433  ;;  %v2517_v55 = vpack.c.bf16 %v2490_v35, %v2488_v43  ;;  %v2516_v11 = vpack.c.bf16 %v2489_v47, %v2487_v58  ;;  %v4518_v43 = vld [vmem:[%s17438_s5 + $0x28] sm:$0xff]  ;;  %v4519_v47 = vld [vmem:[%s17438_s5 + $0x30] sm:$0xff] }
 0x338   : > { %v4522_v58 = vld [vmem:[%s17438_s5 + $0x48] sm:$0xff] }
 0x339   : > { %3915 = vrot.lane.b32.xlu0 %v13090_v8, %s12642_s25  ;;  %v2448_v1 = vpop.permute.xlu1 %2447 }
 0x33a   : > { %v2457_v49 = vsel %vm657_vm2, %v2432_v59, %v2448_v1 }
 0x33b   : > { %3901 = vrot.lane.b32.xlu1 %v13094_v12, %s12642_s25  ;;  %v2450_v0 = vpop.permute.xlu0 %2449 }
 0x33c   : > { %v2458_v40 = vsel %vm657_vm2, %v2434_v61, %v2450_v0  ;;  %v2466_v52 = vsel %vm657_vm2, %v2450_v0, %v2434_v61  ;;  %v2465_v61 = vsel %vm657_vm2, %v2448_v1, %v2432_v59  ;;  %v2492_v0 = vmul.f32 %v13418_v38, %v2457_v49  ;;  %v4520_v49 = vld [vmem:[%s17438_s5 + $0x38] sm:$0xff] }
 0x33d   : > { %3903 = vrot.lane.b32.xlu0 %v13098_v16, %s12642_s25  ;;  %10640 = vmatmul.mubr.msk.bf16.gmra.mrb[28].mxu1 %vm2104_vm10, %v12321_v39  ;;  %v13504_v28 = vpop.permute.xlu1 %2729  ;;  %v2494_v53 = vmul.f32 %v13418_v38, %v2458_v40  ;;  %v2493_v13 = vmul.f32 %v2472_v10, %v2466_v52  ;;  %v2491_v59 = vmul.f32 %v2472_v10, %v2465_v61  ;;  %v12325_v10 = vld [vmem:[%s17437_s4 + $0x18] sm:$0xff]  }
 0x33e   : > { %2338 = vmatprep.mubr.bf16.mxu1 %v17453_v2 }
 0x33f   : > { %3917 = vrot.lane.b32.xlu1 %v13102_v18, %s12642_s25  ;;  %v13492_v20 = vpop.permute.xlu0 %2731  ;;  %v2519_v38 = vpack.c.bf16 %v2494_v53, %v2492_v0  ;;  %v2518_v17 = vpack.c.bf16 %v2493_v13, %v2491_v59  ;;  %v4521_v53 = vld [vmem:[%s17438_s5 + $0x40] sm:$0xff] }
 0x341   : > { %3919 = vrot.lane.b32.xlu0 %v13106_v21, %s12642_s25  ;;  %v13536_v54 = vpop.permute.xlu1 %2745 }
 0x342   : > { %v2761_v14 = vsel %vm817_vm5, %v13504_v28, %v13536_v54 }
 0x343   : > { %3905 = vrot.lane.b32.xlu1 %v13110_v26, %s12642_s25  ;;  %v13522_v44 = vpop.permute.xlu0 %2747  ;;  %v2790_v1 = vmul.f32 %v13552_v9, %v2761_v14  ;;  %v4524_v14 = vld [vmem:[%s17438_s5 + $0x58] sm:$0xff] }
 0x344   : > { %v2762_v39 = vsel %vm817_vm5, %v13492_v20, %v13522_v44  ;;  %v2770_v61 = vsel %vm817_vm5, %v13522_v44, %v13492_v20  ;;  %v2769_v20 = vsel %vm817_vm5, %v13536_v54, %v13504_v28  ;;  %v12330_v28 = vld [vmem:[%s17437_s4 + $0x80] sm:$0xff]  }
 0x345   : > { %3907 = vrot.lane.b32.xlu0 %v13114_v30, %s12642_s25  ;;  %10649 = vmatmul.mubr.msk.bf16.vlgmr.msra.gmra.mrb[0].mxu1 %vm2104_vm10, %v12322_v22  ;;  %v2792_v15 = vmul.f32 %v13552_v9, %v2762_v39  ;;  %v12324_v22 = vld [vmem:[%s17437_s4 + $0x10] sm:$0xff]   ;;  %v2734_v25 = vpop.permute.xlu1 %2733 }
 0x346   : > { %2585 = vmatpush1.bf16.msra.mxu1 %v2512_v29  ;;  %2348 = vmatprep.mubr.bf16.mxu1 %v17453_v2  ;;  %v12327_v29 = vld [vmem:[%s17437_s4 + $0x28] sm:$0xff]   ;;  %v4523_v39 = vld [vmem:[%s17438_s5 + $0x50] sm:$0xff] }
 0x347   : > { %2586 = vmatprep.subr.bf16.mxu1 %v2515_v36  ;;  %3921 = vrot.lane.b32.xlu1 %v13118_v32, %s12642_s25  ;;  %v2823_v19 = vpack.c.bf16 %v2792_v15, %v2790_v1  ;;  %v2736_v24 = vpop.permute.xlu0 %2735  ;;  %v4516_v36 = vld [vmem:[%s17438_s5 + $0x18] sm:$0xff] }
 0x349   : > { %3923 = vrot.lane.b32.xlu0 %v13122_v33, %s12642_s25  ;;  %v2750_v35 = vpop.permute.xlu1 %2749 }
 0x34a   : > { %2587 = vmatpush1.bf16.msra.mxu1 %v2514_v45 }
 0x34b   : > { %2588 = vmatprep.subr.bf16.mxu1 %v2517_v55  ;;  %4203 = vrot.lane.b32.xlu1 %v13064_v42, %s12643_s26  ;;  %v2752_v31 = vpop.permute.xlu0 %2751 }
 0x34c   : > { %v2764_v13 = vsel %vm817_vm5, %v2736_v24, %v2752_v31  ;;  %v2772_v59 = vsel %vm817_vm5, %v2752_v31, %v2736_v24 }
 0x34d   : > { %4205 = vrot.lane.b32.xlu0 %v13066_v46, %s12643_s26  ;;  %10650 = vmatmul.mubr.msk.bf16.gmra.mrb[4].mxu1 %vm2104_vm10, %v12323_v57  ;;  %v2738_v45 = vpop.permute.xlu1 %2737  ;;  %v12329_v57 = vld [vmem:[%s17437_s4 + $0x38] sm:$0xff]   ;;  %v2796_v1 = vmul.f32 %v13552_v9, %v2764_v13 }
 0x34e   : > { %2589 = vmatpush1.bf16.msra.mxu1 %v2516_v11  ;;  %2358 = vmatprep.mubr.bf16.mxu1 %v17453_v2  ;;  %v2782_v11 = vrot.slane %v13531_v50, %v12751_v6  ;;  %v2763_v50 = vsel %vm817_vm5, %v2734_v25, %v2750_v35 }
 0x34f   : > { %2590 = vmatprep.subr.bf16.mxu1 %v2519_v38  ;;  %4219 = vrot.lane.b32.xlu1 %v13070_v48, %s12643_s26  ;;  %v2740_v40 = vpop.permute.xlu0 %2739  ;;  %v4525_v38 = vld [vmem:[%s17438_s5 + $0x60] sm:$0xff] }
 0x350   : > { %v2791_v15 = vmul.f32 %v2782_v11, %v2770_v61  ;;  %v2789_v54 = vmul.f32 %v2782_v11, %v2769_v20 }
 0x351   : > { %4221 = vrot.lane.b32.xlu0 %v13074_v51, %s12643_s26  ;;  %v2754_v55 = vpop.permute.xlu1 %2753 }
 0x352   : > { %2591 = vmatpush1.bf16.msra.mxu1 %v2518_v17  ;;  %v2822_v24 = vpack.c.bf16 %v2791_v15, %v2789_v54  ;;  %v3056_v54 = vpack.c.bf16 %v13066_v46, %v13064_v42  ;;  %v3061_v42 = vpack.c.bf16 %v13106_v21, %v13102_v18  ;;  %v12339_v46 = vld [vmem:[%s17437_s4 + $0xc8] sm:$0xff]  }
 0x353   : > { %2894 = vmatprep.subr.bf16.mxu1 %v2823_v19  ;;  %4207 = vrot.lane.b32.xlu1 %v13078_v56, %s12643_s26  ;;  %v2756_v52 = vpop.permute.xlu0 %2755  ;;  %v4526_v19 = vld [vmem:[%s17438_s5 + $0x68] sm:$0xff] }
 0x354   : > { %v2766_v17 = vsel %vm817_vm5, %v2740_v40, %v2756_v52  ;;  %v2774_v31 = vsel %vm817_vm5, %v2756_v52, %v2740_v40  ;;  %v2773_v40 = vsel %vm817_vm5, %v2754_v55, %v2738_v45 }
 0x355   : > { %4209 = vrot.lane.b32.xlu0 %v13082_v60, %s12643_s26  ;;  %10651 = vmatmul.mubr.msk.bf16.gmra.mrb[8].mxu1 %vm2104_vm10, %v12324_v22  ;;  %v2742_v44 = vpop.permute.xlu1 %2741  ;;  %v2771_v22 = vsel %vm817_vm5, %v2750_v35, %v2734_v25 }
 0x356   : > { %2368 = vmatprep.mubr.bf16.mxu1 %v17453_v2  ;;  %v2793_v35 = vmul.f32 %v2782_v11, %v2771_v22  ;;  %v10755_v22 = vld [vmem:[%s17434_s1 + $0xa] sm:$0x3] }
 0x357   : > { %4223 = vrot.lane.b32.xlu1 %v13086_v62, %s12643_s26  ;;  %v2744_v0 = vpop.permute.xlu0 %2743 }
 0x359   : > { %4225 = vrot.lane.b32.xlu0 %v13090_v8, %s12643_s26 }
 0x35b   : > { %4211 = vrot.lane.b32.xlu1 %v13094_v12, %s12643_s26 }
 0x35d   : > { %4213 = vrot.lane.b32.xlu0 %v13098_v16, %s12643_s26  ;;  %10652 = vmatmul.mubr.msk.bf16.gmra.mrb[12].mxu1 %vm2104_vm10, %v12325_v10  ;;  %v2794_v10 = vmul.f32 %v13552_v9, %v2763_v50  ;;  %v3057_v50 = vpack.c.bf16 %v13074_v51, %v13070_v48  ;;  %v12334_v48 = vld [vmem:[%s17437_s4 + $0xa0] sm:$0xff]   ;;  %v12335_v51 = vld [vmem:[%s17437_s4 + $0xa8] sm:$0xff]  }
 0x35e   : > { %2378 = vmatprep.mubr.bf16.mxu1 %v17453_v2 }
 0x35f   : > { %4227 = vrot.lane.b32.xlu1 %v13102_v18, %s12643_s26  ;;  %v2825_v25 = vpack.c.bf16 %v2796_v1, %v2794_v10  ;;  %v12338_v1 = vld [vmem:[%s17437_s4 + $0xc0] sm:$0xff]   ;;  %v3058_v10 = vpack.c.bf16 %v13082_v60, %v13078_v56  ;;  %v3060_v60 = vpack.c.bf16 %v13098_v16, %v13094_v12  ;;  %v12340_v12 = vld [vmem:[%s17437_s4 + $0xd0] sm:$0xff]   ;;  %v12341_v16 = vld [vmem:[%s17437_s4 + $0xd8] sm:$0xff]  }
 0x361   : > { %4229 = vrot.lane.b32.xlu0 %v13106_v21, %s12643_s26  ;;  %v3063_v21 = vpack.c.bf16 %v13122_v33, %v13118_v32 }
 0x363   : > { %4215 = vrot.lane.b32.xlu1 %v13110_v26, %s12643_s26 }
 0x365   : > { %4217 = vrot.lane.b32.xlu0 %v13114_v30, %s12643_s26  ;;  %10653 = vmatmul.mubr.msk.bf16.gmra.mrb[16].mxu1 %vm2104_vm10, %v12326_v23  ;;  %v2760_v23 = vpop.permute.xlu0 %2759 }
 0x366   : > { %2388 = vmatprep.mubr.bf16.mxu1 %v17453_v2 }
 0x367   : > { %4231 = vrot.lane.b32.xlu1 %v13118_v32, %s12643_s26 }
 0x369   : > { %4233 = vrot.lane.b32.xlu0 %v13122_v33, %s12643_s26 }
 0x36b   : > { %4531 = vperm.xlu1 %12276, %v4513_v27   ;;  %v2795_v27 = vmul.f32 %v2782_v11, %v2772_v59  ;;  %v3276_v59 = vpop.permute.xlu0 %3275 }
 0x36d   : > { %10654 = vmatmul.mubr.msk.bf16.gmra.mrb[20].mxu1 %vm2104_vm10, %v12327_v29  ;;  %4536 = vperm.xlu0 %12275, %v4514_v63   ;;  %v2765_v29 = vsel %vm817_vm5, %v2738_v45, %v2754_v55  ;;  %v4527_v63 = vld [vmem:[%s17438_s5 + $0x70] sm:$0xff]  ;;  %v12331_v45 = vld [vmem:[%s17437_s4 + $0x88] sm:$0xff]   ;;  %v2797_v55 = vmul.f32 %v2782_v11, %v2773_v40 }
 0x36e   : > { %2398 = vmatprep.mubr.bf16.mxu1 %v17453_v2 }
 0x36f   : > { %4541 = vperm.xlu1 %12276, %v4515_v34   ;;  %v2800_v34 = vmul.f32 %v13552_v9, %v2766_v17  ;;  %v3059_v17 = vpack.c.bf16 %v13090_v8, %v13086_v62  ;;  %v13778_v8 = vrot.slane %v10755_v22, %v12754_v7 }
 0x371   : > { %4546 = vperm.xlu0 %12275, %v4516_v36   ;;  %v2758_v36 = vpop.permute.xlu1 %2757 }
 0x372   : > { %v2767_v52 = vsel %vm817_vm5, %v2742_v44, %v2758_v36 }
 0x373   : > { %4551 = vperm.xlu1 %12276, %v4517_v37   ;;  %v2768_v37 = vsel %vm817_vm5, %v2744_v0, %v2760_v23  ;;  %v2802_v61 = vmul.f32 %v13552_v9, %v2767_v52 }
 0x375   : > { %10655 = vmatmul.mubr.msk.bf16.gmra.mrb[24].mxu1 %vm2104_vm10, %v12328_v41  ;;  %4556 = vperm.xlu0 %12275, %v4518_v43   ;;  %v4528_v41 = vld [vmem:[%s17438_s5 + $0x78] sm:$0xff]  ;;  %v2798_v43 = vmul.f32 %v13552_v9, %v2765_v29 }
 0x376   : > { %2408 = vmatprep.mubr.bf16.mxu1 %v17453_v2 }
 0x377   : > { %4561 = vperm.xlu1 %12276, %v4519_v47   ;;  %v2824_v47 = vpack.c.bf16 %v2795_v27, %v2793_v35  ;;  %v3062_v27 = vpack.c.bf16 %v13114_v30, %v13110_v26  ;;  %v12342_v30 = vld [vmem:[%s17437_s4 + $0xe0] sm:$0xff]  }
 0x379   : > { %4566 = vperm.xlu0 %12275, %v4520_v49   ;;  %v2799_v49 = vmul.f32 %v2782_v11, %v2774_v31 }
 0x37b   : > { %4571 = vperm.xlu1 %12276, %v4521_v53   ;;  %v2776_v53 = vsel %vm817_vm5, %v2760_v23, %v2744_v0  ;;  %v2826_v13 = vpack.c.bf16 %v2799_v49, %v2797_v55 }
 0x37d   : > { %10656 = vmatmul.mubr.msk.bf16.gmra.mrb[28].mxu1 %vm2104_vm10, %v12329_v57  ;;  %4576 = vperm.xlu0 %12275, %v4522_v58   ;;  %v2804_v57 = vmul.f32 %v13552_v9, %v2768_v37  ;;  %v2827_v58 = vpack.c.bf16 %v2800_v34, %v2798_v43  ;;  %v12333_v9 = vld [vmem:[%s17437_s4 + $0x98] sm:$0xff]   ;;  %v12343_v34 = vld [vmem:[%s17437_s4 + $0xe8] sm:$0xff]   ;;  %v12344_v37 = vld [vmem:[%s17437_s4 + $0xf0] sm:$0xff]  }
 0x37e   : > { %2616 = vmatprep.mubr.bf16.mxu1 %v17453_v2  ;;  %v12345_v43 = vld [vmem:[%s17437_s4 + $0xf8] sm:$0xff]  }
 0x37f   : > { %4581 = vperm.xlu1 %12276, %v4523_v39   ;;  %v2775_v39 = vsel %vm817_vm5, %v2758_v36, %v2742_v44  ;;  %v2829_v0 = vpack.c.bf16 %v2804_v57, %v2802_v61  ;;  %v12332_v44 = vld [vmem:[%s17437_s4 + $0x90] sm:$0xff]  }
 0x380   : > { %v2801_v20 = vmul.f32 %v2782_v11, %v2775_v39 }
 0x381   : > { %4586 = vperm.xlu0 %12275, %v4524_v14   ;;  %v2803_v14 = vmul.f32 %v2782_v11, %v2776_v53  ;;  %v12336_v11 = vld [vmem:[%s17437_s4 + $0xb0] sm:$0xff]   ;;  %v3326_v53 = vrot.slane %v10755_v22, %v12751_v6 }
 0x383   : > { %4591 = vperm.xlu1 %12276, %v4525_v38   ;;  %v2828_v15 = vpack.c.bf16 %v2803_v14, %v2801_v20  ;;  %v12337_v38 = vld [vmem:[%s17437_s4 + $0xb8] sm:$0xff]   ;;  %v12346_v14 = vld [vmem:[%s17437_s4 + $0x100] sm:$0xff]  }
 0x385   : > { %4596 = vperm.xlu0 %12275, %v4526_v19   ;;  %10682 = vmatmul.mubr.msk.bf16.vlgmr.msra.gmra.mrb[0].mxu1 %vm2104_vm10, %v12330_v28  ;;  %v13757_v28 = vpop.permute.xlu1 %3273  ;;  %v3292_v19 = vpop.permute.xlu0 %3291 }
 0x386   : > { %2895 = vmatpush1.bf16.msra.mxu1 %v2822_v24  ;;  %2626 = vmatprep.mubr.bf16.mxu1 %v17453_v2  ;;  %v3314_v62 = vsel %vm1115_vm6, %v3292_v19, %v3276_v59  ;;  %v3306_v49 = vsel %vm1115_vm6, %v3276_v59, %v3292_v19 }
 0x387   : > { %2896 = vmatprep.subr.bf16.mxu1 %v2825_v25  ;;  %4601 = vperm.xlu1 %12276, %v4527_v63   ;;  %v3336_v18 = vmul.f32 %v13778_v8, %v3314_v62 }
 0x389   : > { %4606 = vperm.xlu0 %12275, %v4528_v41   ;;  %v3290_v23 = vpop.permute.xlu1 %3289  ;;  %v3280_v32 = vpop.permute.xlu0 %3279 }
 0x38a   : > { %2897 = vmatpush1.bf16.msra.mxu1 %v2824_v47  ;;  %v3313_v56 = vsel %vm1115_vm6, %v3290_v23, %v13757_v28 }
 0x38b   : > { %2898 = vmatprep.subr.bf16.mxu1 %v2827_v58  ;;  %v3334_v24 = vmul.f32 %v13778_v8, %v3313_v56  ;;  %v3305_v58 = vsel %vm1115_vm6, %v13757_v28, %v3290_v23 }
 0x38d   : > { %10683 = vmatmul.mubr.msk.bf16.gmra.mrb[4].mxu1 %vm2104_vm10, %v12331_v45  ;;  %v3367_v29 = vpack.c.bf16 %v3336_v18, %v3334_v24  ;;  %v3278_v26 = vpop.permute.xlu1 %3277  ;;  %v3296_v33 = vpop.permute.xlu0 %3295  ;;  %v3335_v45 = vmul.f32 %v3326_v53, %v3306_v49  ;;  %v12347_v18 = vld [vmem:[%s17437_s4 + $0x108] sm:$0xff]  }
 0x38e   : > { %2899 = vmatpush1.bf16.msra.mxu1 %v2826_v13  ;;  %2636 = vmatprep.mubr.bf16.mxu1 %v17453_v2  ;;  %v3316_v57 = vsel %vm1115_vm6, %v3296_v33, %v3280_v32  ;;  %v3308_v39 = vsel %vm1115_vm6, %v3280_v32, %v3296_v33  ;;  %v12351_v49 = vld [vmem:[%s17437_s4 + $0x128] sm:$0xff]  }
 0x38f   : > { %2900 = vmatprep.subr.bf16.mxu1 %v2829_v0  ;;  %v3340_v61 = vmul.f32 %v13778_v8, %v3316_v57  ;;  %v3333_v0 = vmul.f32 %v3326_v53, %v3305_v58  ;;  %v12352_v58 = vld [vmem:[%s17437_s4 + $0x130] sm:$0xff]  }
 0x391   : > { %v3294_v63 = vpop.permute.xlu1 %3293  ;;  %v3284_v31 = vpop.permute.xlu0 %3283 }
 0x392   : > { %2901 = vmatpush1.bf16.msra.mxu1 %v2828_v15  ;;  %v3315_v55 = vsel %vm1115_vm6, %v3294_v63, %v3278_v26  ;;  %v3307_v15 = vsel %vm1115_vm6, %v3278_v26, %v3294_v63 }
 0x393   : > { %3128 = vmatprep.subr.bf16.mxu1 %v3057_v50  ;;  %v3338_v50 = vmul.f32 %v13778_v8, %v3315_v55 }
 0x395   : > { %10684 = vmatmul.mubr.msk.bf16.gmra.mrb[8].mxu1 %vm2104_vm10, %v12332_v44  ;;  %v3282_v36 = vpop.permute.xlu1 %3281  ;;  %v3300_v25 = vpop.permute.xlu0 %3299  ;;  %v3369_v59 = vpack.c.bf16 %v3340_v61, %v3338_v50 }
 0x396   : > { %2646 = vmatprep.mubr.bf16.mxu1 %v17453_v2  ;;  %v3318_v20 = vsel %vm1115_vm6, %v3300_v25, %v3284_v31 }
 0x399   : > { %v3298_v35 = vpop.permute.xlu1 %3297  ;;  %v3288_v41 = vpop.permute.xlu0 %3287 }
 0x39d   : > { %10685 = vmatmul.mubr.msk.bf16.gmra.mrb[12].mxu1 %vm2104_vm10, %v12333_v9  ;;  %v3286_v40 = vpop.permute.xlu1 %3285  ;;  %v3304_v47 = vpop.permute.xlu0 %3303  ;;  %v3366_v9 = vpack.c.bf16 %v3335_v45, %v3333_v0 }
 0x39e   : > { %2656 = vmatprep.mubr.bf16.mxu1 %v17453_v2  ;;  %v3320_v28 = vsel %vm1115_vm6, %v3304_v47, %v3288_v41 }
 0x39f   : > { %v3348_v62 = vmul.f32 %v13778_v8, %v3320_v28 }
 0x3a1   : > { %v3302_v52 = vpop.permute.xlu1 %3301  ;;  %v13836_v13 = vpop.permute.xlu0 %3585 }
 0x3a2   : > { %v3319_v23 = vsel %vm1115_vm6, %v3302_v52, %v3286_v40 }
 0x3a5   : > { %10686 = vmatmul.mubr.msk.bf16.gmra.mrb[16].mxu1 %vm2104_vm10, %v12334_v48  ;;  %v13846_v44 = vpop.permute.xlu1 %3583  ;;  %v3339_v48 = vmul.f32 %v3326_v53, %v3308_v39  ;;  %v3602_v19 = vpop.permute.xlu0 %3601  ;;  %v12353_v39 = vld [vmem:[%s17437_s4 + $0x138] sm:$0xff]  }
 0x3a6   : > { %2666 = vmatprep.mubr.bf16.mxu1 %v17453_v2  ;;  %v3624_v24 = vsel %vm1275_vm7, %v3602_v19, %v13836_v13 }
 0x3a9   : > { %v3600_v56 = vpop.permute.xlu1 %3599 }
 0x3aa   : > { %v3623_v26 = vsel %vm1275_vm7, %v3600_v56, %v13846_v44  ;;  %v3615_v50 = vsel %vm1275_vm7, %v13846_v44, %v3600_v56 }
 0x3ad   : > { %10687 = vmatmul.mubr.msk.bf16.gmra.mrb[20].mxu1 %vm2104_vm10, %v12335_v51  ;;  %v3317_v51 = vsel %vm1115_vm6, %v3298_v35, %v3282_v36 }
 0x3ae   : > { %2676 = vmatprep.mubr.bf16.mxu1 %v17453_v2 }
 0x3b5   : > { %10688 = vmatmul.mubr.msk.bf16.gmra.mrb[24].mxu1 %vm2104_vm10, %v12336_v11  ;;  %v3310_v11 = vsel %vm1115_vm6, %v3284_v31, %v3300_v25  ;;  %v12349_v25 = vld [vmem:[%s17437_s4 + $0x118] sm:$0xff]  }
 0x3b6   : > { %2686 = vmatprep.mubr.bf16.mxu1 %v17453_v2 }
 0x3bd   : > { %10689 = vmatmul.mubr.msk.bf16.gmra.mrb[28].mxu1 %vm2104_vm10, %v12337_v38  ;;  %v3344_v38 = vmul.f32 %v13778_v8, %v3318_v20 }
 0x3be   : > { %2926 = vmatprep.mubr.bf16.mxu1 %v17453_v2 }
 0x3c5   : > { %10715 = vmatmul.mubr.msk.bf16.vlgmr.msra.gmra.mrb[0].mxu1 %vm2104_vm10, %v12338_v1  ;;  %v3337_v1 = vmul.f32 %v3326_v53, %v3307_v15 }
 0x3c6   : > { %3129 = vmatpush1.bf16.msra.mxu1 %v3056_v54  ;;  %2936 = vmatprep.mubr.bf16.mxu1 %v17453_v2  ;;  %v3309_v54 = vsel %vm1115_vm6, %v3282_v36, %v3298_v35  ;;  %v12348_v36 = vld [vmem:[%s17437_s4 + $0x110] sm:$0xff]   ;;  %v3590_v35 = vpop.permute.xlu0 %3589 }
 0x3c7   : > { %3130 = vmatprep.subr.bf16.mxu1 %v3059_v17  ;;  %v3342_v17 = vmul.f32 %v13778_v8, %v3317_v51  ;;  %v3368_v22 = vpack.c.bf16 %v3339_v48, %v3337_v1 }
 0x3ca   : > { %3131 = vmatpush1.bf16.msra.mxu1 %v3058_v10  ;;  %v3343_v10 = vmul.f32 %v3326_v53, %v3310_v11 }
 0x3cb   : > { %3132 = vmatprep.subr.bf16.mxu1 %v3061_v42  ;;  %v10788_v42 = vld [vmem:[%s17434_s1 + $0xc] sm:$0x3] }
 0x3cc   : > { %v3636_v20 = vrot.slane %v10788_v42, %v12751_v6 }
 0x3cd   : > { %10716 = vmatmul.mubr.msk.bf16.gmra.mrb[4].mxu1 %vm2104_vm10, %v12339_v46  ;;  %v3312_v46 = vsel %vm1115_vm6, %v3288_v41, %v3304_v47  ;;  %v12350_v41 = vld [vmem:[%s17437_s4 + $0x120] sm:$0xff]  }
 0x3ce   : > { %3133 = vmatpush1.bf16.msra.mxu1 %v3060_v60  ;;  %2946 = vmatprep.mubr.bf16.mxu1 %v17453_v2  ;;  %v3371_v60 = vpack.c.bf16 %v3344_v38, %v3342_v17  ;;  %v3347_v32 = vmul.f32 %v3326_v53, %v3312_v46  ;;  %v12354_v38 = vld [vmem:[%s17437_s4 + $0x140] sm:$0xff]  }
 0x3cf   : > { %3134 = vmatprep.subr.bf16.mxu1 %v3063_v21  ;;  %v3341_v21 = vmul.f32 %v3326_v53, %v3309_v54 }
 0x3d2   : > { %3135 = vmatpush1.bf16.msra.mxu1 %v3062_v27  ;;  %v3311_v27 = vsel %vm1115_vm6, %v3286_v40, %v3302_v52  ;;  %v3606_v40 = vpop.permute.xlu0 %3605 }
 0x3d3   : > { %3438 = vmatprep.subr.bf16.mxu1 %v3367_v29  ;;  %v3346_v29 = vmul.f32 %v13778_v8, %v3319_v23  ;;  %v3345_v63 = vmul.f32 %v3326_v53, %v3311_v27  ;;  %v3626_v15 = vsel %vm1275_vm7, %v3606_v40, %v3590_v35 }
 0x3d5   : > { %10717 = vmatmul.mubr.msk.bf16.gmra.mrb[8].mxu1 %vm2104_vm10, %v12340_v12  ;;  %v13878_v12 = vrot.slane %v10788_v42, %v12754_v7  ;;  %v3373_v33 = vpack.c.bf16 %v3348_v62, %v3346_v29  ;;  %v3372_v31 = vpack.c.bf16 %v3347_v32, %v3345_v63  ;;  %v10821_v29 = vld [vmem:[%s17434_s1 + $0xe] sm:$0x3] }
 0x3d6   : > { %2956 = vmatprep.mubr.bf16.mxu1 %v17453_v2  ;;  %v3594_v47 = vpop.permute.xlu0 %3593 }
 0x3d7   : > { %v3644_v8 = vmul.f32 %v13878_v12, %v3623_v26  ;;  %v3650_v51 = vmul.f32 %v13878_v12, %v3626_v15 }
 0x3da   : > { %v3610_v53 = vpop.permute.xlu0 %3609 }
 0x3db   : > { %v3628_v1 = vsel %vm1275_vm7, %v3610_v53, %v3594_v47 }
 0x3dc   : > { %v3654_v23 = vmul.f32 %v13878_v12, %v3628_v1  ;;  %v3946_v1 = vrot.slane %v10821_v29, %v12751_v6 }
 0x3dd   : > { %10718 = vmatmul.mubr.msk.bf16.gmra.mrb[12].mxu1 %vm2104_vm10, %v12341_v16  ;;  %v3370_v16 = vpack.c.bf16 %v3343_v10, %v3341_v21  ;;  %v3620_v10 = vsel %vm1275_vm7, %v3594_v47, %v3610_v53  ;;  %v12357_v53 = vld [vmem:[%s17437_s4 + $0x158] sm:$0xff]  }
 0x3de   : > { %2966 = vmatprep.mubr.bf16.mxu1 %v17453_v2  ;;  %v3598_v45 = vpop.permute.xlu0 %3597 }
 0x3e2   : > { %v3614_v61 = vpop.permute.xlu0 %3613 }
 0x3e3   : > { %v3630_v62 = vsel %vm1275_vm7, %v3614_v61, %v3598_v45 }
 0x3e4   : > { %v3658_v32 = vmul.f32 %v13878_v12, %v3630_v62 }
 0x3e5   : > { %10719 = vmatmul.mubr.msk.bf16.gmra.mrb[16].mxu1 %vm2104_vm10, %v12342_v30  ;;  %v3646_v30 = vmul.f32 %v13878_v12, %v3624_v24  ;;  %v3653_v24 = vmul.f32 %v3636_v20, %v3620_v10 }
 0x3e6   : > { %2976 = vmatprep.mubr.bf16.mxu1 %v17453_v2  ;;  %v13931_v11 = vpop.permute.xlu0 %3895 }
 0x3ed   : > { %10720 = vmatmul.mubr.msk.bf16.gmra.mrb[20].mxu1 %vm2104_vm10, %v12343_v34  ;;  %v3677_v34 = vpack.c.bf16 %v3646_v30, %v3644_v8 }
 0x3ee   : > { %2986 = vmatprep.mubr.bf16.mxu1 %v17453_v2 }
 0x3f5   : > { %10721 = vmatmul.mubr.msk.bf16.gmra.mrb[24].mxu1 %vm2104_vm10, %v12344_v37  ;;  %v3588_v37 = vpop.permute.xlu1 %3587 }
 0x3f6   : > { %2996 = vmatprep.mubr.bf16.mxu1 %v17453_v2 }
 0x3fd   : > { %10722 = vmatmul.mubr.msk.bf16.gmra.mrb[28].mxu1 %vm2104_vm10, %v12345_v43  ;;  %v3604_v43 = vpop.permute.xlu1 %3603 }
 0x3fe   : > { %3160 = vmatprep.mubr.bf16.mxu1 %v17453_v2  ;;  %v3625_v48 = vsel %vm1275_vm7, %v3604_v43, %v3588_v37  ;;  %v3617_v44 = vsel %vm1275_vm7, %v3588_v37, %v3604_v43 }
 0x3ff   : > { %v3648_v28 = vmul.f32 %v13878_v12, %v3625_v48  ;;  %v3647_v46 = vmul.f32 %v3636_v20, %v3617_v44 }
 0x401   : > { %v3592_v52 = vpop.permute.xlu1 %3591  ;;  %v3679_v42 = vpack.c.bf16 %v3650_v51, %v3648_v28 }
 0x405   : > { %10747 = vmatmul.mubr.msk.bf16.vlgmr.msra.gmra.mrb[0].mxu1 %vm2104_vm10, %v12346_v14  ;;  %v3608_v57 = vpop.permute.xlu1 %3607  ;;  %v3616_v14 = vsel %vm1275_vm7, %v13836_v13, %v3602_v19  ;;  %v3618_v13 = vsel %vm1275_vm7, %v3590_v35, %v3606_v40 }
 0x406   : > { %3439 = vmatpush1.bf16.msra.mxu1 %v3366_v9  ;;  %3170 = vmatprep.mubr.bf16.mxu1 %v17453_v2  ;;  %v3645_v9 = vmul.f32 %v3636_v20, %v3616_v14  ;;  %v3649_v19 = vmul.f32 %v3636_v20, %v3618_v13  ;;  %v3619_v56 = vsel %vm1275_vm7, %v3592_v52, %v3608_v57  ;;  %v12359_v14 = vld [vmem:[%s17437_s4 + $0x168] sm:$0xff]   ;;  %v12361_v13 = vld [vmem:[%s17437_s4 + $0x178] sm:$0xff]  }
 0x407   : > { %3440 = vmatprep.subr.bf16.mxu1 %v3369_v59  ;;  %v3643_v59 = vmul.f32 %v3636_v20, %v3615_v50  ;;  %v3651_v63 = vmul.f32 %v3636_v20, %v3619_v56  ;;  %v12360_v50 = vld [vmem:[%s17437_s4 + $0x170] sm:$0xff]  }
 0x408   : > { %v3678_v21 = vpack.c.bf16 %v3649_v19, %v3647_v46 }
 0x409   : > { %v3596_v55 = vpop.permute.xlu1 %3595  ;;  %v3676_v17 = vpack.c.bf16 %v3645_v9, %v3643_v59 }
 0x40a   : > { %3441 = vmatpush1.bf16.msra.mxu1 %v3368_v22  ;;  %v3627_v22 = vsel %vm1275_vm7, %v3608_v57, %v3592_v52  ;;  %v12356_v52 = vld [vmem:[%s17437_s4 + $0x150] sm:$0xff]  }
 0x40b   : > { %3442 = vmatprep.subr.bf16.mxu1 %v3371_v60  ;;  %v3652_v60 = vmul.f32 %v13878_v12, %v3627_v22 }
 0x40d   : > { %10748 = vmatmul.mubr.msk.bf16.gmra.mrb[4].mxu1 %vm2104_vm10, %v12347_v18  ;;  %v3612_v0 = vpop.permute.xlu1 %3611  ;;  %v3912_v18 = vpop.permute.xlu0 %3911  ;;  %v3681_v30 = vpack.c.bf16 %v3654_v23, %v3652_v60  ;;  %v12362_v23 = vld [vmem:[%s17437_s4 + $0x180] sm:$0xff]  }
 0x40e   : > { %3443 = vmatpush1.bf16.msra.mxu1 %v3370_v16  ;;  %3180 = vmatprep.mubr.bf16.mxu1 %v17453_v2  ;;  %v3629_v27 = vsel %vm1275_vm7, %v3612_v0, %v3596_v55  ;;  %v3622_v16 = vsel %vm1275_vm7, %v3598_v45, %v3614_v61  ;;  %v3934_v8 = vsel %vm1435_vm8, %v3912_v18, %v13931_v11  ;;  %v12358_v45 = vld [vmem:[%s17437_s4 + $0x160] sm:$0xff]  }
 0x40f   : > { %3444 = vmatprep.subr.bf16.mxu1 %v3373_v33  ;;  %v12355_v33 = vld [vmem:[%s17437_s4 + $0x148] sm:$0xff]   ;;  %v3657_v35 = vmul.f32 %v3636_v20, %v3622_v16 }
 0x411   : > { %v13941_v54 = vpop.permute.xlu1 %3893  ;;  %v3900_v57 = vpop.permute.xlu0 %3899 }
 0x412   : > { %3445 = vmatpush1.bf16.msra.mxu1 %v3372_v31  ;;  %v3621_v31 = vsel %vm1275_vm7, %v3596_v55, %v3612_v0 }
 0x413   : > { %3748 = vmatprep.subr.bf16.mxu1 %v3677_v34  ;;  %v3656_v34 = vmul.f32 %v13878_v12, %v3629_v27  ;;  %v3655_v43 = vmul.f32 %v3636_v20, %v3621_v31 }
 0x415   : > { %10749 = vmatmul.mubr.msk.bf16.gmra.mrb[8].mxu1 %vm2104_vm10, %v12348_v36  ;;  %v3910_v26 = vpop.permute.xlu1 %3909  ;;  %v13973_v36 = vrot.slane %v10821_v29, %v12754_v7  ;;  %v3683_v40 = vpack.c.bf16 %v3658_v32, %v3656_v34  ;;  %v3682_v47 = vpack.c.bf16 %v3657_v35, %v3655_v43  ;;  %v3916_v55 = vpop.permute.xlu0 %3915  ;;  %v10854_v34 = vld [vmem:[%s17434_s1 + $0x10] sm:$0x3] }
 0x416   : > { %3190 = vmatprep.mubr.bf16.mxu1 %v17453_v2  ;;  %v3933_v37 = vsel %vm1435_vm8, %v3910_v26, %v13941_v54  ;;  %v3936_v44 = vsel %vm1435_vm8, %v3916_v55, %v3900_v57  ;;  %v3925_v28 = vsel %vm1435_vm8, %v13941_v54, %v3910_v26 }
 0x417   : > { %v3954_v12 = vmul.f32 %v13973_v36, %v3933_v37  ;;  %v3960_v22 = vmul.f32 %v13973_v36, %v3936_v44 }
 0x419   : > { %v3904_v61 = vpop.permute.xlu0 %3903 }
 0x41d   : > { %10750 = vmatmul.mubr.msk.bf16.gmra.mrb[12].mxu1 %vm2104_vm10, %v12349_v25  ;;  %v3680_v25 = vpack.c.bf16 %v3653_v24, %v3651_v63  ;;  %v3920_v20 = vpop.permute.xlu0 %3919 }
 0x41e   : > { %3200 = vmatprep.mubr.bf16.mxu1 %v17453_v2  ;;  %v3938_v46 = vsel %vm1435_vm8, %v3920_v20, %v3904_v61  ;;  %v3930_v24 = vsel %vm1435_vm8, %v3904_v61, %v3920_v20  ;;  %v12365_v20 = vld [vmem:[%s17437_s4 + $0x198] sm:$0xff]  }
 0x41f   : > { %v3964_v27 = vmul.f32 %v13973_v36, %v3938_v46 }
 0x421   : > { %v3908_v9 = vpop.permute.xlu0 %3907 }
 0x425   : > { %10751 = vmatmul.mubr.msk.bf16.gmra.mrb[16].mxu1 %vm2104_vm10, %v12350_v41  ;;  %v3956_v41 = vmul.f32 %v13973_v36, %v3934_v8  ;;  %v3924_v51 = vpop.permute.xlu0 %3923  ;;  %v3963_v8 = vmul.f32 %v3946_v1, %v3930_v24 }
 0x426   : > { %3210 = vmatprep.mubr.bf16.mxu1 %v17453_v2  ;;  %v3940_v32 = vsel %vm1435_vm8, %v3924_v51, %v3908_v9 }
 0x427   : > { %v3968_v35 = vmul.f32 %v13973_v36, %v3940_v32 }
 0x429   : > { %v14026_v10 = vpop.permute.xlu0 %4205 }
 0x42d   : > { %10752 = vmatmul.mubr.msk.bf16.gmra.mrb[20].mxu1 %vm2104_vm10, %v12351_v49  ;;  %v3987_v49 = vpack.c.bf16 %v3956_v41, %v3954_v12 }
 0x42e   : > { %3220 = vmatprep.mubr.bf16.mxu1 %v17453_v2 }
 0x435   : > { %10753 = vmatmul.mubr.msk.bf16.gmra.mrb[24].mxu1 %vm2104_vm10, %v12352_v58  ;;  %v3898_v58 = vpop.permute.xlu1 %3897 }
 0x436   : > { %3230 = vmatprep.mubr.bf16.mxu1 %v17453_v2 }
 0x43d   : > { %10754 = vmatmul.mubr.msk.bf16.gmra.mrb[28].mxu1 %vm2104_vm10, %v12353_v39  ;;  %v3914_v39 = vpop.permute.xlu1 %3913 }
 0x43e   : > { %3470 = vmatprep.mubr.bf16.mxu1 %v17453_v2  ;;  %v3935_v19 = vsel %vm1435_vm8, %v3914_v39, %v3898_v58  ;;  %v3927_v54 = vsel %vm1435_vm8, %v3898_v58, %v3914_v39 }
 0x43f   : > { %v3958_v62 = vmul.f32 %v13973_v36, %v3935_v19  ;;  %v3957_v16 = vmul.f32 %v3946_v1, %v3927_v54 }
 0x441   : > { %v3902_v0 = vpop.permute.xlu1 %3901  ;;  %v3989_v29 = vpack.c.bf16 %v3960_v22, %v3958_v62  ;;  %v4256_v22 = vrot.slane %v10854_v34, %v12751_v6 }
 0x445   : > { %10780 = vmatmul.mubr.msk.bf16.vlgmr.msra.gmra.mrb[0].mxu1 %vm2104_vm10, %v12354_v38  ;;  %v3918_v15 = vpop.permute.xlu1 %3917  ;;  %v3926_v38 = vsel %vm1435_vm8, %v13931_v11, %v3912_v18  ;;  %v3928_v11 = vsel %vm1435_vm8, %v3900_v57, %v3916_v55 }
 0x446   : > { %3749 = vmatpush1.bf16.msra.mxu1 %v3676_v17  ;;  %3480 = vmatprep.mubr.bf16.mxu1 %v17453_v2  ;;  %v3955_v17 = vmul.f32 %v3946_v1, %v3926_v38  ;;  %v3959_v18 = vmul.f32 %v3946_v1, %v3928_v11  ;;  %v3929_v26 = vsel %vm1435_vm8, %v3902_v0, %v3918_v15 }
 0x447   : > { %3750 = vmatprep.subr.bf16.mxu1 %v3679_v42  ;;  %v3953_v42 = vmul.f32 %v3946_v1, %v3925_v28  ;;  %v3961_v43 = vmul.f32 %v3946_v1, %v3929_v26 }
 0x448   : > { %v3988_v63 = vpack.c.bf16 %v3959_v18, %v3957_v16  ;;  %v12370_v18 = vld [vmem:[%s17437_s4 + $0x1c0] sm:$0xff]  }
 0x449   : > { %v3906_v48 = vpop.permute.xlu1 %3905  ;;  %v3986_v60 = vpack.c.bf16 %v3955_v17, %v3953_v42  ;;  %v12369_v17 = vld [vmem:[%s17437_s4 + $0x1b8] sm:$0xff]  }
 0x44a   : > { %3751 = vmatpush1.bf16.msra.mxu1 %v3678_v21  ;;  %v3937_v21 = vsel %vm1435_vm8, %v3918_v15, %v3902_v0  ;;  %v12364_v0 = vld [vmem:[%s17437_s4 + $0x190] sm:$0xff]   ;;  %v12366_v15 = vld [vmem:[%s17437_s4 + $0x1a0] sm:$0xff]  }
 0x44b   : > { %3752 = vmatprep.subr.bf16.mxu1 %v3681_v30  ;;  %v3962_v30 = vmul.f32 %v13973_v36, %v3937_v21 }
 0x44d   : > { %10781 = vmatmul.mubr.msk.bf16.gmra.mrb[4].mxu1 %vm2104_vm10, %v12355_v33  ;;  %v3922_v59 = vpop.permute.xlu1 %3921  ;;  %v4222_v33 = vpop.permute.xlu0 %4221  ;;  %v3991_v41 = vpack.c.bf16 %v3964_v27, %v3962_v30 }
 0x44e   : > { %3753 = vmatpush1.bf16.msra.mxu1 %v3680_v25  ;;  %3490 = vmatprep.mubr.bf16.mxu1 %v17453_v2  ;;  %v3939_v31 = vsel %vm1435_vm8, %v3922_v59, %v3906_v48  ;;  %v3932_v25 = vsel %vm1435_vm8, %v3908_v9, %v3924_v51  ;;  %v4244_v12 = vsel %vm1595_vm9, %v4222_v33, %v14026_v10 }
 0x44f   : > { %3754 = vmatprep.subr.bf16.mxu1 %v3683_v40  ;;  %v12363_v40 = vld [vmem:[%s17437_s4 + $0x188] sm:$0xff]   ;;  %v3967_v57 = vmul.f32 %v3946_v1, %v3932_v25  ;;  %v4236_v19 = vsel %vm1595_vm9, %v14026_v10, %v4222_v33 }
 0x450   : > { %v4265_v54 = vmul.f32 %v4256_v22, %v4236_v19 }
 0x451   : > { %v14036_v56 = vpop.permute.xlu1 %4203 }
 0x452   : > { %3755 = vmatpush1.bf16.msra.mxu1 %v3682_v47  ;;  %v3931_v47 = vsel %vm1435_vm8, %v3906_v48, %v3922_v59  ;;  %v12367_v48 = vld [vmem:[%s17437_s4 + $0x1a8] sm:$0xff]   ;;  %v12368_v59 = vld [vmem:[%s17437_s4 + $0x1b0] sm:$0xff]  }
 0x453   : > { %4058 = vmatprep.subr.bf16.mxu1 %v3987_v49  ;;  %v3966_v49 = vmul.f32 %v13973_v36, %v3939_v31  ;;  %v3965_v39 = vmul.f32 %v3946_v1, %v3931_v47 }
 0x455   : > { %10782 = vmatmul.mubr.msk.bf16.gmra.mrb[8].mxu1 %vm2104_vm10, %v12356_v52  ;;  %v4220_v37 = vpop.permute.xlu1 %4219  ;;  %v14068_v52 = vrot.slane %v10854_v34, %v12754_v7  ;;  %v3993_v55 = vpack.c.bf16 %v3968_v35, %v3966_v49  ;;  %v3992_v61 = vpack.c.bf16 %v3967_v57, %v3965_v39  ;;  %v12371_v49 = vld [vmem:[%s17437_s4 + $0x1c8] sm:$0xff]  }
 0x456   : > { %3500 = vmatprep.mubr.bf16.mxu1 %v17453_v2  ;;  %v4243_v58 = vsel %vm1595_vm9, %v4220_v37, %v14036_v56  ;;  %v4235_v42 = vsel %vm1595_vm9, %v14036_v56, %v4220_v37 }
 0x457   : > { %v4264_v36 = vmul.f32 %v14068_v52, %v4243_v58  ;;  %v4263_v21 = vmul.f32 %v4256_v22, %v4235_v42 }
 0x459   : > { %v4208_v9 = vpop.permute.xlu1 %4207  ;;  %v4296_v16 = vpack.c.bf16 %v4265_v54, %v4263_v21 }
 0x45d   : > { %10783 = vmatmul.mubr.msk.bf16.gmra.mrb[12].mxu1 %vm2104_vm10, %v12357_v53  ;;  %v3990_v53 = vpack.c.bf16 %v3963_v8, %v3961_v43  ;;  %v4224_v51 = vpop.permute.xlu1 %4223 }
 0x45e   : > { %3510 = vmatprep.mubr.bf16.mxu1 %v17453_v2  ;;  %v4245_v62 = vsel %vm1595_vm9, %v4224_v51, %v4208_v9  ;;  %v4237_v56 = vsel %vm1595_vm9, %v4208_v9, %v4224_v51  ;;  %v12378_v9 = vld [vmem:[%s17437_s4 + $0x200] sm:$0xff]   ;;  %v12381_v51 = vld [vmem:[%s17437_s4 + $0x218] sm:$0xff]  }
 0x45f   : > { %v4268_v27 = vmul.f32 %v14068_v52, %v4245_v62  ;;  %v4267_v31 = vmul.f32 %v4256_v22, %v4237_v56 }
 0x461   : > { %v4212_v1 = vpop.permute.xlu1 %4211 }
 0x465   : > { %10784 = vmatmul.mubr.msk.bf16.gmra.mrb[16].mxu1 %vm2104_vm10, %v12358_v45  ;;  %v4266_v45 = vmul.f32 %v14068_v52, %v4244_v12  ;;  %v4228_v28 = vpop.permute.xlu1 %4227 }
 0x466   : > { %3520 = vmatprep.mubr.bf16.mxu1 %v17453_v2  ;;  %v4247_v26 = vsel %vm1595_vm9, %v4228_v28, %v4212_v1  ;;  %v4239_v25 = vsel %vm1595_vm9, %v4212_v1, %v4228_v28  ;;  %v12384_v1 = vld [vmem:[%s17437_s4 + $0x230] sm:$0xff]  }
 0x467   : > { %v4272_v35 = vmul.f32 %v14068_v52, %v4247_v26 }
 0x469   : > { %v4216_v46 = vpop.permute.xlu1 %4215 }
 0x46d   : > { %10785 = vmatmul.mubr.msk.bf16.gmra.mrb[20].mxu1 %vm2104_vm10, %v12359_v14  ;;  %v4297_v14 = vpack.c.bf16 %v4266_v45, %v4264_v36 }
 0x46e   : > { %3530 = vmatprep.mubr.bf16.mxu1 %v17453_v2 }
 0x475   : > { %10786 = vmatmul.mubr.msk.bf16.gmra.mrb[24].mxu1 %vm2104_vm10, %v12360_v50  ;;  %v4210_v50 = vpop.permute.xlu0 %4209 }
 0x476   : > { %3540 = vmatprep.mubr.bf16.mxu1 %v17453_v2 }
 0x47d   : > { %10787 = vmatmul.mubr.msk.bf16.gmra.mrb[28].mxu1 %vm2104_vm10, %v12361_v13  ;;  %v4226_v13 = vpop.permute.xlu0 %4225 }
 0x47e   : > { %3780 = vmatprep.mubr.bf16.mxu1 %v17453_v2  ;;  %v4238_v10 = vsel %vm1595_vm9, %v4210_v50, %v4226_v13 }
 0x47f   : > { %v4269_v32 = vmul.f32 %v4256_v22, %v4238_v10 }
 0x481   : > { %v4214_v38 = vpop.permute.xlu0 %4213  ;;  %v4298_v37 = vpack.c.bf16 %v4269_v32, %v4267_v31 }
 0x485   : > { %10813 = vmatmul.mubr.msk.bf16.vlgmr.msra.gmra.mrb[0].mxu1 %vm2104_vm10, %v12362_v23  ;;  %v4230_v44 = vpop.permute.xlu0 %4229  ;;  %v4246_v23 = vsel %vm1595_vm9, %v4226_v13, %v4210_v50  ;;  %v12377_v50 = vld [vmem:[%s17437_s4 + $0x1f8] sm:$0xff]   ;;  %v12380_v13 = vld [vmem:[%s17437_s4 + $0x210] sm:$0xff]  }
 0x486   : > { %4059 = vmatpush1.bf16.msra.mxu1 %v3986_v60  ;;  %3790 = vmatprep.mubr.bf16.mxu1 %v17453_v2  ;;  %v4270_v60 = vmul.f32 %v14068_v52, %v4246_v23  ;;  %v4248_v24 = vsel %vm1595_vm9, %v4230_v44, %v4214_v38  ;;  %v4240_v30 = vsel %vm1595_vm9, %v4214_v38, %v4230_v44  ;;  %v12382_v38 = vld [vmem:[%s17437_s4 + $0x220] sm:$0xff]   ;;  %v12385_v44 = vld [vmem:[%s17437_s4 + $0x238] sm:$0xff]  }
 0x487   : > { %4060 = vmatprep.subr.bf16.mxu1 %v3989_v29  ;;  %v4274_v33 = vmul.f32 %v14068_v52, %v4248_v24 }
 0x488   : > { %v4299_v8 = vpack.c.bf16 %v4270_v60, %v4268_v27 }
 0x489   : > { %v4218_v11 = vpop.permute.xlu0 %4217  ;;  %v4301_v47 = vpack.c.bf16 %v4274_v33, %v4272_v35 }
 0x48a   : > { %4061 = vmatpush1.bf16.msra.mxu1 %v3988_v63  ;;  %v4232_v63 = vpop.permute.xlu1 %4231 }
 0x48b   : > { %4062 = vmatprep.subr.bf16.mxu1 %v3991_v41  ;;  %v4273_v41 = vmul.f32 %v4256_v22, %v4240_v30  ;;  %v4241_v57 = vsel %vm1595_vm9, %v4216_v46, %v4232_v63 }
 0x48c   : > { %v4275_v36 = vmul.f32 %v4256_v22, %v4241_v57 }
 0x48d   : > { %10814 = vmatmul.mubr.msk.bf16.gmra.mrb[4].mxu1 %vm2104_vm10, %v12363_v40  ;;  %v4234_v29 = vpop.permute.xlu0 %4233  ;;  %v4249_v40 = vsel %vm1595_vm9, %v4232_v63, %v4216_v46 }
 0x48e   : > { %4063 = vmatpush1.bf16.msra.mxu1 %v3990_v53  ;;  %3800 = vmatprep.mubr.bf16.mxu1 %v17453_v2  ;;  %v4250_v34 = vsel %vm1595_vm9, %v4234_v29, %v4218_v11  ;;  %v4242_v43 = vsel %vm1595_vm9, %v4218_v11, %v4234_v29  ;;  %v4271_v53 = vmul.f32 %v4256_v22, %v4239_v25  ;;  %v4532_v28 = vpop.permute.xlu1 %4531 }
 0x48f   : > { %4064 = vmatprep.subr.bf16.mxu1 %v3993_v55  ;;  %v4278_v12 = vmul.f32 %v14068_v52, %v4250_v34  ;;  %v4276_v58 = vmul.f32 %v14068_v52, %v4249_v40  ;;  %v4277_v55 = vmul.f32 %v4256_v22, %v4242_v43  ;;  %v12373_v52 = vld [vmem:[%s17437_s4 + $0x1d8] sm:$0xff]  }
 0x490   : > { %v4300_v45 = vpack.c.bf16 %v4273_v41, %v4271_v53 }
 0x491   : > { %v4303_v39 = vpack.c.bf16 %v4278_v12, %v4276_v58  ;;  %v4537_v22 = vpop.permute.xlu0 %4536 }
 0x492   : > { %4065 = vmatpush1.bf16.msra.mxu1 %v3992_v61  ;;  %v4302_v61 = vpack.c.bf16 %v4277_v55, %v4275_v36  ;;  %v4542_v21 = vpop.permute.xlu1 %4541 }
 0x493   : > { %4368 = vmatprep.subr.bf16.mxu1 %v4297_v14  ;;  %v12372_v14 = vld [vmem:[%s17437_s4 + $0x1d0] sm:$0xff]  }
 0x495   : > { %10815 = vmatmul.mubr.msk.bf16.gmra.mrb[8].mxu1 %vm2104_vm10, %v12364_v0  ;;  %v12374_v0 = vld [vmem:[%s17437_s4 + $0x1e0] sm:$0xff]  }
 0x496   : > { %3810 = vmatprep.mubr.bf16.mxu1 %v17453_v2  ;;  %v4552_v25 = vpop.permute.xlu1 %4551 }
 0x49d   : > { %10816 = vmatmul.mubr.msk.bf16.gmra.mrb[12].mxu1 %vm2104_vm10, %v12365_v20  ;;  %v12375_v20 = vld [vmem:[%s17437_s4 + $0x1e8] sm:$0xff]  }
 0x49e   : > { %3820 = vmatprep.mubr.bf16.mxu1 %v17453_v2 }
 0x4a5   : > { %10817 = vmatmul.mubr.msk.bf16.gmra.mrb[16].mxu1 %vm2104_vm10, %v12366_v15  ;;  %v12376_v15 = vld [vmem:[%s17437_s4 + $0x1f0] sm:$0xff]  }
 0x4a6   : > { %3830 = vmatprep.mubr.bf16.mxu1 %v17453_v2 }
 0x4ad   : > { %10818 = vmatmul.mubr.msk.bf16.gmra.mrb[20].mxu1 %vm2104_vm10, %v12367_v48  ;;  %v12379_v48 = vld [vmem:[%s17437_s4 + $0x208] sm:$0xff]  }
 0x4ae   : > { %3840 = vmatprep.mubr.bf16.mxu1 %v17453_v2 }
 0x4b5   : > { %10819 = vmatmul.mubr.msk.bf16.gmra.mrb[24].mxu1 %vm2104_vm10, %v12368_v59  ;;  %v12383_v59 = vld [vmem:[%s17437_s4 + $0x228] sm:$0xff]  }
 0x4b6   : > { %3850 = vmatprep.mubr.bf16.mxu1 %v17453_v2 }
 0x4bd   : > { %10820 = vmatmul.mubr.msk.bf16.gmra.mrb[28].mxu1 %vm2104_vm10, %v12369_v17 }
 0x4be   : > { %4090 = vmatprep.mubr.bf16.mxu1 %v17453_v2 }
 0x4c5   : > { %10846 = vmatmul.mubr.msk.bf16.vlgmr.msra.gmra.mrb[0].mxu1 %vm2104_vm10, %v12370_v18 }
 0x4c6   : > { %4369 = vmatpush1.bf16.msra.mxu1 %v4296_v16  ;;  %4100 = vmatprep.mubr.bf16.mxu1 %v17453_v2  ;;  %v4547_v16 = vpop.permute.xlu0 %4546 }
 0x4c7   : > { %4370 = vmatprep.subr.bf16.mxu1 %v4299_v8 }
 0x4ca   : > { %4371 = vmatpush1.bf16.msra.mxu1 %v4298_v37  ;;  %v4557_v43 = vpop.permute.xlu0 %4556 }
 0x4cb   : > { %4372 = vmatprep.subr.bf16.mxu1 %v4301_v47 }
 0x4cd   : > { %10847 = vmatmul.mubr.msk.bf16.gmra.mrb[4].mxu1 %vm2104_vm10, %v12371_v49 }
 0x4ce   : > { %4373 = vmatpush1.bf16.msra.mxu1 %v4300_v45  ;;  %4110 = vmatprep.mubr.bf16.mxu1 %v17453_v2 }
 0x4cf   : > { %4374 = vmatprep.subr.bf16.mxu1 %v4303_v39  ;;  %v4562_v39 = vpop.permute.xlu1 %4561 }
 0x4d2   : > { %4375 = vmatpush1.bf16.msra.mxu1 %v4302_v61 }
 0x4d5   : > { %10848 = vmatmul.mubr.msk.bf16.gmra.mrb[8].mxu1 %vm2104_vm10, %v12372_v14 }
 0x4d6   : > { %4120 = vmatprep.mubr.bf16.mxu1 %v17453_v2 }
 0x4dd   : > { %10849 = vmatmul.mubr.msk.bf16.gmra.mrb[12].mxu1 %vm2104_vm10, %v12373_v52 }
 0x4de   : > { %4130 = vmatprep.mubr.bf16.mxu1 %v17453_v2 }
 0x4e5   : > { %10850 = vmatmul.mubr.msk.bf16.gmra.mrb[16].mxu1 %vm2104_vm10, %v12374_v0  ;;  %v4567_v0 = vpop.permute.xlu0 %4566 }
 0x4e6   : > { %4140 = vmatprep.mubr.bf16.mxu1 %v17453_v2 }
 0x4ed   : > { %10851 = vmatmul.mubr.msk.bf16.gmra.mrb[20].mxu1 %vm2104_vm10, %v12375_v20 }
 0x4ee   : > { %4150 = vmatprep.mubr.bf16.mxu1 %v17453_v2 }
 0x4f5   : > { %10852 = vmatmul.mubr.msk.bf16.gmra.mrb[24].mxu1 %vm2104_vm10, %v12376_v15 }
 0x4f6   : > { %4160 = vmatprep.mubr.bf16.mxu1 %v17453_v2 }
 0x4fd   : > { %10853 = vmatmul.mubr.msk.bf16.gmra.mrb[28].mxu1 %vm2104_vm10, %v12377_v50 }
 0x4fe   : > { %4400 = vmatprep.mubr.bf16.mxu1 %v17453_v2 }
 0x505   : > { %10879 = vmatmul.mubr.msk.bf16.vlgmr.msra.gmra.mrb[0].mxu1 %vm2104_vm10, %v12378_v9 }
 0x506   : > { %4410 = vmatprep.mubr.bf16.mxu1 %v17453_v2 }
 0x50d   : > { %10880 = vmatmul.mubr.msk.bf16.gmra.mrb[4].mxu1 %vm2104_vm10, %v12379_v48 }
 0x50e   : > { %4420 = vmatprep.mubr.bf16.mxu1 %v17453_v2 }
 0x515   : > { %10881 = vmatmul.mubr.msk.bf16.gmra.mrb[8].mxu1 %vm2104_vm10, %v12380_v13 }
 0x516   : > { %4430 = vmatprep.mubr.bf16.mxu1 %v17453_v2 }
 0x51d   : > { %10882 = vmatmul.mubr.msk.bf16.gmra.mrb[12].mxu1 %vm2104_vm10, %v12381_v51 }
 0x51e   : > { %4440 = vmatprep.mubr.bf16.mxu1 %v17453_v2 }
 0x525   : > { %10883 = vmatmul.mubr.msk.bf16.gmra.mrb[16].mxu1 %vm2104_vm10, %v12382_v38 }
 0x526   : > { %4450 = vmatprep.mubr.bf16.mxu1 %v17453_v2 }
 0x52d   : > { %10884 = vmatmul.mubr.msk.bf16.gmra.mrb[20].mxu1 %vm2104_vm10, %v12383_v59  ;;  %v4572_v59 = vpop.permute.xlu1 %4571 }
 0x52e   : > { %4460 = vmatprep.mubr.bf16.mxu1 %v17453_v2 }
 0x535   : > { %10885 = vmatmul.mubr.msk.bf16.gmra.mrb[24].mxu1 %vm2104_vm10, %v12384_v1 }
 0x536   : > { %4470 = vmatprep.mubr.bf16.mxu1 %v17453_v2 }
 0x53d   : > { %10886 = vmatmul.mubr.msk.bf16.gmra.mrb[28].mxu1 %vm2104_vm10, %v12385_v44 }
 0x53e   : > { %5242 = vmatprep.mubr.bf16.mxu1 %v17453_v2 }
 0x5d8   : > { %v4402_v17 = vpop.f32.mrb[0].mxu1 }
 0x5d9   : > { %v4609_v19 = vadd.f32 %v4532_v28, %v4402_v17  ;;  %v4404_v11 = vpop.f32.mrb[1].mxu1 }
 0x5da   : > { %v4406_v23 = vpop.f32.mrb[2].mxu1  ;;  %v4610_v46 = vadd.f32 %v4532_v28, %v4404_v11 }
 0x5db   : > { %v14224_v42 = vmax.f32 %v4609_v19, 0.0  ;;  %v4611_v54 = vadd.f32 %v4537_v22, %v4406_v23  ;;  %v4408_v62 = vpop.f32.mrb[3].mxu1  ;;  %v4577_v19 = vpop.permute.xlu0 %4576 }
 0x5dc   : > { %v4612_v60 = vadd.f32 %v4537_v22, %v4408_v62  ;;  %v14230_v18 = vmax.f32 %v4610_v46, 0.0 }
 0x5dd   : > { %v14226_v10 = vmax.f32 %v4611_v54, 0.0  ;;  %6234 = vrot.lane.b32.xlu1 %v14224_v42, %s12639_s22 }
 0x5de   : > { %v14234_v56 = vmax.f32 %v4612_v60, 0.0 }
 0x5df   : > { %6236 = vrot.lane.b32.xlu0 %v14226_v10, %s12639_s22 }
 0x5e0   : > { %v4412_v24 = vpop.f32.mrb[4].mxu1 }
 0x5e1   : > { %v4613_v27 = vadd.f32 %v4542_v21, %v4412_v24  ;;  %6266 = vrot.lane.b32.xlu1 %v14230_v18, %s12639_s22  ;;  %v4414_v29 = vpop.f32.mrb[5].mxu1  ;;  %v4582_v24 = vpop.permute.xlu1 %4581 }
 0x5e2   : > { %v4416_v32 = vpop.f32.mrb[6].mxu1  ;;  %v4614_v30 = vadd.f32 %v4542_v21, %v4414_v29 }
 0x5e3   : > { %v14238_v26 = vmax.f32 %v4613_v27, 0.0  ;;  %v4615_v33 = vadd.f32 %v4547_v16, %v4416_v32  ;;  %6268 = vrot.lane.b32.xlu0 %v14234_v56, %s12639_s22  ;;  %v4418_v63 = vpop.f32.mrb[7].mxu1 }
 0x5e4   : > { %v4616_v31 = vadd.f32 %v4547_v16, %v4418_v63  ;;  %v14246_v34 = vmax.f32 %v4614_v30, 0.0  ;;  %v4587_v30 = vpop.permute.xlu0 %4586 }
 0x5e5   : > { %v14242_v8 = vmax.f32 %v4615_v33, 0.0  ;;  %6238 = vrot.lane.b32.xlu1 %v14238_v26, %s12639_s22 }
 0x5e6   : > { %v14250_v37 = vmax.f32 %v4616_v31, 0.0 }
 0x5e7   : > { %6240 = vrot.lane.b32.xlu0 %v14242_v8, %s12639_s22 }
 0x5e8   : > { %v4422_v35 = vpop.f32.mrb[8].mxu1 }
 0x5e9   : > { %v4617_v41 = vadd.f32 %v4552_v25, %v4422_v35  ;;  %6270 = vrot.lane.b32.xlu1 %v14246_v34, %s12639_s22  ;;  %v4424_v40 = vpop.f32.mrb[9].mxu1 }
 0x5ea   : > { %v4426_v12 = vpop.f32.mrb[10].mxu1  ;;  %v4618_v49 = vadd.f32 %v4552_v25, %v4424_v40 }
 0x5eb   : > { %v14254_v47 = vmax.f32 %v4617_v41, 0.0  ;;  %v4619_v53 = vadd.f32 %v4557_v43, %v4426_v12  ;;  %6272 = vrot.lane.b32.xlu0 %v14250_v37, %s12639_s22  ;;  %v4428_v57 = vpop.f32.mrb[11].mxu1  ;;  %v4592_v12 = vpop.permute.xlu1 %4591 }
 0x5ec   : > { %v4620_v45 = vadd.f32 %v4557_v43, %v4428_v57  ;;  %v14262_v55 = vmax.f32 %v4618_v49, 0.0 }
 0x5ed   : > { %v14258_v58 = vmax.f32 %v4619_v53, 0.0  ;;  %6242 = vrot.lane.b32.xlu1 %v14254_v47, %s12639_s22 }
 0x5ee   : > { %v14266_v61 = vmax.f32 %v4620_v45, 0.0 }
 0x5ef   : > { %6244 = vrot.lane.b32.xlu0 %v14258_v58, %s12639_s22 }
 0x5f0   : > { %v4432_v36 = vpop.f32.mrb[12].mxu1 }
 0x5f1   : > { %v4621_v14 = vadd.f32 %v4562_v39, %v4432_v36  ;;  %6274 = vrot.lane.b32.xlu1 %v14262_v55, %s12639_s22  ;;  %v4434_v52 = vpop.f32.mrb[13].mxu1 }
 0x5f2   : > { %v4436_v20 = vpop.f32.mrb[14].mxu1  ;;  %v4622_v50 = vadd.f32 %v4562_v39, %v4434_v52  ;;  %v4597_v39 = vpop.permute.xlu0 %4596 }
 0x5f3   : > { %v14270_v15 = vmax.f32 %v4621_v14, 0.0  ;;  %v4623_v9 = vadd.f32 %v4567_v0, %v4436_v20  ;;  %6276 = vrot.lane.b32.xlu0 %v14266_v61, %s12639_s22  ;;  %v4438_v48 = vpop.f32.mrb[15].mxu1 }
 0x5f4   : > { %v4624_v51 = vadd.f32 %v4567_v0, %v4438_v48  ;;  %v14278_v38 = vmax.f32 %v4622_v50, 0.0 }
 0x5f5   : > { %v14274_v13 = vmax.f32 %v4623_v9, 0.0  ;;  %6246 = vrot.lane.b32.xlu1 %v14270_v15, %s12639_s22 }
 0x5f6   : > { %v14282_v44 = vmax.f32 %v4624_v51, 0.0  ;;  %v4602_v51 = vpop.permute.xlu1 %4601 }
 0x5f7   : > { %6248 = vrot.lane.b32.xlu0 %v14274_v13, %s12639_s22 }
 0x5f8   : > { %v4442_v1 = vpop.f32.mrb[16].mxu1 }
 0x5f9   : > { %v4625_v28 = vadd.f32 %v4572_v59, %v4442_v1  ;;  %6278 = vrot.lane.b32.xlu1 %v14278_v38, %s12639_s22  ;;  %v4444_v17 = vpop.f32.mrb[17].mxu1 }
 0x5fa   : > { %v4446_v11 = vpop.f32.mrb[18].mxu1  ;;  %v4626_v23 = vadd.f32 %v4572_v59, %v4444_v17 }
 0x5fb   : > { %v14286_v22 = vmax.f32 %v4625_v28, 0.0  ;;  %v4627_v46 = vadd.f32 %v4577_v19, %v4446_v11  ;;  %6280 = vrot.lane.b32.xlu0 %v14282_v44, %s12639_s22  ;;  %v4448_v54 = vpop.f32.mrb[19].mxu1 }
 0x5fc   : > { %v4628_v60 = vadd.f32 %v4577_v19, %v4448_v54  ;;  %v14294_v21 = vmax.f32 %v4626_v23, 0.0  ;;  %v4607_v19 = vpop.permute.xlu0 %4606 }
 0x5fd   : > { %v14290_v62 = vmax.f32 %v4627_v46, 0.0  ;;  %6250 = vrot.lane.b32.xlu1 %v14286_v22, %s12639_s22 }
 0x5fe   : > { %17533 = vst [vmem:[#allocation7_spill] sm:$0xff] %v14294_v21  ;;  %v14298_v29 = vmax.f32 %v4628_v60, 0.0 }
 0x5ff   : > { %6252 = vrot.lane.b32.xlu0 %v14290_v62, %s12639_s22 }
 0x600   : > { %v4452_v27 = vpop.f32.mrb[20].mxu1  ;;  %17534 = vst [vmem:[#allocation8_spill] sm:$0xff] %v14298_v29 }
 0x601   : > { %v4629_v16 = vadd.f32 %v4582_v24, %v4452_v27  ;;  %6282 = vrot.lane.b32.xlu1 %v14294_v21, %s12639_s22  ;;  %v4454_v32 = vpop.f32.mrb[21].mxu1 }
 0x602   : > { %v4456_v33 = vpop.f32.mrb[22].mxu1  ;;  %v4630_v31 = vadd.f32 %v4582_v24, %v4454_v32 }
 0x603   : > { %v14302_v63 = vmax.f32 %v4629_v16, 0.0  ;;  %v4631_v25 = vadd.f32 %v4587_v30, %v4456_v33  ;;  %6284 = vrot.lane.b32.xlu0 %v14298_v29, %s12639_s22  ;;  %v4458_v35 = vpop.f32.mrb[23].mxu1  ;;  %v11001_v33 = vld [vmem:[%s17434_s1 + $0x6] sm:$0x3] }
 0x604   : > { %v4632_v40 = vadd.f32 %v4587_v30, %v4458_v35  ;;  %v14310_v43 = vmax.f32 %v4630_v31, 0.0  ;;  %v14413_v35 = vrot.slane %v11001_v33, %v12754_v7 }
 0x605   : > { %17535 = vst [vmem:[#allocation9_spill] sm:$0xff] %v14302_v63  ;;  %v14306_v41 = vmax.f32 %v4631_v25, 0.0  ;;  %6254 = vrot.lane.b32.xlu1 %v14302_v63, %s12639_s22  ;;  %v14410_v25 = vrot.slane %v11001_v33, %v12751_v6 }
 0x606   : > { %17537 = vst [vmem:[#allocation11_spill] sm:$0xff] %v14310_v43  ;;  %v14314_v53 = vmax.f32 %v4632_v40, 0.0 }
 0x607   : > { %17536 = vst [vmem:[#allocation10_spill] sm:$0xff] %v14306_v41  ;;  %6256 = vrot.lane.b32.xlu0 %v14306_v41, %s12639_s22 }
 0x608   : > { %v4462_v49 = vpop.f32.mrb[24].mxu1  ;;  %17538 = vst [vmem:[#allocation12_spill] sm:$0xff] %v14314_v53 }
 0x609   : > { %v4633_v57 = vadd.f32 %v4592_v12, %v4462_v49  ;;  %6286 = vrot.lane.b32.xlu1 %v14310_v43, %s12639_s22  ;;  %v4464_v45 = vpop.f32.mrb[25].mxu1 }
 0x60a   : > { %v4466_v36 = vpop.f32.mrb[26].mxu1  ;;  %v4634_v52 = vadd.f32 %v4592_v12, %v4464_v45 }
 0x60b   : > { %v14318_v14 = vmax.f32 %v4633_v57, 0.0  ;;  %v4635_v0 = vadd.f32 %v4597_v39, %v4466_v36  ;;  %6288 = vrot.lane.b32.xlu0 %v14314_v53, %s12639_s22  ;;  %v4468_v20 = vpop.f32.mrb[27].mxu1 }
 0x60c   : > { %v4636_v9 = vadd.f32 %v4597_v39, %v4468_v20  ;;  %v14326_v48 = vmax.f32 %v4634_v52, 0.0 }
 0x60d   : > { %17539 = vst [vmem:[#allocation13_spill] sm:$0xff] %v14318_v14  ;;  %v14322_v50 = vmax.f32 %v4635_v0, 0.0  ;;  %6258 = vrot.lane.b32.xlu1 %v14318_v14, %s12639_s22 }
 0x60e   : > { %17541 = vst [vmem:[#allocation15_spill] sm:$0xff] %v14326_v48  ;;  %v14330_v1 = vmax.f32 %v4636_v9, 0.0 }
 0x60f   : > { %17540 = vst [vmem:[#allocation14_spill] sm:$0xff] %v14322_v50  ;;  %6260 = vrot.lane.b32.xlu0 %v14322_v50, %s12639_s22 }
 0x610   : > { %v4472_v59 = vpop.f32.mrb[28].mxu1  ;;  %17542 = vst [vmem:[#allocation16_spill] sm:$0xff] %v14330_v1 }
 0x611   : > { %v4637_v28 = vadd.f32 %v4602_v51, %v4472_v59  ;;  %6290 = vrot.lane.b32.xlu1 %v14326_v48, %s12639_s22  ;;  %v4474_v17 = vpop.f32.mrb[29].mxu1 }
 0x612   : > { %v4476_v11 = vpop.f32.mrb[30].mxu1  ;;  %v4638_v46 = vadd.f32 %v4602_v51, %v4474_v17 }
 0x613   : > { %v14334_v23 = vmax.f32 %v4637_v28, 0.0  ;;  %v4639_v54 = vadd.f32 %v4607_v19, %v4476_v11  ;;  %6292 = vrot.lane.b32.xlu0 %v14330_v1, %s12639_s22  ;;  %v4478_v60 = vpop.f32.mrb[31].mxu1 }
 0x614   : > { %v4640_v27 = vadd.f32 %v4607_v19, %v4478_v60  ;;  %v14342_v16 = vmax.f32 %v4638_v46, 0.0 }
 0x615   : > { %17543 = vst [vmem:[#allocation17_spill] sm:$0xff] %v14334_v23  ;;  %v14338_v24 = vmax.f32 %v4639_v54, 0.0  ;;  %6262 = vrot.lane.b32.xlu1 %v14334_v23, %s12639_s22 }
 0x616   : > { %17545 = vst [vmem:[#allocation19_spill] sm:$0xff] %v14342_v16  ;;  %v14346_v32 = vmax.f32 %v4640_v27, 0.0 }
 0x617   : > { %17544 = vst [vmem:[#allocation18_spill] sm:$0xff] %v14338_v24  ;;  %6264 = vrot.lane.b32.xlu0 %v14338_v24, %s12639_s22 }
 0x618   : > { %17546 = vst [vmem:[#allocation20_spill] sm:$0xff] %v14346_v32 }
 0x619   : > { %6294 = vrot.lane.b32.xlu1 %v14342_v16, %s12639_s22 }
 0x61b   : > { %6296 = vrot.lane.b32.xlu0 %v14346_v32, %s12639_s22 }
 0x61d   : > { %7178 = vrot.lane.b32.xlu1 %v14224_v42, %s12640_s23 }
 0x61f   : > { %7180 = vrot.lane.b32.xlu0 %v14226_v10, %s12640_s23 }
 0x621   : > { %7210 = vrot.lane.b32.xlu1 %v14230_v18, %s12640_s23 }
 0x623   : > { %7212 = vrot.lane.b32.xlu0 %v14234_v56, %s12640_s23 }
 0x625   : > { %7182 = vrot.lane.b32.xlu1 %v14238_v26, %s12640_s23 }
 0x627   : > { %7184 = vrot.lane.b32.xlu0 %v14242_v8, %s12640_s23 }
 0x629   : > { %7214 = vrot.lane.b32.xlu1 %v14246_v34, %s12640_s23 }
 0x62b   : > { %7216 = vrot.lane.b32.xlu0 %v14250_v37, %s12640_s23 }
 0x62d   : > { %7186 = vrot.lane.b32.xlu1 %v14254_v47, %s12640_s23 }
 0x62f   : > { %7188 = vrot.lane.b32.xlu0 %v14258_v58, %s12640_s23 }
 0x631   : > { %7218 = vrot.lane.b32.xlu1 %v14262_v55, %s12640_s23 }
 0x633   : > { %7220 = vrot.lane.b32.xlu0 %v14266_v61, %s12640_s23 }
 0x635   : > { %7190 = vrot.lane.b32.xlu1 %v14270_v15, %s12640_s23 }
 0x637   : > { %7192 = vrot.lane.b32.xlu0 %v14274_v13, %s12640_s23 }
 0x639   : > { %7222 = vrot.lane.b32.xlu1 %v14278_v38, %s12640_s23 }
 0x63b   : > { %7224 = vrot.lane.b32.xlu0 %v14282_v44, %s12640_s23 }
 0x63d   : > { %7194 = vrot.lane.b32.xlu1 %v14286_v22, %s12640_s23 }
 0x63f   : > { %7196 = vrot.lane.b32.xlu0 %v14290_v62, %s12640_s23 }
 0x641   : > { %7226 = vrot.lane.b32.xlu1 %v14294_v21, %s12640_s23 }
 0x643   : > { %7228 = vrot.lane.b32.xlu0 %v14298_v29, %s12640_s23 }
 0x645   : > { %7198 = vrot.lane.b32.xlu1 %v14302_v63, %s12640_s23 }
 0x647   : > { %7200 = vrot.lane.b32.xlu0 %v14306_v41, %s12640_s23 }
 0x649   : > { %7230 = vrot.lane.b32.xlu1 %v14310_v43, %s12640_s23 }
 0x64b   : > { %7232 = vrot.lane.b32.xlu0 %v14314_v53, %s12640_s23 }
 0x64d   : > { %7202 = vrot.lane.b32.xlu1 %v14318_v14, %s12640_s23 }
 0x64f   : > { %v6235_v30 = vpop.permute.xlu1 %6234  ;;  %7204 = vrot.lane.b32.xlu0 %v14322_v50, %s12640_s23 }
 0x651   : > { %v6237_v31 = vpop.permute.xlu0 %6236  ;;  %7234 = vrot.lane.b32.xlu1 %v14326_v48, %s12640_s23 }
 0x653   : > { %v6267_v40 = vpop.permute.xlu1 %6266  ;;  %7236 = vrot.lane.b32.xlu0 %v14330_v1, %s12640_s23 }
 0x654   : > { %v6298_v12 = vsel %vm817_vm5, %v6235_v30, %v6267_v40  ;;  %v6314_v49 = vsel %vm817_vm5, %v6267_v40, %v6235_v30 }
 0x655   : > { %v6269_v57 = vpop.permute.xlu0 %6268  ;;  %7206 = vrot.lane.b32.xlu1 %v14334_v23, %s12640_s23  ;;  %v6342_v36 = vmul.f32 %v14410_v25, %v6314_v49  ;;  %v6343_v52 = vmul.f32 %v14413_v35, %v6298_v12 }
 0x656   : > { %v6299_v45 = vsel %vm817_vm5, %v6237_v31, %v6269_v57  ;;  %v6315_v39 = vsel %vm817_vm5, %v6269_v57, %v6237_v31 }
 0x657   : > { %v6344_v0 = vmul.f32 %v14410_v25, %v6315_v39  ;;  %v6345_v20 = vmul.f32 %v14413_v35, %v6299_v45  ;;  %v6239_v9 = vpop.permute.xlu1 %6238  ;;  %7208 = vrot.lane.b32.xlu0 %v14338_v24, %s12640_s23 }
 0x659   : > { %v6407_v51 = vpack.c.bf16 %v6344_v0, %v6342_v36  ;;  %v6241_v59 = vpop.permute.xlu0 %6240  ;;  %7238 = vrot.lane.b32.xlu1 %v14342_v16, %s12640_s23  ;;  %v6408_v28 = vpack.c.bf16 %v6345_v20, %v6343_v52 }
 0x65b   : > { %6519 = vmatprep.subr.bf16.mxu0 %v6408_v28  ;;  %v6271_v17 = vpop.permute.xlu1 %6270  ;;  %7240 = vrot.lane.b32.xlu0 %v14346_v32, %s12640_s23 }
 0x65c   : > { %v6300_v19 = vsel %vm817_vm5, %v6239_v9, %v6271_v17  ;;  %v6316_v11 = vsel %vm817_vm5, %v6271_v17, %v6239_v9  ;;  %6520 = vmatpush1.bf16.msra.mxu0 %v6407_v51 }
 0x65d   : > { %v6273_v46 = vpop.permute.xlu0 %6272  ;;  %4925 = vrot.lane.b32.xlu1 %v14224_v42, %s12635_s19  ;;  %v6346_v27 = vmul.f32 %v14410_v25, %v6316_v11  ;;  %v6347_v30 = vmul.f32 %v14413_v35, %v6300_v19 }
 0x65e   : > { %v6301_v54 = vsel %vm817_vm5, %v6241_v59, %v6273_v46  ;;  %v6317_v60 = vsel %vm817_vm5, %v6273_v46, %v6241_v59 }
 0x65f   : > { %v6348_v33 = vmul.f32 %v14410_v25, %v6317_v60  ;;  %v6349_v31 = vmul.f32 %v14413_v35, %v6301_v54  ;;  %v6243_v40 = vpop.permute.xlu1 %6242  ;;  %4927 = vrot.lane.b32.xlu0 %v14226_v10, %s12635_s19 }
 0x661   : > { %v6409_v12 = vpack.c.bf16 %v6348_v33, %v6346_v27  ;;  %v6245_v49 = vpop.permute.xlu0 %6244  ;;  %4957 = vrot.lane.b32.xlu1 %v14230_v18, %s12635_s19  ;;  %v6410_v57 = vpack.c.bf16 %v6349_v31, %v6347_v30 }
 0x663   : > { %6521 = vmatprep.subr.bf16.mxu0 %v6410_v57  ;;  %v6275_v45 = vpop.permute.xlu1 %6274  ;;  %4959 = vrot.lane.b32.xlu0 %v14234_v56, %s12635_s19 }
 0x664   : > { %v6302_v39 = vsel %vm817_vm5, %v6243_v40, %v6275_v45  ;;  %v6318_v36 = vsel %vm817_vm5, %v6275_v45, %v6243_v40  ;;  %6522 = vmatpush1.bf16.msra.mxu0 %v6409_v12 }
 0x665   : > { %v6277_v52 = vpop.permute.xlu0 %6276  ;;  %7720 = vrot.lane.b32.xlu1 %v14224_v42, %s12641_s24  ;;  %v6350_v9 = vmul.f32 %v14410_v25, %v6318_v36  ;;  %v6351_v51 = vmul.f32 %v14413_v35, %v6302_v39 }
 0x666   : > { %v6303_v0 = vsel %vm817_vm5, %v6245_v49, %v6277_v52  ;;  %v6319_v20 = vsel %vm817_vm5, %v6277_v52, %v6245_v49 }
 0x667   : > { %v6352_v59 = vmul.f32 %v14410_v25, %v6319_v20  ;;  %v6353_v28 = vmul.f32 %v14413_v35, %v6303_v0  ;;  %v6247_v17 = vpop.permute.xlu1 %6246  ;;  %7722 = vrot.lane.b32.xlu0 %v14226_v10, %s12641_s24 }
 0x669   : > { %v6411_v19 = vpack.c.bf16 %v6352_v59, %v6350_v9  ;;  %v6249_v11 = vpop.permute.xlu0 %6248  ;;  %7752 = vrot.lane.b32.xlu1 %v14230_v18, %s12641_s24  ;;  %v6412_v46 = vpack.c.bf16 %v6353_v28, %v6351_v51 }
 0x66b   : > { %6523 = vmatprep.subr.bf16.mxu0 %v6412_v46  ;;  %v6279_v54 = vpop.permute.xlu1 %6278  ;;  %7754 = vrot.lane.b32.xlu0 %v14234_v56, %s12641_s24 }
 0x66c   : > { %v6304_v60 = vsel %vm817_vm5, %v6247_v17, %v6279_v54  ;;  %v6320_v27 = vsel %vm817_vm5, %v6279_v54, %v6247_v17  ;;  %6524 = vmatpush1.bf16.msra.mxu0 %v6411_v19 }
 0x66d   : > { %v6281_v30 = vpop.permute.xlu0 %6280  ;;  %4929 = vrot.lane.b32.xlu1 %v14238_v26, %s12635_s19  ;;  %v6354_v40 = vmul.f32 %v14410_v25, %v6320_v27  ;;  %v6355_v12 = vmul.f32 %v14413_v35, %v6304_v60 }
 0x66e   : > { %v6305_v33 = vsel %vm817_vm5, %v6249_v11, %v6281_v30  ;;  %v6321_v31 = vsel %vm817_vm5, %v6281_v30, %v6249_v11 }
 0x66f   : > { %v6356_v49 = vmul.f32 %v14410_v25, %v6321_v31  ;;  %v6357_v57 = vmul.f32 %v14413_v35, %v6305_v33  ;;  %v6251_v45 = vpop.permute.xlu1 %6250  ;;  %4931 = vrot.lane.b32.xlu0 %v14242_v8, %s12635_s19 }
 0x671   : > { %v6413_v39 = vpack.c.bf16 %v6356_v49, %v6354_v40  ;;  %v6253_v36 = vpop.permute.xlu0 %6252  ;;  %4961 = vrot.lane.b32.xlu1 %v14246_v34, %s12635_s19  ;;  %v6414_v52 = vpack.c.bf16 %v6357_v57, %v6355_v12 }
 0x673   : > { %6525 = vmatprep.subr.bf16.mxu0 %v6414_v52  ;;  %v6283_v0 = vpop.permute.xlu1 %6282  ;;  %4963 = vrot.lane.b32.xlu0 %v14250_v37, %s12635_s19 }
 0x674   : > { %v6306_v20 = vsel %vm817_vm5, %v6251_v45, %v6283_v0  ;;  %v6322_v9 = vsel %vm817_vm5, %v6283_v0, %v6251_v45  ;;  %6526 = vmatpush1.bf16.msra.mxu0 %v6413_v39 }
 0x675   : > { %v6285_v51 = vpop.permute.xlu0 %6284  ;;  %7724 = vrot.lane.b32.xlu1 %v14238_v26, %s12641_s24  ;;  %v6358_v17 = vmul.f32 %v14410_v25, %v6322_v9  ;;  %v6359_v19 = vmul.f32 %v14413_v35, %v6306_v20 }
 0x676   : > { %v6307_v59 = vsel %vm817_vm5, %v6253_v36, %v6285_v51  ;;  %v6323_v28 = vsel %vm817_vm5, %v6285_v51, %v6253_v36 }
 0x677   : > { %v6360_v11 = vmul.f32 %v14410_v25, %v6323_v28  ;;  %v6361_v46 = vmul.f32 %v14413_v35, %v6307_v59  ;;  %v6255_v54 = vpop.permute.xlu1 %6254  ;;  %7726 = vrot.lane.b32.xlu0 %v14242_v8, %s12641_s24 }
 0x679   : > { %v6415_v60 = vpack.c.bf16 %v6360_v11, %v6358_v17  ;;  %v6257_v27 = vpop.permute.xlu0 %6256  ;;  %7756 = vrot.lane.b32.xlu1 %v14246_v34, %s12641_s24  ;;  %v6416_v30 = vpack.c.bf16 %v6361_v46, %v6359_v19 }
 0x67b   : > { %6527 = vmatprep.subr.bf16.mxu0 %v6416_v30  ;;  %v6287_v33 = vpop.permute.xlu1 %6286  ;;  %7758 = vrot.lane.b32.xlu0 %v14250_v37, %s12641_s24 }
 0x67c   : > { %v6308_v31 = vsel %vm817_vm5, %v6255_v54, %v6287_v33  ;;  %v6324_v40 = vsel %vm817_vm5, %v6287_v33, %v6255_v54  ;;  %6528 = vmatpush1.bf16.msra.mxu0 %v6415_v60 }
 0x67d   : > { %v6289_v12 = vpop.permute.xlu0 %6288  ;;  %4933 = vrot.lane.b32.xlu1 %v14254_v47, %s12635_s19  ;;  %v6362_v45 = vmul.f32 %v14410_v25, %v6324_v40  ;;  %v6363_v39 = vmul.f32 %v14413_v35, %v6308_v31 }
 0x67e   : > { %v6309_v49 = vsel %vm817_vm5, %v6257_v27, %v6289_v12  ;;  %v6325_v57 = vsel %vm817_vm5, %v6289_v12, %v6257_v27 }
 0x67f   : > { %v6364_v36 = vmul.f32 %v14410_v25, %v6325_v57  ;;  %v6365_v52 = vmul.f32 %v14413_v35, %v6309_v49  ;;  %v6259_v0 = vpop.permute.xlu1 %6258  ;;  %4935 = vrot.lane.b32.xlu0 %v14258_v58, %s12635_s19 }
 0x681   : > { %v6417_v20 = vpack.c.bf16 %v6364_v36, %v6362_v45  ;;  %v6261_v9 = vpop.permute.xlu0 %6260  ;;  %4965 = vrot.lane.b32.xlu1 %v14262_v55, %s12635_s19  ;;  %v6418_v51 = vpack.c.bf16 %v6365_v52, %v6363_v39 }
 0x683   : > { %6529 = vmatprep.subr.bf16.mxu0 %v6418_v51  ;;  %v6291_v59 = vpop.permute.xlu1 %6290  ;;  %4967 = vrot.lane.b32.xlu0 %v14266_v61, %s12635_s19 }
 0x684   : > { %v6310_v28 = vsel %vm817_vm5, %v6259_v0, %v6291_v59  ;;  %v6326_v17 = vsel %vm817_vm5, %v6291_v59, %v6259_v0  ;;  %6530 = vmatpush1.bf16.msra.mxu0 %v6417_v20 }
 0x685   : > { %v6293_v19 = vpop.permute.xlu0 %6292  ;;  %7728 = vrot.lane.b32.xlu1 %v14254_v47, %s12641_s24  ;;  %v6366_v54 = vmul.f32 %v14410_v25, %v6326_v17  ;;  %v6367_v60 = vmul.f32 %v14413_v35, %v6310_v28 }
 0x686   : > { %v6311_v11 = vsel %vm817_vm5, %v6261_v9, %v6293_v19  ;;  %v6327_v46 = vsel %vm817_vm5, %v6293_v19, %v6261_v9 }
 0x687   : > { %v6368_v27 = vmul.f32 %v14410_v25, %v6327_v46  ;;  %v6369_v30 = vmul.f32 %v14413_v35, %v6311_v11  ;;  %v6263_v33 = vpop.permute.xlu1 %6262  ;;  %7730 = vrot.lane.b32.xlu0 %v14258_v58, %s12641_s24 }
 0x689   : > { %v6419_v31 = vpack.c.bf16 %v6368_v27, %v6366_v54  ;;  %7760 = vrot.lane.b32.xlu1 %v14262_v55, %s12641_s24  ;;  %v6265_v40 = vpop.permute.xlu0 %6264  ;;  %v6420_v12 = vpack.c.bf16 %v6369_v30, %v6367_v60  ;;  %v6809_v54 = vpack.c.bf16 %v14226_v10, %v14224_v42  ;;  %v6812_v27 = vpack.c.bf16 %v14250_v37, %v14246_v34 }
 0x68b   : > { %6531 = vmatprep.subr.bf16.mxu0 %v6420_v12  ;;  %v6295_v49 = vpop.permute.xlu1 %6294  ;;  %7762 = vrot.lane.b32.xlu0 %v14266_v61, %s12641_s24  ;;  %v12387_v12 = vld [vmem:[%s17439_s6 + $0x188] sm:$0xff]  }
 0x68c   : > { %v6312_v57 = vsel %vm817_vm5, %v6263_v33, %v6295_v49  ;;  %v6328_v45 = vsel %vm817_vm5, %v6295_v49, %v6263_v33  ;;  %6532 = vmatpush1.bf16.msra.mxu0 %v6419_v31  ;;  %v6811_v33 = vpack.c.bf16 %v14242_v8, %v14238_v26 }
 0x68d   : > { %4937 = vrot.lane.b32.xlu1 %v14270_v15, %s12635_s19  ;;  %v6297_v39 = vpop.permute.xlu0 %6296  ;;  %v6370_v0 = vmul.f32 %v14410_v25, %v6328_v45  ;;  %v6371_v20 = vmul.f32 %v14413_v35, %v6312_v57  ;;  %v6813_v57 = vpack.c.bf16 %v14258_v58, %v14254_v47 }
 0x68e   : > { %v6313_v36 = vsel %vm817_vm5, %v6265_v40, %v6297_v39  ;;  %v6329_v52 = vsel %vm817_vm5, %v6297_v39, %v6265_v40  ;;  %v6814_v40 = vpack.c.bf16 %v14266_v61, %v14262_v55  ;;  %v6816_v39 = vpack.c.bf16 %v14282_v44, %v14278_v38 }
 0x68f   : > { %v6372_v9 = vmul.f32 %v14410_v25, %v6329_v52  ;;  %v6373_v51 = vmul.f32 %v14413_v35, %v6313_v36  ;;  %v14571_v59 = vpop.permute.xlu1 %7178  ;;  %4939 = vrot.lane.b32.xlu0 %v14274_v13, %s12635_s19  ;;  %v6810_v25 = vpack.c.bf16 %v14234_v56, %v14230_v18  ;;  %v12386_v35 = vld [vmem:[%s17439_s6 + $0x180] sm:$0xff]   ;;  %v6815_v52 = vpack.c.bf16 %v14274_v13, %v14270_v15 }
 0x691   : > { %v6421_v28 = vpack.c.bf16 %v6372_v9, %v6370_v0  ;;  %4969 = vrot.lane.b32.xlu1 %v14278_v38, %s12635_s19  ;;  %v14577_v17 = vpop.permute.xlu0 %7180  ;;  %v6422_v19 = vpack.c.bf16 %v6373_v51, %v6371_v20  ;;  %v6818_v20 = vpack.c.bf16 %v14298_v29, %v14294_v21  ;;  %v12388_v9 = vld [vmem:[%s17439_s6 + $0x190] sm:$0xff]  }
 0x693   : > { %v14579_v11 = vpop.permute.xlu1 %7210  ;;  %4971 = vrot.lane.b32.xlu0 %v14282_v44, %s12635_s19  ;;  %6533 = vmatprep.subr.bf16.mxu0 %v6422_v19 }
 0x694   : > { %6534 = vmatpush1.bf16.msra.mxu0 %v6421_v28  ;;  %v6817_v28 = vpack.c.bf16 %v14290_v62, %v14286_v22 }
 0x695   : > { %7732 = vrot.lane.b32.xlu1 %v14270_v15, %s12641_s24  ;;  %6921 = vmatprep.subr.bf16.mxu0 %v6810_v25  ;;  %v14590_v46 = vpop.permute.xlu0 %7212  ;;  %v6820_v25 = vpack.c.bf16 %v14314_v53, %v14310_v43 }
 0x697   : > { %v14594_v60 = vpop.permute.xlu1 %7182  ;;  %7734 = vrot.lane.b32.xlu0 %v14274_v13, %s12641_s24  ;;  %6552 = vmatmul.mubr.bf16.vlgmr.msra.gmra.mrb[16].mxu0 %v12386_v35 }
 0x698   : > { %6922 = vmatpush1.bf16.msra.mxu0 %v6809_v54  ;;  %6561 = vmatprep.mubr.bf16.mxu0 %v17453_v2  ;;  %v14664_v54 = vld [vmem:[%s17434_s1 + $0xa] sm:$0x3] }
 0x699   : > { %7764 = vrot.lane.b32.xlu1 %v14278_v38, %s12641_s24  ;;  %6923 = vmatprep.subr.bf16.mxu0 %v6812_v27  ;;  %v14603_v30 = vpop.permute.xlu0 %7184  ;;  %v6819_v27 = vpack.c.bf16 %v14306_v41, %v14302_v63 }
 0x69b   : > { %v14607_v31 = vpop.permute.xlu1 %7214  ;;  %7766 = vrot.lane.b32.xlu0 %v14282_v44, %s12641_s24 }
 0x69c   : > { %6924 = vmatpush1.bf16.msra.mxu0 %v6811_v33 }
 0x69d   : > { %4941 = vrot.lane.b32.xlu1 %v14286_v22, %s12635_s19  ;;  %6925 = vmatprep.subr.bf16.mxu0 %v6814_v40  ;;  %v14618_v49 = vpop.permute.xlu0 %7216  ;;  %v6822_v40 = vpack.c.bf16 %v14330_v1, %v14326_v48 }
 0x69f   : > { %v14622_v45 = vpop.permute.xlu1 %7186  ;;  %4943 = vrot.lane.b32.xlu0 %v14290_v62, %s12635_s19  ;;  %6562 = vmatmul.mubr.bf16.gmra.mrb[20].mxu0 %v12387_v12  ;;  %v12389_v12 = vld [vmem:[%s17439_s6 + $0x198] sm:$0xff]  }
 0x6a0   : > { %6926 = vmatpush1.bf16.msra.mxu0 %v6813_v57  ;;  %6571 = vmatprep.mubr.bf16.mxu0 %v17453_v2  ;;  %v7259_v57 = vsel %vm1115_vm6, %v14590_v46, %v14577_v17 }
 0x6a1   : > { %4973 = vrot.lane.b32.xlu1 %v14294_v21, %s12635_s19  ;;  %6927 = vmatprep.subr.bf16.mxu0 %v6816_v39  ;;  %v14631_v36 = vpop.permute.xlu0 %7188  ;;  %v14683_v39 = vrot.slane %v14664_v54, %v12754_v7 }
 0x6a3   : > { %v14635_v0 = vpop.permute.xlu1 %7218  ;;  %4975 = vrot.lane.b32.xlu0 %v14298_v29, %s12635_s19 }
 0x6a4   : > { %6928 = vmatpush1.bf16.msra.mxu0 %v6815_v52 }
 0x6a5   : > { %7736 = vrot.lane.b32.xlu1 %v14286_v22, %s12641_s24  ;;  %6929 = vmatprep.subr.bf16.mxu0 %v6818_v20  ;;  %v14646_v51 = vpop.permute.xlu0 %7220  ;;  %v7258_v20 = vsel %vm1115_vm6, %v14579_v11, %v14571_v59 }
 0x6a7   : > { %v14650_v19 = vpop.permute.xlu1 %7190  ;;  %7738 = vrot.lane.b32.xlu0 %v14290_v62, %s12641_s24  ;;  %6572 = vmatmul.mubr.bf16.gmra.mrb[24].mxu0 %v12388_v9  ;;  %v6821_v9 = vpack.c.bf16 %v14322_v50, %v14318_v14 }
 0x6a8   : > { %6930 = vmatpush1.bf16.msra.mxu0 %v6817_v28  ;;  %6581 = vmatprep.mubr.bf16.mxu0 %v17453_v2  ;;  %v7289_v28 = vmul.f32 %v14683_v39, %v7259_v57  ;;  %v6823_v57 = vpack.c.bf16 %v14338_v24, %v14334_v23 }
 0x6a9   : > { %7768 = vrot.lane.b32.xlu1 %v14294_v21, %s12641_s24  ;;  %6931 = vmatprep.subr.bf16.mxu0 %v6820_v25  ;;  %v14659_v35 = vpop.permute.xlu0 %7192 }
 0x6ab   : > { %v14668_v33 = vpop.permute.xlu1 %7222  ;;  %7770 = vrot.lane.b32.xlu0 %v14298_v29, %s12641_s24 }
 0x6ac   : > { %6932 = vmatpush1.bf16.msra.mxu0 %v6819_v27  ;;  %v6824_v27 = vpack.c.bf16 %v14346_v32, %v14342_v16 }
 0x6ad   : > { %4945 = vrot.lane.b32.xlu1 %v14302_v63, %s12635_s19  ;;  %6933 = vmatprep.subr.bf16.mxu0 %v6822_v40  ;;  %v14687_v52 = vpop.permute.xlu0 %7224  ;;  %v7287_v40 = vmul.f32 %v14683_v39, %v7258_v20 }
 0x6af   : > { %v14696_v25 = vpop.permute.xlu1 %7194  ;;  %4947 = vrot.lane.b32.xlu0 %v14306_v41, %s12635_s19  ;;  %6582 = vmatmul.mubr.bf16.gmra.mrb[28].mxu0 %v12389_v12  ;;  %v7352_v12 = vpack.c.bf16 %v7289_v28, %v7287_v40 }
 0x6b0   : > { %6934 = vmatpush1.bf16.msra.mxu0 %v6821_v9  ;;  %6591 = vmatprep.mubr.bf16.mxu0 %v17453_v2  ;;  %v12390_v9 = vld [vmem:[%s17439_s6 + $0x1a0] sm:$0xff]  }
 0x6b1   : > { %4977 = vrot.lane.b32.xlu1 %v14310_v43, %s12635_s19  ;;  %v14706_v3 = vpop.permute.xlu0 %7196  ;;  %6935 = vmatprep.subr.bf16.mxu0 %v6824_v27 }
 0x6b3   : > { %v14710_v5 = vpop.permute.xlu1 %7226  ;;  %4979 = vrot.lane.b32.xlu0 %v14314_v53, %s12635_s19 }
 0x6b4   : > { %6936 = vmatpush1.bf16.msra.mxu0 %v6823_v57  ;;  %v12391_v57 = vld [vmem:[%s17439_s6 + $0x1a8] sm:$0xff]  }
 0x6b5   : > { %7740 = vrot.lane.b32.xlu1 %v14302_v63, %s12641_s24  ;;  %v14719_v20 = vpop.permute.xlu0 %7228  ;;  %7463 = vmatprep.subr.bf16.mxu0 %v7352_v12  ;;  %v17554_v63 = vmov 0  }
 0x6b7   : > { %v14721_v27 = vpop.permute.xlu1 %7198  ;;  %7742 = vrot.lane.b32.xlu0 %v14306_v41, %s12641_s24  ;;  %6592 = vmatmul.mubr.bf16.gmra.mrb[32].mxu0 %v12390_v9  ;;  %v12392_v41 = vld [vmem:[%s17439_s6 + $0x1b0] sm:$0xff]  }
 0x6b8   : > { %17547 = vst [vmem:[#allocation21_spill] sm:$0xff] %v14721_v27  ;;  %6601 = vmatprep.mubr.bf16.mxu0 %v17453_v2 }
 0x6b9   : > { %7772 = vrot.lane.b32.xlu1 %v14310_v43, %s12641_s24  ;;  %v14728_v28 = vpop.permute.xlu0 %7200 }
 0x6bb   : > { %v14730_v40 = vpop.permute.xlu1 %7230  ;;  %7774 = vrot.lane.b32.xlu0 %v14314_v53, %s12641_s24 }
 0x6bc   : > { %17548 = vst [vmem:[#allocation22_spill] sm:$0xff] %v14730_v40 }
 0x6bd   : > { %4949 = vrot.lane.b32.xlu1 %v14318_v14, %s12635_s19  ;;  %v14739_v12 = vpop.permute.xlu0 %7232 }
 0x6bf   : > { %v14741_v9 = vpop.permute.xlu1 %7202  ;;  %4951 = vrot.lane.b32.xlu0 %v14322_v50, %s12635_s19  ;;  %6602 = vmatmul.mubr.bf16.gmra.mrb[36].mxu0 %v12391_v57 }
 0x6c0   : > { %17549 = vst [vmem:[#allocation23_spill] sm:$0xff] %v14741_v9  ;;  %6611 = vmatprep.mubr.bf16.mxu0 %v17453_v2 }
 0x6c1   : > { %4981 = vrot.lane.b32.xlu1 %v14326_v48, %s12635_s19  ;;  %v14748_v53 = vpop.permute.xlu0 %7204 }
 0x6c2   : > { %17550 = vst [vmem:[#allocation24_spill] sm:$0xff] %v14748_v53 }
 0x6c3   : > { %v14750_v43 = vpop.permute.xlu1 %7234  ;;  %4983 = vrot.lane.b32.xlu0 %v14330_v1, %s12635_s19 }
 0x6c4   : > { %17551 = vst [vmem:[#allocation25_spill] sm:$0xff] %v14750_v43 }
 0x6c5   : > { %7744 = vrot.lane.b32.xlu1 %v14318_v14, %s12641_s24  ;;  %v14759_v57 = vpop.permute.xlu0 %7236  ;;  %v12393_v14 = vld [vmem:[%s17439_s6 + $0x1b8] sm:$0xff]  }
 0x6c6   : > { %17552 = vst [vmem:[#allocation26_spill] sm:$0xff] %v14759_v57 }
 0x6c7   : > { %v14761_v2 = vpop.permute.xlu1 %7206  ;;  %7746 = vrot.lane.b32.xlu0 %v14322_v50, %s12641_s24  ;;  %6612 = vmatmul.mubr.bf16.gmra.mrb[40].mxu0 %v12392_v41 }
 0x6c8   : > { %17553 = vst [vmem:[#allocation27_spill] sm:$0xff] %v14761_v2  ;;  %6621 = vmatprep.mubr.bf16.mxu0 %v17554_v63 }
 0x6c9   : > { %7776 = vrot.lane.b32.xlu1 %v14326_v48, %s12641_s24  ;;  %v14768_v43 = vpop.permute.xlu0 %7208  ;;  %v10887_v48 = vld [vmem:[%s17434_s1 + $0x2] sm:$0x3] }
 0x6ca   : > { %17555 = vst [vmem:[#allocation28_spill] sm:$0xff] %v14768_v43  ;;  %v14793_v2 = vrot.slane %v10887_v48, %v12754_v7 }
 0x6cb   : > { %v14770_v9 = vpop.permute.xlu1 %7238  ;;  %7778 = vrot.lane.b32.xlu0 %v14330_v1, %s12641_s24 }
 0x6cc   : > { %17556 = vst [vmem:[#allocation29_spill] sm:$0xff] %v14770_v9  ;;  %v14790_v9 = vrot.slane %v10887_v48, %v12751_v6 }
 0x6cd   : > { %4953 = vrot.lane.b32.xlu1 %v14334_v23, %s12635_s19  ;;  %v14779_v41 = vpop.permute.xlu0 %7240 }
 0x6ce   : > { %17557 = vst [vmem:[#allocation30_spill] sm:$0xff] %v14779_v41 }
 0x6cf   : > { %v4926_v50 = vpop.permute.xlu1 %4925  ;;  %4955 = vrot.lane.b32.xlu0 %v14338_v24, %s12635_s19  ;;  %6622 = vmatmul.mubr.bf16.gmra.mrb[44].mxu0 %v12393_v14  ;;  %v12394_v14 = vld [vmem:[%s17439_s6 + $0x1c0] sm:$0xff]  }
 0x6d0   : > { %6631 = vmatprep.mubr.bf16.mxu0 %v17554_v63 }
 0x6d1   : > { %4985 = vrot.lane.b32.xlu1 %v14342_v16, %s12635_s19  ;;  %v4928_v1 = vpop.permute.xlu0 %4927 }
 0x6d3   : > { %v4958_v41 = vpop.permute.xlu1 %4957  ;;  %7750 = vrot.lane.b32.xlu0 %v14338_v24, %s12641_s24 }
 0x6d4   : > { %v4989_v43 = vsel %vm400_vm0, %v4926_v50, %v4958_v41  ;;  %v5005_v29 = vsel %vm400_vm0, %v4958_v41, %v4926_v50 }
 0x6d5   : > { %7748 = vrot.lane.b32.xlu1 %v14334_v23, %s12641_s24  ;;  %v4960_v57 = vpop.permute.xlu0 %4959  ;;  %v5033_v48 = vmul.f32 %v14790_v9, %v5005_v29  ;;  %v5034_v53 = vmul.f32 %v14793_v2, %v4989_v43 }
 0x6d6   : > { %v4990_v7 = vsel %vm400_vm0, %v4928_v1, %v4960_v57  ;;  %v5006_v24 = vsel %vm400_vm0, %v4960_v57, %v4928_v1  ;;  %v12396_v57 = vld [vmem:[%s17439_s6 + $0x1d0] sm:$0xff]  }
 0x6d7   : > { %v5035_v21 = vmul.f32 %v14790_v9, %v5006_v24  ;;  %v5036_v40 = vmul.f32 %v14793_v2, %v4990_v7  ;;  %v14814_v27 = vpop.permute.xlu1 %7720  ;;  %4987 = vrot.lane.b32.xlu0 %v14346_v32, %s12635_s19  ;;  %6632 = vmatmul.mubr.bf16.gmra.mrb[48].mxu0 %v12394_v14  ;;  %v12395_v7 = vld [vmem:[%s17439_s6 + $0x1c8] sm:$0xff]  }
 0x6d8   : > { %6641 = vmatprep.mubr.bf16.mxu0 %v17554_v63 }
 0x6d9   : > { %v5098_v29 = vpack.c.bf16 %v5035_v21, %v5033_v48  ;;  %7780 = vrot.lane.b32.xlu1 %v14342_v16, %s12641_s24  ;;  %v14821_v50 = vpop.permute.xlu0 %7722  ;;  %v5099_v1 = vpack.c.bf16 %v5036_v40, %v5034_v53 }
 0x6db   : > { %v14823_v43 = vpop.permute.xlu1 %7752  ;;  %7782 = vrot.lane.b32.xlu0 %v14346_v32, %s12641_s24  ;;  %5210 = vmatprep.subr.bf16.mxu1 %v5099_v1 }
 0x6dc   : > { %17558 = vst [vmem:[#allocation31_spill] sm:$0xff] %v14823_v43  ;;  %5211 = vmatpush1.bf16.msra.mxu1 %v5098_v29 }
 0x6dd   : > { %4737 = vrot.lane.b32.xlu1 %v14224_v42, %s12636_s20  ;;  %v14832_v21 = vpop.permute.xlu0 %7754 }
 0x6df   : > { %v4930_v24 = vpop.permute.xlu1 %4929  ;;  %6642 = vmatmul.mubr.bf16.gmra.mrb[52].mxu0 %v12395_v7  ;;  %4739 = vrot.lane.b32.xlu0 %v14226_v10, %s12636_s20 }
 0x6e0   : > { %6651 = vmatprep.mubr.bf16.mxu0 %v17554_v63 }
 0x6e1   : > { %4769 = vrot.lane.b32.xlu1 %v14230_v18, %s12636_s20  ;;  %v4932_v53 = vpop.permute.xlu0 %4931 }
 0x6e3   : > { %v4962_v40 = vpop.permute.xlu1 %4961  ;;  %4771 = vrot.lane.b32.xlu0 %v14234_v56, %s12636_s20 }
 0x6e4   : > { %v4991_v41 = vsel %vm400_vm0, %v4930_v24, %v4962_v40  ;;  %v5007_v14 = vsel %vm400_vm0, %v4962_v40, %v4930_v24 }
 0x6e5   : > { %8262 = vrot.lane.b32.xlu1 %v14224_v42, %s12642_s25  ;;  %v4964_v48 = vpop.permute.xlu0 %4963  ;;  %v5037_v29 = vmul.f32 %v14790_v9, %v5007_v14  ;;  %v5038_v32 = vmul.f32 %v14793_v2, %v4991_v41 }
 0x6e6   : > { %v4992_v1 = vsel %vm400_vm0, %v4932_v53, %v4964_v48  ;;  %v5008_v7 = vsel %vm400_vm0, %v4964_v48, %v4932_v53  ;;  %v12398_v48 = vld [vmem:[%s17439_s6 + $0x1e0] sm:$0xff]  }
 0x6e7   : > { %v5039_v16 = vmul.f32 %v14790_v9, %v5008_v7  ;;  %v5040_v23 = vmul.f32 %v14793_v2, %v4992_v1  ;;  %v14858_v43 = vpop.permute.xlu1 %7724  ;;  %6652 = vmatmul.mubr.bf16.gmra.mrb[56].mxu0 %v12396_v57  ;;  %8264 = vrot.lane.b32.xlu0 %v14226_v10, %s12642_s25  ;;  %v12397_v57 = vld [vmem:[%s17439_s6 + $0x1d8] sm:$0xff]  }
 0x6e8   : > { %17559 = vst [vmem:[#allocation32_spill] sm:$0xff] %v14858_v43  ;;  %6661 = vmatprep.mubr.bf16.mxu0 %v17554_v63 }
 0x6e9   : > { %v5100_v24 = vpack.c.bf16 %v5039_v16, %v5037_v29  ;;  %8294 = vrot.lane.b32.xlu1 %v14230_v18, %s12642_s25  ;;  %v14865_v40 = vpop.permute.xlu0 %7726  ;;  %v5101_v53 = vpack.c.bf16 %v5040_v23, %v5038_v32 }
 0x6ea   : > { %17560 = vst [vmem:[#allocation33_spill] sm:$0xff] %v14865_v40 }
 0x6eb   : > { %v14867_v41 = vpop.permute.xlu1 %7756  ;;  %8296 = vrot.lane.b32.xlu0 %v14234_v56, %s12642_s25  ;;  %5212 = vmatprep.subr.bf16.mxu1 %v5101_v53 }
 0x6ec   : > { %17561 = vst [vmem:[#allocation34_spill] sm:$0xff] %v14867_v41  ;;  %5213 = vmatpush1.bf16.msra.mxu1 %v5100_v24 }
 0x6ed   : > { %4741 = vrot.lane.b32.xlu1 %v14238_v26, %s12636_s20  ;;  %v14876_v16 = vpop.permute.xlu0 %7758 }
 0x6ee   : > { %17562 = vst [vmem:[#allocation35_spill] sm:$0xff] %v14876_v16 }
 0x6ef   : > { %v4934_v14 = vpop.permute.xlu1 %4933  ;;  %6662 = vmatmul.mubr.bf16.gmra.mrb[60].mxu0 %v12397_v57  ;;  %4743 = vrot.lane.b32.xlu0 %v14242_v8, %s12636_s20 }
 0x6f0   : > { %6671 = vmatprep.mubr.bf16.mxu0 %v17554_v63 }
 0x6f1   : > { %4773 = vrot.lane.b32.xlu1 %v14246_v34, %s12636_s20  ;;  %v4936_v23 = vpop.permute.xlu0 %4935 }
 0x6f3   : > { %v4966_v32 = vpop.permute.xlu1 %4965  ;;  %4775 = vrot.lane.b32.xlu0 %v14250_v37, %s12636_s20 }
 0x6f4   : > { %v4993_v29 = vsel %vm400_vm0, %v4934_v14, %v4966_v32  ;;  %v5009_v1 = vsel %vm400_vm0, %v4966_v32, %v4934_v14 }
 0x6f5   : > { %8266 = vrot.lane.b32.xlu1 %v14238_v26, %s12642_s25  ;;  %v4968_v7 = vpop.permute.xlu0 %4967  ;;  %v5041_v24 = vmul.f32 %v14790_v9, %v5009_v1  ;;  %v5042_v41 = vmul.f32 %v14793_v2, %v4993_v29 }
 0x6f6   : > { %v4994_v53 = vsel %vm400_vm0, %v4936_v23, %v4968_v7  ;;  %v5010_v57 = vsel %vm400_vm0, %v4968_v7, %v4936_v23  ;;  %v12400_v7 = vld [vmem:[%s17439_s6 + $0x1f0] sm:$0xff]  }
 0x6f7   : > { %v5043_v43 = vmul.f32 %v14790_v9, %v5010_v57  ;;  %v5044_v16 = vmul.f32 %v14793_v2, %v4994_v53  ;;  %v14902_v40 = vpop.permute.xlu1 %7728  ;;  %6672 = vmatmul.mubr.bf16.gmra.mrb[64].mxu0 %v12398_v48  ;;  %8268 = vrot.lane.b32.xlu0 %v14242_v8, %s12642_s25  ;;  %v12399_v48 = vld [vmem:[%s17439_s6 + $0x1e8] sm:$0xff]  }
 0x6f8   : > { %17563 = vst [vmem:[#allocation36_spill] sm:$0xff] %v14902_v40  ;;  %6681 = vmatprep.mubr.bf16.mxu0 %v17554_v63 }
 0x6f9   : > { %v5102_v14 = vpack.c.bf16 %v5043_v43, %v5041_v24  ;;  %8298 = vrot.lane.b32.xlu1 %v14246_v34, %s12642_s25  ;;  %v14909_v32 = vpop.permute.xlu0 %7730  ;;  %v5103_v23 = vpack.c.bf16 %v5044_v16, %v5042_v41 }
 0x6fa   : > { %17564 = vst [vmem:[#allocation37_spill] sm:$0xff] %v14909_v32 }
 0x6fb   : > { %v14911_v29 = vpop.permute.xlu1 %7760  ;;  %8300 = vrot.lane.b32.xlu0 %v14250_v37, %s12642_s25  ;;  %5214 = vmatprep.subr.bf16.mxu1 %v5103_v23 }
 0x6fc   : > { %17565 = vst [vmem:[#allocation38_spill] sm:$0xff] %v14911_v29  ;;  %5215 = vmatpush1.bf16.msra.mxu1 %v5102_v14 }
 0x6fd   : > { %4745 = vrot.lane.b32.xlu1 %v14254_v47, %s12636_s20  ;;  %v14920_v43 = vpop.permute.xlu0 %7762 }
 0x6fe   : > { %17566 = vst [vmem:[#allocation39_spill] sm:$0xff] %v14920_v43 }
 0x6ff   : > { %v4938_v1 = vpop.permute.xlu1 %4937  ;;  %6682 = vmatmul.mubr.bf16.gmra.mrb[68].mxu0 %v12399_v48  ;;  %4747 = vrot.lane.b32.xlu0 %v14258_v58, %s12636_s20 }
 0x700   : > { %6691 = vmatprep.mubr.bf16.mxu0 %v17554_v63 }
 0x701   : > { %4777 = vrot.lane.b32.xlu1 %v14262_v55, %s12636_s20  ;;  %v4940_v41 = vpop.permute.xlu0 %4939 }
 0x703   : > { %v4970_v16 = vpop.permute.xlu1 %4969  ;;  %4779 = vrot.lane.b32.xlu0 %v14266_v61, %s12636_s20 }
 0x704   : > { %v4995_v24 = vsel %vm400_vm0, %v4938_v1, %v4970_v16  ;;  %v5011_v53 = vsel %vm400_vm0, %v4970_v16, %v4938_v1 }
 0x705   : > { %8270 = vrot.lane.b32.xlu1 %v14254_v47, %s12642_s25  ;;  %v4972_v57 = vpop.permute.xlu0 %4971  ;;  %v5045_v14 = vmul.f32 %v14790_v9, %v5011_v53  ;;  %v5046_v29 = vmul.f32 %v14793_v2, %v4995_v24  ;;  %v7261_v53 = vsel %vm1115_vm6, %v14618_v49, %v14603_v30 }
 0x706   : > { %v4996_v23 = vsel %vm400_vm0, %v4940_v41, %v4972_v57  ;;  %v5012_v48 = vsel %vm400_vm0, %v4972_v57, %v4940_v41  ;;  %v7242_v57 = vsel %vm1115_vm6, %v14571_v59, %v14579_v11 }
 0x707   : > { %v5047_v40 = vmul.f32 %v14790_v9, %v5012_v48  ;;  %v5048_v43 = vmul.f32 %v14793_v2, %v4996_v23  ;;  %v14946_v32 = vpop.permute.xlu1 %7732  ;;  %6692 = vmatmul.mubr.bf16.gmra.mrb[72].mxu0 %v12400_v7  ;;  %8272 = vrot.lane.b32.xlu0 %v14258_v58, %s12642_s25  ;;  %v12401_v7 = vld [vmem:[%s17439_s6 + $0x1f8] sm:$0xff]   ;;  %v7245_v23 = vsel %vm1115_vm6, %v14603_v30, %v14618_v49 }
 0x708   : > { %17567 = vst [vmem:[#allocation40_spill] sm:$0xff] %v14946_v32  ;;  %6701 = vmatprep.mubr.bf16.mxu0 %v17554_v63  ;;  %v7244_v30 = vsel %vm1115_vm6, %v14594_v60, %v14607_v31 }
 0x709   : > { %v5104_v1 = vpack.c.bf16 %v5047_v40, %v5045_v14  ;;  %8302 = vrot.lane.b32.xlu1 %v14262_v55, %s12642_s25  ;;  %v14953_v16 = vpop.permute.xlu0 %7734  ;;  %v5105_v41 = vpack.c.bf16 %v5048_v43, %v5046_v29  ;;  %v7243_v40 = vsel %vm1115_vm6, %v14577_v17, %v14590_v46  ;;  %v14972_v43 = vrot.slane %v14664_v54, %v12751_v6 }
 0x70a   : > { %v7260_v54 = vsel %vm1115_vm6, %v14607_v31, %v14594_v60  ;;  %v7293_v14 = vmul.f32 %v14683_v39, %v7261_v53 }
 0x70b   : > { %v14955_v24 = vpop.permute.xlu1 %7764  ;;  %8304 = vrot.lane.b32.xlu0 %v14266_v61, %s12642_s25  ;;  %5216 = vmatprep.subr.bf16.mxu1 %v5105_v41  ;;  %v7288_v46 = vmul.f32 %v14972_v43, %v7243_v40  ;;  %v7286_v11 = vmul.f32 %v14972_v43, %v7242_v57  ;;  %v7291_v48 = vmul.f32 %v14683_v39, %v7260_v54 }
 0x70c   : > { %17568 = vst [vmem:[#allocation41_spill] sm:$0xff] %v14955_v24  ;;  %5217 = vmatpush1.bf16.msra.mxu1 %v5104_v1  ;;  %v7263_v1 = vsel %vm1115_vm6, %v14646_v51, %v14631_v36  ;;  %v7292_v57 = vmul.f32 %v14972_v43, %v7245_v23  ;;  %v7262_v54 = vsel %vm1115_vm6, %v14635_v0, %v14622_v45 }
 0x70d   : > { %4749 = vrot.lane.b32.xlu1 %v14270_v15, %s12636_s20  ;;  %v14968_v29 = vpop.permute.xlu0 %7766  ;;  %v7351_v40 = vpack.c.bf16 %v7288_v46, %v7286_v11  ;;  %v7247_v46 = vsel %vm1115_vm6, %v14631_v36, %v14646_v51  ;;  %v7354_v31 = vpack.c.bf16 %v7293_v14, %v7291_v48  ;;  %v7297_v11 = vmul.f32 %v14683_v39, %v7263_v1 }
 0x70e   : > { %v7290_v14 = vmul.f32 %v14972_v43, %v7244_v30  ;;  %v7246_v48 = vsel %vm1115_vm6, %v14622_v45, %v14635_v0  ;;  %v7295_v1 = vmul.f32 %v14683_v39, %v7262_v54  ;;  %v7296_v45 = vmul.f32 %v14972_v43, %v7247_v46 }
 0x70f   : > { %v4942_v17 = vpop.permute.xlu1 %4941  ;;  %6702 = vmatmul.mubr.bf16.gmra.mrb[76].mxu0 %v12401_v7  ;;  %4751 = vrot.lane.b32.xlu0 %v14274_v13, %s12636_s20  ;;  %v12402_v7 = vld [vmem:[%s17439_s6 + $0x200] sm:$0xff]   ;;  %v7264_v0 = vsel %vm1115_vm6, %v14668_v33, %v14650_v19  ;;  %v7294_v46 = vmul.f32 %v14972_v43, %v7246_v48 }
 0x710   : > { %6953 = vmatprep.mubr.bf16.mxu0 %v17554_v63 }
 0x711   : > { %4781 = vrot.lane.b32.xlu1 %v14278_v38, %s12636_s20  ;;  %v4944_v59 = vpop.permute.xlu0 %4943 }
 0x713   : > { %v4974_v41 = vpop.permute.xlu1 %4973  ;;  %4783 = vrot.lane.b32.xlu0 %v14282_v44, %s12636_s20 }
 0x714   : > { %v4997_v49 = vsel %vm400_vm0, %v4942_v17, %v4974_v41  ;;  %v5013_v53 = vsel %vm400_vm0, %v4974_v41, %v4942_v17 }
 0x715   : > { %8274 = vrot.lane.b32.xlu1 %v14270_v15, %s12642_s25  ;;  %v4976_v60 = vpop.permute.xlu0 %4975  ;;  %v5049_v17 = vmul.f32 %v14790_v9, %v5013_v53  ;;  %v5050_v24 = vmul.f32 %v14793_v2, %v4997_v49  ;;  %v7353_v53 = vpack.c.bf16 %v7292_v57, %v7290_v14  ;;  %v12403_v57 = vld [vmem:[%s17439_s6 + $0x208] sm:$0xff]  }
 0x716   : > { %v4998_v23 = vsel %vm400_vm0, %v4944_v59, %v4976_v60  ;;  %v5014_v41 = vsel %vm400_vm0, %v4976_v60, %v4944_v59  ;;  %v7265_v59 = vsel %vm1115_vm6, %v14687_v52, %v14659_v35  ;;  %v7248_v60 = vsel %vm1115_vm6, %v14650_v19, %v14668_v33 }
 0x717   : > { %v5051_v32 = vmul.f32 %v14790_v9, %v5014_v41  ;;  %v5052_v36 = vmul.f32 %v14793_v2, %v4998_v23  ;;  %v15036_v51 = vpop.permute.xlu1 %7736  ;;  %8276 = vrot.lane.b32.xlu0 %v14274_v13, %s12642_s25  ;;  %6954 = vmatmul.mubr.bf16.vlgmr.msra.gmra.mrb[16].mxu0 %v12402_v7  ;;  %v7266_v19 = vsel %vm1115_vm6, %v14710_v5, %v14696_v25 }
 0x718   : > { %7464 = vmatpush1.bf16.msra.mxu0 %v7351_v40  ;;  %6963 = vmatprep.mubr.bf16.mxu0 %v17554_v63  ;;  %v7301_v40 = vmul.f32 %v14683_v39, %v7265_v59  ;;  %v7269_v33 = vsel %vm1115_vm6, %v14739_v12, %v14728_v28  ;;  %v7298_v48 = vmul.f32 %v14972_v43, %v7248_v60  ;;  %v17574_v60 = vld [vmem:[#allocation8_spill] sm:$0xff] }
 0x719   : > { %v5106_v49 = vpack.c.bf16 %v5051_v32, %v5049_v17  ;;  %7465 = vmatprep.subr.bf16.mxu0 %v7354_v31  ;;  %8306 = vrot.lane.b32.xlu1 %v14278_v38, %s12642_s25  ;;  %v15053_v7 = vpop.permute.xlu0 %7738  ;;  %v5107_v30 = vpack.c.bf16 %v5052_v36, %v5050_v24  ;;  %v7249_v32 = vsel %vm1115_vm6, %v14659_v35, %v14687_v52 }
 0x71a   : > { %v7356_v24 = vpack.c.bf16 %v7297_v11, %v7295_v1  ;;  %v7251_v35 = vsel %vm1115_vm6, %v14706_v3, %v14719_v20  ;;  %v7267_v52 = vsel %vm1115_vm6, %v14719_v20, %v14706_v3  ;;  %v7299_v31 = vmul.f32 %v14683_v39, %v7264_v0 }
 0x71b   : > { %v15065_v54 = vpop.permute.xlu1 %7768  ;;  %8308 = vrot.lane.b32.xlu0 %v14282_v44, %s12642_s25  ;;  %5218 = vmatprep.subr.bf16.mxu1 %v5107_v30  ;;  %v7250_v11 = vsel %vm1115_vm6, %v14696_v25, %v14710_v5  ;;  %v7355_v3 = vpack.c.bf16 %v7296_v45, %v7294_v46  ;;  %v7300_v20 = vmul.f32 %v14972_v43, %v7249_v32  ;;  %v17569_v5 = vld [vmem:[#allocation21_spill] sm:$0xff]  ;;  %v17570_v25 = vld [vmem:[#allocation22_spill] sm:$0xff]  ;;  %v17571_v45 = vld [vmem:[#allocation7_spill] sm:$0xff] }
 0x71c   : > { %7466 = vmatpush1.bf16.msra.mxu0 %v7353_v53  ;;  %5219 = vmatpush1.bf16.msra.mxu1 %v5106_v49  ;;  %v7304_v23 = vmul.f32 %v14972_v43, %v7251_v35  ;;  %v7305_v41 = vmul.f32 %v14683_v39, %v7267_v52  ;;  %v7358_v14 = vpack.c.bf16 %v7301_v40, %v7299_v31  ;;  %v17573_v46 = vld [vmem:[#allocation26_spill] sm:$0xff] }
 0x71d   : > { %7467 = vmatprep.subr.bf16.mxu0 %v7356_v24  ;;  %4753 = vrot.lane.b32.xlu1 %v14286_v22, %s12636_s20  ;;  %v15092_v17 = vpop.permute.xlu0 %7770  ;;  %v7302_v59 = vmul.f32 %v14972_v43, %v7250_v11  ;;  %v7268_v1 = vsel %vm1115_vm6, %v17570_v25, %v17569_v5  ;;  %v7303_v49 = vmul.f32 %v14683_v39, %v7266_v19  ;;  %v17575_v19 = vld [vmem:[#allocation23_spill] sm:$0xff] }
 0x71e   : > { %v7253_v30 = vsel %vm1115_vm6, %v14728_v28, %v14739_v12  ;;  %v7309_v53 = vmul.f32 %v14683_v39, %v7269_v33  ;;  %v7357_v32 = vpack.c.bf16 %v7300_v20, %v7298_v48  ;;  %v7307_v24 = vmul.f32 %v14683_v39, %v7268_v1  ;;  %v12404_v12 = vld [vmem:[%s17439_s6 + $0x210] sm:$0xff]   ;;  %v17576_v33 = vld [vmem:[#allocation25_spill] sm:$0xff] }
 0x71f   : > { %v4946_v36 = vpop.permute.xlu1 %4945  ;;  %4755 = vrot.lane.b32.xlu0 %v14290_v62, %s12636_s20  ;;  %6964 = vmatmul.mubr.bf16.gmra.mrb[20].mxu0 %v12403_v57  ;;  %v7359_v40 = vpack.c.bf16 %v7304_v23, %v7302_v59  ;;  %v17572_v57 = vld [vmem:[#allocation24_spill] sm:$0xff]  ;;  %v7360_v28 = vpack.c.bf16 %v7305_v41, %v7303_v49  ;;  %v7252_v31 = vsel %vm1115_vm6, %v17569_v5, %v17570_v25 }
 0x720   : > { %7468 = vmatpush1.bf16.msra.mxu0 %v7355_v3  ;;  %6973 = vmatprep.mubr.bf16.mxu0 %v17554_v63  ;;  %v7271_v35 = vsel %vm1115_vm6, %v17573_v46, %v17572_v57  ;;  %v7308_v11 = vmul.f32 %v14972_v43, %v7253_v30  ;;  %v7270_v23 = vsel %vm1115_vm6, %v17576_v33, %v17575_v19 }
 0x721   : > { %7469 = vmatprep.subr.bf16.mxu0 %v7358_v14  ;;  %4785 = vrot.lane.b32.xlu1 %v17571_v45, %s12636_s20  ;;  %v4948_v0 = vpop.permute.xlu0 %4947  ;;  %v7255_v41 = vsel %vm1115_vm6, %v17572_v57, %v17573_v46  ;;  %v7362_v48 = vpack.c.bf16 %v7309_v53, %v7307_v24  ;;  %v7313_v59 = vmul.f32 %v14683_v39, %v7271_v35  ;;  %v17578_v57 = vld [vmem:[#allocation30_spill] sm:$0xff] }
 0x722   : > { %v7306_v53 = vmul.f32 %v14972_v43, %v7252_v31  ;;  %v7254_v24 = vsel %vm1115_vm6, %v17575_v19, %v17576_v33  ;;  %v7311_v35 = vmul.f32 %v14683_v39, %v7270_v23  ;;  %v17580_v19 = vld [vmem:[#allocation29_spill] sm:$0xff] }
 0x723   : > { %v4978_v52 = vpop.permute.xlu1 %4977  ;;  %4787 = vrot.lane.b32.xlu0 %v17574_v60, %s12636_s20  ;;  %v15187_v33 = vld [vmem:[%s17434_s1 + $0xc] sm:$0x3] }
 0x724   : > { %v4999_v3 = vsel %vm400_vm0, %v4946_v36, %v4978_v52  ;;  %v5015_v20 = vsel %vm400_vm0, %v4978_v52, %v4946_v36  ;;  %7470 = vmatpush1.bf16.msra.mxu0 %v7357_v32  ;;  %v7361_v31 = vpack.c.bf16 %v7308_v11, %v7306_v53 }
 0x725   : > { %7471 = vmatprep.subr.bf16.mxu0 %v7360_v28  ;;  %8278 = vrot.lane.b32.xlu1 %v14286_v22, %s12642_s25  ;;  %v4980_v14 = vpop.permute.xlu0 %4979  ;;  %v5053_v36 = vmul.f32 %v14790_v9, %v5015_v20  ;;  %v5054_v1 = vmul.f32 %v14793_v2, %v4999_v3  ;;  %v7312_v3 = vmul.f32 %v14972_v43, %v7255_v41  ;;  %v17579_v20 = vld [vmem:[#allocation27_spill] sm:$0xff] }
 0x726   : > { %v5000_v5 = vsel %vm400_vm0, %v4948_v0, %v4980_v14  ;;  %v5016_v25 = vsel %vm400_vm0, %v4980_v14, %v4948_v0  ;;  %v17577_v0 = vld [vmem:[#allocation28_spill] sm:$0xff]  ;;  %v7364_v41 = vpack.c.bf16 %v7313_v59, %v7311_v35 }
 0x727   : > { %v5055_v49 = vmul.f32 %v14790_v9, %v5016_v25  ;;  %v5056_v30 = vmul.f32 %v14793_v2, %v5000_v5  ;;  %v15160_v32 = vpop.permute.xlu1 %7740  ;;  %8280 = vrot.lane.b32.xlu0 %v14290_v62, %s12642_s25  ;;  %6974 = vmatmul.mubr.bf16.gmra.mrb[24].mxu0 %v12404_v12  ;;  %v7273_v46 = vsel %vm1115_vm6, %v17578_v57, %v17577_v0 }
 0x728   : > { %7472 = vmatpush1.bf16.msra.mxu0 %v7359_v40  ;;  %6983 = vmatprep.mubr.bf16.mxu0 %v17554_v63  ;;  %v7272_v40 = vsel %vm1115_vm6, %v17580_v19, %v17579_v20  ;;  %v7257_v23 = vsel %vm1115_vm6, %v17577_v0, %v17578_v57  ;;  %v7317_v14 = vmul.f32 %v14683_v39, %v7273_v46  ;;  %v17583_v57 = vld [vmem:[#allocation31_spill] sm:$0xff] }
 0x729   : > { %v5108_v52 = vpack.c.bf16 %v5055_v49, %v5053_v36  ;;  %7473 = vmatprep.subr.bf16.mxu0 %v7362_v48  ;;  %8310 = vrot.lane.b32.xlu1 %v17571_v45, %s12642_s25  ;;  %v15177_v28 = vpop.permute.xlu0 %7742  ;;  %v5109_v12 = vpack.c.bf16 %v5056_v30, %v5054_v1  ;;  %v12405_v48 = vld [vmem:[%s17439_s6 + $0x218] sm:$0xff]   ;;  %v7310_v36 = vmul.f32 %v14972_v43, %v7254_v24  ;;  %v17581_v1 = vld [vmem:[#allocation6_spill] sm:$0xff]  ;;  %v17582_v30 = vld [vmem:[#allocation9_spill] sm:$0xff] }
 0x72a   : > { %v7801_v5 = vsel %vm1275_vm7, %v14832_v21, %v14821_v50  ;;  %v7256_v25 = vsel %vm1115_vm6, %v17579_v20, %v17580_v19  ;;  %v7315_v59 = vmul.f32 %v14683_v39, %v7272_v40  ;;  %v15213_v49 = vrot.slane %v15187_v33, %v17581_v1  ;;  %v17585_v20 = vld [vmem:[#allocation11_spill] sm:$0xff] }
 0x72b   : > { %v15194_v11 = vpop.permute.xlu1 %7772  ;;  %8312 = vrot.lane.b32.xlu0 %v17574_v60, %s12642_s25  ;;  %5220 = vmatprep.subr.bf16.mxu1 %v5109_v12  ;;  %v7363_v24 = vpack.c.bf16 %v7312_v3, %v7310_v36  ;;  %v7316_v0 = vmul.f32 %v14972_v43, %v7257_v23  ;;  %v7800_v46 = vsel %vm1275_vm7, %v17583_v57, %v14814_v27 }
 0x72c   : > { %7474 = vmatpush1.bf16.msra.mxu0 %v7361_v31  ;;  %5221 = vmatpush1.bf16.msra.mxu1 %v5108_v52  ;;  %v7831_v39 = vmul.f32 %v15213_v49, %v7801_v5  ;;  %v17584_v52 = vld [vmem:[#allocation10_spill] sm:$0xff]  ;;  %v7366_v12 = vpack.c.bf16 %v7317_v14, %v7315_v59  ;;  %v7314_v31 = vmul.f32 %v14972_v43, %v7256_v25  ;;  %v12406_v43 = vld [vmem:[%s17439_s6 + $0x220] sm:$0xff]  }
 0x72d   : > { %7475 = vmatprep.subr.bf16.mxu0 %v7364_v41  ;;  %4757 = vrot.lane.b32.xlu1 %v17582_v30, %s12636_s20  ;;  %v15217_v53 = vpop.permute.xlu0 %7774  ;;  %v7829_v3 = vmul.f32 %v15213_v49, %v7800_v46  ;;  %v17586_v41 = vld [vmem:[#allocation12_spill] sm:$0xff] }
 0x72e   : > { %v7365_v40 = vpack.c.bf16 %v7316_v0, %v7314_v31 }
 0x72f   : > { %v4950_v35 = vpop.permute.xlu1 %4949  ;;  %4759 = vrot.lane.b32.xlu0 %v17584_v52, %s12636_s20  ;;  %6984 = vmatmul.mubr.bf16.gmra.mrb[28].mxu0 %v12405_v48  ;;  %v7894_v36 = vpack.c.bf16 %v7831_v39, %v7829_v3 }
 0x730   : > { %7476 = vmatpush1.bf16.msra.mxu0 %v7363_v24  ;;  %6993 = vmatprep.mubr.bf16.mxu0 %v17554_v63 }
 0x731   : > { %7477 = vmatprep.subr.bf16.mxu0 %v7366_v12  ;;  %4789 = vrot.lane.b32.xlu1 %v17585_v20, %s12636_s20  ;;  %v4952_v19 = vpop.permute.xlu0 %4951 }
 0x733   : > { %v4982_v23 = vpop.permute.xlu1 %4981  ;;  %4791 = vrot.lane.b32.xlu0 %v17586_v41, %s12636_s20 }
 0x734   : > { %v5001_v14 = vsel %vm400_vm0, %v4950_v35, %v4982_v23  ;;  %v5017_v48 = vsel %vm400_vm0, %v4982_v23, %v4950_v35  ;;  %7478 = vmatpush1.bf16.msra.mxu0 %v7365_v40  ;;  %v12407_v40 = vld [vmem:[%s17439_s6 + $0x228] sm:$0xff]  }
 0x735   : > { %8005 = vmatprep.subr.bf16.mxu0 %v7894_v36  ;;  %8282 = vrot.lane.b32.xlu1 %v17582_v30, %s12642_s25  ;;  %v4984_v5 = vpop.permute.xlu0 %4983  ;;  %v5057_v25 = vmul.f32 %v14790_v9, %v5017_v48  ;;  %v5058_v0 = vmul.f32 %v14793_v2, %v5001_v14  ;;  %v17587_v23 = vld [vmem:[#allocation13_spill] sm:$0xff]  ;;  %v17588_v14 = vld [vmem:[#allocation14_spill] sm:$0xff]  ;;  %v17589_v48 = vld [vmem:[#allocation15_spill] sm:$0xff] }
 0x736   : > { %v5002_v59 = vsel %vm400_vm0, %v4952_v19, %v4984_v5  ;;  %v5018_v24 = vsel %vm400_vm0, %v4984_v5, %v4952_v19 }
 0x737   : > { %v5059_v46 = vmul.f32 %v14790_v9, %v5018_v24  ;;  %v5060_v39 = vmul.f32 %v14793_v2, %v5002_v59  ;;  %v15251_v35 = vpop.permute.xlu1 %7744  ;;  %8284 = vrot.lane.b32.xlu0 %v17584_v52, %s12642_s25  ;;  %6994 = vmatmul.mubr.bf16.gmra.mrb[32].mxu0 %v12406_v43  ;;  %v17590_v59 = vld [vmem:[#allocation16_spill] sm:$0xff]  ;;  %v12408_v24 = vld [vmem:[%s17439_s6 + $0x230] sm:$0xff]  }
 0x738   : > { %7003 = vmatprep.mubr.bf16.mxu0 %v17554_v63 }
 0x739   : > { %v5110_v12 = vpack.c.bf16 %v5059_v46, %v5057_v25  ;;  %8314 = vrot.lane.b32.xlu1 %v17585_v20, %s12642_s25  ;;  %v15258_v31 = vpop.permute.xlu0 %7746  ;;  %v5111_v3 = vpack.c.bf16 %v5060_v39, %v5058_v0 }
 0x73b   : > { %v15260_v19 = vpop.permute.xlu1 %7776  ;;  %8316 = vrot.lane.b32.xlu0 %v17586_v41, %s12642_s25  ;;  %5222 = vmatprep.subr.bf16.mxu1 %v5111_v3 }
 0x73c   : > { %5223 = vmatpush1.bf16.msra.mxu1 %v5110_v12 }
 0x73d   : > { %4761 = vrot.lane.b32.xlu1 %v17587_v23, %s12636_s20  ;;  %v15269_v36 = vpop.permute.xlu0 %7778 }
 0x73f   : > { %v4954_v43 = vpop.permute.xlu1 %4953  ;;  %4763 = vrot.lane.b32.xlu0 %v17588_v14, %s12636_s20  ;;  %7004 = vmatmul.mubr.bf16.gmra.mrb[36].mxu0 %v12407_v40 }
 0x740   : > { %7013 = vmatprep.mubr.bf16.mxu0 %v17554_v63 }
 0x741   : > { %4793 = vrot.lane.b32.xlu1 %v17589_v48, %s12636_s20  ;;  %v4956_v5 = vpop.permute.xlu0 %4955 }
 0x743   : > { %v4986_v25 = vpop.permute.xlu1 %4985  ;;  %4795 = vrot.lane.b32.xlu0 %v17590_v59, %s12636_s20 }
 0x744   : > { %v5003_v39 = vsel %vm400_vm0, %v4954_v43, %v4986_v25  ;;  %v5019_v12 = vsel %vm400_vm0, %v4986_v25, %v4954_v43 }
 0x745   : > { %8286 = vrot.lane.b32.xlu1 %v17587_v23, %s12642_s25  ;;  %v15283_v0 = vpop.permute.xlu0 %7750 }
 0x747   : > { %v15285_v46 = vpop.permute.xlu1 %7748  ;;  %8288 = vrot.lane.b32.xlu0 %v17588_v14, %s12642_s25  ;;  %7014 = vmatmul.mubr.bf16.gmra.mrb[40].mxu0 %v12408_v24  ;;  %v5061_v24 = vmul.f32 %v14790_v9, %v5019_v12  ;;  %v5062_v14 = vmul.f32 %v14793_v2, %v5003_v39 }
 0x748   : > { %7023 = vmatprep.mubr.bf16.mxu0 %v17554_v63 }
 0x749   : > { %8318 = vrot.lane.b32.xlu1 %v17589_v48, %s12642_s25  ;;  %v4988_v3 = vpop.permute.xlu0 %4987  ;;  %v12409_v48 = vld [vmem:[%s17439_s6 + $0x238] sm:$0xff]  }
 0x74a   : > { %v5004_v40 = vsel %vm400_vm0, %v4956_v5, %v4988_v3  ;;  %v5020_v23 = vsel %vm400_vm0, %v4988_v3, %v4956_v5  ;;  %v17592_v5 = vld [vmem:[#allocation17_spill] sm:$0xff] }
 0x74b   : > { %v5063_v41 = vmul.f32 %v14790_v9, %v5020_v23  ;;  %v5064_v43 = vmul.f32 %v14793_v2, %v5004_v40  ;;  %v15304_v25 = vpop.permute.xlu1 %7780  ;;  %8320 = vrot.lane.b32.xlu0 %v17590_v59, %s12642_s25  ;;  %v17593_v9 = vld [vmem:[#allocation18_spill] sm:$0xff]  ;;  %v12410_v2 = vld [vmem:[%s17439_s6 + $0x80] sm:$0xff]   ;;  %v17594_v23 = vld [vmem:[#allocation19_spill] sm:$0xff] }
 0x74c   : > { %17591 = vst [vmem:[#allocation21_spill] sm:$0xff] %v15304_v25 }
 0x74d   : > { %v5112_v20 = vpack.c.bf16 %v5063_v41, %v5061_v24  ;;  %4765 = vrot.lane.b32.xlu1 %v17592_v5, %s12636_s20  ;;  %v15313_v12 = vpop.permute.xlu0 %7782  ;;  %v5113_v39 = vpack.c.bf16 %v5064_v43, %v5062_v14  ;;  %v4833_v41 = vld [vmem:[%s17434_s1] sm:$0x3] }
 0x74e   : > { %v15327_v14 = vrot.slane %v4833_v41, %v12751_v6  ;;  %v15330_v24 = vrot.slane %v4833_v41, %v17581_v1  ;;  %v17595_v1 = vld [vmem:[#allocation20_spill] sm:$0xff] }
 0x74f   : > { %v4738_v3 = vpop.permute.xlu1 %4737  ;;  %4767 = vrot.lane.b32.xlu0 %v17593_v9, %s12636_s20  ;;  %5224 = vmatprep.subr.bf16.mxu1 %v5113_v39  ;;  %v12411_v39 = vld [vmem:[%s17439_s6 + $0x240] sm:$0xff]  }
 0x750   : > { %7024 = vmatmul.mubr.bf16.gmra.mrb[44].mxu0 %v12409_v48  ;;  %5225 = vmatpush1.bf16.msra.mxu1 %v5112_v20 }
 0x751   : > { %4797 = vrot.lane.b32.xlu1 %v17594_v23, %s12636_s20  ;;  %v4740_v40 = vpop.permute.xlu0 %4739  ;;  %7033 = vmatprep.mubr.bf16.mxu0 %v17554_v63 }
 0x753   : > { %v4770_v43 = vpop.permute.xlu1 %4769  ;;  %8292 = vrot.lane.b32.xlu0 %v17593_v9, %s12642_s25  ;;  %5243 = vmatmul.mubr.bf16.vlgmr.msra.gmra.mrb[32].mxu1 %v12410_v2 }
 0x754   : > { %v4801_v20 = vsel %vm369_vm1, %v4738_v3, %v4770_v43  ;;  %v4817_v48 = vsel %vm369_vm1, %v4770_v43, %v4738_v3  ;;  %5252 = vmatprep.mubr.bf16.mxu1 %v17554_v63 }
 0x755   : > { %8290 = vrot.lane.b32.xlu1 %v17592_v5, %s12642_s25  ;;  %v4772_v41 = vpop.permute.xlu0 %4771  ;;  %v4845_v59 = vmul.f32 %v15327_v14, %v4817_v48  ;;  %v4846_v3 = vmul.f32 %v15330_v24, %v4801_v20  ;;  %v12412_v5 = vld [vmem:[%s17439_s6 + $0x88] sm:$0xff]  }
 0x756   : > { %v4802_v9 = vsel %vm369_vm1, %v4740_v40, %v4772_v41  ;;  %v4818_v2 = vsel %vm369_vm1, %v4772_v41, %v4740_v40  ;;  %v12413_v48 = vld [vmem:[%s17439_s6 + $0x248] sm:$0xff]  }
 0x757   : > { %v4847_v43 = vmul.f32 %v15327_v14, %v4818_v2  ;;  %v4848_v52 = vmul.f32 %v15330_v24, %v4802_v9  ;;  %v15352_v30 = vpop.permute.xlu1 %8262  ;;  %4799 = vrot.lane.b32.xlu0 %v17595_v1, %s12636_s20 }
 0x758   : > { %7034 = vmatmul.mubr.bf16.gmra.mrb[48].mxu0 %v12411_v39 }
 0x759   : > { %v4909_v25 = vpack.c.bf16 %v4847_v43, %v4845_v59  ;;  %8322 = vrot.lane.b32.xlu1 %v17594_v23, %s12642_s25  ;;  %v15361_v40 = vpop.permute.xlu0 %8264  ;;  %v4910_v20 = vpack.c.bf16 %v4848_v52, %v4846_v3  ;;  %7043 = vmatprep.mubr.bf16.mxu0 %v17554_v63  ;;  %v12415_v3 = vld [vmem:[%s17439_s6 + $0x250] sm:$0xff]  }
 0x75b   : > { %v15364_v9 = vpop.permute.xlu1 %8294  ;;  %8324 = vrot.lane.b32.xlu0 %v17595_v1, %s12642_s25  ;;  %5253 = vmatmul.mubr.bf16.gmra.mrb[36].mxu1 %v12412_v5  ;;  %v12414_v5 = vld [vmem:[%s17439_s6 + $0x90] sm:$0xff]  }
 0x75c   : > { %17596 = vst [vmem:[#allocation22_spill] sm:$0xff] %v15364_v9  ;;  %5499 = vmatprep.subr.bf16.mxu1 %v4910_v20  ;;  %5262 = vmatprep.mubr.bf16.mxu1 %v17554_v63 }
 0x75d   : > { %5500 = vmatpush1.bf16.msra.mxu1 %v4909_v25  ;;  %5692 = vrot.lane.b32.xlu1 %v14224_v42, %s12638_s21  ;;  %v15374_v52 = vpop.permute.xlu0 %8296 }
 0x75f   : > { %v4742_v59 = vpop.permute.xlu1 %4741  ;;  %5694 = vrot.lane.b32.xlu0 %v14226_v10, %s12638_s21 }
 0x760   : > { %7044 = vmatmul.mubr.bf16.gmra.mrb[52].mxu0 %v12413_v48 }
 0x761   : > { %5724 = vrot.lane.b32.xlu1 %v14230_v18, %s12638_s21  ;;  %v4744_v39 = vpop.permute.xlu0 %4743  ;;  %7053 = vmatprep.mubr.bf16.mxu0 %v17554_v63 }
 0x763   : > { %v4774_v25 = vpop.permute.xlu1 %4773  ;;  %5726 = vrot.lane.b32.xlu0 %v14234_v56, %s12638_s21  ;;  %5263 = vmatmul.mubr.bf16.gmra.mrb[40].mxu1 %v12414_v5 }
 0x764   : > { %v4803_v41 = vsel %vm369_vm1, %v4742_v59, %v4774_v25  ;;  %v4819_v2 = vsel %vm369_vm1, %v4774_v25, %v4742_v59  ;;  %5272 = vmatprep.mubr.bf16.mxu1 %v17554_v63 }
 0x765   : > { %8804 = vrot.lane.b32.xlu1 %v14224_v42, %s12643_s26  ;;  %v4776_v43 = vpop.permute.xlu0 %4775  ;;  %v4849_v5 = vmul.f32 %v15327_v14, %v4819_v2  ;;  %v4850_v59 = vmul.f32 %v15330_v24, %v4803_v41  ;;  %v12416_v42 = vld [vmem:[%s17439_s6 + $0x98] sm:$0xff]  }
 0x766   : > { %v4804_v20 = vsel %vm369_vm1, %v4744_v39, %v4776_v43  ;;  %v4820_v48 = vsel %vm369_vm1, %v4776_v43, %v4744_v39 }
 0x767   : > { %v4851_v25 = vmul.f32 %v15327_v14, %v4820_v48  ;;  %v4852_v1 = vmul.f32 %v15330_v24, %v4804_v20  ;;  %v15404_v23 = vpop.permute.xlu1 %8266  ;;  %8806 = vrot.lane.b32.xlu0 %v14226_v10, %s12643_s26  ;;  %v12417_v10 = vld [vmem:[%s17439_s6 + $0x258] sm:$0xff]   ;;  %v12419_v48 = vld [vmem:[%s17439_s6 + $0x260] sm:$0xff]  }
 0x768   : > { %7054 = vmatmul.mubr.bf16.gmra.mrb[56].mxu0 %v12415_v3 }
 0x769   : > { %v4911_v9 = vpack.c.bf16 %v4851_v25, %v4849_v5  ;;  %8836 = vrot.lane.b32.xlu1 %v14230_v18, %s12643_s26  ;;  %v15413_v39 = vpop.permute.xlu0 %8268  ;;  %v4912_v41 = vpack.c.bf16 %v4852_v1, %v4850_v59  ;;  %7063 = vmatprep.mubr.bf16.mxu0 %v17554_v63 }
 0x76b   : > { %v15416_v2 = vpop.permute.xlu1 %8298  ;;  %8838 = vrot.lane.b32.xlu0 %v14234_v56, %s12643_s26  ;;  %5273 = vmatmul.mubr.bf16.gmra.mrb[44].mxu1 %v12416_v42  ;;  %v12418_v56 = vld [vmem:[%s17439_s6 + $0xa0] sm:$0xff]  }
 0x76c   : > { %5501 = vmatprep.subr.bf16.mxu1 %v4912_v41  ;;  %5282 = vmatprep.mubr.bf16.mxu1 %v17554_v63 }
 0x76d   : > { %5502 = vmatpush1.bf16.msra.mxu1 %v4911_v9  ;;  %5696 = vrot.lane.b32.xlu1 %v14238_v26, %s12638_s21  ;;  %v15426_v18 = vpop.permute.xlu0 %8300 }
 0x76f   : > { %v4746_v1 = vpop.permute.xlu1 %4745  ;;  %5698 = vrot.lane.b32.xlu0 %v14242_v8, %s12638_s21 }
 0x770   : > { %7064 = vmatmul.mubr.bf16.gmra.mrb[60].mxu0 %v12417_v10 }
 0x771   : > { %5728 = vrot.lane.b32.xlu1 %v14246_v34, %s12638_s21  ;;  %v4748_v3 = vpop.permute.xlu0 %4747  ;;  %7073 = vmatprep.mubr.bf16.mxu0 %v17554_v63 }
 0x773   : > { %v4778_v9 = vpop.permute.xlu1 %4777  ;;  %5730 = vrot.lane.b32.xlu0 %v14250_v37, %s12638_s21  ;;  %5283 = vmatmul.mubr.bf16.gmra.mrb[48].mxu1 %v12418_v56 }
 0x774   : > { %v4805_v43 = vsel %vm369_vm1, %v4746_v1, %v4778_v9  ;;  %v4821_v20 = vsel %vm369_vm1, %v4778_v9, %v4746_v1  ;;  %5292 = vmatprep.mubr.bf16.mxu1 %v17554_v63 }
 0x775   : > { %8808 = vrot.lane.b32.xlu1 %v14238_v26, %s12643_s26  ;;  %v4780_v5 = vpop.permute.xlu0 %4779  ;;  %v4853_v42 = vmul.f32 %v15327_v14, %v4821_v20  ;;  %v4854_v41 = vmul.f32 %v15330_v24, %v4805_v43  ;;  %v12420_v26 = vld [vmem:[%s17439_s6 + $0xa8] sm:$0xff]  }
 0x776   : > { %v4806_v59 = vsel %vm369_vm1, %v4748_v3, %v4780_v5  ;;  %v4822_v25 = vsel %vm369_vm1, %v4780_v5, %v4748_v3 }
 0x777   : > { %v4855_v10 = vmul.f32 %v15327_v14, %v4822_v25  ;;  %v4856_v1 = vmul.f32 %v15330_v24, %v4806_v59  ;;  %v15456_v56 = vpop.permute.xlu1 %8270  ;;  %8810 = vrot.lane.b32.xlu0 %v14242_v8, %s12643_s26  ;;  %v12421_v8 = vld [vmem:[%s17439_s6 + $0x268] sm:$0xff]  }
 0x778   : > { %17597 = vst [vmem:[#allocation7_spill] sm:$0xff] %v15456_v56  ;;  %7074 = vmatmul.mubr.bf16.gmra.mrb[64].mxu0 %v12419_v48 }
 0x779   : > { %v4913_v9 = vpack.c.bf16 %v4855_v10, %v4853_v42  ;;  %8840 = vrot.lane.b32.xlu1 %v14246_v34, %s12643_s26  ;;  %v15465_v3 = vpop.permute.xlu0 %8272  ;;  %v4914_v43 = vpack.c.bf16 %v4856_v1, %v4854_v41  ;;  %7083 = vmatprep.mubr.bf16.mxu0 %v17554_v63  ;;  %v12423_v41 = vld [vmem:[%s17439_s6 + $0x270] sm:$0xff]  }
 0x77a   : > { %17598 = vst [vmem:[#allocation24_spill] sm:$0xff] %v15465_v3 }
 0x77b   : > { %v15468_v20 = vpop.permute.xlu1 %8302  ;;  %8842 = vrot.lane.b32.xlu0 %v14250_v37, %s12643_s26  ;;  %5293 = vmatmul.mubr.bf16.gmra.mrb[52].mxu1 %v12420_v26  ;;  %v12422_v37 = vld [vmem:[%s17439_s6 + $0xb0] sm:$0xff]  }
 0x77c   : > { %17599 = vst [vmem:[#allocation26_spill] sm:$0xff] %v15468_v20  ;;  %5503 = vmatprep.subr.bf16.mxu1 %v4914_v43  ;;  %5302 = vmatprep.mubr.bf16.mxu1 %v17554_v63 }
 0x77d   : > { %5504 = vmatpush1.bf16.msra.mxu1 %v4913_v9  ;;  %5700 = vrot.lane.b32.xlu1 %v14254_v47, %s12638_s21  ;;  %v15478_v34 = vpop.permute.xlu0 %8304 }
 0x77f   : > { %v4750_v48 = vpop.permute.xlu1 %4749  ;;  %5702 = vrot.lane.b32.xlu0 %v14258_v58, %s12638_s21 }
 0x780   : > { %7084 = vmatmul.mubr.bf16.gmra.mrb[68].mxu0 %v12421_v8 }
 0x781   : > { %5732 = vrot.lane.b32.xlu1 %v14262_v55, %s12638_s21  ;;  %v4752_v5 = vpop.permute.xlu0 %4751  ;;  %7093 = vmatprep.mubr.bf16.mxu0 %v17554_v63 }
 0x783   : > { %v4782_v59 = vpop.permute.xlu1 %4781  ;;  %5734 = vrot.lane.b32.xlu0 %v14266_v61, %s12638_s21  ;;  %5303 = vmatmul.mubr.bf16.gmra.mrb[56].mxu1 %v12422_v37 }
 0x784   : > { %v4807_v25 = vsel %vm369_vm1, %v4750_v48, %v4782_v59  ;;  %v4823_v42 = vsel %vm369_vm1, %v4782_v59, %v4750_v48  ;;  %5312 = vmatprep.mubr.bf16.mxu1 %v17554_v63 }
 0x785   : > { %8812 = vrot.lane.b32.xlu1 %v14254_v47, %s12643_s26  ;;  %v4784_v10 = vpop.permute.xlu0 %4783  ;;  %v4857_v9 = vmul.f32 %v15327_v14, %v4823_v42  ;;  %v4858_v43 = vmul.f32 %v15330_v24, %v4807_v25  ;;  %v12424_v47 = vld [vmem:[%s17439_s6 + $0xb8] sm:$0xff]  }
 0x786   : > { %v4808_v1 = vsel %vm369_vm1, %v4752_v5, %v4784_v10  ;;  %v4824_v26 = vsel %vm369_vm1, %v4784_v10, %v4752_v5 }
 0x787   : > { %v4859_v8 = vmul.f32 %v15327_v14, %v4824_v26  ;;  %v4860_v48 = vmul.f32 %v15330_v24, %v4808_v1  ;;  %v15508_v37 = vpop.permute.xlu1 %8274  ;;  %8814 = vrot.lane.b32.xlu0 %v14258_v58, %s12643_s26  ;;  %v12425_v58 = vld [vmem:[%s17439_s6 + $0x278] sm:$0xff]   ;;  %v12426_v1 = vld [vmem:[%s17439_s6 + $0xc0] sm:$0xff]   ;;  %v7784_v26 = vsel %vm1275_vm7, %v14814_v27, %v17583_v57 }
 0x788   : > { %17600 = vst [vmem:[#allocation8_spill] sm:$0xff] %v15508_v37  ;;  %7094 = vmatmul.mubr.bf16.gmra.mrb[72].mxu0 %v12423_v41  ;;  %v7785_v41 = vsel %vm1275_vm7, %v14821_v50, %v14832_v21  ;;  %v17604_v21 = vld [vmem:[#allocation33_spill] sm:$0xff]  ;;  %v17611_v37 = vld [vmem:[#allocation38_spill] sm:$0xff] }
 0x789   : > { %v4915_v59 = vpack.c.bf16 %v4859_v8, %v4857_v9  ;;  %8844 = vrot.lane.b32.xlu1 %v14262_v55, %s12643_s26  ;;  %v15517_v5 = vpop.permute.xlu0 %8276  ;;  %v4916_v25 = vpack.c.bf16 %v4860_v48, %v4858_v43  ;;  %7103 = vmatprep.mubr.bf16.mxu0 %v17554_v63  ;;  %v17605_v9 = vld [vmem:[#allocation35_spill] sm:$0xff]  ;;  %v17606_v8 = vld [vmem:[#allocation32_spill] sm:$0xff]  ;;  %v17607_v48 = vld [vmem:[#allocation34_spill] sm:$0xff] }
 0x78a   : > { %17601 = vst [vmem:[#allocation23_spill] sm:$0xff] %v15517_v5  ;;  %v7787_v57 = vsel %vm1275_vm7, %v17604_v21, %v17605_v9 }
 0x78b   : > { %v15520_v42 = vpop.permute.xlu1 %8306  ;;  %8846 = vrot.lane.b32.xlu0 %v14266_v61, %s12643_s26  ;;  %5313 = vmatmul.mubr.bf16.gmra.mrb[60].mxu1 %v12424_v47  ;;  %v15538_v61 = vrot.slane %v15187_v33, %v12751_v6  ;;  %v7803_v33 = vsel %vm1275_vm7, %v17605_v9, %v17604_v21  ;;  %v7802_v47 = vsel %vm1275_vm7, %v17607_v48, %v17606_v8  ;;  %v12427_v21 = vld [vmem:[%s17439_s6 + $0x280] sm:$0xff]  }
 0x78c   : > { %17602 = vst [vmem:[#allocation25_spill] sm:$0xff] %v15520_v42  ;;  %5505 = vmatprep.subr.bf16.mxu1 %v4916_v25  ;;  %5322 = vmatprep.mubr.bf16.mxu1 %v17554_v63  ;;  %v17609_v25 = vld [vmem:[#allocation39_spill] sm:$0xff]  ;;  %v7835_v5 = vmul.f32 %v15213_v49, %v7803_v33  ;;  %v7833_v33 = vmul.f32 %v15213_v49, %v7802_v47  ;;  %v17610_v42 = vld [vmem:[#allocation36_spill] sm:$0xff] }
 0x78d   : > { %5506 = vmatpush1.bf16.msra.mxu1 %v4915_v59  ;;  %5704 = vrot.lane.b32.xlu1 %v14270_v15, %s12638_s21  ;;  %v15530_v55 = vpop.permute.xlu0 %8308  ;;  %v7830_v50 = vmul.f32 %v15538_v61, %v7785_v41  ;;  %v7828_v27 = vmul.f32 %v15538_v61, %v7784_v26  ;;  %v17608_v59 = vld [vmem:[#allocation37_spill] sm:$0xff]  ;;  %v7804_v56 = vsel %vm1275_vm7, %v17611_v37, %v17610_v42 }
 0x78e   : > { %17603 = vst [vmem:[#allocation28_spill] sm:$0xff] %v15530_v55 }
 0x78f   : > { %v4754_v10 = vpop.permute.xlu1 %4753  ;;  %5706 = vrot.lane.b32.xlu0 %v14274_v13, %s12638_s21  ;;  %v7893_v9 = vpack.c.bf16 %v7830_v50, %v7828_v27 }
 0x790   : > { %7104 = vmatmul.mubr.bf16.gmra.mrb[76].mxu0 %v12425_v58  ;;  %v7805_v58 = vsel %vm1275_vm7, %v17609_v25, %v17608_v59 }
 0x791   : > { %5736 = vrot.lane.b32.xlu1 %v14278_v38, %s12638_s21  ;;  %v4756_v43 = vpop.permute.xlu0 %4755  ;;  %7495 = vmatprep.mubr.bf16.mxu0 %v17554_v63  ;;  %v7839_v50 = vmul.f32 %v15213_v49, %v7805_v58 }
 0x793   : > { %v4786_v41 = vpop.permute.xlu1 %4785  ;;  %5738 = vrot.lane.b32.xlu0 %v14282_v44, %s12638_s21  ;;  %5323 = vmatmul.mubr.bf16.gmra.mrb[64].mxu1 %v12426_v1  ;;  %v7786_v1 = vsel %vm1275_vm7, %v17606_v8, %v17607_v48 }
 0x794   : > { %v4809_v26 = vsel %vm369_vm1, %v4754_v10, %v4786_v41  ;;  %v4825_v55 = vsel %vm369_vm1, %v4786_v41, %v4754_v10  ;;  %5332 = vmatprep.mubr.bf16.mxu1 %v17554_v63  ;;  %v7834_v41 = vmul.f32 %v15538_v61, %v7787_v57  ;;  %v12428_v57 = vld [vmem:[%s17439_s6 + $0xc8] sm:$0xff]   ;;  %v7832_v58 = vmul.f32 %v15538_v61, %v7786_v1 }
 0x795   : > { %8816 = vrot.lane.b32.xlu1 %v14270_v15, %s12643_s26  ;;  %v4788_v10 = vpop.permute.xlu0 %4787  ;;  %v4861_v48 = vmul.f32 %v15327_v14, %v4825_v55  ;;  %v4862_v47 = vmul.f32 %v15330_v24, %v4809_v26  ;;  %v7789_v55 = vsel %vm1275_vm7, %v17608_v59, %v17609_v25  ;;  %v7896_v26 = vpack.c.bf16 %v7835_v5, %v7833_v33  ;;  %v17612_v25 = vld [vmem:[#allocation40_spill] sm:$0xff]  ;;  %v12429_v33 = vld [vmem:[%s17439_s6 + $0x288] sm:$0xff]  }
 0x796   : > { %v4810_v27 = vsel %vm369_vm1, %v4756_v43, %v4788_v10  ;;  %v4826_v8 = vsel %vm369_vm1, %v4788_v10, %v4756_v43  ;;  %v7837_v43 = vmul.f32 %v15213_v49, %v7804_v56  ;;  %v7788_v59 = vsel %vm1275_vm7, %v17610_v42, %v17611_v37 }
 0x797   : > { %v4863_v20 = vmul.f32 %v15327_v14, %v4826_v8  ;;  %v4864_v3 = vmul.f32 %v15330_v24, %v4810_v27  ;;  %v15602_v15 = vpop.permute.xlu1 %8278  ;;  %8818 = vrot.lane.b32.xlu0 %v14274_v13, %s12643_s26  ;;  %v7807_v13 = vsel %vm1275_vm7, %v14968_v29, %v14953_v16  ;;  %v7895_v27 = vpack.c.bf16 %v7834_v41, %v7832_v58  ;;  %v12430_v58 = vld [vmem:[%s17439_s6 + $0xd0] sm:$0xff]  }
 0x798   : > { %7496 = vmatmul.mubr.bf16.vlgmr.msra.gmra.mrb[16].mxu0 %v12427_v21  ;;  %v7838_v5 = vmul.f32 %v15538_v61, %v7789_v55  ;;  %v7791_v37 = vsel %vm1275_vm7, %v14953_v16, %v14968_v29  ;;  %v7843_v42 = vmul.f32 %v15213_v49, %v7807_v13  ;;  %v7809_v16 = vsel %vm1275_vm7, %v15092_v17, %v15053_v7 }
 0x799   : > { %v4917_v10 = vpack.c.bf16 %v4863_v20, %v4861_v48  ;;  %8006 = vmatpush1.bf16.msra.mxu0 %v7893_v9  ;;  %8848 = vrot.lane.b32.xlu1 %v14278_v38, %s12643_s26  ;;  %v15621_v1 = vpop.permute.xlu0 %8280  ;;  %v4918_v56 = vpack.c.bf16 %v4864_v3, %v4862_v47  ;;  %v17613_v20 = vld [vmem:[#allocation41_spill] sm:$0xff]  ;;  %v7898_v3 = vpack.c.bf16 %v7839_v50, %v7837_v43 }
 0x79a   : > { %8007 = vmatprep.subr.bf16.mxu0 %v7896_v26  ;;  %7505 = vmatprep.mubr.bf16.mxu0 %v17554_v63  ;;  %v7806_v21 = vsel %vm1275_vm7, %v17613_v20, %v17612_v25  ;;  %v7793_v9 = vsel %vm1275_vm7, %v15053_v7, %v15092_v17  ;;  %v7790_v41 = vsel %vm1275_vm7, %v17612_v25, %v17613_v20 }
 0x79b   : > { %v15633_v38 = vpop.permute.xlu1 %8310  ;;  %5333 = vmatmul.mubr.bf16.gmra.mrb[68].mxu1 %v12428_v57  ;;  %8850 = vrot.lane.b32.xlu0 %v14282_v44, %s12643_s26  ;;  %v7836_v44 = vmul.f32 %v15538_v61, %v7788_v59  ;;  %v7841_v50 = vmul.f32 %v15213_v49, %v7806_v21  ;;  %v7792_v8 = vsel %vm1275_vm7, %v15036_v51, %v15065_v54 }
 0x79c   : > { %5507 = vmatprep.subr.bf16.mxu1 %v4918_v56  ;;  %5342 = vmatprep.mubr.bf16.mxu1 %v17554_v63  ;;  %v7842_v17 = vmul.f32 %v15538_v61, %v7791_v37  ;;  %v7808_v48 = vsel %vm1275_vm7, %v15065_v54, %v15036_v51  ;;  %v7846_v47 = vmul.f32 %v15538_v61, %v7793_v9 }
 0x79d   : > { %8008 = vmatpush1.bf16.msra.mxu0 %v7895_v27  ;;  %5508 = vmatpush1.bf16.msra.mxu1 %v4917_v10  ;;  %v15655_v29 = vpop.permute.xlu0 %8312  ;;  %v7897_v7 = vpack.c.bf16 %v7838_v5, %v7836_v44  ;;  %v7847_v43 = vmul.f32 %v15213_v49, %v7809_v16  ;;  %v7900_v55 = vpack.c.bf16 %v7843_v42, %v7841_v50 }
 0x79e   : > { %8009 = vmatprep.subr.bf16.mxu0 %v7898_v3  ;;  %5708 = vrot.lane.b32.xlu1 %v14286_v22, %s12638_s21  ;;  %v7840_v26 = vmul.f32 %v15538_v61, %v7790_v41  ;;  %v7844_v13 = vmul.f32 %v15538_v61, %v7792_v8  ;;  %v7811_v51 = vsel %vm1275_vm7, %v15217_v53, %v15177_v28 }
 0x79f   : > { %v4758_v57 = vpop.permute.xlu1 %4757  ;;  %5710 = vrot.lane.b32.xlu0 %v14290_v62, %s12638_s21  ;;  %v7845_v10 = vmul.f32 %v15213_v49, %v7808_v48  ;;  %v7810_v56 = vsel %vm1275_vm7, %v15194_v11, %v15160_v32  ;;  %v7795_v27 = vsel %vm1275_vm7, %v15177_v28, %v15217_v53  ;;  %v7851_v20 = vmul.f32 %v15213_v49, %v7811_v51  ;;  %v12431_v53 = vld [vmem:[%s17439_s6 + $0x290] sm:$0xff]  }
 0x7a0   : > { %7506 = vmatmul.mubr.bf16.gmra.mrb[20].mxu0 %v12429_v33  ;;  %v7899_v59 = vpack.c.bf16 %v7842_v17, %v7840_v26  ;;  %v7901_v5 = vpack.c.bf16 %v7846_v47, %v7844_v13  ;;  %v7794_v37 = vsel %vm1275_vm7, %v15160_v32, %v15194_v11  ;;  %v7849_v42 = vmul.f32 %v15213_v49, %v7810_v56  ;;  %v15768_v56 = vld [vmem:[%s17434_s1 + $0xe] sm:$0x3] }
 0x7a1   : > { %8010 = vmatpush1.bf16.msra.mxu0 %v7897_v7  ;;  %v4760_v54 = vpop.permute.xlu0 %4759  ;;  %7515 = vmatprep.mubr.bf16.mxu0 %v17554_v63  ;;  %v7902_v28 = vpack.c.bf16 %v7847_v43, %v7845_v10  ;;  %v7850_v9 = vmul.f32 %v15538_v61, %v7795_v27  ;;  %v7813_v33 = vsel %vm1275_vm7, %v15269_v36, %v15258_v31 }
 0x7a2   : > { %8011 = vmatprep.subr.bf16.mxu0 %v7900_v55  ;;  %5740 = vrot.lane.b32.xlu1 %v17571_v45, %s12638_s21  ;;  %v7812_v16 = vsel %vm1275_vm7, %v15260_v19, %v15251_v35  ;;  %v7848_v48 = vmul.f32 %v15538_v61, %v7794_v37  ;;  %v7797_v47 = vsel %vm1275_vm7, %v15258_v31, %v15269_v36  ;;  %v17617_v37 = vld [vmem:[#allocation22_spill] sm:$0xff] }
 0x7a3   : > { %v4790_v25 = vpop.permute.xlu1 %4789  ;;  %5343 = vmatmul.mubr.bf16.gmra.mrb[72].mxu1 %v12430_v58  ;;  %5742 = vrot.lane.b32.xlu0 %v17574_v60, %s12638_s21  ;;  %v7904_v58 = vpack.c.bf16 %v7851_v20, %v7849_v42  ;;  %v7796_v31 = vsel %vm1275_vm7, %v15251_v35, %v15260_v19  ;;  %v7853_v36 = vmul.f32 %v15213_v49, %v7812_v16  ;;  %v17615_v20 = vld [vmem:[#allocation6_spill] sm:$0xff] }
 0x7a4   : > { %v4811_v21 = vsel %vm369_vm1, %v4758_v57, %v4790_v25  ;;  %v4827_v3 = vsel %vm369_vm1, %v4790_v25, %v4758_v57  ;;  %5352 = vmatprep.mubr.bf16.mxu1 %v17554_v63  ;;  %v7855_v57 = vmul.f32 %v15213_v49, %v7813_v33  ;;  %v7903_v13 = vpack.c.bf16 %v7850_v9, %v7848_v48 }
 0x7a5   : > { %8012 = vmatpush1.bf16.msra.mxu0 %v7899_v59  ;;  %v4792_v44 = vpop.permute.xlu0 %4791  ;;  %v4865_v41 = vmul.f32 %v15327_v14, %v4827_v3  ;;  %v4866_v50 = vmul.f32 %v15330_v24, %v4811_v21  ;;  %v7854_v51 = vmul.f32 %v15538_v61, %v7797_v47  ;;  %v12433_v59 = vld [vmem:[%s17439_s6 + $0x298] sm:$0xff]   ;;  %v15797_v21 = vrot.slane %v15768_v56, %v17615_v20  ;;  %v17616_v3 = vld [vmem:[#allocation9_spill] sm:$0xff]  ;;  %v12435_v47 = vld [vmem:[%s17439_s6 + $0x2a0] sm:$0xff]  }
 0x7a6   : > { %8013 = vmatprep.subr.bf16.mxu0 %v7902_v28  ;;  %8820 = vrot.lane.b32.xlu1 %v14286_v22, %s12643_s26  ;;  %v4812_v32 = vsel %vm369_vm1, %v4760_v54, %v4792_v44  ;;  %v4828_v11 = vsel %vm369_vm1, %v4792_v44, %v4760_v54  ;;  %v12432_v22 = vld [vmem:[%s17439_s6 + $0xd8] sm:$0xff]   ;;  %v17614_v54 = vld [vmem:[#allocation21_spill] sm:$0xff]  ;;  %v7906_v27 = vpack.c.bf16 %v7855_v57, %v7853_v36 }
 0x7a7   : > { %v4867_v8 = vmul.f32 %v15327_v14, %v4828_v11  ;;  %v4868_v7 = vmul.f32 %v15330_v24, %v4812_v32  ;;  %v15733_v17 = vpop.permute.xlu1 %8282  ;;  %8822 = vrot.lane.b32.xlu0 %v14290_v62, %s12643_s26  ;;  %v7815_v62 = vsel %vm1275_vm7, %v15313_v12, %v15283_v0  ;;  %v7814_v10 = vsel %vm1275_vm7, %v17614_v54, %v15285_v46 }
 0x7a8   : > { %7516 = vmatmul.mubr.bf16.gmra.mrb[24].mxu0 %v12431_v53  ;;  %v7859_v19 = vmul.f32 %v15213_v49, %v7815_v62  ;;  %v7857_v25 = vmul.f32 %v15213_v49, %v7814_v10  ;;  %v8342_v42 = vsel %vm1435_vm8, %v17617_v37, %v15352_v30  ;;  %v12434_v49 = vld [vmem:[%s17439_s6 + $0xe0] sm:$0xff]  }
 0x7a9   : > { %v4919_v43 = vpack.c.bf16 %v4867_v8, %v4865_v41  ;;  %8014 = vmatpush1.bf16.msra.mxu0 %v7901_v5  ;;  %v15750_v55 = vpop.permute.xlu0 %8284  ;;  %v4920_v26 = vpack.c.bf16 %v4868_v7, %v4866_v50  ;;  %7525 = vmatprep.mubr.bf16.mxu0 %v17554_v63  ;;  %v7852_v5 = vmul.f32 %v15538_v61, %v7796_v31  ;;  %v17619_v41 = vld [vmem:[#allocation11_spill] sm:$0xff]  ;;  %v17620_v7 = vld [vmem:[#allocation12_spill] sm:$0xff] }
 0x7aa   : > { %8015 = vmatprep.subr.bf16.mxu0 %v7904_v58  ;;  %8852 = vrot.lane.b32.xlu1 %v17571_v45, %s12643_s26  ;;  %v7799_v45 = vsel %vm1275_vm7, %v15283_v0, %v15313_v12  ;;  %v7798_v12 = vsel %vm1275_vm7, %v15285_v46, %v17614_v54  ;;  %v17618_v46 = vld [vmem:[#allocation10_spill] sm:$0xff]  ;;  %v7908_v44 = vpack.c.bf16 %v7859_v19, %v7857_v25 }
 0x7ab   : > { %v15770_v35 = vpop.permute.xlu1 %8314  ;;  %5353 = vmatmul.mubr.bf16.gmra.mrb[76].mxu1 %v12432_v22  ;;  %8854 = vrot.lane.b32.xlu0 %v17574_v60, %s12643_s26  ;;  %v8343_v60 = vsel %vm1435_vm8, %v15374_v52, %v15361_v40  ;;  %v7905_v28 = vpack.c.bf16 %v7854_v51, %v7852_v5  ;;  %v7858_v53 = vmul.f32 %v15538_v61, %v7799_v45  ;;  %v12436_v51 = vld [vmem:[%s17439_s6 + $0xe8] sm:$0xff]   ;;  %v12438_v25 = vld [vmem:[%s17439_s6 + $0xf0] sm:$0xff]  }
 0x7ac   : > { %5509 = vmatprep.subr.bf16.mxu1 %v4920_v26  ;;  %5362 = vmatprep.mubr.bf16.mxu1 %v17554_v63  ;;  %v8373_v33 = vmul.f32 %v15797_v21, %v8343_v60  ;;  %v7856_v16 = vmul.f32 %v15538_v61, %v7798_v12  ;;  %v8371_v11 = vmul.f32 %v15797_v21, %v8342_v42  ;;  %v17621_v5 = vld [vmem:[#allocation13_spill] sm:$0xff]  ;;  %v17622_v12 = vld [vmem:[#allocation14_spill] sm:$0xff]  ;;  %v17624_v42 = vld [vmem:[#allocation16_spill] sm:$0xff] }
 0x7ad   : > { %8016 = vmatpush1.bf16.msra.mxu0 %v7903_v13  ;;  %5510 = vmatpush1.bf16.msra.mxu1 %v4919_v43  ;;  %v15788_v0 = vpop.permute.xlu0 %8316 }
 0x7ae   : > { %8017 = vmatprep.subr.bf16.mxu0 %v7906_v27  ;;  %5712 = vrot.lane.b32.xlu1 %v17616_v3, %s12638_s21  ;;  %v7907_v50 = vpack.c.bf16 %v7858_v53, %v7856_v16  ;;  %v8436_v48 = vpack.c.bf16 %v8373_v33, %v8371_v11  ;;  %v12437_v27 = vld [vmem:[%s17439_s6 + $0x2a8] sm:$0xff]   ;;  %v15889_v11 = vrot.slane %v15768_v56, %v12751_v6 }
 0x7af   : > { %v4762_v9 = vpop.permute.xlu1 %4761  ;;  %5714 = vrot.lane.b32.xlu0 %v17618_v46, %s12638_s21 }
 0x7b0   : > { %7526 = vmatmul.mubr.bf16.gmra.mrb[28].mxu0 %v12433_v59 }
 0x7b1   : > { %8018 = vmatpush1.bf16.msra.mxu0 %v7905_v28  ;;  %v4764_v32 = vpop.permute.xlu0 %4763  ;;  %7535 = vmatprep.mubr.bf16.mxu0 %v17554_v63  ;;  %v17623_v28 = vld [vmem:[#allocation15_spill] sm:$0xff] }
 0x7b2   : > { %8019 = vmatprep.subr.bf16.mxu0 %v7908_v44  ;;  %5744 = vrot.lane.b32.xlu1 %v17619_v41, %s12638_s21  ;;  %v12440_v44 = vld [vmem:[%s17439_s6 + $0xf8] sm:$0xff]  }
 0x7b3   : > { %v4794_v8 = vpop.permute.xlu1 %4793  ;;  %5363 = vmatmul.mubr.bf16.gmra.mrb[80].mxu1 %v12434_v49  ;;  %5746 = vrot.lane.b32.xlu0 %v17620_v7, %s12638_s21 }
 0x7b4   : > { %v4813_v22 = vsel %vm369_vm1, %v4762_v9, %v4794_v8  ;;  %v4829_v61 = vsel %vm369_vm1, %v4794_v8, %v4762_v9  ;;  %5372 = vmatprep.mubr.bf16.mxu1 %v17554_v63  ;;  %v12439_v9 = vld [vmem:[%s17439_s6 + $0x2b0] sm:$0xff]  }
 0x7b5   : > { %8020 = vmatpush1.bf16.msra.mxu0 %v7907_v50  ;;  %v4796_v57 = vpop.permute.xlu0 %4795  ;;  %v4869_v43 = vmul.f32 %v15327_v14, %v4829_v61  ;;  %v4870_v26 = vmul.f32 %v15330_v24, %v4813_v22 }
 0x7b6   : > { %8547 = vmatprep.subr.bf16.mxu0 %v8436_v48  ;;  %8824 = vrot.lane.b32.xlu1 %v17616_v3, %s12643_s26  ;;  %v4814_v58 = vsel %vm369_vm1, %v4764_v32, %v4796_v57  ;;  %v4830_v62 = vsel %vm369_vm1, %v4796_v57, %v4764_v32  ;;  %v12441_v57 = vld [vmem:[%s17439_s6 + $0x2b8] sm:$0xff]  }
 0x7b7   : > { %v4871_v31 = vmul.f32 %v15327_v14, %v4830_v62  ;;  %v4872_v36 = vmul.f32 %v15330_v24, %v4814_v58  ;;  %v15837_v13 = vpop.permute.xlu1 %8286  ;;  %8826 = vrot.lane.b32.xlu0 %v17618_v46, %s12643_s26 }
 0x7b8   : > { %7536 = vmatmul.mubr.bf16.gmra.mrb[32].mxu0 %v12435_v47 }
 0x7b9   : > { %v4921_v54 = vpack.c.bf16 %v4871_v31, %v4869_v43  ;;  %v15844_v10 = vpop.permute.xlu0 %8288  ;;  %v4922_v45 = vpack.c.bf16 %v4872_v36, %v4870_v26  ;;  %7545 = vmatprep.mubr.bf16.mxu0 %v17554_v63  ;;  %v17625_v43 = vld [vmem:[#allocation17_spill] sm:$0xff] }
 0x7ba   : > { %8856 = vrot.lane.b32.xlu1 %v17619_v41, %s12643_s26 }
 0x7bb   : > { %v15849_v19 = vpop.permute.xlu1 %8318  ;;  %5373 = vmatmul.mubr.bf16.gmra.mrb[84].mxu1 %v12436_v51  ;;  %8858 = vrot.lane.b32.xlu0 %v17620_v7, %s12643_s26 }
 0x7bc   : > { %5511 = vmatprep.subr.bf16.mxu1 %v4922_v45  ;;  %5382 = vmatprep.mubr.bf16.mxu1 %v17554_v63 }
 0x7bd   : > { %5512 = vmatpush1.bf16.msra.mxu1 %v4921_v54  ;;  %v15857_v59 = vpop.permute.xlu0 %8320 }
 0x7be   : > { %5716 = vrot.lane.b32.xlu1 %v17621_v5, %s12638_s21 }
 0x7bf   : > { %v4766_v60 = vpop.permute.xlu1 %4765  ;;  %5718 = vrot.lane.b32.xlu0 %v17622_v12, %s12638_s21 }
 0x7c0   : > { %7546 = vmatmul.mubr.bf16.gmra.mrb[36].mxu0 %v12437_v27  ;;  %v17626_v27 = vld [vmem:[#allocation18_spill] sm:$0xff] }
 0x7c1   : > { %v4768_v3 = vpop.permute.xlu0 %4767  ;;  %7555 = vmatprep.mubr.bf16.mxu0 %v17554_v63 }
 0x7c2   : > { %5748 = vrot.lane.b32.xlu1 %v17623_v28, %s12638_s21 }
 0x7c3   : > { %v4798_v53 = vpop.permute.xlu1 %4797  ;;  %5383 = vmatmul.mubr.bf16.gmra.mrb[88].mxu1 %v12438_v25  ;;  %5750 = vrot.lane.b32.xlu0 %v17624_v42, %s12638_s21 }
 0x7c4   : > { %5392 = vmatprep.mubr.bf16.mxu1 %v17554_v63  ;;  %v4831_v49 = vsel %vm369_vm1, %v4798_v53, %v4766_v60  ;;  %v4815_v16 = vsel %vm369_vm1, %v4766_v60, %v4798_v53  ;;  %v10952_v60 = vld [vmem:[%s17434_s1 + $0x4] sm:$0x3] }
 0x7c5   : > { %v8293_v46 = vpop.permute.xlu0 %8292  ;;  %v4873_v41 = vmul.f32 %v15327_v14, %v4831_v49  ;;  %v4874_v7 = vmul.f32 %v15330_v24, %v4815_v16  ;;  %v15945_v53 = vrot.slane %v10952_v60, %v12751_v6 }
 0x7c6   : > { %8828 = vrot.lane.b32.xlu1 %v17621_v5, %s12643_s26  ;;  %v12442_v5 = vld [vmem:[%s17439_s6] sm:$0xff]  }
 0x7c7   : > { %v8291_v33 = vpop.permute.xlu1 %8290  ;;  %8830 = vrot.lane.b32.xlu0 %v17622_v12, %s12643_s26 }
 0x7c8   : > { %7556 = vmatmul.mubr.bf16.gmra.mrb[40].mxu0 %v12439_v9 }
 0x7c9   : > { %v4800_v32 = vpop.permute.xlu0 %4799  ;;  %7565 = vmatprep.mubr.bf16.mxu0 %v17554_v63 }
 0x7ca   : > { %8860 = vrot.lane.b32.xlu1 %v17623_v28, %s12643_s26  ;;  %v4816_v50 = vsel %vm369_vm1, %v4768_v3, %v4800_v32  ;;  %v4832_v8 = vsel %vm369_vm1, %v4800_v32, %v4768_v3  ;;  %v17627_v28 = vld [vmem:[#allocation19_spill] sm:$0xff] }
 0x7cb   : > { %v4875_v22 = vmul.f32 %v15327_v14, %v4832_v8  ;;  %v4876_v61 = vmul.f32 %v15330_v24, %v4816_v50  ;;  %v8323_v48 = vpop.permute.xlu1 %8322  ;;  %5393 = vmatmul.mubr.bf16.gmra.mrb[92].mxu1 %v12440_v44  ;;  %8862 = vrot.lane.b32.xlu0 %v17624_v42, %s12643_s26  ;;  %v15948_v42 = vrot.slane %v10952_v60, %v17615_v20 }
 0x7cc   : > { %v8340_v56 = vsel %vm1435_vm8, %v8291_v33, %v8323_v48  ;;  %v8356_v47 = vsel %vm1435_vm8, %v8323_v48, %v8291_v33  ;;  %5531 = vmatprep.mubr.bf16.mxu1 %v17554_v63  ;;  %v12443_v33 = vld [vmem:[%s17439_s6 + $0x2c0] sm:$0xff]  }
 0x7cd   : > { %v4923_v14 = vpack.c.bf16 %v4875_v22, %v4873_v41  ;;  %v15912_v24 = vmul.f32 %v15889_v11, %v8340_v56  ;;  %v8325_v58 = vpop.permute.xlu0 %8324  ;;  %v4924_v62 = vpack.c.bf16 %v4876_v61, %v4874_v7  ;;  %v15921_v36 = vmul.f32 %v15797_v21, %v8356_v47  ;;  %v11245_v41 = vld [vmem:[%s17434_s1 + $0x10] sm:$0x3]  ;;  %v17628_v48 = vld [vmem:[#allocation20_spill] sm:$0xff]  ;;  %v12444_v56 = vld [vmem:[%s17439_s6 + $0x8] sm:$0xff]  }
 0x7ce   : > { %5720 = vrot.lane.b32.xlu1 %v17625_v43, %s12638_s21  ;;  %v8341_v26 = vsel %vm1435_vm8, %v8293_v46, %v8325_v58  ;;  %v8357_v31 = vsel %vm1435_vm8, %v8325_v58, %v8293_v46 }
 0x7cf   : > { %v15924_v51 = vmul.f32 %v15889_v11, %v8341_v26  ;;  %v15927_v54 = vmul.f32 %v15797_v21, %v8357_v31  ;;  %v5693_v45 = vpop.permute.xlu1 %5692  ;;  %5722 = vrot.lane.b32.xlu0 %v17626_v27, %s12638_s21  ;;  %5513 = vmatprep.subr.bf16.mxu1 %v4924_v62  ;;  %v15985_v62 = vrot.slane %v11245_v41, %v17615_v20  ;;  %v9362_v26 = vld [vmem:[%s17440_s7 + $0x80] sm:$0xff] }
 0x7d0   : > { %7566 = vmatmul.mubr.bf16.gmra.mrb[44].mxu0 %v12441_v57  ;;  %5514 = vmatpush1.bf16.msra.mxu1 %v4923_v14  ;;  %v15979_v14 = vrot.slane %v11245_v41, %v12751_v6  ;;  %v9347_v41 = vld [vmem:[%s17440_s7 + $0x8] sm:$0xff] }
 0x7d1   : > { %v5695_v25 = vpop.permute.xlu0 %5694  ;;  %7575 = vmatprep.mubr.bf16.mxu0 %v17554_v63 }
 0x7d2   : > { %5752 = vrot.lane.b32.xlu1 %v17627_v28, %s12638_s21 }
 0x7d3   : > { %v5725_v9 = vpop.permute.xlu1 %5724  ;;  %8834 = vrot.lane.b32.xlu0 %v17626_v27, %s12643_s26  ;;  %5532 = vmatmul.mubr.bf16.vlgmr.msra.gmra.mrb[32].mxu1 %v12442_v5  ;;  %v9346_v27 = vld [vmem:[%s17440_s7] sm:$0xff]  ;;  %v12445_v5 = vld [vmem:[%s17439_s6 + $0x2c8] sm:$0xff]  }
 0x7d4   : > { %v5756_v46 = vsel %vm657_vm2, %v5693_v45, %v5725_v9  ;;  %v5772_v49 = vsel %vm657_vm2, %v5725_v9, %v5693_v45  ;;  %5541 = vmatprep.mubr.bf16.mxu1 %v17554_v63 }
 0x7d5   : > { %v5727_v44 = vpop.permute.xlu0 %5726  ;;  %v5800_v50 = vmul.f32 %v15945_v53, %v5772_v49  ;;  %v5801_v8 = vmul.f32 %v15948_v42, %v5756_v46 }
 0x7d6   : > { %8832 = vrot.lane.b32.xlu1 %v17625_v43, %s12643_s26  ;;  %v5757_v16 = vsel %vm657_vm2, %v5695_v25, %v5727_v44  ;;  %v5773_v32 = vsel %vm657_vm2, %v5727_v44, %v5695_v25 }
 0x7d7   : > { %v5802_v7 = vmul.f32 %v15945_v53, %v5773_v32  ;;  %v5803_v22 = vmul.f32 %v15948_v42, %v5757_v16  ;;  %v8805_v61 = vpop.permute.xlu1 %8804  ;;  %5754 = vrot.lane.b32.xlu0 %v17628_v48, %s12638_s21  ;;  %v9363_v16 = vld [vmem:[%s17440_s7 + $0x88] sm:$0xff]  ;;  %v12446_v32 = vld [vmem:[%s17439_s6 + $0x10] sm:$0xff]  }
 0x7d8   : > { %7576 = vmatmul.mubr.bf16.gmra.mrb[48].mxu0 %v12443_v33 }
 0x7d9   : > { %v5865_v47 = vpack.c.bf16 %v5802_v7, %v5800_v50  ;;  %v8807_v57 = vpop.permute.xlu0 %8806  ;;  %v5866_v58 = vpack.c.bf16 %v5803_v22, %v5801_v8  ;;  %7585 = vmatprep.mubr.bf16.mxu0 %v17554_v63  ;;  %v12456_v7 = vld [vmem:[%s17439_s6 + $0x38] sm:$0xff]  }
 0x7da   : > { %8864 = vrot.lane.b32.xlu1 %v17627_v28, %s12643_s26 }
 0x7db   : > { %v8837_v43 = vpop.permute.xlu1 %8836  ;;  %8866 = vrot.lane.b32.xlu0 %v17628_v48, %s12643_s26  ;;  %5542 = vmatmul.mubr.bf16.gmra.mrb[36].mxu1 %v12444_v56 }
 0x7dc   : > { %v8868_v31 = vsel %vm1595_vm9, %v8805_v61, %v8837_v43  ;;  %v8884_v45 = vsel %vm1595_vm9, %v8837_v43, %v8805_v61  ;;  %5977 = vmatprep.subr.bf16.mxu1 %v5866_v58  ;;  %5551 = vmatprep.mubr.bf16.mxu1 %v17554_v63  ;;  %v9364_v61 = vld [vmem:[%s17440_s7 + $0x90] sm:$0xff] }
 0x7dd   : > { %v16004_v60 = vmul.f32 %v15979_v14, %v8868_v31  ;;  %5978 = vmatpush1.bf16.msra.mxu1 %v5865_v47  ;;  %v8839_v25 = vpop.permute.xlu0 %8838  ;;  %v16011_v46 = vmul.f32 %v15985_v62, %v8884_v45  ;;  %v9348_v47 = vld [vmem:[%s17440_s7 + $0x10] sm:$0xff] }
 0x7de   : > { %9460 = vperm.xlu1 %12276, %v9362_v26   ;;  %v8869_v28 = vsel %vm1595_vm9, %v8807_v57, %v8839_v25  ;;  %v8885_v9 = vsel %vm1595_vm9, %v8839_v25, %v8807_v57  ;;  %v12447_v57 = vld [vmem:[%s17439_s6 + $0x2d0] sm:$0xff]  }
 0x7df   : > { %v16014_v49 = vmul.f32 %v15979_v14, %v8869_v28  ;;  %v16017_v33 = vmul.f32 %v15985_v62, %v8885_v9  ;;  %v5697_v44 = vpop.permute.xlu1 %5696  ;;  %9380 = vperm.xlu0 %12275, %v9346_v27   ;;  %v9365_v28 = vld [vmem:[%s17440_s7 + $0x98] sm:$0xff] }
 0x7e0   : > { %7586 = vmatmul.mubr.bf16.gmra.mrb[52].mxu0 %v12445_v5  ;;  %v12448_v9 = vld [vmem:[%s17439_s6 + $0x18] sm:$0xff]  }
 0x7e1   : > { %v5699_v8 = vpop.permute.xlu0 %5698  ;;  %7595 = vmatprep.mubr.bf16.mxu0 %v17554_v63 }
 0x7e2   : > { %9465 = vperm.xlu1 %12276, %v9363_v16  }
 0x7e3   : > { %v5729_v22 = vpop.permute.xlu1 %5728  ;;  %9385 = vperm.xlu0 %12275, %v9347_v41   ;;  %5552 = vmatmul.mubr.bf16.gmra.mrb[40].mxu1 %v12446_v32 }
 0x7e4   : > { %v5758_v48 = vsel %vm657_vm2, %v5697_v44, %v5729_v22  ;;  %v5774_v56 = vsel %vm657_vm2, %v5729_v22, %v5697_v44  ;;  %5561 = vmatprep.mubr.bf16.mxu1 %v17554_v63  ;;  %v9349_v44 = vld [vmem:[%s17440_s7 + $0x18] sm:$0xff]  ;;  %v9366_v22 = vld [vmem:[%s17440_s7 + $0xa0] sm:$0xff] }
 0x7e5   : > { %v5731_v58 = vpop.permute.xlu0 %5730  ;;  %v5804_v31 = vmul.f32 %v15945_v53, %v5774_v56  ;;  %v5805_v45 = vmul.f32 %v15948_v42, %v5758_v48  ;;  %v9350_v56 = vld [vmem:[%s17440_s7 + $0x20] sm:$0xff] }
 0x7e6   : > { %9470 = vperm.xlu1 %12276, %v9364_v61   ;;  %v5759_v43 = vsel %vm657_vm2, %v5699_v8, %v5731_v58  ;;  %v5775_v26 = vsel %vm657_vm2, %v5731_v58, %v5699_v8 }
 0x7e7   : > { %v5806_v27 = vmul.f32 %v15945_v53, %v5775_v26  ;;  %v5807_v5 = vmul.f32 %v15948_v42, %v5759_v43  ;;  %v8809_v25 = vpop.permute.xlu1 %8808  ;;  %9390 = vperm.xlu0 %12275, %v9348_v47   ;;  %v12449_v47 = vld [vmem:[%s17439_s6 + $0x2d8] sm:$0xff]  }
 0x7e8   : > { %7596 = vmatmul.mubr.bf16.gmra.mrb[56].mxu0 %v12447_v57 }
 0x7e9   : > { %v5867_v16 = vpack.c.bf16 %v5806_v27, %v5804_v31  ;;  %v8811_v32 = vpop.permute.xlu0 %8810  ;;  %v5868_v41 = vpack.c.bf16 %v5807_v5, %v5805_v45  ;;  %7605 = vmatprep.mubr.bf16.mxu0 %v17554_v63 }
 0x7ea   : > { %9475 = vperm.xlu1 %12276, %v9365_v28   ;;  %v12450_v28 = vld [vmem:[%s17439_s6 + $0x20] sm:$0xff]  }
 0x7eb   : > { %v8841_v8 = vpop.permute.xlu1 %8840  ;;  %9395 = vperm.xlu0 %12275, %v9349_v44   ;;  %5562 = vmatmul.mubr.bf16.gmra.mrb[44].mxu1 %v12448_v9  ;;  %v9351_v9 = vld [vmem:[%s17440_s7 + $0x28] sm:$0xff] }
 0x7ec   : > { %v8870_v61 = vsel %vm1595_vm9, %v8809_v25, %v8841_v8  ;;  %v8886_v48 = vsel %vm1595_vm9, %v8841_v8, %v8809_v25  ;;  %5979 = vmatprep.subr.bf16.mxu1 %v5868_v41  ;;  %5571 = vmatprep.mubr.bf16.mxu1 %v17554_v63  ;;  %v9367_v25 = vld [vmem:[%s17440_s7 + $0xa8] sm:$0xff]  ;;  %v9368_v8 = vld [vmem:[%s17440_s7 + $0xb0] sm:$0xff] }
 0x7ed   : > { %v16080_v57 = vmul.f32 %v15979_v14, %v8870_v61  ;;  %5980 = vmatpush1.bf16.msra.mxu1 %v5867_v16  ;;  %v8843_v58 = vpop.permute.xlu0 %8842  ;;  %v16087_v31 = vmul.f32 %v15985_v62, %v8886_v48  ;;  %v9352_v48 = vld [vmem:[%s17440_s7 + $0x30] sm:$0xff] }
 0x7ee   : > { %9480 = vperm.xlu1 %12276, %v9366_v22   ;;  %v8871_v43 = vsel %vm1595_vm9, %v8811_v32, %v8843_v58  ;;  %v8887_v26 = vsel %vm1595_vm9, %v8843_v58, %v8811_v32 }
 0x7ef   : > { %v16090_v45 = vmul.f32 %v15979_v14, %v8871_v43  ;;  %v16093_v27 = vmul.f32 %v15985_v62, %v8887_v26  ;;  %v5701_v5 = vpop.permute.xlu1 %5700  ;;  %9400 = vperm.xlu0 %12275, %v9350_v56   ;;  %v12451_v56 = vld [vmem:[%s17439_s6 + $0x2e0] sm:$0xff]  }
 0x7f0   : > { %7606 = vmatmul.mubr.bf16.gmra.mrb[60].mxu0 %v12449_v47 }
 0x7f1   : > { %v5703_v16 = vpop.permute.xlu0 %5702  ;;  %7615 = vmatprep.mubr.bf16.mxu0 %v17554_v63 }
 0x7f2   : > { %9485 = vperm.xlu1 %12276, %v9367_v25  }
 0x7f3   : > { %v5733_v41 = vpop.permute.xlu1 %5732  ;;  %9405 = vperm.xlu0 %12275, %v9351_v9   ;;  %5572 = vmatmul.mubr.bf16.gmra.mrb[48].mxu1 %v12450_v28 }
 0x7f4   : > { %v5760_v22 = vsel %vm657_vm2, %v5701_v5, %v5733_v41  ;;  %v5776_v61 = vsel %vm657_vm2, %v5733_v41, %v5701_v5  ;;  %5581 = vmatprep.mubr.bf16.mxu1 %v17554_v63  ;;  %v9369_v41 = vld [vmem:[%s17440_s7 + $0xb8] sm:$0xff] }
 0x7f5   : > { %v5735_v47 = vpop.permute.xlu0 %5734  ;;  %v5808_v26 = vmul.f32 %v15945_v53, %v5776_v61  ;;  %v5809_v5 = vmul.f32 %v15948_v42, %v5760_v22 }
 0x7f6   : > { %9490 = vperm.xlu1 %12276, %v9368_v8   ;;  %v5761_v58 = vsel %vm657_vm2, %v5703_v16, %v5735_v47  ;;  %v5777_v43 = vsel %vm657_vm2, %v5735_v47, %v5703_v16  ;;  %v12452_v8 = vld [vmem:[%s17439_s6 + $0x28] sm:$0xff]   ;;  %v9353_v16 = vld [vmem:[%s17440_s7 + $0x38] sm:$0xff] }
 0x7f7   : > { %v5810_v25 = vmul.f32 %v15945_v53, %v5777_v43  ;;  %v5811_v28 = vmul.f32 %v15948_v42, %v5761_v58  ;;  %v8813_v9 = vpop.permute.xlu1 %8812  ;;  %9410 = vperm.xlu0 %12275, %v9352_v48   ;;  %v9370_v58 = vld [vmem:[%s17440_s7 + $0xc0] sm:$0xff] }
 0x7f8   : > { %7616 = vmatmul.mubr.bf16.gmra.mrb[64].mxu0 %v12451_v56 }
 0x7f9   : > { %v5869_v22 = vpack.c.bf16 %v5810_v25, %v5808_v26  ;;  %v8815_v61 = vpop.permute.xlu0 %8814  ;;  %v5870_v47 = vpack.c.bf16 %v5811_v28, %v5809_v5  ;;  %7625 = vmatprep.mubr.bf16.mxu0 %v17554_v63  ;;  %v9354_v26 = vld [vmem:[%s17440_s7 + $0x40] sm:$0xff]  ;;  %v12453_v5 = vld [vmem:[%s17439_s6 + $0x2e8] sm:$0xff]  }
 0x7fa   : > { %9495 = vperm.xlu1 %12276, %v9369_v41  }
 0x7fb   : > { %v8845_v48 = vpop.permute.xlu1 %8844  ;;  %9415 = vperm.xlu0 %12275, %v9353_v16   ;;  %5582 = vmatmul.mubr.bf16.gmra.mrb[52].mxu1 %v12452_v8 }
 0x7fc   : > { %v8872_v56 = vsel %vm1595_vm9, %v8813_v9, %v8845_v48  ;;  %v8888_v43 = vsel %vm1595_vm9, %v8845_v48, %v8813_v9  ;;  %5981 = vmatprep.subr.bf16.mxu1 %v5870_v47  ;;  %5591 = vmatprep.mubr.bf16.mxu1 %v17554_v63 }
 0x7fd   : > { %v16156_v25 = vmul.f32 %v15979_v14, %v8872_v56  ;;  %5982 = vmatpush1.bf16.msra.mxu1 %v5869_v22  ;;  %v8847_v28 = vpop.permute.xlu0 %8846  ;;  %v16163_v8 = vmul.f32 %v15985_v62, %v8888_v43  ;;  %v9371_v22 = vld [vmem:[%s17440_s7 + $0xc8] sm:$0xff]  ;;  %v9356_v56 = vld [vmem:[%s17440_s7 + $0x50] sm:$0xff] }
 0x7fe   : > { %9500 = vperm.xlu1 %12276, %v9370_v58   ;;  %v8873_v9 = vsel %vm1595_vm9, %v8815_v61, %v8847_v28  ;;  %v8889_v41 = vsel %vm1595_vm9, %v8847_v28, %v8815_v61  ;;  %v12454_v58 = vld [vmem:[%s17439_s6 + $0x30] sm:$0xff]   ;;  %v9355_v61 = vld [vmem:[%s17440_s7 + $0x48] sm:$0xff] }
 0x7ff   : > { %17629 = vst [vmem:[#allocation30_spill] sm:$0xff] %v16156_v25  ;;  %v16166_v16 = vmul.f32 %v15979_v14, %v8873_v9  ;;  %v16169_v47 = vmul.f32 %v15985_v62, %v8889_v41  ;;  %v5705_v48 = vpop.permute.xlu1 %5704  ;;  %9420 = vperm.xlu0 %12275, %v9354_v26  }
 0x800   : > { %7626 = vmatmul.mubr.bf16.gmra.mrb[68].mxu0 %v12453_v5  ;;  %v9372_v5 = vld [vmem:[%s17440_s7 + $0xd0] sm:$0xff] }
 0x801   : > { %17630 = vst [vmem:[#allocation27_spill] sm:$0xff] %v16166_v16  ;;  %v5707_v43 = vpop.permute.xlu0 %5706  ;;  %7635 = vmatprep.mubr.bf16.mxu0 %v17554_v63 }
 0x802   : > { %9505 = vperm.xlu1 %12276, %v9371_v22   ;;  %v12455_v22 = vld [vmem:[%s17439_s6 + $0x2f0] sm:$0xff]  }
 0x803   : > { %v5737_v28 = vpop.permute.xlu1 %5736  ;;  %9425 = vperm.xlu0 %12275, %v9355_v61   ;;  %5592 = vmatmul.mubr.bf16.gmra.mrb[56].mxu1 %v12454_v58 }
 0x804   : > { %v5762_v9 = vsel %vm657_vm2, %v5705_v48, %v5737_v28  ;;  %v5778_v41 = vsel %vm657_vm2, %v5737_v28, %v5705_v48  ;;  %5601 = vmatprep.mubr.bf16.mxu1 %v17554_v63 }
 0x805   : > { %v5739_v58 = vpop.permute.xlu0 %5738  ;;  %v5812_v48 = vmul.f32 %v15945_v53, %v5778_v41  ;;  %v5813_v28 = vmul.f32 %v15948_v42, %v5762_v9 }
 0x806   : > { %9510 = vperm.xlu1 %12276, %v9372_v5   ;;  %v5763_v61 = vsel %vm657_vm2, %v5707_v43, %v5739_v58  ;;  %v5779_v26 = vsel %vm657_vm2, %v5739_v58, %v5707_v43  ;;  %v9373_v5 = vld [vmem:[%s17440_s7 + $0xd8] sm:$0xff]  ;;  %v9374_v58 = vld [vmem:[%s17440_s7 + $0xe0] sm:$0xff] }
 0x807   : > { %v5814_v44 = vmul.f32 %v15945_v53, %v5779_v26  ;;  %v5815_v32 = vmul.f32 %v15948_v42, %v5763_v61  ;;  %v8817_v50 = vpop.permute.xlu1 %8816  ;;  %9430 = vperm.xlu0 %12275, %v9356_v56   ;;  %v9357_v43 = vld [vmem:[%s17440_s7 + $0x58] sm:$0xff] }
 0x808   : > { %7636 = vmatmul.mubr.bf16.gmra.mrb[72].mxu0 %v12455_v22 }
 0x809   : > { %v5871_v9 = vpack.c.bf16 %v5814_v44, %v5812_v48  ;;  %v8819_v41 = vpop.permute.xlu0 %8818  ;;  %v5872_v26 = vpack.c.bf16 %v5815_v32, %v5813_v28  ;;  %7645 = vmatprep.mubr.bf16.mxu0 %v17554_v63  ;;  %v9358_v44 = vld [vmem:[%s17440_s7 + $0x60] sm:$0xff]  ;;  %v12457_v32 = vld [vmem:[%s17439_s6 + $0x2f8] sm:$0xff]  }
 0x80a   : > { %9515 = vperm.xlu1 %12276, %v9373_v5   ;;  %v8326_v5 = vsel %vm1435_vm8, %v15352_v30, %v17617_v37  ;;  %v9375_v37 = vld [vmem:[%s17440_s7 + $0xe8] sm:$0xff] }
 0x80b   : > { %v8849_v56 = vpop.permute.xlu1 %8848  ;;  %9435 = vperm.xlu0 %12275, %v9357_v43   ;;  %5602 = vmatmul.mubr.bf16.gmra.mrb[60].mxu1 %v12456_v7  ;;  %v8327_v7 = vsel %vm1435_vm8, %v15361_v40, %v15374_v52  ;;  %v8344_v52 = vsel %vm1435_vm8, %v15416_v2, %v15404_v23 }
 0x80c   : > { %v8874_v22 = vsel %vm1595_vm9, %v8817_v50, %v8849_v56  ;;  %v8890_v61 = vsel %vm1595_vm9, %v8849_v56, %v8817_v50  ;;  %5983 = vmatprep.subr.bf16.mxu1 %v5872_v26  ;;  %5611 = vmatprep.mubr.bf16.mxu1 %v17554_v63  ;;  %v8345_v50 = vsel %vm1435_vm8, %v15426_v18, %v15413_v39 }
 0x80d   : > { %v16240_v48 = vmul.f32 %v15979_v14, %v8874_v22  ;;  %5984 = vmatpush1.bf16.msra.mxu1 %v5871_v9  ;;  %v8851_v28 = vpop.permute.xlu0 %8850  ;;  %v16255_v9 = vmul.f32 %v15985_v62, %v8890_v61  ;;  %v8372_v56 = vmul.f32 %v15889_v11, %v8327_v7  ;;  %v9359_v61 = vld [vmem:[%s17440_s7 + $0x68] sm:$0xff] }
 0x80e   : > { %9520 = vperm.xlu1 %12276, %v9374_v58   ;;  %v8875_v43 = vsel %vm1595_vm9, %v8819_v41, %v8851_v28  ;;  %v8891_v40 = vsel %vm1595_vm9, %v8851_v28, %v8819_v41  ;;  %v12458_v41 = vld [vmem:[%s17439_s6 + $0x40] sm:$0xff]   ;;  %v8377_v58 = vmul.f32 %v15797_v21, %v8345_v50  ;;  %v8329_v28 = vsel %vm1435_vm8, %v15413_v39, %v15426_v18  ;;  %v9376_v18 = vld [vmem:[%s17440_s7 + $0xf0] sm:$0xff] }
 0x80f   : > { %17631 = vst [vmem:[#allocation29_spill] sm:$0xff] %v16240_v48  ;;  %17632 = vst [vmem:[#allocation31_spill] sm:$0xff] %v16255_v9  ;;  %v16258_v26 = vmul.f32 %v15979_v14, %v8875_v43  ;;  %v16261_v30 = vmul.f32 %v15985_v62, %v8891_v40  ;;  %9440 = vperm.xlu0 %12275, %v9358_v44   ;;  %v8328_v44 = vsel %vm1435_vm8, %v15404_v23, %v15416_v2  ;;  %v17635_v23 = vld [vmem:[#allocation24_spill] sm:$0xff]  ;;  %v9361_v48 = vld [vmem:[%s17440_s7 + $0x78] sm:$0xff] }
 0x810   : > { %v5709_v22 = vpop.permute.xlu1 %5708  ;;  %7646 = vmatmul.mubr.bf16.gmra.mrb[76].mxu0 %v12457_v32  ;;  %v8370_v43 = vmul.f32 %v15889_v11, %v8326_v5  ;;  %v8375_v40 = vmul.f32 %v15797_v21, %v8344_v52  ;;  %v8331_v2 = vsel %vm1435_vm8, %v17635_v23, %v15478_v34  ;;  %v8347_v39 = vsel %vm1435_vm8, %v15478_v34, %v17635_v23  ;;  %v9360_v32 = vld [vmem:[%s17440_s7 + $0x70] sm:$0xff]  ;;  %v12459_v34 = vld [vmem:[%s17439_s6 + $0x300] sm:$0xff]   ;;  %v17637_v23 = vld [vmem:[#allocation7_spill] sm:$0xff] }
 0x811   : > { %17633 = vst [vmem:[#allocation33_spill] sm:$0xff] %v16258_v26  ;;  %17634 = vst [vmem:[#allocation35_spill] sm:$0xff] %v16261_v30  ;;  %v5711_v50 = vpop.permute.xlu0 %5710  ;;  %8037 = vmatprep.mubr.bf16.mxu0 %v17554_v63  ;;  %v8374_v52 = vmul.f32 %v15889_v11, %v8328_v44 }
 0x812   : > { %9525 = vperm.xlu1 %12276, %v9375_v37   ;;  %v8435_v5 = vpack.c.bf16 %v8372_v56, %v8370_v43  ;;  %v8376_v37 = vmul.f32 %v15889_v11, %v8329_v28 }
 0x813   : > { %9445 = vperm.xlu0 %12275, %v9359_v61   ;;  %5612 = vmatmul.mubr.bf16.gmra.mrb[64].mxu1 %v12458_v41  ;;  %v8438_v61 = vpack.c.bf16 %v8377_v58, %v8375_v40  ;;  %v17636_v41 = vld [vmem:[#allocation26_spill] sm:$0xff]  ;;  %v16322_v58 = vmul.f32 %v15889_v11, %v8331_v2  ;;  %v8381_v40 = vmul.f32 %v15797_v21, %v8347_v39  ;;  %v12460_v2 = vld [vmem:[%s17439_s6 + $0x48] sm:$0xff]  }
 0x814   : > { %v5741_v7 = vpop.permute.xlu1 %5740  ;;  %5621 = vmatprep.mubr.bf16.mxu1 %v17554_v63  ;;  %v8330_v56 = vsel %vm1435_vm8, %v17637_v23, %v17636_v41  ;;  %v8346_v44 = vsel %vm1435_vm8, %v17636_v41, %v17637_v23  ;;  %v8437_v30 = vpack.c.bf16 %v8376_v37, %v8374_v52  ;;  %v8335_v52 = vsel %vm1435_vm8, %v15621_v1, %v15655_v29 }
 0x815   : > { %v5764_v28 = vsel %vm657_vm2, %v5709_v22, %v5741_v7  ;;  %v5780_v43 = vsel %vm657_vm2, %v5741_v7, %v5709_v22  ;;  %v5743_v12 = vpop.permute.xlu0 %5742  ;;  %v9377_v7 = vld [vmem:[%s17440_s7 + $0xf8] sm:$0xff]  ;;  %v8378_v39 = vmul.f32 %v15889_v11, %v8330_v56 }
 0x816   : > { %9530 = vperm.xlu1 %12276, %v9376_v18   ;;  %v5765_v3 = vsel %vm657_vm2, %v5711_v50, %v5743_v12  ;;  %v5781_v20 = vsel %vm657_vm2, %v5743_v12, %v5711_v50  ;;  %v5816_v41 = vmul.f32 %v15945_v53, %v5780_v43  ;;  %v5817_v23 = vmul.f32 %v15948_v42, %v5764_v28  ;;  %v17638_v50 = vld [vmem:[#allocation8_spill] sm:$0xff]  ;;  %v17639_v18 = vld [vmem:[#allocation25_spill] sm:$0xff] }
 0x817   : > { %v5818_v6 = vmul.f32 %v15945_v53, %v5781_v20  ;;  %v5819_v22 = vmul.f32 %v15948_v42, %v5765_v3  ;;  %9450 = vperm.xlu0 %12275, %v9360_v32   ;;  %v8379_v12 = vmul.f32 %v15797_v21, %v8346_v44  ;;  %v8348_v20 = vsel %vm1435_vm8, %v17639_v18, %v17638_v50  ;;  %v17640_v28 = vld [vmem:[#allocation28_spill] sm:$0xff]  ;;  %v17641_v3 = vld [vmem:[#allocation23_spill] sm:$0xff] }
 0x818   : > { %v8333_v32 = vsel %vm1435_vm8, %v17641_v3, %v17640_v28  ;;  %v8821_v43 = vpop.permute.xlu1 %8820  ;;  %8038 = vmatmul.mubr.bf16.vlgmr.msra.gmra.mrb[16].mxu0 %v12459_v34  ;;  %v8349_v56 = vsel %vm1435_vm8, %v17640_v28, %v17641_v3  ;;  %v8439_v25 = vpack.c.bf16 %v16322_v58, %v8378_v39  ;;  %v8332_v34 = vsel %vm1435_vm8, %v17638_v50, %v17639_v18 }
 0x819   : > { %v5873_v44 = vpack.c.bf16 %v5818_v6, %v5816_v41  ;;  %8548 = vmatpush1.bf16.msra.mxu0 %v8435_v5  ;;  %v8823_v26 = vpop.permute.xlu0 %8822  ;;  %v5874_v9 = vpack.c.bf16 %v5819_v22, %v5817_v23  ;;  %8047 = vmatprep.mubr.bf16.mxu0 %v17554_v63  ;;  %v8383_v16 = vmul.f32 %v15797_v21, %v8348_v20 }
 0x81a   : > { %8549 = vmatprep.subr.bf16.mxu0 %v8438_v61  ;;  %9535 = vperm.xlu1 %12276, %v9377_v7   ;;  %v8440_v6 = vpack.c.bf16 %v8381_v40, %v8379_v12  ;;  %v8384_v5 = vmul.f32 %v15889_v11, %v8333_v32  ;;  %v8385_v41 = vmul.f32 %v15797_v21, %v8349_v56  ;;  %v12461_v61 = vld [vmem:[%s17439_s6 + $0x308] sm:$0xff]   ;;  %v12462_v12 = vld [vmem:[%s17439_s6 + $0x50] sm:$0xff]  }
 0x81b   : > { %5622 = vmatmul.mubr.bf16.gmra.mrb[68].mxu1 %v12460_v2  ;;  %9455 = vperm.xlu0 %12275, %v9361_v48   ;;  %v8351_v48 = vsel %vm1435_vm8, %v15655_v29, %v15621_v1  ;;  %v8334_v23 = vsel %vm1435_vm8, %v15602_v15, %v15633_v38  ;;  %v8388_v50 = vmul.f32 %v15889_v11, %v8335_v52 }
 0x81c   : > { %v8853_v37 = vpop.permute.xlu1 %8852  ;;  %5985 = vmatprep.subr.bf16.mxu1 %v5874_v9  ;;  %5631 = vmatprep.mubr.bf16.mxu1 %v17554_v63  ;;  %v8389_v18 = vmul.f32 %v15797_v21, %v8351_v48  ;;  %v8353_v20 = vsel %vm1435_vm8, %v15788_v0, %v15750_v55 }
 0x81d   : > { %v8876_v58 = vsel %vm1595_vm9, %v8821_v43, %v8853_v37  ;;  %v8892_v40 = vsel %vm1595_vm9, %v8853_v37, %v8821_v43  ;;  %8550 = vmatpush1.bf16.msra.mxu0 %v8437_v30  ;;  %5986 = vmatpush1.bf16.msra.mxu1 %v5873_v44  ;;  %v8855_v9 = vpop.permute.xlu0 %8854  ;;  %v8350_v30 = vsel %vm1435_vm8, %v15633_v38, %v15602_v15 }
 0x81e   : > { %v16386_v22 = vmul.f32 %v15979_v14, %v8876_v58  ;;  %8551 = vmatprep.subr.bf16.mxu0 %v8440_v6  ;;  %v8877_v1 = vsel %vm1595_vm9, %v8823_v26, %v8855_v9  ;;  %v8893_v29 = vsel %vm1595_vm9, %v8855_v9, %v8823_v26  ;;  %v16397_v7 = vmul.f32 %v15985_v62, %v8892_v40 }
 0x81f   : > { %v16400_v2 = vmul.f32 %v15979_v14, %v8877_v1  ;;  %v16403_v39 = vmul.f32 %v15985_v62, %v8893_v29  ;;  %v8382_v26 = vmul.f32 %v15889_v11, %v8332_v34  ;;  %v8442_v38 = vpack.c.bf16 %v8385_v41, %v8383_v16 }
 0x820   : > { %v5713_v15 = vpop.permute.xlu1 %5712  ;;  %8048 = vmatmul.mubr.bf16.gmra.mrb[20].mxu0 %v12461_v61  ;;  %v8386_v43 = vmul.f32 %v15889_v11, %v8334_v23  ;;  %v8387_v56 = vmul.f32 %v15797_v21, %v8350_v30  ;;  %v8352_v16 = vsel %vm1435_vm8, %v15770_v35, %v15733_v17  ;;  %v8336_v6 = vsel %vm1435_vm8, %v15733_v17, %v15770_v35 }
 0x821   : > { %v8985_v28 = vpack.c.bf16 %v16400_v2, %v16386_v22  ;;  %8552 = vmatpush1.bf16.msra.mxu0 %v8439_v25  ;;  %v5715_v3 = vpop.permute.xlu0 %5714  ;;  %8057 = vmatprep.mubr.bf16.mxu0 %v17554_v63  ;;  %v8986_v32 = vpack.c.bf16 %v16403_v39, %v16397_v7  ;;  %v8441_v44 = vpack.c.bf16 %v8384_v5, %v8382_v26  ;;  %v12463_v5 = vld [vmem:[%s17439_s6 + $0x310] sm:$0xff]  }
 0x822   : > { %8553 = vmatprep.subr.bf16.mxu0 %v8442_v38  ;;  %v8337_v25 = vsel %vm1435_vm8, %v15750_v55, %v15788_v0  ;;  %v8443_v34 = vpack.c.bf16 %v8388_v50, %v8386_v43  ;;  %v8393_v41 = vmul.f32 %v15797_v21, %v8353_v20  ;;  %v8444_v37 = vpack.c.bf16 %v8389_v18, %v8387_v56 }
 0x823   : > { %5632 = vmatmul.mubr.bf16.gmra.mrb[72].mxu1 %v12462_v12  ;;  %v8391_v61 = vmul.f32 %v15797_v21, %v8352_v16  ;;  %v8355_v55 = vsel %vm1435_vm8, %v15857_v59, %v15844_v10  ;;  %v8392_v48 = vmul.f32 %v15889_v11, %v8337_v25  ;;  %v8354_v58 = vsel %vm1435_vm8, %v15849_v19, %v15837_v13  ;;  %v12464_v12 = vld [vmem:[%s17439_s6 + $0x58] sm:$0xff]  }
 0x824   : > { %v5745_v52 = vpop.permute.xlu1 %5744  ;;  %5641 = vmatprep.mubr.bf16.mxu1 %v17554_v63  ;;  %v8339_v26 = vsel %vm1435_vm8, %v15844_v10, %v15857_v59  ;;  %v8397_v50 = vmul.f32 %v15797_v21, %v8355_v55  ;;  %v8390_v38 = vmul.f32 %v15889_v11, %v8336_v6  ;;  %v8338_v56 = vsel %vm1435_vm8, %v15837_v13, %v15849_v19 }
 0x825   : > { %v5766_v17 = vsel %vm657_vm2, %v5713_v15, %v5745_v52  ;;  %v5782_v35 = vsel %vm657_vm2, %v5745_v52, %v5713_v15  ;;  %8554 = vmatpush1.bf16.msra.mxu0 %v8441_v44  ;;  %v5747_v0 = vpop.permute.xlu0 %5746  ;;  %v8446_v15 = vpack.c.bf16 %v8393_v41, %v8391_v61  ;;  %v8395_v10 = vmul.f32 %v15797_v21, %v8354_v58 }
 0x826   : > { %8555 = vmatprep.subr.bf16.mxu0 %v8444_v37  ;;  %v5767_v40 = vsel %vm657_vm2, %v5715_v3, %v5747_v0  ;;  %v5783_v9 = vsel %vm657_vm2, %v5747_v0, %v5715_v3  ;;  %v5820_v23 = vmul.f32 %v15945_v53, %v5782_v35  ;;  %v5821_v1 = vmul.f32 %v15948_v42, %v5766_v17  ;;  %v12466_v17 = vld [vmem:[%s17439_s6 + $0x60] sm:$0xff]  }
 0x827   : > { %v5822_v29 = vmul.f32 %v15945_v53, %v5783_v9  ;;  %v5823_v30 = vmul.f32 %v15948_v42, %v5767_v40  ;;  %v8445_v59 = vpack.c.bf16 %v8392_v48, %v8390_v38  ;;  %v8396_v16 = vmul.f32 %v15889_v11, %v8339_v26 }
 0x828   : > { %v8825_v18 = vpop.permute.xlu1 %8824  ;;  %8058 = vmatmul.mubr.bf16.gmra.mrb[24].mxu0 %v12463_v5  ;;  %v8448_v25 = vpack.c.bf16 %v8397_v50, %v8395_v10  ;;  %v8394_v6 = vmul.f32 %v15889_v11, %v8338_v56  ;;  %v17642_v40 = vpack.c.bf16 %v15927_v54, %v15921_v36  ;;  %v17644_v54 = vpack.c.bf16 %v16017_v33, %v16011_v46 }
 0x829   : > { %v5875_v20 = vpack.c.bf16 %v5822_v29, %v5820_v23  ;;  %8556 = vmatpush1.bf16.msra.mxu0 %v8443_v34  ;;  %v8827_v3 = vpop.permute.xlu0 %8826  ;;  %v5876_v43 = vpack.c.bf16 %v5823_v30, %v5821_v1  ;;  %8067 = vmatprep.mubr.bf16.mxu0 %v17554_v63  ;;  %v12465_v34 = vld [vmem:[%s17439_s6 + $0x318] sm:$0xff]   ;;  %v12467_v23 = vld [vmem:[%s17439_s6 + $0x320] sm:$0xff]   ;;  %v17643_v30 = vpack.c.bf16 %v15924_v51, %v15912_v24  ;;  %v12468_v51 = vld [vmem:[%s17439_s6 + $0x68] sm:$0xff]  }
 0x82a   : > { %8557 = vmatprep.subr.bf16.mxu0 %v8446_v15  ;;  %v8447_v5 = vpack.c.bf16 %v8396_v16, %v8394_v6 }
 0x82b   : > { %5642 = vmatmul.mubr.bf16.gmra.mrb[76].mxu1 %v12464_v12  ;;  %5987 = vmatprep.subr.bf16.mxu1 %v5876_v43  ;;  %v12469_v43 = vld [vmem:[%s17439_s6 + $0x328] sm:$0xff]  }
 0x82c   : > { %v8857_v44 = vpop.permute.xlu1 %8856  ;;  %5988 = vmatpush1.bf16.msra.mxu1 %v5875_v20  ;;  %5651 = vmatprep.mubr.bf16.mxu1 %v17554_v63 }
 0x82d   : > { %v8878_v21 = vsel %vm1595_vm9, %v8825_v18, %v8857_v44  ;;  %v8894_v13 = vsel %vm1595_vm9, %v8857_v44, %v8825_v18  ;;  %8558 = vmatpush1.bf16.msra.mxu0 %v8445_v59  ;;  %v8859_v19 = vpop.permute.xlu0 %8858 }
 0x82e   : > { %v16487_v41 = vmul.f32 %v15979_v14, %v8878_v21  ;;  %8559 = vmatprep.subr.bf16.mxu0 %v8448_v25  ;;  %v8879_v52 = vsel %vm1595_vm9, %v8827_v3, %v8859_v19  ;;  %v8895_v37 = vsel %vm1595_vm9, %v8859_v19, %v8827_v3  ;;  %v16494_v11 = vmul.f32 %v15985_v62, %v8894_v13  ;;  %v12470_v13 = vld [vmem:[%s17439_s6 + $0x70] sm:$0xff]  }
 0x82f   : > { %v16497_v61 = vmul.f32 %v15979_v14, %v8879_v52  ;;  %v16500_v55 = vmul.f32 %v15985_v62, %v8895_v37 }
 0x830   : > { %v5717_v35 = vpop.permute.xlu1 %5716  ;;  %8068 = vmatmul.mubr.bf16.gmra.mrb[28].mxu0 %v12465_v34 }
 0x831   : > { %v8987_v0 = vpack.c.bf16 %v16497_v61, %v16487_v41  ;;  %8560 = vmatpush1.bf16.msra.mxu0 %v8447_v5  ;;  %v5719_v48 = vpop.permute.xlu0 %5718  ;;  %8077 = vmatprep.mubr.bf16.mxu0 %v17554_v63  ;;  %v8988_v58 = vpack.c.bf16 %v16500_v55, %v16494_v11  ;;  %v12501_v41 = vld [vmem:[%s17439_s6 + $0x3a8] sm:$0xff]   ;;  %v12502_v11 = vld [vmem:[%s17439_s6 + $0x170] sm:$0xff]   ;;  %v12504_v55 = vld [vmem:[%s17439_s6 + $0x178] sm:$0xff]  }
 0x832   : > { %8561 = vmatprep.subr.bf16.mxu0 %v17642_v40  ;;  %v12472_v40 = vld [vmem:[%s17439_s6 + $0x78] sm:$0xff]   ;;  %v12503_v61 = vld [vmem:[%s17439_s6 + $0x3b0] sm:$0xff]  }
 0x833   : > { %5652 = vmatmul.mubr.bf16.gmra.mrb[80].mxu1 %v12466_v17 }
 0x834   : > { %v5749_v9 = vpop.permute.xlu1 %5748  ;;  %5661 = vmatprep.mubr.bf16.mxu1 %v17554_v63 }
 0x835   : > { %v5768_v1 = vsel %vm657_vm2, %v5717_v35, %v5749_v9  ;;  %v5784_v29 = vsel %vm657_vm2, %v5749_v9, %v5717_v35  ;;  %8562 = vmatpush1.bf16.msra.mxu0 %v17643_v30  ;;  %v5751_v36 = vpop.permute.xlu0 %5750  ;;  %v12471_v35 = vld [vmem:[%s17439_s6 + $0x330] sm:$0xff]  }
 0x836   : > { %9089 = vmatprep.subr.bf16.mxu0 %v17644_v54  ;;  %v5769_v12 = vsel %vm657_vm2, %v5719_v48, %v5751_v36  ;;  %v5785_v26 = vsel %vm657_vm2, %v5751_v36, %v5719_v48  ;;  %v5824_v50 = vmul.f32 %v15945_v53, %v5784_v29  ;;  %v5825_v18 = vmul.f32 %v15948_v42, %v5768_v1 }
 0x837   : > { %v5826_v15 = vmul.f32 %v15945_v53, %v5785_v26  ;;  %v5827_v24 = vmul.f32 %v15948_v42, %v5769_v12 }
 0x838   : > { %v8829_v46 = vpop.permute.xlu1 %8828  ;;  %8078 = vmatmul.mubr.bf16.gmra.mrb[32].mxu0 %v12467_v23 }
 0x839   : > { %v5877_v33 = vpack.c.bf16 %v5826_v15, %v5824_v50  ;;  %v8831_v38 = vpop.permute.xlu0 %8830  ;;  %v5878_v20 = vpack.c.bf16 %v5827_v24, %v5825_v18  ;;  %8087 = vmatprep.mubr.bf16.mxu0 %v17554_v63  ;;  %v12473_v15 = vld [vmem:[%s17439_s6 + $0x338] sm:$0xff]  }
 0x83b   : > { %5662 = vmatmul.mubr.bf16.gmra.mrb[84].mxu1 %v12468_v51  ;;  %5989 = vmatprep.subr.bf16.mxu1 %v5878_v20  ;;  %v12474_v20 = vld [vmem:[%s17439_s6 + $0x100] sm:$0xff]  }
 0x83c   : > { %v8861_v3 = vpop.permute.xlu1 %8860  ;;  %5990 = vmatpush1.bf16.msra.mxu1 %v5877_v33  ;;  %5671 = vmatprep.mubr.bf16.mxu1 %v17554_v63 }
 0x83d   : > { %v8880_v56 = vsel %vm1595_vm9, %v8829_v46, %v8861_v3  ;;  %v8896_v10 = vsel %vm1595_vm9, %v8861_v3, %v8829_v46  ;;  %v8863_v59 = vpop.permute.xlu0 %8862 }
 0x83e   : > { %v16548_v16 = vmul.f32 %v15979_v14, %v8880_v56  ;;  %v8881_v44 = vsel %vm1595_vm9, %v8831_v38, %v8863_v59  ;;  %v8897_v25 = vsel %vm1595_vm9, %v8863_v59, %v8831_v38  ;;  %v16555_v34 = vmul.f32 %v15985_v62, %v8896_v10  ;;  %v12477_v56 = vld [vmem:[%s17439_s6 + $0x348] sm:$0xff]   ;;  %v12478_v10 = vld [vmem:[%s17439_s6 + $0x110] sm:$0xff]  }
 0x83f   : > { %v16558_v6 = vmul.f32 %v15979_v14, %v8881_v44  ;;  %v16561_v21 = vmul.f32 %v15985_v62, %v8897_v25  ;;  %v12479_v59 = vld [vmem:[%s17439_s6 + $0x350] sm:$0xff]   ;;  %v12480_v44 = vld [vmem:[%s17439_s6 + $0x118] sm:$0xff]  }
 0x840   : > { %v5721_v19 = vpop.permute.xlu1 %5720  ;;  %8088 = vmatmul.mubr.bf16.gmra.mrb[36].mxu0 %v12469_v43  ;;  %v12475_v43 = vld [vmem:[%s17439_s6 + $0x340] sm:$0xff]   ;;  %v12481_v25 = vld [vmem:[%s17439_s6 + $0x358] sm:$0xff]  }
 0x841   : > { %v8989_v52 = vpack.c.bf16 %v16558_v6, %v16548_v16  ;;  %v5723_v37 = vpop.permute.xlu0 %5722  ;;  %8097 = vmatprep.mubr.bf16.mxu0 %v17554_v63  ;;  %v8990_v5 = vpack.c.bf16 %v16561_v21, %v16555_v34  ;;  %v12507_v16 = vld [vmem:[%s17439_s6 + $0x3c8] sm:$0xff]   ;;  %v12508_v34 = vld [vmem:[%s17439_s6 + $0x3d0] sm:$0xff]   ;;  %v12509_v6 = vld [vmem:[%s17439_s6 + $0x3d8] sm:$0xff]  }
 0x842   : > { %v12510_v21 = vld [vmem:[%s17439_s6 + $0x3e0] sm:$0xff]  }
 0x843   : > { %5672 = vmatmul.mubr.bf16.gmra.mrb[88].mxu1 %v12470_v13  ;;  %v12482_v13 = vld [vmem:[%s17439_s6 + $0x120] sm:$0xff]  }
 0x844   : > { %v5753_v17 = vpop.permute.xlu1 %5752  ;;  %5681 = vmatprep.mubr.bf16.mxu1 %v17554_v63 }
 0x845   : > { %v16575_v48 = vpop.permute.xlu0 %8834  ;;  %v5770_v9 = vsel %vm657_vm2, %v5721_v19, %v5753_v17  ;;  %v5786_v23 = vsel %vm657_vm2, %v5753_v17, %v5721_v19  ;;  %v12483_v19 = vld [vmem:[%s17439_s6 + $0x360] sm:$0xff]   ;;  %v12485_v17 = vld [vmem:[%s17439_s6 + $0x368] sm:$0xff]  }
 0x846   : > { %v5828_v54 = vmul.f32 %v15945_v53, %v5786_v23  ;;  %v5829_v12 = vmul.f32 %v15948_v42, %v5770_v9  ;;  %v12488_v9 = vld [vmem:[%s17439_s6 + $0x138] sm:$0xff]  }
 0x847   : > { %v12489_v23 = vld [vmem:[%s17439_s6 + $0x378] sm:$0xff]  }
 0x848   : > { %v16584_v1 = vpop.permute.xlu1 %8832  ;;  %8098 = vmatmul.mubr.bf16.gmra.mrb[40].mxu0 %v12471_v35  ;;  %v12486_v35 = vld [vmem:[%s17439_s6 + $0x130] sm:$0xff]  }
 0x849   : > { %v5755_v29 = vpop.permute.xlu0 %5754  ;;  %8107 = vmatprep.mubr.bf16.mxu0 %v17554_v63 }
 0x84a   : > { %v5771_v30 = vsel %vm657_vm2, %v5723_v37, %v5755_v29  ;;  %v5787_v36 = vsel %vm657_vm2, %v5755_v29, %v5723_v37  ;;  %v12484_v37 = vld [vmem:[%s17439_s6 + $0x128] sm:$0xff]   ;;  %v12490_v29 = vld [vmem:[%s17439_s6 + $0x140] sm:$0xff]  }
 0x84b   : > { %v5830_v26 = vmul.f32 %v15945_v53, %v5787_v36  ;;  %v5831_v50 = vmul.f32 %v15948_v42, %v5771_v30  ;;  %5682 = vmatmul.mubr.bf16.gmra.mrb[92].mxu1 %v12472_v40  ;;  %v12487_v40 = vld [vmem:[%s17439_s6 + $0x370] sm:$0xff]   ;;  %v12491_v30 = vld [vmem:[%s17439_s6 + $0x380] sm:$0xff]   ;;  %v12492_v36 = vld [vmem:[%s17439_s6 + $0x148] sm:$0xff]  }
 0x84c   : > { %v16595_v18 = vpop.permute.xlu1 %8864  ;;  %6009 = vmatprep.mubr.bf16.mxu1 %v17554_v63 }
 0x84d   : > { %v5879_v24 = vpack.c.bf16 %v5830_v26, %v5828_v54  ;;  %v8882_v51 = vsel %vm1595_vm9, %v16584_v1, %v16595_v18  ;;  %v16605_v46 = vpop.permute.xlu0 %8866  ;;  %v5880_v53 = vpack.c.bf16 %v5831_v50, %v5829_v12  ;;  %v17645_v54 = vpack.c.bf16 %v16014_v49, %v16004_v60  ;;  %v12493_v26 = vld [vmem:[%s17439_s6 + $0x388] sm:$0xff]   ;;  %v12494_v49 = vld [vmem:[%s17439_s6 + $0x150] sm:$0xff]  }
 0x84e   : > { %v8883_v42 = vsel %vm1595_vm9, %v16575_v48, %v16605_v46  ;;  %v16612_v33 = vmul.f32 %v15979_v14, %v8882_v51  ;;  %v17646_v12 = vpack.c.bf16 %v16093_v27, %v16087_v31  ;;  %v17647_v50 = vpack.c.bf16 %v16090_v45, %v16080_v57  ;;  %v17649_v31 = vld [vmem:[#allocation27_spill] sm:$0xff]  ;;  %v17650_v27 = vld [vmem:[#allocation30_spill] sm:$0xff]  ;;  %v17655_v45 = vld [vmem:[#allocation33_spill] sm:$0xff] }
 0x84f   : > { %v16615_v38 = vmul.f32 %v15979_v14, %v8883_v42  ;;  %5991 = vmatprep.subr.bf16.mxu1 %v5880_v53  ;;  %v12476_v14 = vld [vmem:[%s17439_s6 + $0x108] sm:$0xff]   ;;  %v17648_v60 = vpack.c.bf16 %v16169_v47, %v16163_v8  ;;  %v17653_v51 = vld [vmem:[#allocation31_spill] sm:$0xff]  ;;  %v12495_v57 = vld [vmem:[%s17439_s6 + $0x390] sm:$0xff]   ;;  %v8898_v7 = vsel %vm1595_vm9, %v16595_v18, %v16584_v1 }
 0x850   : > { %8108 = vmatmul.mubr.bf16.gmra.mrb[44].mxu0 %v12473_v15  ;;  %5992 = vmatpush1.bf16.msra.mxu1 %v5879_v24  ;;  %v17651_v15 = vpack.c.bf16 %v17649_v31, %v17650_v27  ;;  %v17652_v24 = vld [vmem:[#allocation35_spill] sm:$0xff]  ;;  %v17656_v8 = vld [vmem:[#allocation29_spill] sm:$0xff]  ;;  %v8941_v22 = vmul.f32 %v15985_v62, %v8898_v7  ;;  %v12514_v1 = vld [vmem:[%s17439_s6 + $0x400] sm:$0xff]  }
 0x851   : > { %v8991_v3 = vpack.c.bf16 %v16615_v38, %v16612_v33  ;;  %8117 = vmatprep.mubr.bf16.mxu0 %v17554_v63  ;;  %v17654_v53 = vpack.c.bf16 %v17652_v24, %v17653_v51  ;;  %v17657_v47 = vpack.c.bf16 %v17655_v45, %v17656_v8  ;;  %v12496_v42 = vld [vmem:[%s17439_s6 + $0x158] sm:$0xff]   ;;  %v12515_v18 = vld [vmem:[%s17439_s6 + $0x408] sm:$0xff]   ;;  %v12524_v7 = vld [vmem:[%s17439_s6 + $0x450] sm:$0xff]  }
 0x852   : > { %v12523_v45 = vld [vmem:[%s17439_s6 + $0x448] sm:$0xff]  }
 0x853   : > { %6010 = vmatmul.mubr.bf16.vlgmr.msra.gmra.mrb[32].mxu1 %v12474_v20  ;;  %v8899_v20 = vsel %vm1595_vm9, %v16605_v46, %v16575_v48  ;;  %v12513_v48 = vld [vmem:[%s17439_s6 + $0x3f8] sm:$0xff]   ;;  %v12516_v46 = vld [vmem:[%s17439_s6 + $0x410] sm:$0xff]  }
 0x854   : > { %6019 = vmatprep.mubr.bf16.mxu1 %v17554_v63  ;;  %v8943_v39 = vmul.f32 %v15985_v62, %v8899_v20  ;;  %v12499_v62 = vld [vmem:[%s17439_s6 + $0x3a0] sm:$0xff]  }
 0x856   : > { %v8992_v2 = vpack.c.bf16 %v8943_v39, %v8941_v22 }
 0x858   : > { %8118 = vmatmul.mubr.bf16.gmra.mrb[48].mxu0 %v12475_v43 }
 0x859   : > { %8127 = vmatprep.mubr.bf16.mxu0 %v17554_v63 }
 0x85b   : > { %6020 = vmatmul.mubr.bf16.gmra.mrb[36].mxu1 %v12476_v14  ;;  %v12517_v14 = vld [vmem:[%s17439_s6 + $0x418] sm:$0xff]  }
 0x85c   : > { %6029 = vmatprep.mubr.bf16.mxu1 %v17554_v63 }
 0x860   : > { %8128 = vmatmul.mubr.bf16.gmra.mrb[52].mxu0 %v12477_v56 }
 0x861   : > { %8137 = vmatprep.mubr.bf16.mxu0 %v17554_v63 }
 0x863   : > { %6030 = vmatmul.mubr.bf16.gmra.mrb[40].mxu1 %v12478_v10 }
 0x864   : > { %6039 = vmatprep.mubr.bf16.mxu1 %v17554_v63 }
 0x868   : > { %8138 = vmatmul.mubr.bf16.gmra.mrb[56].mxu0 %v12479_v59 }
 0x869   : > { %8147 = vmatprep.mubr.bf16.mxu0 %v17554_v63 }
 0x86b   : > { %6040 = vmatmul.mubr.bf16.gmra.mrb[44].mxu1 %v12480_v44 }
 0x86c   : > { %6049 = vmatprep.mubr.bf16.mxu1 %v17554_v63 }
 0x870   : > { %8148 = vmatmul.mubr.bf16.gmra.mrb[60].mxu0 %v12481_v25  ;;  %v12518_v25 = vld [vmem:[%s17439_s6 + $0x420] sm:$0xff]  }
 0x871   : > { %8157 = vmatprep.mubr.bf16.mxu0 %v17554_v63 }
 0x873   : > { %6050 = vmatmul.mubr.bf16.gmra.mrb[48].mxu1 %v12482_v13 }
 0x874   : > { %6059 = vmatprep.mubr.bf16.mxu1 %v17554_v63 }
 0x878   : > { %8158 = vmatmul.mubr.bf16.gmra.mrb[64].mxu0 %v12483_v19 }
 0x879   : > { %8167 = vmatprep.mubr.bf16.mxu0 %v17554_v63 }
 0x87b   : > { %6060 = vmatmul.mubr.bf16.gmra.mrb[52].mxu1 %v12484_v37 }
 0x87c   : > { %6069 = vmatprep.mubr.bf16.mxu1 %v17554_v63 }
 0x880   : > { %8168 = vmatmul.mubr.bf16.gmra.mrb[68].mxu0 %v12485_v17 }
 0x881   : > { %8177 = vmatprep.mubr.bf16.mxu0 %v17554_v63 }
 0x883   : > { %6070 = vmatmul.mubr.bf16.gmra.mrb[56].mxu1 %v12486_v35  ;;  %v12519_v35 = vld [vmem:[%s17439_s6 + $0x428] sm:$0xff]  }
 0x884   : > { %6079 = vmatprep.mubr.bf16.mxu1 %v17554_v63 }
 0x888   : > { %8178 = vmatmul.mubr.bf16.gmra.mrb[72].mxu0 %v12487_v40 }
 0x889   : > { %8187 = vmatprep.mubr.bf16.mxu0 %v17554_v63 }
 0x88b   : > { %6080 = vmatmul.mubr.bf16.gmra.mrb[60].mxu1 %v12488_v9 }
 0x88c   : > { %6089 = vmatprep.mubr.bf16.mxu1 %v17554_v63 }
 0x890   : > { %8188 = vmatmul.mubr.bf16.gmra.mrb[76].mxu0 %v12489_v23 }
 0x891   : > { %8579 = vmatprep.mubr.bf16.mxu0 %v17554_v63 }
 0x893   : > { %6090 = vmatmul.mubr.bf16.gmra.mrb[64].mxu1 %v12490_v29 }
 0x894   : > { %6099 = vmatprep.mubr.bf16.mxu1 %v17554_v63 }
 0x898   : > { %8580 = vmatmul.mubr.bf16.vlgmr.msra.gmra.mrb[16].mxu0 %v12491_v30  ;;  %v12520_v30 = vld [vmem:[%s17439_s6 + $0x430] sm:$0xff]  }
 0x899   : > { %9090 = vmatpush1.bf16.msra.mxu0 %v17645_v54  ;;  %8589 = vmatprep.mubr.bf16.mxu0 %v17554_v63 }
 0x89a   : > { %9091 = vmatprep.subr.bf16.mxu0 %v17646_v12 }
 0x89b   : > { %6100 = vmatmul.mubr.bf16.gmra.mrb[68].mxu1 %v12492_v36 }
 0x89c   : > { %6109 = vmatprep.mubr.bf16.mxu1 %v17554_v63 }
 0x89d   : > { %9092 = vmatpush1.bf16.msra.mxu0 %v17647_v50  ;;  %v12521_v50 = vld [vmem:[%s17439_s6 + $0x438] sm:$0xff]  }
 0x89e   : > { %9093 = vmatprep.subr.bf16.mxu0 %v17648_v60 }
 0x8a0   : > { %8590 = vmatmul.mubr.bf16.gmra.mrb[20].mxu0 %v12493_v26 }
 0x8a1   : > { %9094 = vmatpush1.bf16.msra.mxu0 %v17651_v15  ;;  %8599 = vmatprep.mubr.bf16.mxu0 %v17554_v63  ;;  %v12522_v15 = vld [vmem:[%s17439_s6 + $0x440] sm:$0xff]  }
 0x8a2   : > { %9095 = vmatprep.subr.bf16.mxu0 %v17654_v53 }
 0x8a3   : > { %6110 = vmatmul.mubr.bf16.gmra.mrb[72].mxu1 %v12494_v49 }
 0x8a4   : > { %6119 = vmatprep.mubr.bf16.mxu1 %v17554_v63 }
 0x8a5   : > { %9096 = vmatpush1.bf16.msra.mxu0 %v17657_v47 }
 0x8a6   : > { %9097 = vmatprep.subr.bf16.mxu0 %v8986_v32  ;;  %v12497_v32 = vld [vmem:[%s17439_s6 + $0x398] sm:$0xff]  }
 0x8a8   : > { %8600 = vmatmul.mubr.bf16.gmra.mrb[24].mxu0 %v12495_v57 }
 0x8a9   : > { %9098 = vmatpush1.bf16.msra.mxu0 %v8985_v28  ;;  %8609 = vmatprep.mubr.bf16.mxu0 %v17554_v63  ;;  %v12500_v28 = vld [vmem:[%s17439_s6 + $0x168] sm:$0xff]  }
 0x8aa   : > { %9099 = vmatprep.subr.bf16.mxu0 %v8988_v58  ;;  %v12506_v58 = vld [vmem:[%s17439_s6 + $0x3c0] sm:$0xff]  }
 0x8ab   : > { %6120 = vmatmul.mubr.bf16.gmra.mrb[76].mxu1 %v12496_v42 }
 0x8ac   : > { %6129 = vmatprep.mubr.bf16.mxu1 %v17554_v63 }
 0x8ad   : > { %9100 = vmatpush1.bf16.msra.mxu0 %v8987_v0  ;;  %v12505_v0 = vld [vmem:[%s17439_s6 + $0x3b8] sm:$0xff]  }
 0x8ae   : > { %9101 = vmatprep.subr.bf16.mxu0 %v8990_v5  ;;  %v12512_v5 = vld [vmem:[%s17439_s6 + $0x3f0] sm:$0xff]  }
 0x8b0   : > { %8610 = vmatmul.mubr.bf16.gmra.mrb[28].mxu0 %v12497_v32 }
 0x8b1   : > { %9102 = vmatpush1.bf16.msra.mxu0 %v8989_v52  ;;  %8619 = vmatprep.mubr.bf16.mxu0 %v17554_v63  ;;  %v12511_v52 = vld [vmem:[%s17439_s6 + $0x3e8] sm:$0xff]  }
 0x8b2   : > { %9103 = vmatprep.subr.bf16.mxu0 %v8992_v2  ;;  %v12525_v2 = vld [vmem:[%s17439_s6 + $0x458] sm:$0xff]  }
 0x8b3   : > { %6130 = vmatmul.mubr.bf16.gmra.mrb[80].mxu1 %v12498_v4 }
 0x8b4   : > { %6139 = vmatprep.mubr.bf16.mxu1 %v17554_v63 }
 0x8b5   : > { %9104 = vmatpush1.bf16.msra.mxu0 %v8991_v3 }
 0x8b8   : > { %8620 = vmatmul.mubr.bf16.gmra.mrb[32].mxu0 %v12499_v62 }
 0x8b9   : > { %8629 = vmatprep.mubr.bf16.mxu0 %v17554_v63 }
 0x8bb   : > { %6140 = vmatmul.mubr.bf16.gmra.mrb[84].mxu1 %v12500_v28 }
 0x8bc   : > { %6149 = vmatprep.mubr.bf16.mxu1 %v17554_v63 }
 0x8c0   : > { %8630 = vmatmul.mubr.bf16.gmra.mrb[36].mxu0 %v12501_v41 }
 0x8c1   : > { %8639 = vmatprep.mubr.bf16.mxu0 %v17554_v63 }
 0x8c3   : > { %6150 = vmatmul.mubr.bf16.gmra.mrb[88].mxu1 %v12502_v11 }
 0x8c4   : > { %6159 = vmatprep.mubr.bf16.mxu1 %v17554_v63 }
 0x8c8   : > { %8640 = vmatmul.mubr.bf16.gmra.mrb[40].mxu0 %v12503_v61  ;;  %v12526_v61 = vld [vmem:[%s17439_s6 + $0x460] sm:$0xff]  }
 0x8c9   : > { %8649 = vmatprep.mubr.bf16.mxu0 %v17554_v63 }
 0x8cb   : > { %6160 = vmatmul.mubr.bf16.gmra.mrb[92].mxu1 %v12504_v55 }
 0x8d0   : > { %8650 = vmatmul.mubr.bf16.gmra.mrb[44].mxu0 %v12505_v0 }
 0x8d1   : > { %8659 = vmatprep.mubr.bf16.mxu0 %v17554_v63 }
 0x8d8   : > { %8660 = vmatmul.mubr.bf16.gmra.mrb[48].mxu0 %v12506_v58 }
 0x8d9   : > { %8669 = vmatprep.mubr.bf16.mxu0 %v17554_v63 }
 0x8e0   : > { %8670 = vmatmul.mubr.bf16.gmra.mrb[52].mxu0 %v12507_v16 }
 0x8e1   : > { %8679 = vmatprep.mubr.bf16.mxu0 %v17554_v63 }
 0x8e8   : > { %8680 = vmatmul.mubr.bf16.gmra.mrb[56].mxu0 %v12508_v34  ;;  %v12527_v34 = vld [vmem:[%s17439_s6 + $0x468] sm:$0xff]  }
 0x8e9   : > { %8689 = vmatprep.mubr.bf16.mxu0 %v17554_v63 }
 0x8f0   : > { %8690 = vmatmul.mubr.bf16.gmra.mrb[60].mxu0 %v12509_v6 }
 0x8f1   : > { %8699 = vmatprep.mubr.bf16.mxu0 %v17554_v63 }
 0x8f8   : > { %8700 = vmatmul.mubr.bf16.gmra.mrb[64].mxu0 %v12510_v21 }
 0x8f9   : > { %8709 = vmatprep.mubr.bf16.mxu0 %v17554_v63 }
 0x900   : > { %8710 = vmatmul.mubr.bf16.gmra.mrb[68].mxu0 %v12511_v52 }
 0x901   : > { %8719 = vmatprep.mubr.bf16.mxu0 %v17554_v63 }
 0x908   : > { %8720 = vmatmul.mubr.bf16.gmra.mrb[72].mxu0 %v12512_v5 }
 0x909   : > { %8729 = vmatprep.mubr.bf16.mxu0 %v17554_v63 }
 0x910   : > { %8730 = vmatmul.mubr.bf16.gmra.mrb[76].mxu0 %v12513_v48  ;;  %v12528_v48 = vld [vmem:[%s17439_s6 + $0x470] sm:$0xff]  }
 0x911   : > { %9121 = vmatprep.mubr.bf16.mxu0 %v17554_v63 }
 0x918   : > { %9122 = vmatmul.mubr.bf16.vlgmr.msra.gmra.mrb[16].mxu0 %v12514_v1 }
 0x919   : > { %9131 = vmatprep.mubr.bf16.mxu0 %v17554_v63 }
 0x920   : > { %9132 = vmatmul.mubr.bf16.gmra.mrb[20].mxu0 %v12515_v18 }
 0x921   : > { %9141 = vmatprep.mubr.bf16.mxu0 %v17554_v63 }
 0x926   : > { %v16842_v33 = vpop.f32.mrb[32].mxu1 }
 0x927   : > { %v16844_v38 = vpop.f32.mrb[33].mxu1 }
 0x928   : > { %9142 = vmatmul.mubr.bf16.gmra.mrb[24].mxu0 %v12516_v46  ;;  %v16846_v3 = vpop.f32.mrb[34].mxu1 }
 0x929   : > { %v16848_v43 = vpop.f32.mrb[35].mxu1  ;;  %9151 = vmatprep.mubr.bf16.mxu0 %v17554_v63 }
 0x92e   : > { %v16854_v56 = vpop.f32.mrb[36].mxu1 }
 0x92f   : > { %v16856_v10 = vpop.f32.mrb[37].mxu1 }
 0x930   : > { %9152 = vmatmul.mubr.bf16.gmra.mrb[28].mxu0 %v12517_v14  ;;  %v16858_v59 = vpop.f32.mrb[38].mxu1 }
 0x931   : > { %v16860_v44 = vpop.f32.mrb[39].mxu1  ;;  %9161 = vmatprep.mubr.bf16.mxu0 %v17554_v63 }
 0x936   : > { %v16866_v13 = vpop.f32.mrb[40].mxu1 }
 0x937   : > { %v16868_v19 = vpop.f32.mrb[41].mxu1 }
 0x938   : > { %9162 = vmatmul.mubr.bf16.gmra.mrb[32].mxu0 %v12518_v25  ;;  %v16870_v37 = vpop.f32.mrb[42].mxu1  ;;  %v12529_v25 = vld [vmem:[%s17439_s6 + $0x478] sm:$0xff]  }
 0x939   : > { %v16872_v17 = vpop.f32.mrb[43].mxu1  ;;  %9171 = vmatprep.mubr.bf16.mxu0 %v17554_v63 }
 0x93e   : > { %v16878_v40 = vpop.f32.mrb[44].mxu1 }
 0x93f   : > { %v16880_v9 = vpop.f32.mrb[45].mxu1 }
 0x940   : > { %9172 = vmatmul.mubr.bf16.gmra.mrb[36].mxu0 %v12519_v35  ;;  %v16882_v23 = vpop.f32.mrb[46].mxu1 }
 0x941   : > { %v16884_v29 = vpop.f32.mrb[47].mxu1  ;;  %9181 = vmatprep.mubr.bf16.mxu0 %v17554_v63 }
 0x946   : > { %v16890_v36 = vpop.f32.mrb[48].mxu1 }
 0x947   : > { %v16892_v54 = vpop.f32.mrb[49].mxu1 }
 0x948   : > { %9182 = vmatmul.mubr.bf16.gmra.mrb[40].mxu0 %v12520_v30  ;;  %v16894_v12 = vpop.f32.mrb[50].mxu1 }
 0x949   : > { %v16896_v26 = vpop.f32.mrb[51].mxu1  ;;  %9191 = vmatprep.mubr.bf16.mxu0 %v17554_v63 }
 0x94e   : > { %v16902_v60 = vpop.f32.mrb[52].mxu1 }
 0x94f   : > { %v16904_v49 = vpop.f32.mrb[53].mxu1 }
 0x950   : > { %9192 = vmatmul.mubr.bf16.gmra.mrb[44].mxu0 %v12521_v50  ;;  %v16906_v31 = vpop.f32.mrb[54].mxu1 }
 0x951   : > { %v16908_v27 = vpop.f32.mrb[55].mxu1  ;;  %9201 = vmatprep.mubr.bf16.mxu0 %v17554_v63 }
 0x956   : > { %v16914_v24 = vpop.f32.mrb[56].mxu1 }
 0x957   : > { %v16916_v51 = vpop.f32.mrb[57].mxu1 }
 0x958   : > { %9202 = vmatmul.mubr.bf16.gmra.mrb[48].mxu0 %v12522_v15  ;;  %v16918_v53 = vpop.f32.mrb[58].mxu1 }
 0x959   : > { %v16920_v57 = vpop.f32.mrb[59].mxu1  ;;  %9211 = vmatprep.mubr.bf16.mxu0 %v17554_v63 }
 0x95e   : > { %v16926_v8 = vpop.f32.mrb[60].mxu1 }
 0x95f   : > { %v16928_v47 = vpop.f32.mrb[61].mxu1 }
 0x960   : > { %9212 = vmatmul.mubr.bf16.gmra.mrb[52].mxu0 %v12523_v45  ;;  %v16930_v42 = vpop.f32.mrb[62].mxu1 }
 0x961   : > { %v16932_v20 = vpop.f32.mrb[63].mxu1  ;;  %9221 = vmatprep.mubr.bf16.mxu0 %v17554_v63 }
 0x966   : > { %v16938_v39 = vpop.f32.mrb[64].mxu1 }
 0x967   : > { %v16940_v32 = vpop.f32.mrb[65].mxu1 }
 0x968   : > { %9222 = vmatmul.mubr.bf16.gmra.mrb[56].mxu0 %v12524_v7  ;;  %v16942_v22 = vpop.f32.mrb[66].mxu1 }
 0x969   : > { %v16944_v4 = vpop.f32.mrb[67].mxu1  ;;  %9231 = vmatprep.mubr.bf16.mxu0 %v17554_v63 }
 0x96e   : > { %v16950_v62 = vpop.f32.mrb[68].mxu1 }
 0x96f   : > { %v16952_v28 = vpop.f32.mrb[69].mxu1 }
 0x970   : > { %9232 = vmatmul.mubr.bf16.gmra.mrb[60].mxu0 %v12525_v2  ;;  %v16954_v41 = vpop.f32.mrb[70].mxu1 }
 0x971   : > { %v16956_v11 = vpop.f32.mrb[71].mxu1  ;;  %9241 = vmatprep.mubr.bf16.mxu0 %v17554_v63 }
 0x976   : > { %v16962_v55 = vpop.f32.mrb[72].mxu1 }
 0x977   : > { %v16964_v0 = vpop.f32.mrb[73].mxu1 }
 0x978   : > { %9242 = vmatmul.mubr.bf16.gmra.mrb[64].mxu0 %v12526_v61  ;;  %v16966_v58 = vpop.f32.mrb[74].mxu1 }
 0x979   : > { %v16968_v16 = vpop.f32.mrb[75].mxu1  ;;  %9251 = vmatprep.mubr.bf16.mxu0 %v17554_v63 }
 0x97e   : > { %v16974_v6 = vpop.f32.mrb[76].mxu1 }
 0x97f   : > { %v16976_v21 = vpop.f32.mrb[77].mxu1 }
 0x980   : > { %9252 = vmatmul.mubr.bf16.gmra.mrb[68].mxu0 %v12527_v34  ;;  %v16978_v52 = vpop.f32.mrb[78].mxu1 }
 0x981   : > { %17658 = vst [vmem:[#allocation32_spill] sm:$0xff] %v16978_v52  ;;  %v16980_v5 = vpop.f32.mrb[79].mxu1  ;;  %9261 = vmatprep.mubr.bf16.mxu0 %v17554_v63 }
 0x982   : > { %17659 = vst [vmem:[#allocation34_spill] sm:$0xff] %v16980_v5 }
 0x986   : > { %v16986_v1 = vpop.f32.mrb[80].mxu1 }
 0x987   : > { %17660 = vst [vmem:[#allocation37_spill] sm:$0xff] %v16986_v1  ;;  %v16988_v18 = vpop.f32.mrb[81].mxu1 }
 0x988   : > { %17661 = vst [vmem:[#allocation39_spill] sm:$0xff] %v16988_v18  ;;  %9262 = vmatmul.mubr.bf16.gmra.mrb[72].mxu0 %v12528_v48  ;;  %v16990_v46 = vpop.f32.mrb[82].mxu1 }
 0x989   : > { %17662 = vst [vmem:[#allocation36_spill] sm:$0xff] %v16990_v46  ;;  %v16992_v14 = vpop.f32.mrb[83].mxu1  ;;  %9271 = vmatprep.mubr.bf16.mxu0 %v17554_v63 }
 0x98a   : > { %17663 = vst [vmem:[#allocation38_spill] sm:$0xff] %v16992_v14 }
 0x98e   : > { %v16998_v35 = vpop.f32.mrb[84].mxu1 }
 0x98f   : > { %17664 = vst [vmem:[#allocation40_spill] sm:$0xff] %v16998_v35  ;;  %v17000_v30 = vpop.f32.mrb[85].mxu1 }
 0x990   : > { %17665 = vst [vmem:[#allocation41_spill] sm:$0xff] %v17000_v30  ;;  %9272 = vmatmul.mubr.bf16.gmra.mrb[76].mxu0 %v12529_v25  ;;  %v17002_v50 = vpop.f32.mrb[86].mxu1  ;;  %v17022_v25 = vpop.permute.xlu0 %9380 }
 0x991   : > { %17666 = vst [vmem:[#allocation21_spill] sm:$0xff] %v17002_v50  ;;  %v17004_v15 = vpop.f32.mrb[87].mxu1 }
 0x992   : > { %17667 = vst [vmem:[#allocation9_spill] sm:$0xff] %v17004_v15 }
 0x994   : > { %v17024_v50 = vpop.permute.xlu0 %9385 }
 0x996   : > { %v17006_v45 = vpop.f32.mrb[88].mxu1 }
 0x997   : > { %17668 = vst [vmem:[#allocation22_spill] sm:$0xff] %v17006_v45  ;;  %v17008_v7 = vpop.f32.mrb[89].mxu1 }
 0x998   : > { %17669 = vst [vmem:[#allocation10_spill] sm:$0xff] %v17008_v7  ;;  %v17010_v2 = vpop.f32.mrb[90].mxu1  ;;  %v17026_v15 = vpop.permute.xlu0 %9390 }
 0x999   : > { %17670 = vst [vmem:[#allocation11_spill] sm:$0xff] %v17010_v2  ;;  %v17012_v63 = vpop.f32.mrb[91].mxu1 }
 0x99a   : > { %17671 = vst [vmem:[#allocation12_spill] sm:$0xff] %v17012_v63 }
 0x99c   : > { %v17028_v45 = vpop.permute.xlu0 %9395 }
 0x99e   : > { %v17014_v61 = vpop.f32.mrb[92].mxu1 }
 0x99f   : > { %17672 = vst [vmem:[#allocation13_spill] sm:$0xff] %v17014_v61  ;;  %v17016_v34 = vpop.f32.mrb[93].mxu1 }
 0x9a0   : > { %17673 = vst [vmem:[#allocation14_spill] sm:$0xff] %v17016_v34  ;;  %v17018_v48 = vpop.f32.mrb[94].mxu1  ;;  %v17030_v7 = vpop.permute.xlu0 %9400 }
 0x9a1   : > { %17674 = vst [vmem:[#allocation15_spill] sm:$0xff] %v17018_v48  ;;  %v17020_v30 = vpop.f32.mrb[95].mxu1 }
 0x9a2   : > { %17675 = vst [vmem:[#allocation16_spill] sm:$0xff] %v17020_v30 }
 0x9a4   : > { %v17032_v2 = vpop.permute.xlu0 %9405 }
 0x9a8   : > { %v17044_v52 = vpop.permute.xlu0 %9410 }
 0x9eb   : > { %v9123_v63 = vpop.f32.mrb[16].mxu0 }
 0x9ec   : > { %v11361_v61 = vadd.f32 %v9123_v63, %v16842_v33  ;;  %v9125_v34 = vpop.f32.mrb[17].mxu0 }
 0x9ed   : > { %v17036_v48 = vadd.f32 %v9125_v34, %v16844_v38  ;;  %v9127_v30 = vpop.f32.mrb[18].mxu0 }
 0x9ee   : > { %v9538_v35 = vadd.f32 %v11361_v61, %v17022_v25  ;;  %v11363_v14 = vadd.f32 %v9127_v30, %v16846_v3  ;;  %v9129_v46 = vpop.f32.mrb[19].mxu0 }
 0x9ef   : > { %17676 = vst [vmem:[#allocation17_spill] sm:$0xff] %v17036_v48  ;;  %v17041_v18 = vadd.f32 %v9129_v46, %v16848_v43 }
 0x9f0   : > { %v9602_v1 = vmax.f32 %v9538_v35, 0.0  ;;  %v9540_v5 = vadd.f32 %v11363_v14, %v17024_v50  ;;  %v17052_v35 = vpop.permute.xlu0 %9415 }
 0x9f2   : > { %9666 = vxpose.xlu0.b32.start [1/16] %v9602_v1, 128  ;;  %v9604_v63 = vmax.f32 %v9540_v5, 0.0 }
 0x9f3   : > { %v9133_v33 = vpop.f32.mrb[20].mxu0 }
 0x9f4   : > { %v11365_v38 = vadd.f32 %v9133_v33, %v16854_v56  ;;  %v9135_v34 = vpop.f32.mrb[21].mxu0 }
 0x9f5   : > { %v17048_v48 = vadd.f32 %v9135_v34, %v16856_v10  ;;  %v9137_v61 = vpop.f32.mrb[22].mxu0  ;;  %v17059_v34 = vpop.permute.xlu0 %9420 }
 0x9f6   : > { %v9542_v3 = vadd.f32 %v11365_v38, %v17026_v15  ;;  %v11367_v43 = vadd.f32 %v9137_v61, %v16858_v59  ;;  %9667 = vxpose.xlu0.b32.cont [2/16] %v9604_v63, 128  ;;  %v9139_v46 = vpop.f32.mrb[23].mxu0 }
 0x9f7   : > { %v17055_v14 = vadd.f32 %v9139_v46, %v16860_v44 }
 0x9f8   : > { %v9606_v1 = vmax.f32 %v9542_v3, 0.0  ;;  %v9544_v5 = vadd.f32 %v11367_v43, %v17028_v45 }
 0x9fa   : > { %9668 = vxpose.xlu0.b32.cont [3/16] %v9606_v1, 128  ;;  %v9608_v30 = vmax.f32 %v9544_v5, 0.0 }
 0x9fb   : > { %v9143_v56 = vpop.f32.mrb[24].mxu0 }
 0x9fc   : > { %v11369_v10 = vadd.f32 %v9143_v56, %v16866_v13  ;;  %v9145_v33 = vpop.f32.mrb[25].mxu0  ;;  %v17070_v13 = vpop.permute.xlu0 %9425 }
 0x9fd   : > { %v17062_v59 = vadd.f32 %v9145_v33, %v16868_v19  ;;  %v9147_v63 = vpop.f32.mrb[26].mxu0 }
 0x9fe   : > { %v9546_v38 = vadd.f32 %v11369_v10, %v17030_v7  ;;  %v11371_v44 = vadd.f32 %v9147_v63, %v16870_v37  ;;  %9669 = vxpose.xlu0.b32.cont [4/16] %v9608_v30, 128  ;;  %v9149_v61 = vpop.f32.mrb[27].mxu0 }
 0x9ff   : > { %v17067_v3 = vadd.f32 %v9149_v61, %v16872_v17 }
 0xa00   : > { %v9610_v43 = vmax.f32 %v9546_v38, 0.0  ;;  %v9548_v46 = vadd.f32 %v11371_v44, %v17032_v2  ;;  %v17082_v61 = vpop.permute.xlu0 %9430 }
 0xa02   : > { %9670 = vxpose.xlu0.b32.cont [5/16] %v9610_v43, 128  ;;  %v9612_v5 = vmax.f32 %v9548_v46, 0.0 }
 0xa03   : > { %v9153_v1 = vpop.f32.mrb[28].mxu0 }
 0xa04   : > { %v11373_v19 = vadd.f32 %v9153_v1, %v16878_v40  ;;  %v9155_v56 = vpop.f32.mrb[29].mxu0  ;;  %v17085_v1 = vpop.permute.xlu1 %9460 }
 0xa05   : > { %v17074_v10 = vadd.f32 %v9155_v56, %v16880_v9  ;;  %v9157_v37 = vpop.f32.mrb[30].mxu0 }
 0xa06   : > { %v9550_v30 = vadd.f32 %v11373_v19, %v17044_v52  ;;  %v11375_v17 = vadd.f32 %v9157_v37, %v16882_v23  ;;  %9671 = vxpose.xlu0.b32.cont [6/16] %v9612_v5, 128  ;;  %v9159_v33 = vpop.f32.mrb[31].mxu0  ;;  %v17092_v37 = vpop.permute.xlu0 %9435 }
 0xa07   : > { %v17079_v63 = vadd.f32 %v9159_v33, %v16884_v29 }
 0xa08   : > { %v9614_v38 = vmax.f32 %v9550_v30, 0.0  ;;  %v9552_v44 = vadd.f32 %v11375_v17, %v17052_v35  ;;  %v17098_v33 = vpop.permute.xlu1 %9465 }
 0xa0a   : > { %9672 = vxpose.xlu0.b32.cont [7/16] %v9614_v38, 128  ;;  %v9616_v43 = vmax.f32 %v9552_v44, 0.0 }
 0xa0b   : > { %v9163_v40 = vpop.f32.mrb[32].mxu0 }
 0xa0c   : > { %v11377_v9 = vadd.f32 %v9163_v40, %v16890_v36  ;;  %v9165_v46 = vpop.f32.mrb[33].mxu0 }
 0xa0d   : > { %v17088_v23 = vadd.f32 %v9165_v46, %v16892_v54  ;;  %v9167_v5 = vpop.f32.mrb[34].mxu0 }
 0xa0e   : > { %v9554_v29 = vadd.f32 %v11377_v9, %v17059_v34  ;;  %v11379_v19 = vadd.f32 %v9167_v5, %v16894_v12  ;;  %9673 = vxpose.xlu0.b32.cont [8/16] %v9616_v43, 128  ;;  %v9169_v56 = vpop.f32.mrb[35].mxu0  ;;  %v17101_v9 = vpop.permute.xlu0 %9440 }
 0xa0f   : > { %v17095_v30 = vadd.f32 %v9169_v56, %v16896_v26 }
 0xa10   : > { %v9618_v17 = vmax.f32 %v9554_v29, 0.0  ;;  %v9556_v36 = vadd.f32 %v11379_v19, %v17070_v13 }
 0xa12   : > { %9674 = vxpose.xlu0.b32.cont [9/16] %v9618_v17, 128  ;;  %v9620_v38 = vmax.f32 %v9556_v36, 0.0  ;;  %v17114_v17 = vpop.permute.xlu0 %9445 }
 0xa13   : > { %v9173_v54 = vpop.f32.mrb[36].mxu0 }
 0xa14   : > { %v11381_v44 = vadd.f32 %v9173_v54, %v16902_v60  ;;  %v9175_v40 = vpop.f32.mrb[37].mxu0  ;;  %v17112_v60 = vpop.permute.xlu1 %9470 }
 0xa15   : > { %v17104_v12 = vadd.f32 %v9175_v40, %v16904_v49  ;;  %v9177_v43 = vpop.f32.mrb[38].mxu0 }
 0xa16   : > { %v9558_v26 = vadd.f32 %v11381_v44, %v17082_v61  ;;  %v11383_v46 = vadd.f32 %v9177_v43, %v16906_v31  ;;  %9675 = vxpose.xlu0.b32.cont [10/16] %v9620_v38, 128  ;;  %v9179_v5 = vpop.f32.mrb[39].mxu0 }
 0xa17   : > { %v17109_v29 = vadd.f32 %v9179_v5, %v16908_v27 }
 0xa18   : > { %v9622_v19 = vmax.f32 %v9558_v26, 0.0  ;;  %v9560_v56 = vadd.f32 %v11383_v46, %v17092_v37  ;;  %v9476_v26 = vpop.permute.xlu1 %9475 }
 0xa1a   : > { %9676 = vxpose.xlu0.b32.cont [11/16] %v9622_v19, 128  ;;  %v9624_v36 = vmax.f32 %v9560_v56, 0.0  ;;  %v17126_v56 = vpop.permute.xlu0 %9450 }
 0xa1b   : > { %v9183_v49 = vpop.f32.mrb[40].mxu0 }
 0xa1c   : > { %v11385_v54 = vadd.f32 %v9183_v49, %v16914_v24  ;;  %v9185_v44 = vpop.f32.mrb[41].mxu0 }
 0xa1d   : > { %v17118_v31 = vadd.f32 %v9185_v44, %v16916_v51  ;;  %v9187_v38 = vpop.f32.mrb[42].mxu0 }
 0xa1e   : > { %v9562_v27 = vadd.f32 %v11385_v54, %v17101_v9  ;;  %v11387_v40 = vadd.f32 %v9187_v38, %v16918_v53  ;;  %9677 = vxpose.xlu0.b32.cont [12/16] %v9624_v36, 128  ;;  %v9189_v43 = vpop.f32.mrb[43].mxu0  ;;  %v17129_v54 = vpop.permute.xlu1 %9480 }
 0xa1f   : > { %v17123_v46 = vadd.f32 %v9189_v43, %v16920_v57 }
 0xa20   : > { %v9626_v5 = vmax.f32 %v9562_v27, 0.0  ;;  %v9564_v19 = vadd.f32 %v11387_v40, %v17114_v17  ;;  %v17136_v40 = vpop.permute.xlu0 %9455 }
 0xa22   : > { %9678 = vxpose.xlu0.b32.cont [13/16] %v9626_v5, 128  ;;  %v9628_v51 = vmax.f32 %v9564_v19, 0.0  ;;  %v9486_v19 = vpop.permute.xlu1 %9485 }
 0xa23   : > { %v9193_v24 = vpop.f32.mrb[44].mxu0 }
 0xa24   : > { %v11389_v49 = vadd.f32 %v9193_v24, %v16926_v8  ;;  %v9195_v44 = vpop.f32.mrb[45].mxu0 }
 0xa25   : > { %v17132_v53 = vadd.f32 %v9195_v44, %v16928_v47  ;;  %v9197_v36 = vpop.f32.mrb[46].mxu0 }
 0xa26   : > { %v9566_v57 = vadd.f32 %v11389_v49, %v17126_v56  ;;  %v11391_v38 = vadd.f32 %v9197_v36, %v16930_v42  ;;  %9679 = vxpose.xlu0.b32.cont [14/16] %v9628_v51, 128  ;;  %v9199_v27 = vpop.f32.mrb[47].mxu0 }
 0xa27   : > { %17677 = vst [vmem:[#allocation18_spill] sm:$0xff] %v17132_v53  ;;  %v17139_v43 = vadd.f32 %v9199_v27, %v16932_v20 }
 0xa28   : > { %v9630_v5 = vmax.f32 %v9566_v57, 0.0  ;;  %v9568_v8 = vadd.f32 %v11391_v38, %v17136_v40 }
 0xa2a   : > { %9680 = vxpose.xlu0.b32.cont [15/16] %v9630_v5, 128  ;;  %v9632_v47 = vmax.f32 %v9568_v8, 0.0  ;;  %v17149_v8 = vpop.permute.xlu1 %9490 }
 0xa2b   : > { %v9203_v24 = vpop.f32.mrb[48].mxu0 }
 0xa2c   : > { %v11393_v44 = vadd.f32 %v9203_v24, %v16938_v39  ;;  %v9205_v53 = vpop.f32.mrb[49].mxu0 }
 0xa2d   : > { %v11394_v49 = vadd.f32 %v9205_v53, %v16940_v32  ;;  %v9207_v42 = vpop.f32.mrb[50].mxu0 }
 0xa2e   : > { %v9570_v51 = vadd.f32 %v11393_v44, %v17085_v1  ;;  %v11395_v36 = vadd.f32 %v9207_v42, %v16942_v22  ;;  %9681 = vxpose.xlu0.b32.end [16/16] %v9632_v47, 128  ;;  %v9209_v20 = vpop.f32.mrb[51].mxu0 }
 0xa2f   : > { %v9571_v57 = vadd.f32 %v11394_v49, %v17085_v1  ;;  %v11396_v38 = vadd.f32 %v9209_v20, %v16944_v4 }
 0xa30   : > { %v9634_v27 = vmax.f32 %v9570_v51, 0.0  ;;  %v9572_v5 = vadd.f32 %v11395_v36, %v17098_v33  ;;  %v9496_v36 = vpop.permute.xlu1 %9495 }
 0xa31   : > { %v9635_v39 = vmax.f32 %v9571_v57, 0.0  ;;  %v9573_v24 = vadd.f32 %v11396_v38, %v17098_v33 }
 0xa32   : > { %9730 = vxpose.xlu1.b32.start [1/16] %v9634_v27, 128  ;;  %v9636_v53 = vmax.f32 %v9572_v5, 0.0 }
 0xa33   : > { %9762 = vxpose.xlu0.b32.start [1/16] %v9635_v39, 128  ;;  %v9213_v32 = vpop.f32.mrb[52].mxu0  ;;  %v9637_v44 = vmax.f32 %v9573_v24, 0.0 }
 0xa34   : > { %v11397_v22 = vadd.f32 %v9213_v32, %v16950_v62  ;;  %v9215_v47 = vpop.f32.mrb[53].mxu0 }
 0xa35   : > { %v11398_v1 = vadd.f32 %v9215_v47, %v16952_v28  ;;  %v9217_v49 = vpop.f32.mrb[54].mxu0 }
 0xa36   : > { %v9574_v4 = vadd.f32 %v11397_v22, %v17112_v60  ;;  %v11399_v42 = vadd.f32 %v9217_v49, %v16954_v41  ;;  %9731 = vxpose.xlu1.b32.cont [2/16] %v9636_v53, 128  ;;  %v9219_v51 = vpop.f32.mrb[55].mxu0  ;;  %v9501_v41 = vpop.permute.xlu1 %9500 }
 0xa37   : > { %v9575_v33 = vadd.f32 %v11398_v1, %v17112_v60  ;;  %v11400_v20 = vadd.f32 %v9219_v51, %v16956_v11  ;;  %9763 = vxpose.xlu0.b32.cont [2/16] %v9637_v44, 128  ;;  %v12530_v51 = vld [vmem:[%s17441_s8] ss:$16 sps:$4 sm:$0xff]  }
 0xa38   : > { %v9638_v57 = vmax.f32 %v9574_v4, 0.0  ;;  %v9576_v38 = vadd.f32 %v11399_v42, %v9476_v26 }
 0xa39   : > { %v9639_v62 = vmax.f32 %v9575_v33, 0.0  ;;  %v9577_v27 = vadd.f32 %v11400_v20, %v9476_v26 }
 0xa3a   : > { %9732 = vxpose.xlu1.b32.cont [3/16] %v9638_v57, 128  ;;  %v9640_v5 = vmax.f32 %v9576_v38, 0.0  ;;  %v9506_v42 = vpop.permute.xlu1 %9505 }
 0xa3b   : > { %9764 = vxpose.xlu0.b32.cont [3/16] %v9639_v62, 128  ;;  %v9223_v28 = vpop.f32.mrb[56].mxu0  ;;  %v9641_v32 = vmax.f32 %v9577_v27, 0.0  ;;  %v17678_v62 = vld [vmem:[#allocation32_spill] sm:$0xff] }
 0xa3c   : > { %v11401_v39 = vadd.f32 %v9223_v28, %v16962_v55  ;;  %v9225_v24 = vpop.f32.mrb[57].mxu0 }
 0xa3d   : > { %v11402_v53 = vadd.f32 %v9225_v24, %v16964_v0  ;;  %v9227_v22 = vpop.f32.mrb[58].mxu0 }
 0xa3e   : > { %v9578_v60 = vadd.f32 %v11401_v39, %v17129_v54  ;;  %v11403_v11 = vadd.f32 %v9227_v22, %v16966_v58  ;;  %9733 = vxpose.xlu1.b32.cont [4/16] %v9640_v5, 128  ;;  %v9229_v47 = vpop.f32.mrb[59].mxu0  ;;  %v12532_v58 = vld [vmem:[%s17441_s8 + $0x4] ss:$16 sps:$4 sm:$0xff]  }
 0xa3f   : > { %v9579_v26 = vadd.f32 %v11402_v53, %v17129_v54  ;;  %v11404_v44 = vadd.f32 %v9229_v47, %v16968_v16  ;;  %9765 = vxpose.xlu0.b32.cont [4/16] %v9641_v32, 128  ;;  %10279 = vmatprep.subr.bf16.mxu1 %v12532_v58  ;;  %v17679_v39 = vld [vmem:[#allocation34_spill] sm:$0xff]  ;;  %v9511_v53 = vpop.permute.xlu1 %9510 }
 0xa40   : > { %v9642_v1 = vmax.f32 %v9578_v60, 0.0  ;;  %v9580_v49 = vadd.f32 %v11403_v11, %v9486_v19  ;;  %10280 = vmatpush1.bf16.msra.mxu1 %v12530_v51  ;;  %v12533_v11 = vld [vmem:[%s17441_s8 + $0x20] ss:$16 sps:$4 sm:$0xff]   ;;  %v12535_v47 = vld [vmem:[%s17441_s8 + $0x24] ss:$16 sps:$4 sm:$0xff]  }
 0xa41   : > { %v9643_v55 = vmax.f32 %v9579_v26, 0.0  ;;  %v9581_v4 = vadd.f32 %v11404_v44, %v9486_v19  ;;  %v17680_v26 = vld [vmem:[#allocation37_spill] sm:$0xff]  ;;  %10281 = vmatprep.subr.bf16.mxu1 %v12535_v47  ;;  %v17682_v51 = vld [vmem:[#allocation36_spill] sm:$0xff] }
 0xa42   : > { %9734 = vxpose.xlu1.b32.cont [5/16] %v9642_v1, 128  ;;  %v9644_v54 = vmax.f32 %v9580_v49, 0.0 }
 0xa43   : > { %9766 = vxpose.xlu0.b32.cont [5/16] %v9643_v55, 128  ;;  %v9233_v0 = vpop.f32.mrb[60].mxu0  ;;  %v9645_v20 = vmax.f32 %v9581_v4, 0.0  ;;  %v17681_v55 = vld [vmem:[#allocation39_spill] sm:$0xff] }
 0xa44   : > { %v11405_v16 = vadd.f32 %v9233_v0, %v16974_v6  ;;  %v9235_v33 = vpop.f32.mrb[61].mxu0  ;;  %10282 = vmatpush1.bf16.msra.mxu1 %v12533_v11 }
 0xa45   : > { %v11406_v57 = vadd.f32 %v9235_v33, %v16976_v21  ;;  %v9237_v19 = vpop.f32.mrb[62].mxu0 }
 0xa46   : > { %v9582_v38 = vadd.f32 %v11405_v16, %v17149_v8  ;;  %v11407_v27 = vadd.f32 %v9237_v19, %v17678_v62  ;;  %9735 = vxpose.xlu1.b32.cont [6/16] %v9644_v54, 128  ;;  %v9239_v28 = vpop.f32.mrb[63].mxu0  ;;  %v9516_v16 = vpop.permute.xlu1 %9515 }
 0xa47   : > { %v9583_v5 = vadd.f32 %v11406_v57, %v17149_v8  ;;  %v11408_v24 = vadd.f32 %v9239_v28, %v17679_v39  ;;  %9767 = vxpose.xlu0.b32.cont [6/16] %v9645_v20, 128  ;;  %v17683_v20 = vld [vmem:[#allocation38_spill] sm:$0xff] }
 0xa48   : > { %v9646_v32 = vmax.f32 %v9582_v38, 0.0  ;;  %v9584_v6 = vadd.f32 %v11407_v27, %v9496_v36  ;;  %v12538_v39 = vld [vmem:[%s17441_s8 + $0x44] ss:$16 sps:$4 sm:$0xff]  }
 0xa49   : > { %v9647_v22 = vmax.f32 %v9583_v5, 0.0  ;;  %v9585_v60 = vadd.f32 %v11408_v24, %v9496_v36  ;;  %v12536_v5 = vld [vmem:[%s17441_s8 + $0x40] ss:$16 sps:$4 sm:$0xff]   ;;  %10283 = vmatprep.subr.bf16.mxu1 %v12538_v39  ;;  %v17690_v39 = vld [vmem:[#allocation11_spill] sm:$0xff] }
 0xa4a   : > { %9736 = vxpose.xlu1.b32.cont [7/16] %v9646_v32, 128  ;;  %v9648_v8 = vmax.f32 %v9584_v6, 0.0  ;;  %10284 = vmatpush1.bf16.msra.mxu1 %v12536_v5 }
 0xa4b   : > { %9768 = vxpose.xlu0.b32.cont [7/16] %v9647_v22, 128  ;;  %v9243_v21 = vpop.f32.mrb[64].mxu0  ;;  %v9649_v49 = vmax.f32 %v9585_v60, 0.0  ;;  %v9521_v22 = vpop.permute.xlu1 %9520 }
 0xa4c   : > { %v11409_v44 = vadd.f32 %v9243_v21, %v17680_v26  ;;  %v9245_v1 = vpop.f32.mrb[65].mxu0  ;;  %v17685_v21 = vld [vmem:[#allocation41_spill] sm:$0xff] }
 0xa4d   : > { %v11410_v4 = vadd.f32 %v9245_v1, %v17681_v55  ;;  %v9247_v0 = vpop.f32.mrb[66].mxu0 }
 0xa4e   : > { %v9586_v36 = vadd.f32 %v11409_v44, %v9501_v41  ;;  %v11411_v58 = vadd.f32 %v9247_v0, %v17682_v51  ;;  %9737 = vxpose.xlu1.b32.cont [8/16] %v9648_v8, 128  ;;  %v9249_v54 = vpop.f32.mrb[67].mxu0  ;;  %v17686_v8 = vld [vmem:[#allocation21_spill] sm:$0xff] }
 0xa4f   : > { %v9587_v33 = vadd.f32 %v11410_v4, %v9501_v41  ;;  %v11412_v57 = vadd.f32 %v9249_v54, %v17683_v20  ;;  %9769 = vxpose.xlu0.b32.cont [8/16] %v9649_v49, 128  ;;  %v17684_v41 = vld [vmem:[#allocation40_spill] sm:$0xff]  ;;  %v17687_v49 = vld [vmem:[#allocation9_spill] sm:$0xff] }
 0xa50   : > { %v9650_v19 = vmax.f32 %v9586_v36, 0.0  ;;  %v9588_v38 = vadd.f32 %v11411_v58, %v9506_v42  ;;  %v9526_v58 = vpop.permute.xlu1 %9525  ;;  %v12541_v20 = vld [vmem:[%s17441_s8 + $0x64] ss:$16 sps:$4 sm:$0xff]  }
 0xa51   : > { %v9651_v62 = vmax.f32 %v9587_v33, 0.0  ;;  %v9589_v27 = vadd.f32 %v11412_v57, %v9506_v42  ;;  %v12539_v33 = vld [vmem:[%s17441_s8 + $0x60] ss:$16 sps:$4 sm:$0xff]   ;;  %10285 = vmatprep.subr.bf16.mxu1 %v12541_v20 }
 0xa52   : > { %9738 = vxpose.xlu1.b32.cont [9/16] %v9650_v19, 128  ;;  %v9652_v24 = vmax.f32 %v9588_v38, 0.0  ;;  %v17688_v57 = vld [vmem:[#allocation22_spill] sm:$0xff]  ;;  %10286 = vmatpush1.bf16.msra.mxu1 %v12539_v33  ;;  %v17694_v33 = vld [vmem:[#allocation15_spill] sm:$0xff] }
 0xa53   : > { %9770 = vxpose.xlu0.b32.cont [9/16] %v9651_v62, 128  ;;  %v9253_v28 = vpop.f32.mrb[68].mxu0  ;;  %v9653_v60 = vmax.f32 %v9589_v27, 0.0  ;;  %v17689_v27 = vld [vmem:[#allocation10_spill] sm:$0xff] }
 0xa54   : > { %v11413_v32 = vadd.f32 %v9253_v28, %v17684_v41  ;;  %v9255_v6 = vpop.f32.mrb[69].mxu0 }
 0xa55   : > { %v11414_v11 = vadd.f32 %v9255_v6, %v17685_v21  ;;  %v9257_v42 = vpop.f32.mrb[70].mxu0  ;;  %v17691_v6 = vld [vmem:[#allocation12_spill] sm:$0xff] }
 0xa56   : > { %v9590_v47 = vadd.f32 %v11413_v32, %v9511_v53  ;;  %v11415_v26 = vadd.f32 %v9257_v42, %v17686_v8  ;;  %9739 = vxpose.xlu1.b32.cont [10/16] %v9652_v24, 128  ;;  %v9259_v44 = vpop.f32.mrb[71].mxu0  ;;  %v9531_v42 = vpop.permute.xlu1 %9530 }
 0xa57   : > { %v9591_v1 = vadd.f32 %v11414_v11, %v9511_v53  ;;  %v11416_v55 = vadd.f32 %v9259_v44, %v17687_v49  ;;  %9771 = vxpose.xlu0.b32.cont [10/16] %v9653_v60, 128  ;;  %v12542_v44 = vld [vmem:[%s17441_s8 + $0x80] ss:$16 sps:$4 sm:$0xff]   ;;  %v17692_v49 = vld [vmem:[#allocation13_spill] sm:$0xff] }
 0xa58   : > { %v9654_v4 = vmax.f32 %v9590_v47, 0.0  ;;  %v9592_v0 = vadd.f32 %v11415_v26, %v9516_v16 }
 0xa59   : > { %v9655_v36 = vmax.f32 %v9591_v1, 0.0  ;;  %v9593_v51 = vadd.f32 %v11416_v55, %v9516_v16  ;;  %v12544_v1 = vld [vmem:[%s17441_s8 + $0x84] ss:$16 sps:$4 sm:$0xff]  }
 0xa5a   : > { %9740 = vxpose.xlu1.b32.cont [11/16] %v9654_v4, 128  ;;  %v9656_v53 = vmax.f32 %v9592_v0, 0.0  ;;  %10287 = vmatprep.subr.bf16.mxu1 %v12544_v1  ;;  %v9545_v1 = vadd.f32 %v17055_v14, %v17028_v45  ;;  %v12550_v45 = vld [vmem:[%s17441_s8 + $0xc4] ss:$16 sps:$4 sm:$0xff]  }
 0xa5b   : > { %9772 = vxpose.xlu0.b32.cont [11/16] %v9655_v36, 128  ;;  %v9263_v54 = vpop.f32.mrb[72].mxu0  ;;  %v9657_v62 = vmax.f32 %v9593_v51, 0.0  ;;  %v17693_v36 = vld [vmem:[#allocation14_spill] sm:$0xff]  ;;  %10288 = vmatpush1.bf16.msra.mxu1 %v12542_v44 }
 0xa5c   : > { %v11417_v19 = vadd.f32 %v9263_v54, %v17688_v57  ;;  %v9265_v38 = vpop.f32.mrb[73].mxu0  ;;  %v9536_v57 = vpop.permute.xlu1 %9535 }
 0xa5d   : > { %v11418_v28 = vadd.f32 %v9265_v38, %v17689_v27  ;;  %v9267_v16 = vpop.f32.mrb[74].mxu0  ;;  %v17695_v38 = vld [vmem:[#allocation16_spill] sm:$0xff] }
 0xa5e   : > { %v9594_v5 = vadd.f32 %v11417_v19, %v9521_v22  ;;  %v11419_v24 = vadd.f32 %v9267_v16, %v17690_v39  ;;  %9741 = vxpose.xlu1.b32.cont [12/16] %v9656_v53, 128  ;;  %v9269_v41 = vpop.f32.mrb[75].mxu0  ;;  %v12545_v39 = vld [vmem:[%s17441_s8 + $0xa0] ss:$16 sps:$4 sm:$0xff]  }
 0xa5f   : > { %v9595_v32 = vadd.f32 %v11418_v28, %v9521_v22  ;;  %v11420_v60 = vadd.f32 %v9269_v41, %v17691_v6  ;;  %9773 = vxpose.xlu0.b32.cont [12/16] %v9657_v62, 128  ;;  %v17696_v41 = vld [vmem:[#allocation17_spill] sm:$0xff] }
 0xa60   : > { %v9658_v21 = vmax.f32 %v9594_v5, 0.0  ;;  %v9596_v11 = vadd.f32 %v11419_v24, %v9526_v58  ;;  %v12547_v24 = vld [vmem:[%s17441_s8 + $0xa4] ss:$16 sps:$4 sm:$0xff]  }
 0xa61   : > { %v9659_v47 = vmax.f32 %v9595_v32, 0.0  ;;  %v9597_v8 = vadd.f32 %v11420_v60, %v9526_v58  ;;  %v9539_v32 = vadd.f32 %v17696_v41, %v17022_v25  ;;  %10289 = vmatprep.subr.bf16.mxu1 %v12547_v24 }
 0xa62   : > { %9742 = vxpose.xlu1.b32.cont [13/16] %v9658_v21, 128  ;;  %v9660_v22 = vmax.f32 %v9596_v11, 0.0  ;;  %10290 = vmatpush1.bf16.msra.mxu1 %v12545_v39  ;;  %v9541_v11 = vadd.f32 %v17041_v18, %v17024_v50  ;;  %v9547_v18 = vadd.f32 %v17062_v59, %v17030_v7  ;;  %v9551_v59 = vadd.f32 %v17074_v10, %v17044_v52  ;;  %v12554_v52 = vld [vmem:[%s17441_s8 + $0x100] ss:$16 sps:$4 sm:$0xff]   ;;  %v12556_v10 = vld [vmem:[%s17441_s8 + $0x104] ss:$16 sps:$4 sm:$0xff]  }
 0xa63   : > { %9774 = vxpose.xlu0.b32.cont [13/16] %v9659_v47, 128  ;;  %v9273_v26 = vpop.f32.mrb[76].mxu0  ;;  %v9661_v0 = vmax.f32 %v9597_v8, 0.0  ;;  %v9603_v21 = vmax.f32 %v9539_v32, 0.0  ;;  %v9543_v8 = vadd.f32 %v17048_v48, %v17026_v15  ;;  %v9549_v15 = vadd.f32 %v17067_v3, %v17032_v2  ;;  %v12548_v48 = vld [vmem:[%s17441_s8 + $0xc0] ss:$16 sps:$4 sm:$0xff]   ;;  %10291 = vmatprep.subr.bf16.mxu1 %v12550_v45 }
 0xa64   : > { %v11421_v55 = vadd.f32 %v9273_v26, %v17692_v49  ;;  %v9275_v4 = vpop.f32.mrb[77].mxu0  ;;  %v9605_v47 = vmax.f32 %v9541_v11, 0.0  ;;  %v12551_v2 = vld [vmem:[%s17441_s8 + $0xe0] ss:$16 sps:$4 sm:$0xff]   ;;  %v12553_v3 = vld [vmem:[%s17441_s8 + $0xe4] ss:$16 sps:$4 sm:$0xff]   ;;  %v9561_v32 = vadd.f32 %v17109_v29, %v17092_v37  ;;  %v9563_v37 = vadd.f32 %v17118_v31, %v17101_v9 }
 0xa65   : > { %v11422_v51 = vadd.f32 %v9275_v4, %v17693_v36  ;;  %v9277_v54 = vpop.f32.mrb[78].mxu0  ;;  %v9607_v25 = vmax.f32 %v9543_v8, 0.0  ;;  %v9613_v7 = vmax.f32 %v9549_v15, 0.0  ;;  %v12563_v29 = vld [vmem:[%s17441_s8 + $0x160] ss:$16 sps:$4 sm:$0xff]  }
 0xa66   : > { %v9598_v58 = vadd.f32 %v11421_v55, %v9531_v42  ;;  %v11423_v20 = vadd.f32 %v9277_v54, %v17694_v33  ;;  %9743 = vxpose.xlu1.b32.cont [14/16] %v9660_v22, 128  ;;  %v9279_v53 = vpop.f32.mrb[79].mxu0  ;;  %v9609_v55 = vmax.f32 %v9545_v1, 0.0  ;;  %10292 = vmatpush1.bf16.msra.mxu1 %v12548_v48  ;;  %v9553_v33 = vadd.f32 %v17079_v63, %v17052_v35  ;;  %v12557_v35 = vld [vmem:[%s17441_s8 + $0x120] ss:$16 sps:$4 sm:$0xff]   ;;  %v12559_v63 = vld [vmem:[%s17441_s8 + $0x124] ss:$16 sps:$4 sm:$0xff]  }
 0xa67   : > { %v9599_v19 = vadd.f32 %v11422_v51, %v9531_v42  ;;  %v11424_v62 = vadd.f32 %v9279_v53, %v17695_v38  ;;  %9775 = vxpose.xlu0.b32.cont [14/16] %v9661_v0, 128  ;;  %v9611_v0 = vmax.f32 %v9547_v18, 0.0  ;;  %10293 = vmatprep.subr.bf16.mxu1 %v12553_v3  ;;  %v12566_v9 = vld [vmem:[%s17441_s8 + $0x180] ss:$16 sps:$4 sm:$0xff]   ;;  %v12568_v31 = vld [vmem:[%s17441_s8 + $0x184] ss:$16 sps:$4 sm:$0xff]  }
 0xa68   : > { %v9662_v27 = vmax.f32 %v9598_v58, 0.0  ;;  %v9600_v28 = vadd.f32 %v11423_v20, %v9536_v57  ;;  %v9615_v58 = vmax.f32 %v9551_v59, 0.0  ;;  %v12574_v45 = vld [vmem:[%s17441_s8 + $0x1c4] ss:$16 sps:$4 sm:$0xff]  }
 0xa69   : > { %v9663_v16 = vmax.f32 %v9599_v19, 0.0  ;;  %v9601_v5 = vadd.f32 %v11424_v62, %v9536_v57  ;;  %v9617_v57 = vmax.f32 %v9553_v33, 0.0  ;;  %v9555_v19 = vadd.f32 %v17088_v23, %v17059_v34  ;;  %v12577_v59 = vld [vmem:[%s17441_s8 + $0x1e4] ss:$16 sps:$4 sm:$0xff]  }
 0xa6a   : > { %9744 = vxpose.xlu1.b32.cont [15/16] %v9662_v27, 128  ;;  %v9664_v6 = vmax.f32 %v9600_v28, 0.0  ;;  %10294 = vmatpush1.bf16.msra.mxu1 %v12551_v2  ;;  %v9557_v28 = vadd.f32 %v17095_v30, %v17070_v13  ;;  %v12562_v13 = vld [vmem:[%s17441_s8 + $0x144] ss:$16 sps:$4 sm:$0xff]   ;;  %v12575_v2 = vld [vmem:[%s17441_s8 + $0x1e0] ss:$16 sps:$4 sm:$0xff]  }
 0xa6b   : > { %9776 = vxpose.xlu0.b32.cont [15/16] %v9663_v16, 128  ;;  %v9665_v60 = vmax.f32 %v9601_v5, 0.0  ;;  %10295 = vmatprep.subr.bf16.mxu1 %v12556_v10  ;;  %v9619_v27 = vmax.f32 %v9555_v19, 0.0  ;;  %v9559_v5 = vadd.f32 %v17104_v12, %v17082_v61  ;;  %v12565_v61 = vld [vmem:[%s17441_s8 + $0x164] ss:$16 sps:$4 sm:$0xff]   ;;  %v9625_v12 = vmax.f32 %v9561_v32, 0.0 }
 0xa6c   : > { %v9621_v16 = vmax.f32 %v9557_v28, 0.0 }
 0xa6d   : > { %v9623_v41 = vmax.f32 %v9559_v5, 0.0 }
 0xa6e   : > { %9745 = vxpose.xlu1.b32.end [16/16] %v9664_v6, 128  ;;  %10296 = vmatpush1.bf16.msra.mxu1 %v12554_v52  ;;  %v12560_v6 = vld [vmem:[%s17441_s8 + $0x140] ss:$16 sps:$4 sm:$0xff]  }
 0xa6f   : > { %9777 = vxpose.xlu0.b32.end [16/16] %v9665_v60, 128  ;;  %10297 = vmatprep.subr.bf16.mxu1 %v12559_v63 }
 0xa72   : > { %9698 = vxpose.xlu1.b32.start [1/16] %v9603_v21, 128  ;;  %v9682_v42 = vpop.trf.xlu0  ;;  %10298 = vmatpush1.bf16.msra.mxu1 %v12557_v35 }
 0xa73   : > { %10299 = vmatprep.subr.bf16.mxu1 %v12562_v13 }
 0xa76   : > { %9699 = vxpose.xlu1.b32.cont [2/16] %v9605_v47, 128  ;;  %v9683_v26 = vpop.trf.xlu0  ;;  %10300 = vmatpush1.bf16.msra.mxu1 %v12560_v6  ;;  %v9565_v47 = vadd.f32 %v17123_v46, %v17114_v17 }
 0xa77   : > { %v9794_v44 = vadd.f32 %v9683_v26, %v9682_v42  ;;  %10301 = vmatprep.subr.bf16.mxu1 %v12565_v61  ;;  %v9627_v42 = vmax.f32 %v9563_v37, 0.0 }
 0xa7a   : > { %9700 = vxpose.xlu1.b32.cont [3/16] %v9607_v25, 128  ;;  %v9684_v22 = vpop.trf.xlu0  ;;  %10302 = vmatpush1.bf16.msra.mxu1 %v12563_v29  ;;  %v17697_v25 = vld [vmem:[#allocation18_spill] sm:$0xff] }
 0xa7b   : > { %v9795_v49 = vadd.f32 %v9794_v44, %v9684_v22  ;;  %v9629_v44 = vmax.f32 %v9565_v47, 0.0  ;;  %v9567_v1 = vadd.f32 %v17697_v25, %v17126_v56  ;;  %10303 = vmatprep.subr.bf16.mxu1 %v12568_v31  ;;  %v12571_v56 = vld [vmem:[%s17441_s8 + $0x1a4] ss:$16 sps:$4 sm:$0xff]  }
 0xa7d   : > { %v9631_v46 = vmax.f32 %v9567_v1, 0.0 }
 0xa7e   : > { %9701 = vxpose.xlu1.b32.cont [4/16] %v9609_v55, 128  ;;  %v9685_v50 = vpop.trf.xlu0  ;;  %10304 = vmatpush1.bf16.msra.mxu1 %v12566_v9 }
 0xa7f   : > { %v9796_v4 = vadd.f32 %v9795_v49, %v9685_v50  ;;  %v9569_v49 = vadd.f32 %v17139_v43, %v17136_v40  ;;  %v12569_v50 = vld [vmem:[%s17441_s8 + $0x1a0] ss:$16 sps:$4 sm:$0xff]   ;;  %10305 = vmatprep.subr.bf16.mxu1 %v12571_v56 }
 0xa82   : > { %9702 = vxpose.xlu1.b32.cont [5/16] %v9611_v0, 128  ;;  %v9686_v14 = vpop.trf.xlu0  ;;  %10306 = vmatpush1.bf16.msra.mxu1 %v12569_v50 }
 0xa83   : > { %v9797_v36 = vadd.f32 %v9796_v4, %v9686_v14  ;;  %v9633_v4 = vmax.f32 %v9569_v49, 0.0  ;;  %10307 = vmatprep.subr.bf16.mxu1 %v12574_v45 }
 0xa86   : > { %9703 = vxpose.xlu1.b32.cont [6/16] %v9613_v7, 128  ;;  %v9687_v51 = vpop.trf.xlu0 }
 0xa87   : > { %v9798_v54 = vadd.f32 %v9797_v36, %v9687_v51  ;;  %v12572_v36 = vld [vmem:[%s17441_s8 + $0x1c0] ss:$16 sps:$4 sm:$0xff]  }
 0xa88   : > { %10308 = vmatpush1.bf16.msra.mxu1 %v12572_v36 }
 0xa89   : > { %10309 = vmatprep.subr.bf16.mxu1 %v12577_v59 }
 0xa8a   : > { %9704 = vxpose.xlu1.b32.cont [7/16] %v9615_v58, 128  ;;  %v9688_v20 = vpop.trf.xlu0 }
 0xa8b   : > { %v9799_v53 = vadd.f32 %v9798_v54, %v9688_v20  ;;  %v12580_v54 = vld [vmem:[%s17441_s8 + $0xc] ss:$16 sps:$4 sm:$0xff]  }
 0xa8c   : > { %10310 = vmatpush1.bf16.msra.mxu1 %v12575_v2 }
 0xa8d   : > { %10320 = vmatprep.subr.bf16.mxu1 %v12580_v54 }
 0xa8e   : > { %9705 = vxpose.xlu1.b32.cont [8/16] %v9617_v57, 128  ;;  %v9689_v38 = vpop.trf.xlu0 }
 0xa8f   : > { %v9800_v62 = vadd.f32 %v9799_v53, %v9689_v38 }
 0xa92   : > { %9706 = vxpose.xlu1.b32.cont [9/16] %v9619_v27, 128  ;;  %v9690_v34 = vpop.trf.xlu0 }
 0xa93   : > { %v9801_v23 = vadd.f32 %v9800_v62, %v9690_v34 }
 0xa96   : > { %9707 = vxpose.xlu1.b32.cont [10/16] %v9621_v16, 128  ;;  %v9691_v39 = vpop.trf.xlu0 }
 0xa97   : > { %v9802_v24 = vadd.f32 %v9801_v23, %v9691_v39 }
 0xa9a   : > { %9708 = vxpose.xlu1.b32.cont [11/16] %v9623_v41, 128  ;;  %v9692_v30 = vpop.trf.xlu0 }
 0xa9b   : > { %v9803_v60 = vadd.f32 %v9802_v24, %v9692_v30 }
 0xa9e   : > { %9709 = vxpose.xlu1.b32.cont [12/16] %v9625_v12, 128  ;;  %v9693_v21 = vpop.trf.xlu0 }
 0xa9f   : > { %v9804_v11 = vadd.f32 %v9803_v60, %v9693_v21 }
 0xaa2   : > { %9710 = vxpose.xlu1.b32.cont [13/16] %v9627_v42, 128  ;;  %v9694_v8 = vpop.trf.xlu0 }
 0xaa3   : > { %v9805_v26 = vadd.f32 %v9804_v11, %v9694_v8 }
 0xaa6   : > { %9711 = vxpose.xlu1.b32.cont [14/16] %v9629_v44, 128  ;;  %v9695_v22 = vpop.trf.xlu0 }
 0xaa7   : > { %v9806_v17 = vadd.f32 %v9805_v26, %v9695_v22 }
 0xaaa   : > { %9712 = vxpose.xlu1.b32.cont [15/16] %v9631_v46, 128  ;;  %v9696_v55 = vpop.trf.xlu0 }
 0xaab   : > { %v9807_v18 = vadd.f32 %v9806_v17, %v9696_v55 }
 0xaae   : > { %9713 = vxpose.xlu1.b32.end [16/16] %v9633_v4, 128  ;;  %v9697_v0 = vpop.trf.xlu0 }
 0xaaf   : > { %v17302_v15 = vadd.f32 %v9807_v18, %v9697_v0 }
 0xab2   : > { %v9746_v48 = vpop.trf.xlu1 }
 0xab3   : > { %v9778_v40 = vpop.trf.xlu0 }
 0xab6   : > { %v9747_v43 = vpop.trf.xlu1 }
 0xab7   : > { %v9779_v14 = vpop.trf.xlu0  ;;  %v9831_v35 = vadd.f32 %v9747_v43, %v9746_v48 }
 0xaba   : > { %v9748_v7 = vpop.trf.xlu1 }
 0xabb   : > { %v9780_v51 = vpop.trf.xlu0  ;;  %v9832_v63 = vadd.f32 %v9831_v35, %v9748_v7 }
 0xabe   : > { %v9749_v3 = vpop.trf.xlu1 }
 0xabf   : > { %v9781_v33 = vpop.trf.xlu0  ;;  %v9833_v27 = vadd.f32 %v9832_v63, %v9749_v3 }
 0xac2   : > { %v9750_v58 = vpop.trf.xlu1 }
 0xac3   : > { %v9782_v20 = vpop.trf.xlu0  ;;  %v9834_v28 = vadd.f32 %v9833_v27, %v9750_v58 }
 0xac6   : > { %v9751_v52 = vpop.trf.xlu1 }
 0xac7   : > { %v9783_v57 = vpop.trf.xlu0  ;;  %v9835_v23 = vadd.f32 %v9834_v28, %v9751_v52 }
 0xaca   : > { %v9752_v10 = vpop.trf.xlu1 }
 0xacb   : > { %v9784_v62 = vpop.trf.xlu0  ;;  %v9836_v5 = vadd.f32 %v9835_v23, %v9752_v10 }
 0xace   : > { %v9753_v53 = vpop.trf.xlu1 }
 0xacf   : > { %v9785_v16 = vpop.trf.xlu0  ;;  %v9837_v24 = vadd.f32 %v9836_v5, %v9753_v53 }
 0xad2   : > { %v9754_v19 = vpop.trf.xlu1 }
 0xad3   : > { %v9838_v41 = vadd.f32 %v9837_v24, %v9754_v19  ;;  %v9786_v6 = vpop.trf.xlu0 }
 0xad6   : > { %v9755_v38 = vpop.trf.xlu1 }
 0xad7   : > { %v9839_v13 = vadd.f32 %v9838_v41, %v9755_v38  ;;  %v9787_v12 = vpop.trf.xlu0 }
 0xada   : > { %v9756_v34 = vpop.trf.xlu1 }
 0xadb   : > { %v9840_v30 = vadd.f32 %v9839_v13, %v9756_v34  ;;  %v9788_v47 = vpop.trf.xlu0 }
 0xade   : > { %v9757_v39 = vpop.trf.xlu1 }
 0xadf   : > { %v9841_v61 = vadd.f32 %v9840_v30, %v9757_v39  ;;  %v9789_v44 = vpop.trf.xlu0 }
 0xae2   : > { %v9758_v32 = vpop.trf.xlu1 }
 0xae3   : > { %v9842_v37 = vadd.f32 %v9841_v61, %v9758_v32  ;;  %v9790_v49 = vpop.trf.xlu0 }
 0xae6   : > { %v9759_v60 = vpop.trf.xlu1 }
 0xae7   : > { %v9843_v21 = vadd.f32 %v9842_v37, %v9759_v60  ;;  %v9791_v4 = vpop.trf.xlu0 }
 0xaea   : > { %v9760_v29 = vpop.trf.xlu1 }
 0xaeb   : > { %v9844_v11 = vadd.f32 %v9843_v21, %v9760_v29 }
 0xaee   : > { %v9761_v42 = vpop.trf.xlu1 }
 0xaef   : > { %v9845_v8 = vadd.f32 %v9844_v11, %v9761_v42 }
 0xaf1   : > { %v9846_v26 = vadd.f32 %v9845_v8, %v9778_v40  ;;  %v9792_v40 = vpop.trf.xlu0 }
 0xaf2   : > { %v9714_v9 = vpop.trf.xlu1 }
 0xaf3   : > { %v9847_v31 = vadd.f32 %v9846_v26, %v9779_v14 }
 0xaf5   : > { %v9848_v25 = vadd.f32 %v9847_v31, %v9780_v51  ;;  %v9793_v3 = vpop.trf.xlu0 }
 0xaf6   : > { %v9715_v1 = vpop.trf.xlu1 }
 0xaf7   : > { %v9849_v22 = vadd.f32 %v9848_v25, %v9781_v33  ;;  %v9809_v33 = vadd.f32 %v17302_v15, %v9714_v9  ;;  %v12578_v25 = vld [vmem:[%s17441_s8 + $0x8] ss:$16 sps:$4 sm:$0xff]  }
 0xaf9   : > { %v9850_v17 = vadd.f32 %v9849_v22, %v9782_v20  ;;  %v9810_v20 = vadd.f32 %v9809_v33, %v9715_v1  ;;  %v12583_v22 = vld [vmem:[%s17441_s8 + $0x2c] ss:$16 sps:$4 sm:$0xff]   ;;  %v12614_v33 = vld [vmem:[%s17441_s8 + $0x188] ss:$16 sps:$4 sm:$0xff]  }
 0xafa   : > { %v9716_v46 = vpop.trf.xlu1 }
 0xafb   : > { %v9851_v55 = vadd.f32 %v9850_v17, %v9783_v57  ;;  %v9811_v57 = vadd.f32 %v9810_v20, %v9716_v46  ;;  %v12581_v17 = vld [vmem:[%s17441_s8 + $0x28] ss:$16 sps:$4 sm:$0xff]   ;;  %v12586_v46 = vld [vmem:[%s17441_s8 + $0x4c] ss:$16 sps:$4 sm:$0xff]  }
 0xafc   : > { %v12622_v20 = vld [vmem:[%s17441_s8 + $0x1cc] ss:$16 sps:$4 sm:$0xff]  }
 0xafd   : > { %v9852_v18 = vadd.f32 %v9851_v55, %v9784_v62  ;;  %v12589_v55 = vld [vmem:[%s17441_s8 + $0x6c] ss:$16 sps:$4 sm:$0xff]  }
 0xafe   : > { %v9717_v50 = vpop.trf.xlu1 }
 0xaff   : > { %v9853_v56 = vadd.f32 %v9852_v18, %v9785_v16  ;;  %v9812_v63 = vadd.f32 %v9811_v57, %v9717_v50  ;;  %v12587_v18 = vld [vmem:[%s17441_s8 + $0x68] ss:$16 sps:$4 sm:$0xff]   ;;  %v12592_v50 = vld [vmem:[%s17441_s8 + $0x8c] ss:$16 sps:$4 sm:$0xff]  }
 0xb00   : > { %v12625_v57 = vld [vmem:[%s17441_s8 + $0x1ec] ss:$16 sps:$4 sm:$0xff]  }
 0xb01   : > { %v9854_v0 = vadd.f32 %v9853_v56, %v9786_v6  ;;  %v12590_v56 = vld [vmem:[%s17441_s8 + $0x88] ss:$16 sps:$4 sm:$0xff]  }
 0xb02   : > { %v9718_v48 = vpop.trf.xlu1 }
 0xb03   : > { %v9855_v43 = vadd.f32 %v9854_v0, %v9787_v12  ;;  %v9813_v62 = vadd.f32 %v9812_v63, %v9718_v48  ;;  %v12593_v0 = vld [vmem:[%s17441_s8 + $0xa8] ss:$16 sps:$4 sm:$0xff]   ;;  %v12598_v48 = vld [vmem:[%s17441_s8 + $0xcc] ss:$16 sps:$4 sm:$0xff]  }
 0xb04   : > { %v17698_v63 = vld [vmem:[#allocation5_spill] sm:$0xff] }
 0xb05   : > { %v9856_v45 = vadd.f32 %v9855_v43, %v9788_v47  ;;  %v12596_v43 = vld [vmem:[%s17441_s8 + $0xc8] ss:$16 sps:$4 sm:$0xff]  }
 0xb06   : > { %v9719_v36 = vpop.trf.xlu1 }
 0xb07   : > { %v9857_v7 = vadd.f32 %v9856_v45, %v9789_v44  ;;  %v9814_v34 = vadd.f32 %v9813_v62, %v9719_v36  ;;  %v12601_v45 = vld [vmem:[%s17441_s8 + $0xec] ss:$16 sps:$4 sm:$0xff]   ;;  %v12599_v36 = vld [vmem:[%s17441_s8 + $0xe8] ss:$16 sps:$4 sm:$0xff]   ;;  %v17699_v62 = vld [vmem:[#allocation6_spill] sm:$0xff] }
 0xb09   : > { %v9858_v14 = vadd.f32 %v9857_v7, %v9790_v49  ;;  %v12584_v49 = vld [vmem:[%s17441_s8 + $0x48] ss:$16 sps:$4 sm:$0xff]  }
 0xb0a   : > { %v9720_v59 = vpop.trf.xlu1  ;;  %v12602_v7 = vld [vmem:[%s17441_s8 + $0x108] ss:$16 sps:$4 sm:$0xff]  }
 0xb0b   : > { %v9859_v2 = vadd.f32 %v9858_v14, %v9791_v4  ;;  %v9815_v16 = vadd.f32 %v9814_v34, %v9720_v59  ;;  %v12595_v4 = vld [vmem:[%s17441_s8 + $0xac] ss:$16 sps:$4 sm:$0xff]   ;;  %v12605_v59 = vld [vmem:[%s17441_s8 + $0x128] ss:$16 sps:$4 sm:$0xff]  }
 0xb0c   : > { %v12607_v14 = vld [vmem:[%s17441_s8 + $0x12c] ss:$16 sps:$4 sm:$0xff]  }
 0xb0d   : > { %v9860_v51 = vadd.f32 %v9859_v2, %v9792_v40  ;;  %v12604_v40 = vld [vmem:[%s17441_s8 + $0x10c] ss:$16 sps:$4 sm:$0xff]  }
 0xb0e   : > { %v9721_v54 = vpop.trf.xlu1  ;;  %v12610_v2 = vld [vmem:[%s17441_s8 + $0x14c] ss:$16 sps:$4 sm:$0xff]  }
 0xb0f   : > { %v9861_v58 = vadd.f32 %v9860_v51, %v9793_v3  ;;  %v9816_v24 = vadd.f32 %v9815_v16, %v9721_v54  ;;  %v12608_v3 = vld [vmem:[%s17441_s8 + $0x148] ss:$16 sps:$4 sm:$0xff]   ;;  %v12613_v51 = vld [vmem:[%s17441_s8 + $0x16c] ss:$16 sps:$4 sm:$0xff]  }
 0xb10   : > { %v12611_v54 = vld [vmem:[%s17441_s8 + $0x168] ss:$16 sps:$4 sm:$0xff]  }
 0xb11   : > { %v9862_v52 = vrot.slane %v9861_v58, 4 }
 0xb12   : > { %v9722_v10 = vpop.trf.xlu1 }
 0xb13   : > { %v9863_v53 = vadd.f32 %v9862_v52, %v9861_v58  ;;  %v9817_v15 = vadd.f32 %v9816_v24, %v9722_v10  ;;  %v12616_v58 = vld [vmem:[%s17441_s8 + $0x18c] ss:$16 sps:$4 sm:$0xff]   ;;  %v12617_v10 = vld [vmem:[%s17441_s8 + $0x1a8] ss:$16 sps:$4 sm:$0xff]  }
 0xb14   : > { %v12619_v52 = vld [vmem:[%s17441_s8 + $0x1ac] ss:$16 sps:$4 sm:$0xff]  }
 0xb15   : > { %v9864_v19 = vrot.slane %v9863_v53, 2 }
 0xb16   : > { %v9723_v35 = vpop.trf.xlu1 }
 0xb17   : > { %v9865_v38 = vadd.f32 %v9864_v19, %v9863_v53  ;;  %v9818_v6 = vadd.f32 %v9817_v15, %v9723_v35  ;;  %v12620_v53 = vld [vmem:[%s17441_s8 + $0x1c8] ss:$16 sps:$4 sm:$0xff]   ;;  %v9937_v35 = vld [vmem:[%s17442_s9] sm:$0xf] }
 0xb18   : > { %v12623_v19 = vld [vmem:[%s17441_s8 + $0x1e8] ss:$16 sps:$4 sm:$0xff]  }
 0xb19   : > { %v9866_v27 = vrot.slane %v9865_v38, 1 }
 0xb1a   : > { %v9724_v28 = vpop.trf.xlu1 }
 0xb1b   : > { %v9867_v23 = vadd.f32 %v9866_v27, %v9865_v38  ;;  %v9819_v13 = vadd.f32 %v9818_v6, %v9724_v28  ;;  %v10262_v38 = vrot.slane %v9937_v35, %v17698_v63  ;;  %v10266_v27 = vrot.slane %v9937_v35, %v17699_v62 }
 0xb1d   : > { %v9870_v5 = vmul.f32 0.00390625, %v9867_v23 }
 0xb1e   : > { %v9725_v39 = vpop.trf.xlu1 }
 0xb1f   : > { %v9872_v41 = vpack.c.bf16 %v9870_v5, %v9870_v5  ;;  %v9820_v60 = vadd.f32 %v9819_v13, %v9725_v39 }
 0xb21   : > { %10311 = vmatprep.mubr.bf16.mxu1 %v9872_v41 }
 0xb22   : > { %v9726_v32 = vpop.trf.xlu1 }
 0xb23   : > { %v9821_v61 = vadd.f32 %v9820_v60, %v9726_v32  ;;  %v12644_v32 = vmov 1966171168  }
 0xb24   : > { %v10368_v6 = vunpack.c.l.s4 %v12644_v32 }
 0xb26   : > { %v9727_v30 = vpop.trf.xlu1  ;;  %v10369_v60 = vunpack.c.0.s8 %v10368_v6 }
 0xb27   : > { %v9822_v37 = vadd.f32 %v9821_v61, %v9727_v30 }
 0xb2a   : > { %v9728_v12 = vpop.trf.xlu1 }
 0xb2b   : > { %v9823_v29 = vadd.f32 %v9822_v37, %v9728_v12 }
 0xb2e   : > { %v9729_v21 = vpop.trf.xlu1 }
 0xb2f   : > { %v9824_v11 = vadd.f32 %v9823_v29, %v9729_v21 }
 0xb31   : > { %v9825_v42 = vrot.slane %v9824_v11, 4 }
 0xb33   : > { %v9826_v47 = vadd.f32 %v9825_v42, %v9824_v11 }
 0xb35   : > { %v9827_v8 = vrot.slane %v9826_v47, 2 }
 0xb37   : > { %v9828_v26 = vadd.f32 %v9827_v8, %v9826_v47 }
 0xb39   : > { %v9829_v9 = vrot.slane %v9828_v26, 1 }
 0xb3b   : > { %v9830_v31 = vadd.f32 %v9829_v9, %v9828_v26 }
 0xb3d   : > { %v9869_v44 = vmul.f32 0.00390625, %v9830_v31 }
 0xb3f   : > { %v17323_v1 = vpack.c.bf16 %v9869_v44, %v9869_v44  ;;  %v17701_v44 = vlaneseq }
 0xb41   : > { %10312 = vmatmul.mubr.bf16.vlgmr.msra.gmra.mrb[96].mxu1 %v17323_v1  ;;  %vm10392_vm11 = vcmp.lt.s32.totalorder %v17701_v44, 512 }
 0xb42   : > { %10321 = vmatpush1.bf16.msra.mxu1 %v12578_v25  ;;  %10352 = vmatprep.mubr.bf16.mxu1 %v9872_v41  ;;  %v17700_v41 = vld [vmem:[#allocation4_spill] sm:$0xff] }
 0xb43   : > { %10322 = vmatprep.subr.bf16.mxu1 %v12583_v22  ;;  %v10269_v15 = vsub.s32 2, %v17700_v41  ;;  %v10273_v13 = vsub.s32 3, %v17700_v41  ;;  %v10372_v21 = vsub.s32 %v10369_v60, %v17700_v41 }
 0xb45   : > { %v10270_v30 = vrot.slane %v9937_v35, %v10269_v15  ;;  %v10274_v61 = vrot.slane %v9937_v35, %v10273_v13 }
 0xb46   : > { %10323 = vmatpush1.bf16.msra.mxu1 %v12581_v17 }
 0xb47   : > { %10324 = vmatprep.subr.bf16.mxu1 %v12586_v46 }
 0xb4a   : > { %10325 = vmatpush1.bf16.msra.mxu1 %v12584_v49 }
 0xb4b   : > { %10326 = vmatprep.subr.bf16.mxu1 %v12589_v55 }
 0xb4e   : > { %10327 = vmatpush1.bf16.msra.mxu1 %v12587_v18 }
 0xb4f   : > { %10328 = vmatprep.subr.bf16.mxu1 %v12592_v50 }
 0xb52   : > { %10329 = vmatpush1.bf16.msra.mxu1 %v12590_v56 }
 0xb53   : > { %10330 = vmatprep.subr.bf16.mxu1 %v12595_v4 }
 0xb56   : > { %10331 = vmatpush1.bf16.msra.mxu1 %v12593_v0 }
 0xb57   : > { %10332 = vmatprep.subr.bf16.mxu1 %v12598_v48 }
 0xb5a   : > { %10333 = vmatpush1.bf16.msra.mxu1 %v12596_v43 }
 0xb5b   : > { %10334 = vmatprep.subr.bf16.mxu1 %v12601_v45 }
 0xb5e   : > { %10335 = vmatpush1.bf16.msra.mxu1 %v12599_v36 }
 0xb5f   : > { %10336 = vmatprep.subr.bf16.mxu1 %v12604_v40 }
 0xb62   : > { %10337 = vmatpush1.bf16.msra.mxu1 %v12602_v7 }
 0xb63   : > { %10338 = vmatprep.subr.bf16.mxu1 %v12607_v14 }
 0xb66   : > { %10339 = vmatpush1.bf16.msra.mxu1 %v12605_v59 }
 0xb67   : > { %10340 = vmatprep.subr.bf16.mxu1 %v12610_v2 }
 0xb6a   : > { %10341 = vmatpush1.bf16.msra.mxu1 %v12608_v3 }
 0xb6b   : > { %10342 = vmatprep.subr.bf16.mxu1 %v12613_v51 }
 0xb6e   : > { %10343 = vmatpush1.bf16.msra.mxu1 %v12611_v54 }
 0xb6f   : > { %10344 = vmatprep.subr.bf16.mxu1 %v12616_v58 }
 0xb72   : > { %10345 = vmatpush1.bf16.msra.mxu1 %v12614_v33 }
 0xb73   : > { %10346 = vmatprep.subr.bf16.mxu1 %v12619_v52 }
 0xb76   : > { %10347 = vmatpush1.bf16.msra.mxu1 %v12617_v10 }
 0xb77   : > { %10348 = vmatprep.subr.bf16.mxu1 %v12622_v20 }
 0xb7a   : > { %10349 = vmatpush1.bf16.msra.mxu1 %v12620_v53 }
 0xb7b   : > { %10350 = vmatprep.subr.bf16.mxu1 %v12625_v57 }
 0xb7e   : > { %10351 = vmatpush1.bf16.msra.mxu1 %v12623_v19 }
 0xb81   : > { %10353 = vmatmul.mubr.bf16.vlgmr.msra.gmra.mrb[100].mxu1 %v17323_v1 }
 0xc14   : > { %v10313_v28 = vpop.f32.mrb[96].mxu1 }
 0xc15   : > { %v10314_v34 = vadd.f32 %v10313_v28, %v10262_v38  ;;  %v10315_v23 = vpop.f32.mrb[97].mxu1 }
 0xc16   : > { %v10316_v16 = vadd.f32 %v10315_v23, %v10266_v27  ;;  %v10317_v5 = vpop.f32.mrb[98].mxu1 }
 0xc17   : > { %v10318_v39 = vpop.f32.mrb[99].mxu1 }
 0xc18   : > { %v10365_v24 = vcombine.low %v10314_v34, %v10316_v16 }
 0xc1a   : > { %v10373_v26 = vrot.slane %v10365_v24, %v10372_v21 }
 0xc54   : > { %v10354_v12 = vpop.f32.mrb[100].mxu1 }
 0xc55   : > { %v10355_v37 = vadd.f32 %v10354_v12, %v10270_v30  ;;  %v10356_v29 = vpop.f32.mrb[101].mxu1 }
 0xc56   : > { %v10357_v11 = vadd.f32 %v10356_v29, %v10274_v61  ;;  %v10358_v42 = vpop.f32.mrb[102].mxu1 }
 0xc57   : > { %v10359_v47 = vpop.f32.mrb[103].mxu1 }
 0xc58   : > { %v10366_v8 = vcombine.low %v10355_v37, %v10357_v11 }
 0xc5a   : > { %v10380_v9 = vrot.slane %v10366_v8, %v10372_v21 }
 0xc5c   : > { %v10381_v31 = vcombine.low %v10373_v26, %v10380_v9 }
 0xc5e   : > { %v10388_v25 = vrot.slane %v10381_v31, %v10372_v21 }
 0xc60   : > { %10394 = vst.msk [vmem:[%s357_s29] sm:$0xf] %vm10392_vm11, %v10388_v25 }
 0xc61 PF: > { %s20_s13 = sadd.s32 1, %s12633_s13  }
 0xc62   : > { %p17_p4 = scmp.ge.s32.totalorder %s20_s13, 6  }
 0xc64   :  { %19 = sbr.rel (!%p17_p4) target bundleno = 1 (0x1), region = 121 }

</bundles_post_ra>
